<compile_context>
chip_gen: v6e
topology: v6e:2x2x1
jax: 0.10.0
libtpu: 0.0.40
codegen_flags: <defaults>
</compile_context>

<pallas_src>
import math
import functools

import jax
import jax.numpy as jnp
from jax import lax
from jax.experimental import pallas as pl
from jax.experimental.pallas import tpu as pltpu


# ---------------------------------------------------------------------------
# In-kernel building blocks (traced inside the Pallas kernels)
# ---------------------------------------------------------------------------

def _mha(xq, xkv, wq, wk, wv, wo, mask_bool, scale):
    """Multi-head attention, all heads at once.

    xq: [Lq, D], xkv: [Lk, D]
    wq/wk/wv: [H, D, Dh]   (per-head projection slabs)
    wo:       [H, Dh, D]
    mask_bool: [H, Lq, Lk], True => masked (filled with -1e9, like masked_fill_)
    returns [Lq, D]
    """
    H, D, Dh = wq.shape
    Lq = xq.shape[0]
    Lk = xkv.shape[0]
    qb = jnp.broadcast_to(xq[None], (H, Lq, D))
    kb = jnp.broadcast_to(xkv[None], (H, Lk, D))
    q = jnp.einsum('hld,hde->hle', qb, wq, preferred_element_type=jnp.float32)
    k = jnp.einsum('hld,hde->hle', kb, wk, preferred_element_type=jnp.float32)
    v = jnp.einsum('hld,hde->hle', kb, wv, preferred_element_type=jnp.float32)
    s = jnp.einsum('hqe,hke->hqk', q, k, preferred_element_type=jnp.float32) * scale
    s = jnp.where(mask_bool, -1.0e9, s)
    s_max = jnp.max(s, axis=-1, keepdims=True)
    e = jnp.exp(s - s_max)
    p = e / jnp.sum(e, axis=-1, keepdims=True)
    ctx = jnp.einsum('hqk,hke->hqe', p, v, preferred_element_type=jnp.float32)
    # Per-head output projection, then reduce over heads: sum_h ctx_h @ wo_h
    o = jnp.einsum('hle,hed->hld', ctx, wo, preferred_element_type=jnp.float32)
    return jnp.sum(o, axis=0)


def _add_ln(x, res, g, b, eps):
    h = x + res
    mean = jnp.mean(h, axis=-1, keepdims=True)
    var = jnp.mean((h - mean) ** 2, axis=-1, keepdims=True)
    return (h - mean) * lax.rsqrt(var + eps) * g + b


def _ffn(x, w1, b1, w2, b2):
    h = jnp.maximum(jnp.dot(x, w1, preferred_element_type=jnp.float32) + b1, 0.0)
    # TODO(synk): nn.Dropout inside the FFN treated as identity.
    return jnp.dot(h, w2, preferred_element_type=jnp.float32) + b2


# ---------------------------------------------------------------------------
# Pallas kernels (one fused kernel per transformer *stack*)
# ---------------------------------------------------------------------------

def _encoder_stack_kernel(x_ref, pad_ref,
                          wq_ref, wk_ref, wv_ref, wo_ref,
                          ln1_g_ref, ln1_b_ref,
                          w1_ref, b1_ref, w2_ref, b2_ref,
                          ln2_g_ref, ln2_b_ref,
                          o_ref, *, num_layers, num_heads, scale, eps):
    x = x_ref[0]                      # [S, D]
    S = x.shape[0]
    padf = pad_ref[0]                 # [1, S] float, 1.0 => padded key
    mask = jnp.broadcast_to(padf[None], (num_heads, S, S)) > 0.5

    for l in range(num_layers):       # static, small — fully unrolled
        att = _mha(x, x, wq_ref[l], wk_ref[l], wv_ref[l], wo_ref[l], mask, scale)
        x1 = _add_ln(att, x, ln1_g_ref[l], ln1_b_ref[l], eps)
        ff = _ffn(x1, w1_ref[l], b1_ref[l], w2_ref[l], b2_ref[l])
        x = _add_ln(ff, x1, ln2_g_ref[l], ln2_b_ref[l], eps)

    o_ref[0] = x


def _decoder_stack_kernel(x_ref, enc_ref, enc_pad_ref,
                          s_wq_ref, s_wk_ref, s_wv_ref, s_wo_ref,
                          ln1_g_ref, ln1_b_ref,
                          c_wq_ref, c_wk_ref, c_wv_ref, c_wo_ref,
                          ln2_g_ref, ln2_b_ref,
                          w1_ref, b1_ref, w2_ref, b2_ref,
                          ln3_g_ref, ln3_b_ref,
                          ow_ref, ob_ref,
                          o_ref, *, num_layers, num_heads, scale, eps):
    x_in = x_ref[0]                   # [T, D]  (reference feeds this to EVERY layer)
    enc = enc_ref[0]                  # [S, D]
    T = x_in.shape[0]
    S = enc.shape[0]
    H = num_heads

    # Causal (upper-triangular, diagonal=1) mask built in-kernel — no HBM mask.
    row = lax.broadcasted_iota(jnp.int32, (H, T, T), 1)
    col = lax.broadcasted_iota(jnp.int32, (H, T, T), 2)
    causal = col > row

    padf = enc_pad_ref[0]             # [1, S]
    cross_mask = jnp.broadcast_to(padf[None], (H, T, S)) > 0.5

    x = x_in
    for l in range(num_layers):       # static; only last layer affects the output
        att = _mha(x_in, x_in, s_wq_ref[l], s_wk_ref[l], s_wv_ref[l], s_wo_ref[l],
                   causal, scale)
        x1 = _add_ln(att, x_in, ln1_g_ref[l], ln1_b_ref[l], eps)
        cross = _mha(x1, enc, c_wq_ref[l], c_wk_ref[l], c_wv_ref[l], c_wo_ref[l],
                     cross_mask, scale)
        x2 = _add_ln(cross, x1, ln2_g_ref[l], ln2_b_ref[l], eps)
        ff = _ffn(x2, w1_ref[l], b1_ref[l], w2_ref[l], b2_ref[l])
        x = _add_ln(ff, x2, ln3_g_ref[l], ln3_b_ref[l], eps)

    # Fused final vocab projection (output padded to 128 lanes by the wrapper).
    o_ref[0] = (jnp.dot(x, ow_ref[...], preferred_element_type=jnp.float32)
                + ob_ref[...])


# ---------------------------------------------------------------------------
# Pallas wrappers
# ---------------------------------------------------------------------------

def _full_spec(shape):
    nd = len(shape)
    return pl.BlockSpec(tuple(shape), lambda b, _nd=nd: (0,) * _nd)


def encoder_stack(p, x, enc_pad_f, num_heads, eps=1e-6):
    B, S, D = x.shape
    L = p["wq"].shape[0]
    scale = 1.0 / math.sqrt(D // num_heads)
    weights = [p["wq"], p["wk"], p["wv"], p["wo"],
               p["ln1_g"], p["ln1_b"],
               p["w1"], p["b1"], p["w2"], p["b2"],
               p["ln2_g"], p["ln2_b"]]
    in_specs = ([pl.BlockSpec((1, S, D), lambda b: (b, 0, 0)),
                 pl.BlockSpec((1, 1, S), lambda b: (b, 0, 0))]
                + [_full_spec(w.shape) for w in weights])
    return pl.pallas_call(
        functools.partial(_encoder_stack_kernel, num_layers=L,
                          num_heads=num_heads, scale=scale, eps=eps),
        out_shape=jax.ShapeDtypeStruct((B, S, D), jnp.float32),
        grid=(B,),
        in_specs=in_specs,
        out_specs=pl.BlockSpec((1, S, D), lambda b: (b, 0, 0)),
        compiler_params=pltpu.CompilerParams(
            dimension_semantics=("parallel",)),
    )(x, enc_pad_f, *weights)


def decoder_stack(p, x, enc_out, enc_pad_f, out_w_pad, out_b_pad,
                  num_heads, eps=1e-6):
    B, T, D = x.shape
    S = enc_out.shape[1]
    L = p["s_wq"].shape[0]
    Np = out_w_pad.shape[1]
    scale = 1.0 / math.sqrt(D // num_heads)
    weights = [p["s_wq"], p["s_wk"], p["s_wv"], p["s_wo"],
               p["ln1_g"], p["ln1_b"],
               p["c_wq"], p["c_wk"], p["c_wv"], p["c_wo"],
               p["ln2_g"], p["ln2_b"],
               p["w1"], p["b1"], p["w2"], p["b2"],
               p["ln3_g"], p["ln3_b"],
               out_w_pad, out_b_pad]
    in_specs = ([pl.BlockSpec((1, T, D), lambda b: (b, 0, 0)),
                 pl.BlockSpec((1, S, D), lambda b: (b, 0, 0)),
                 pl.BlockSpec((1, 1, S), lambda b: (b, 0, 0))]
                + [_full_spec(w.shape) for w in weights])
    return pl.pallas_call(
        functools.partial(_decoder_stack_kernel, num_layers=L,
                          num_heads=num_heads, scale=scale, eps=eps),
        out_shape=jax.ShapeDtypeStruct((B, T, Np), jnp.float32),
        grid=(B,),
        in_specs=in_specs,
        out_specs=pl.BlockSpec((1, T, Np), lambda b: (b, 0, 0)),
        compiler_params=pltpu.CompilerParams(
            dimension_semantics=("parallel",)),
    )(x, enc_out, enc_pad_f, *weights)


# ---------------------------------------------------------------------------
# Model glue (plain JAX orchestration around the two fused Pallas kernels)
# ---------------------------------------------------------------------------

def my_transformer_forward(params, enc_inputs, dec_inputs, cfg):
    d_model = cfg["d_model"]
    num_heads = cfg["num_heads"]      # cross-attention uses the default 8 heads;
    # keep cfg["num_heads"] == 8 so both attentions use the same head count.
    emb_scale = d_model ** 0.5
    pe = params["pos_encoding"]
    B, S = enc_inputs.shape
    T = dec_inputs.shape[1]

    # ---- encoder side ----
    enc_pad = (enc_inputs == cfg["src_pad_idx"])                 # [B, S]
    enc_pad_f = enc_pad.astype(jnp.float32).reshape(B, 1, S)     # tiny mask only

    enc_emb = params["i_embed"][enc_inputs]                      # [B, S, D]
    enc_emb = jnp.where(enc_pad[:, :, None], 0.0, enc_emb)
    enc_emb = enc_emb * emb_scale
    enc_x = enc_emb + pe[:S]
    # TODO(synk): top-level nn.Dropout treated as identity.

    enc_out = encoder_stack(params["enc"], enc_x, enc_pad_f, num_heads)

    # ---- decoder side ----
    dec_pad = (dec_inputs == cfg["tgt_pad_idx"])                 # [B, T]
    dec_emb = params["i_embed"][dec_inputs]                      # reference uses i_embed
    dec_emb = jnp.where(dec_pad[:, :, None], 0.0, dec_emb)
    dec_emb = dec_emb[:, :-1]
    dec_emb = jnp.pad(dec_emb, ((0, 0), (1, 0), (0, 0)))         # shift right by one
    dec_emb = dec_emb * emb_scale
    dec_x = dec_emb + pe[:T]

    logits_pad = decoder_stack(params["dec"], dec_x, enc_out, enc_pad_f,
                               params["out_w_pad"], params["out_b_pad"],
                               num_heads)
    return logits_pad[:, :, :cfg["t_vocab"]]


# ---------------------------------------------------------------------------
# Deterministic parameter initialization (kernel-ready, layer-stacked layouts)
# ---------------------------------------------------------------------------

def _xavier_uniform(key, shape):
    fan_in, fan_out = shape
    bound = math.sqrt(6.0 / (fan_in + fan_out))
    return jax.random.uniform(key, shape, jnp.float32, -bound, bound)


def make_params(key, cfg):
    d = cfg["d_model"]
    ff = cfg["dim_feedforward"]
    H = cfg["num_heads"]
    dh = d // H
    iv, tv = cfg["i_vocab"], cfg["t_vocab"]
    keys = iter(jax.random.split(key, 512))
    nk = lambda: next(keys)

    def mha_params(prefix=""):
        wq = _xavier_uniform(nk(), (d, d))
        wk = _xavier_uniform(nk(), (d, d))
        wv = _xavier_uniform(nk(), (d, d))
        wo = _xavier_uniform(nk(), (d, d))
        # Per-head layout consumed directly by the fused kernels:
        #   wq/wk/wv: [H, D, Dh]   wo: [H, Dh, D]
        return {prefix + "wq": wq.reshape(d, H, dh).transpose(1, 0, 2),
                prefix + "wk": wk.reshape(d, H, dh).transpose(1, 0, 2),
                prefix + "wv": wv.reshape(d, H, dh).transpose(1, 0, 2),
                prefix + "wo": wo.reshape(H, dh, d)}

    def ffn_params():
        return {"w1": _xavier_uniform(nk(), (d, ff)),
                "b1": jnp.zeros((1, ff), jnp.float32),
                "w2": _xavier_uniform(nk(), (ff, d)),
                "b2": jnp.zeros((1, d), jnp.float32)}

    ones_d = lambda: jnp.ones((1, d), jnp.float32)
    zeros_d = lambda: jnp.zeros((1, d), jnp.float32)

    def enc_layer_params():
        p = {}
        p.update(mha_params())
        p.update(ffn_params())
        p.update({"ln1_g": ones_d(), "ln1_b": zeros_d(),
                  "ln2_g": ones_d(), "ln2_b": zeros_d()})
        return p

    def dec_layer_params():
        p = {}
        p.update(mha_params("s_"))
        p.update(mha_params("c_"))
        p.update(ffn_params())
        p.update({"ln1_g": ones_d(), "ln1_b": zeros_d(),
                  "ln2_g": ones_d(), "ln2_b": zeros_d(),
                  "ln3_g": ones_d(), "ln3_b": zeros_d()})
        return p

    def stack_layers(layer_list):
        return {k: jnp.stack([lp[k] for lp in layer_list], axis=0)
                for k in layer_list[0]}

    enc_layers = [enc_layer_params() for _ in range(cfg["num_encoder_layers"])]
    dec_layers = [dec_layer_params() for _ in range(cfg["num_decoder_layers"])]

    # sinusoid positional table (same construction as PositionalEncoding)
    max_len = cfg["max_length"]
    pos = jnp.arange(max_len, dtype=jnp.float32)[:, None]
    _2i = jnp.arange(0, d, 2, dtype=jnp.float32)
    angle = pos / (10000.0 ** (_2i / d))
    pe = jnp.zeros((max_len, d), jnp.float32)
    pe = pe.at[:, 0::2].set(jnp.sin(angle))
    pe = pe.at[:, 1::2].set(jnp.cos(angle))

    # Final vocab projection, padded to a multiple of 128 lanes so the fused
    # decoder kernel does lane-dense unmasked stores.
    out_w = _xavier_uniform(nk(), (d, tv))
    out_b = jnp.zeros((tv,), jnp.float32)
    n_pad = ((tv + 127) // 128) * 128
    out_w_pad = jnp.pad(out_w, ((0, 0), (0, n_pad - tv)))
    out_b_pad = jnp.pad(out_b, (0, n_pad - tv)).reshape(1, n_pad)

    return {
        "i_embed": jax.random.normal(nk(), (iv, d), jnp.float32),
        "t_embed": jax.random.normal(nk(), (tv, d), jnp.float32),  # unused (matches reference)
        "pos_encoding": pe,
        "enc": stack_layers(enc_layers),   # every leaf: [L_enc, ...]
        "dec": stack_layers(dec_layers),   # every leaf: [L_dec, ...]
        "out_w_pad": out_w_pad,
        "out_b_pad": out_b_pad,
    }


# ---------------------------------------------------------------------------

if __name__ == "__main__":
    cfg = dict(
        d_model=64,
        num_heads=8,            # default num_heads=8 so cross-attention matches too
        dim_feedforward=128,
        num_encoder_layers=2,
        num_decoder_layers=2,
        max_length=12,
        i_vocab=11,
        t_vocab=13,
        src_pad_idx=0,
        tgt_pad_idx=0,
    )

    key = jax.random.PRNGKey(0)
    k_params, k_enc, k_dec = jax.random.split(key, 3)
    params = make_params(k_params, cfg)

    B, S, T = 2, 8, 8
    enc_inputs = jax.random.randint(k_enc, (B, S), 0, cfg["i_vocab"], dtype=jnp.int32)
    dec_inputs = jax.random.randint(k_dec, (B, T), 0, cfg["i_vocab"], dtype=jnp.int32)

    forward = jax.jit(functools.partial(my_transformer_forward, cfg=cfg))
    out = forward(params, enc_inputs, dec_inputs)
    jax.block_until_ready(out)
    assert out.shape == (B, T, cfg["t_vocab"])
    assert bool(jnp.all(jnp.isfinite(out)))
    print("KERNEL_OK")
</pallas_src>

<mosaic_0001>
module attributes {stable_mosaic.version = 11 : i64} {
  func.func @_encoder_stack_kernel(%arg0: i32, %arg1: memref<1x8x64xf32, #tpu.memory_space<vmem>>, %arg2: memref<1x1x8xf32, #tpu.memory_space<vmem>>, %arg3: memref<2x8x64x8xf32, #tpu.memory_space<vmem>>, %arg4: memref<2x8x64x8xf32, #tpu.memory_space<vmem>>, %arg5: memref<2x8x64x8xf32, #tpu.memory_space<vmem>>, %arg6: memref<2x8x8x64xf32, #tpu.memory_space<vmem>>, %arg7: memref<2x1x64xf32, #tpu.memory_space<vmem>>, %arg8: memref<2x1x64xf32, #tpu.memory_space<vmem>>, %arg9: memref<2x64x128xf32, #tpu.memory_space<vmem>>, %arg10: memref<2x1x128xf32, #tpu.memory_space<vmem>>, %arg11: memref<2x128x64xf32, #tpu.memory_space<vmem>>, %arg12: memref<2x1x64xf32, #tpu.memory_space<vmem>>, %arg13: memref<2x1x64xf32, #tpu.memory_space<vmem>>, %arg14: memref<2x1x64xf32, #tpu.memory_space<vmem>>, %arg15: memref<1x8x64xf32, #tpu.memory_space<vmem>>) attributes {dimension_semantics = [#tpu.dimension_semantics<parallel>], iteration_bounds = array<i64: 2>, scalar_prefetch = 0 : i64, scratch_operands = 0 : i64, tpu.core_type = #tpu.core_type<tc>, window_params = [{transform_indices = @transform_0, window_bounds = array<i64: 1, 8, 64>}, {transform_indices = @transform_1, window_bounds = array<i64: 1, 1, 8>}, {pipeline_mode = #tpu.pipeline_mode<synchronous>, transform_indices = @transform_2, window_bounds = array<i64: 2, 8, 64, 8>}, {pipeline_mode = #tpu.pipeline_mode<synchronous>, transform_indices = @transform_3, window_bounds = array<i64: 2, 8, 64, 8>}, {pipeline_mode = #tpu.pipeline_mode<synchronous>, transform_indices = @transform_4, window_bounds = array<i64: 2, 8, 64, 8>}, {pipeline_mode = #tpu.pipeline_mode<synchronous>, transform_indices = @transform_5, window_bounds = array<i64: 2, 8, 8, 64>}, {pipeline_mode = #tpu.pipeline_mode<synchronous>, transform_indices = @transform_6, window_bounds = array<i64: 2, 1, 64>}, {pipeline_mode = #tpu.pipeline_mode<synchronous>, transform_indices = @transform_7, window_bounds = array<i64: 2, 1, 64>}, {pipeline_mode = #tpu.pipeline_mode<synchronous>, transform_indices = @transform_8, window_bounds = array<i64: 2, 64, 128>}, {pipeline_mode = #tpu.pipeline_mode<synchronous>, transform_indices = @transform_9, window_bounds = array<i64: 2, 1, 128>}, {pipeline_mode = #tpu.pipeline_mode<synchronous>, transform_indices = @transform_10, window_bounds = array<i64: 2, 128, 64>}, {pipeline_mode = #tpu.pipeline_mode<synchronous>, transform_indices = @transform_11, window_bounds = array<i64: 2, 1, 64>}, {pipeline_mode = #tpu.pipeline_mode<synchronous>, transform_indices = @transform_12, window_bounds = array<i64: 2, 1, 64>}, {pipeline_mode = #tpu.pipeline_mode<synchronous>, transform_indices = @transform_13, window_bounds = array<i64: 2, 1, 64>}, {transform_indices = @transform_14, window_bounds = array<i64: 1, 8, 64>}]} {
    %c0 = arith.constant 0 : index
    %c0_0 = arith.constant 0 : index
    %c0_1 = arith.constant 0 : index
    %0 = vector.load %arg1[%c0, %c0_0, %c0_1] : memref<1x8x64xf32, #tpu.memory_space<vmem>>, vector<1x8x64xf32>
    %1 = vector.shape_cast %0 : vector<1x8x64xf32> to vector<8x64xf32>
    %c0_2 = arith.constant 0 : index
    %c0_3 = arith.constant 0 : index
    %c0_4 = arith.constant 0 : index
    %2 = vector.load %arg2[%c0_2, %c0_3, %c0_4] : memref<1x1x8xf32, #tpu.memory_space<vmem>>, vector<1x1x8xf32>
    %3 = vector.shape_cast %2 : vector<1x1x8xf32> to vector<1x8xf32>
    %4 = vector.shape_cast %3 : vector<1x8xf32> to vector<1x1x8xf32>
    %5 = vector.shape_cast %4 : vector<1x1x8xf32> to vector<1x1x8xf32>
    %6 = vector.broadcast %5 : vector<1x1x8xf32> to vector<8x8x8xf32>
    %cst = arith.constant 5.000000e-01 : f32
    %7 = vector.broadcast %cst : f32 to vector<8x8x8xf32>
    %8 = arith.cmpf ogt, %6, %7 : vector<8x8x8xf32>
    %c0_5 = arith.constant 0 : index
    %c0_6 = arith.constant 0 : index
    %c0_7 = arith.constant 0 : index
    %c0_8 = arith.constant 0 : index
    %9 = vector.load %arg3[%c0_5, %c0_6, %c0_7, %c0_8] : memref<2x8x64x8xf32, #tpu.memory_space<vmem>>, vector<1x8x64x8xf32>
    %10 = vector.shape_cast %9 : vector<1x8x64x8xf32> to vector<8x64x8xf32>
    %c0_9 = arith.constant 0 : index
    %c0_10 = arith.constant 0 : index
    %c0_11 = arith.constant 0 : index
    %c0_12 = arith.constant 0 : index
    %11 = vector.load %arg4[%c0_9, %c0_10, %c0_11, %c0_12] : memref<2x8x64x8xf32, #tpu.memory_space<vmem>>, vector<1x8x64x8xf32>
    %12 = vector.shape_cast %11 : vector<1x8x64x8xf32> to vector<8x64x8xf32>
    %c0_13 = arith.constant 0 : index
    %c0_14 = arith.constant 0 : index
    %c0_15 = arith.constant 0 : index
    %c0_16 = arith.constant 0 : index
    %13 = vector.load %arg5[%c0_13, %c0_14, %c0_15, %c0_16] : memref<2x8x64x8xf32, #tpu.memory_space<vmem>>, vector<1x8x64x8xf32>
    %14 = vector.shape_cast %13 : vector<1x8x64x8xf32> to vector<8x64x8xf32>
    %c0_17 = arith.constant 0 : index
    %c0_18 = arith.constant 0 : index
    %c0_19 = arith.constant 0 : index
    %c0_20 = arith.constant 0 : index
    %15 = vector.load %arg6[%c0_17, %c0_18, %c0_19, %c0_20] : memref<2x8x8x64xf32, #tpu.memory_space<vmem>>, vector<1x8x8x64xf32>
    %16 = vector.shape_cast %15 : vector<1x8x8x64xf32> to vector<8x8x64xf32>
    %17 = vector.shape_cast %1 : vector<8x64xf32> to vector<1x8x64xf32>
    %18 = vector.shape_cast %17 : vector<1x8x64xf32> to vector<1x8x64xf32>
    %19 = vector.broadcast %18 : vector<1x8x64xf32> to vector<8x8x64xf32>
    %20 = vector.shape_cast %1 : vector<8x64xf32> to vector<1x8x64xf32>
    %21 = vector.shape_cast %20 : vector<1x8x64xf32> to vector<1x8x64xf32>
    %22 = vector.broadcast %21 : vector<1x8x64xf32> to vector<8x8x64xf32>
    "tpu.trace_start"() <{level = 10 : i32, message = "hld,hde->hle"}> : () -> ()
    %cst_21 = arith.constant dense<0.000000e+00> : vector<8x8x8xf32>
    %23 = tpu.matmul %19, %10, %cst_21 {dimension_numbers = #tpu.dot_dimension_numbers<[2], [1], [1], [2], [0, 0, 0, 1, 1, 2], [0], [0]>} : vector<8x8x64xf32>, vector<8x64x8xf32>, vector<8x8x8xf32> -> vector<8x8x8xf32>
    %cst_22 = arith.constant dense<0.000000e+00> : vector<8x8x8xf32>
    %24 = tpu.matmul %22, %12, %cst_22 {dimension_numbers = #tpu.dot_dimension_numbers<[2], [1], [1], [2], [0, 0, 0, 1, 1, 2], [0], [0]>} : vector<8x8x64xf32>, vector<8x64x8xf32>, vector<8x8x8xf32> -> vector<8x8x8xf32>
    %cst_23 = arith.constant dense<0.000000e+00> : vector<8x8x8xf32>
    %25 = tpu.matmul %22, %14, %cst_23 {dimension_numbers = #tpu.dot_dimension_numbers<[2], [1], [1], [2], [0, 0, 0, 1, 1, 2], [0], [0]>} : vector<8x8x64xf32>, vector<8x64x8xf32>, vector<8x8x8xf32> -> vector<8x8x8xf32>
    "tpu.trace_stop"() : () -> ()
    "tpu.trace_start"() <{level = 10 : i32, message = "hqe,hke->hqk"}> : () -> ()
    %cst_24 = arith.constant dense<0.000000e+00> : vector<8x8x8xf32>
    %26 = tpu.matmul %23, %24, %cst_24 {dimension_numbers = #tpu.dot_dimension_numbers<[2], [2], [1], [1], [0, 0, 0, 1, 1, 1], [0], [0]>} : vector<8x8x8xf32>, vector<8x8x8xf32>, vector<8x8x8xf32> -> vector<8x8x8xf32>
    "tpu.trace_stop"() : () -> ()
    %cst_25 = arith.constant 0.353553385 : f32
    %27 = vector.broadcast %cst_25 : f32 to vector<8x8x8xf32>
    %28 = arith.mulf %26, %27 : vector<8x8x8xf32>
    %cst_26 = arith.constant -1.000000e+09 : f32
    %29 = vector.broadcast %cst_26 : f32 to vector<8x8x8xf32>
    %30 = arith.select %8, %29, %28 : vector<8x8x8xi1>, vector<8x8x8xf32>
    %cst_27 = arith.constant dense<0xFF800000> : vector<8x8xf32>
    %31 = vector.multi_reduction <maximumf>, %30, %cst_27 [2] : vector<8x8x8xf32> to vector<8x8xf32>
    %32 = vector.shape_cast %31 : vector<8x8xf32> to vector<8x8x1xf32>
    %33 = vector.broadcast %32 : vector<8x8x1xf32> to vector<8x8x8xf32>
    %34 = arith.subf %30, %33 : vector<8x8x8xf32>
    %35 = math.exp %34 : vector<8x8x8xf32>
    %cst_28 = arith.constant dense<0.000000e+00> : vector<8x8xf32>
    %36 = vector.multi_reduction <add>, %35, %cst_28 [2] : vector<8x8x8xf32> to vector<8x8xf32>
    %37 = vector.shape_cast %36 : vector<8x8xf32> to vector<8x8x1xf32>
    %38 = vector.broadcast %37 : vector<8x8x1xf32> to vector<8x8x8xf32>
    %39 = arith.divf %35, %38 : vector<8x8x8xf32>
    "tpu.trace_start"() <{level = 10 : i32, message = "hqk,hke->hqe"}> : () -> ()
    %cst_29 = arith.constant dense<0.000000e+00> : vector<8x8x8xf32>
    %40 = tpu.matmul %39, %25, %cst_29 {dimension_numbers = #tpu.dot_dimension_numbers<[2], [1], [1], [2], [0, 0, 0, 1, 1, 2], [0], [0]>} : vector<8x8x8xf32>, vector<8x8x8xf32>, vector<8x8x8xf32> -> vector<8x8x8xf32>
    "tpu.trace_stop"() : () -> ()
    "tpu.trace_start"() <{level = 10 : i32, message = "hle,hed->hld"}> : () -> ()
    %cst_30 = arith.constant dense<0.000000e+00> : vector<8x8x64xf32>
    %41 = tpu.matmul %40, %16, %cst_30 {dimension_numbers = #tpu.dot_dimension_numbers<[2], [1], [1], [2], [0, 0, 0, 1, 1, 2], [0], [0]>} : vector<8x8x8xf32>, vector<8x8x64xf32>, vector<8x8x64xf32> -> vector<8x8x64xf32>
    "tpu.trace_stop"() : () -> ()
    %cst_31 = arith.constant dense<0.000000e+00> : vector<8x64xf32>
    %42 = vector.multi_reduction <add>, %41, %cst_31 [0] : vector<8x8x64xf32> to vector<8x64xf32>
    %c0_32 = arith.constant 0 : index
    %c0_33 = arith.constant 0 : index
    %c0_34 = arith.constant 0 : index
    %43 = vector.load %arg7[%c0_32, %c0_33, %c0_34] : memref<2x1x64xf32, #tpu.memory_space<vmem>>, vector<1x1x64xf32>
    %44 = vector.shape_cast %43 : vector<1x1x64xf32> to vector<1x64xf32>
    %c0_35 = arith.constant 0 : index
    %c0_36 = arith.constant 0 : index
    %c0_37 = arith.constant 0 : index
    %45 = vector.load %arg8[%c0_35, %c0_36, %c0_37] : memref<2x1x64xf32, #tpu.memory_space<vmem>>, vector<1x1x64xf32>
    %46 = vector.shape_cast %45 : vector<1x1x64xf32> to vector<1x64xf32>
    %47 = arith.addf %42, %1 : vector<8x64xf32>
    %cst_38 = arith.constant dense<0.000000e+00> : vector<8xf32>
    %48 = vector.multi_reduction <add>, %47, %cst_38 [1] : vector<8x64xf32> to vector<8xf32>
    %49 = vector.shape_cast %48 : vector<8xf32> to vector<8x1xf32>
    %cst_39 = arith.constant 6.400000e+01 : f32
    %50 = vector.broadcast %cst_39 : f32 to vector<8x1xf32>
    %51 = arith.divf %49, %50 : vector<8x1xf32>
    %52 = vector.broadcast %51 : vector<8x1xf32> to vector<8x64xf32>
    %53 = arith.subf %47, %52 : vector<8x64xf32>
    %54 = arith.mulf %53, %53 : vector<8x64xf32>
    %cst_40 = arith.constant dense<0.000000e+00> : vector<8xf32>
    %55 = vector.multi_reduction <add>, %54, %cst_40 [1] : vector<8x64xf32> to vector<8xf32>
    %56 = vector.shape_cast %55 : vector<8xf32> to vector<8x1xf32>
    %cst_41 = arith.constant 6.400000e+01 : f32
    %57 = vector.broadcast %cst_41 : f32 to vector<8x1xf32>
    %58 = arith.divf %56, %57 : vector<8x1xf32>
    %59 = vector.broadcast %51 : vector<8x1xf32> to vector<8x64xf32>
    %60 = arith.subf %47, %59 : vector<8x64xf32>
    %cst_42 = arith.constant 9.99999997E-7 : f32
    %61 = vector.broadcast %cst_42 : f32 to vector<8x1xf32>
    %62 = arith.addf %58, %61 : vector<8x1xf32>
    %63 = math.rsqrt %62 : vector<8x1xf32>
    %64 = vector.broadcast %63 : vector<8x1xf32> to vector<8x64xf32>
    %65 = arith.mulf %60, %64 : vector<8x64xf32>
    %66 = vector.broadcast %44 : vector<1x64xf32> to vector<8x64xf32>
    %67 = arith.mulf %65, %66 : vector<8x64xf32>
    %68 = vector.broadcast %46 : vector<1x64xf32> to vector<8x64xf32>
    %69 = arith.addf %67, %68 : vector<8x64xf32>
    %c0_43 = arith.constant 0 : index
    %c0_44 = arith.constant 0 : index
    %c0_45 = arith.constant 0 : index
    %70 = vector.load %arg9[%c0_43, %c0_44, %c0_45] : memref<2x64x128xf32, #tpu.memory_space<vmem>>, vector<1x64x128xf32>
    %71 = vector.shape_cast %70 : vector<1x64x128xf32> to vector<64x128xf32>
    %c0_46 = arith.constant 0 : index
    %c0_47 = arith.constant 0 : index
    %c0_48 = arith.constant 0 : index
    %72 = vector.load %arg10[%c0_46, %c0_47, %c0_48] : memref<2x1x128xf32, #tpu.memory_space<vmem>>, vector<1x1x128xf32>
    %73 = vector.shape_cast %72 : vector<1x1x128xf32> to vector<1x128xf32>
    %c0_49 = arith.constant 0 : index
    %c0_50 = arith.constant 0 : index
    %c0_51 = arith.constant 0 : index
    %74 = vector.load %arg11[%c0_49, %c0_50, %c0_51] : memref<2x128x64xf32, #tpu.memory_space<vmem>>, vector<1x128x64xf32>
    %75 = vector.shape_cast %74 : vector<1x128x64xf32> to vector<128x64xf32>
    %c0_52 = arith.constant 0 : index
    %c0_53 = arith.constant 0 : index
    %c0_54 = arith.constant 0 : index
    %76 = vector.load %arg12[%c0_52, %c0_53, %c0_54] : memref<2x1x64xf32, #tpu.memory_space<vmem>>, vector<1x1x64xf32>
    %77 = vector.shape_cast %76 : vector<1x1x64xf32> to vector<1x64xf32>
    %cst_55 = arith.constant dense<0.000000e+00> : vector<8x128xf32>
    %78 = tpu.matmul %69, %71, %cst_55 {dimension_numbers = #tpu.dot_dimension_numbers<[1], [0], [0], [1], [0, 0, 1, 1], [], []>} : vector<8x64xf32>, vector<64x128xf32>, vector<8x128xf32> -> vector<8x128xf32>
    %79 = vector.broadcast %73 : vector<1x128xf32> to vector<8x128xf32>
    %80 = arith.addf %78, %79 : vector<8x128xf32>
    %cst_56 = arith.constant 0.000000e+00 : f32
    %81 = vector.broadcast %cst_56 : f32 to vector<8x128xf32>
    %82 = arith.maximumf %80, %81 : vector<8x128xf32>
    %cst_57 = arith.constant dense<0.000000e+00> : vector<8x64xf32>
    %83 = tpu.matmul %82, %75, %cst_57 {dimension_numbers = #tpu.dot_dimension_numbers<[1], [0], [0], [1], [0, 0, 1, 1], [], []>} : vector<8x128xf32>, vector<128x64xf32>, vector<8x64xf32> -> vector<8x64xf32>
    %84 = vector.broadcast %77 : vector<1x64xf32> to vector<8x64xf32>
    %85 = arith.addf %83, %84 : vector<8x64xf32>
    %c0_58 = arith.constant 0 : index
    %c0_59 = arith.constant 0 : index
    %c0_60 = arith.constant 0 : index
    %86 = vector.load %arg13[%c0_58, %c0_59, %c0_60] : memref<2x1x64xf32, #tpu.memory_space<vmem>>, vector<1x1x64xf32>
    %87 = vector.shape_cast %86 : vector<1x1x64xf32> to vector<1x64xf32>
    %c0_61 = arith.constant 0 : index
    %c0_62 = arith.constant 0 : index
    %c0_63 = arith.constant 0 : index
    %88 = vector.load %arg14[%c0_61, %c0_62, %c0_63] : memref<2x1x64xf32, #tpu.memory_space<vmem>>, vector<1x1x64xf32>
    %89 = vector.shape_cast %88 : vector<1x1x64xf32> to vector<1x64xf32>
    %90 = arith.addf %85, %69 : vector<8x64xf32>
    %cst_64 = arith.constant dense<0.000000e+00> : vector<8xf32>
    %91 = vector.multi_reduction <add>, %90, %cst_64 [1] : vector<8x64xf32> to vector<8xf32>
    %92 = vector.shape_cast %91 : vector<8xf32> to vector<8x1xf32>
    %cst_65 = arith.constant 6.400000e+01 : f32
    %93 = vector.broadcast %cst_65 : f32 to vector<8x1xf32>
    %94 = arith.divf %92, %93 : vector<8x1xf32>
    %95 = vector.broadcast %94 : vector<8x1xf32> to vector<8x64xf32>
    %96 = arith.subf %90, %95 : vector<8x64xf32>
    %97 = arith.mulf %96, %96 : vector<8x64xf32>
    %cst_66 = arith.constant dense<0.000000e+00> : vector<8xf32>
    %98 = vector.multi_reduction <add>, %97, %cst_66 [1] : vector<8x64xf32> to vector<8xf32>
    %99 = vector.shape_cast %98 : vector<8xf32> to vector<8x1xf32>
    %cst_67 = arith.constant 6.400000e+01 : f32
    %100 = vector.broadcast %cst_67 : f32 to vector<8x1xf32>
    %101 = arith.divf %99, %100 : vector<8x1xf32>
    %102 = vector.broadcast %94 : vector<8x1xf32> to vector<8x64xf32>
    %103 = arith.subf %90, %102 : vector<8x64xf32>
    %cst_68 = arith.constant 9.99999997E-7 : f32
    %104 = vector.broadcast %cst_68 : f32 to vector<8x1xf32>
    %105 = arith.addf %101, %104 : vector<8x1xf32>
    %106 = math.rsqrt %105 : vector<8x1xf32>
    %107 = vector.broadcast %106 : vector<8x1xf32> to vector<8x64xf32>
    %108 = arith.mulf %103, %107 : vector<8x64xf32>
    %109 = vector.broadcast %87 : vector<1x64xf32> to vector<8x64xf32>
    %110 = arith.mulf %108, %109 : vector<8x64xf32>
    %111 = vector.broadcast %89 : vector<1x64xf32> to vector<8x64xf32>
    %112 = arith.addf %110, %111 : vector<8x64xf32>
    %c1 = arith.constant 1 : index
    %c0_69 = arith.constant 0 : index
    %c0_70 = arith.constant 0 : index
    %c0_71 = arith.constant 0 : index
    %113 = vector.load %arg3[%c1, %c0_69, %c0_70, %c0_71] : memref<2x8x64x8xf32, #tpu.memory_space<vmem>>, vector<1x8x64x8xf32>
    %114 = vector.shape_cast %113 : vector<1x8x64x8xf32> to vector<8x64x8xf32>
    %c1_72 = arith.constant 1 : index
    %c0_73 = arith.constant 0 : index
    %c0_74 = arith.constant 0 : index
    %c0_75 = arith.constant 0 : index
    %115 = vector.load %arg4[%c1_72, %c0_73, %c0_74, %c0_75] : memref<2x8x64x8xf32, #tpu.memory_space<vmem>>, vector<1x8x64x8xf32>
    %116 = vector.shape_cast %115 : vector<1x8x64x8xf32> to vector<8x64x8xf32>
    %c1_76 = arith.constant 1 : index
    %c0_77 = arith.constant 0 : index
    %c0_78 = arith.constant 0 : index
    %c0_79 = arith.constant 0 : index
    %117 = vector.load %arg5[%c1_76, %c0_77, %c0_78, %c0_79] : memref<2x8x64x8xf32, #tpu.memory_space<vmem>>, vector<1x8x64x8xf32>
    %118 = vector.shape_cast %117 : vector<1x8x64x8xf32> to vector<8x64x8xf32>
    %c1_80 = arith.constant 1 : index
    %c0_81 = arith.constant 0 : index
    %c0_82 = arith.constant 0 : index
    %c0_83 = arith.constant 0 : index
    %119 = vector.load %arg6[%c1_80, %c0_81, %c0_82, %c0_83] : memref<2x8x8x64xf32, #tpu.memory_space<vmem>>, vector<1x8x8x64xf32>
    %120 = vector.shape_cast %119 : vector<1x8x8x64xf32> to vector<8x8x64xf32>
    %121 = vector.shape_cast %112 : vector<8x64xf32> to vector<1x8x64xf32>
    %122 = vector.shape_cast %121 : vector<1x8x64xf32> to vector<1x8x64xf32>
    %123 = vector.broadcast %122 : vector<1x8x64xf32> to vector<8x8x64xf32>
    %124 = vector.shape_cast %112 : vector<8x64xf32> to vector<1x8x64xf32>
    %125 = vector.shape_cast %124 : vector<1x8x64xf32> to vector<1x8x64xf32>
    %126 = vector.broadcast %125 : vector<1x8x64xf32> to vector<8x8x64xf32>
    "tpu.trace_start"() <{level = 10 : i32, message = "hld,hde->hle"}> : () -> ()
    %cst_84 = arith.constant dense<0.000000e+00> : vector<8x8x8xf32>
    %127 = tpu.matmul %123, %114, %cst_84 {dimension_numbers = #tpu.dot_dimension_numbers<[2], [1], [1], [2], [0, 0, 0, 1, 1, 2], [0], [0]>} : vector<8x8x64xf32>, vector<8x64x8xf32>, vector<8x8x8xf32> -> vector<8x8x8xf32>
    %cst_85 = arith.constant dense<0.000000e+00> : vector<8x8x8xf32>
    %128 = tpu.matmul %126, %116, %cst_85 {dimension_numbers = #tpu.dot_dimension_numbers<[2], [1], [1], [2], [0, 0, 0, 1, 1, 2], [0], [0]>} : vector<8x8x64xf32>, vector<8x64x8xf32>, vector<8x8x8xf32> -> vector<8x8x8xf32>
    %cst_86 = arith.constant dense<0.000000e+00> : vector<8x8x8xf32>
    %129 = tpu.matmul %126, %118, %cst_86 {dimension_numbers = #tpu.dot_dimension_numbers<[2], [1], [1], [2], [0, 0, 0, 1, 1, 2], [0], [0]>} : vector<8x8x64xf32>, vector<8x64x8xf32>, vector<8x8x8xf32> -> vector<8x8x8xf32>
    "tpu.trace_stop"() : () -> ()
    "tpu.trace_start"() <{level = 10 : i32, message = "hqe,hke->hqk"}> : () -> ()
    %cst_87 = arith.constant dense<0.000000e+00> : vector<8x8x8xf32>
    %130 = tpu.matmul %127, %128, %cst_87 {dimension_numbers = #tpu.dot_dimension_numbers<[2], [2], [1], [1], [0, 0, 0, 1, 1, 1], [0], [0]>} : vector<8x8x8xf32>, vector<8x8x8xf32>, vector<8x8x8xf32> -> vector<8x8x8xf32>
    "tpu.trace_stop"() : () -> ()
    %cst_88 = arith.constant 0.353553385 : f32
    %131 = vector.broadcast %cst_88 : f32 to vector<8x8x8xf32>
    %132 = arith.mulf %130, %131 : vector<8x8x8xf32>
    %cst_89 = arith.constant -1.000000e+09 : f32
    %133 = vector.broadcast %cst_89 : f32 to vector<8x8x8xf32>
    %134 = arith.select %8, %133, %132 : vector<8x8x8xi1>, vector<8x8x8xf32>
    %cst_90 = arith.constant dense<0xFF800000> : vector<8x8xf32>
    %135 = vector.multi_reduction <maximumf>, %134, %cst_90 [2] : vector<8x8x8xf32> to vector<8x8xf32>
    %136 = vector.shape_cast %135 : vector<8x8xf32> to vector<8x8x1xf32>
    %137 = vector.broadcast %136 : vector<8x8x1xf32> to vector<8x8x8xf32>
    %138 = arith.subf %134, %137 : vector<8x8x8xf32>
    %139 = math.exp %138 : vector<8x8x8xf32>
    %cst_91 = arith.constant dense<0.000000e+00> : vector<8x8xf32>
    %140 = vector.multi_reduction <add>, %139, %cst_91 [2] : vector<8x8x8xf32> to vector<8x8xf32>
    %141 = vector.shape_cast %140 : vector<8x8xf32> to vector<8x8x1xf32>
    %142 = vector.broadcast %141 : vector<8x8x1xf32> to vector<8x8x8xf32>
    %143 = arith.divf %139, %142 : vector<8x8x8xf32>
    "tpu.trace_start"() <{level = 10 : i32, message = "hqk,hke->hqe"}> : () -> ()
    %cst_92 = arith.constant dense<0.000000e+00> : vector<8x8x8xf32>
    %144 = tpu.matmul %143, %129, %cst_92 {dimension_numbers = #tpu.dot_dimension_numbers<[2], [1], [1], [2], [0, 0, 0, 1, 1, 2], [0], [0]>} : vector<8x8x8xf32>, vector<8x8x8xf32>, vector<8x8x8xf32> -> vector<8x8x8xf32>
    "tpu.trace_stop"() : () -> ()
    "tpu.trace_start"() <{level = 10 : i32, message = "hle,hed->hld"}> : () -> ()
    %cst_93 = arith.constant dense<0.000000e+00> : vector<8x8x64xf32>
    %145 = tpu.matmul %144, %120, %cst_93 {dimension_numbers = #tpu.dot_dimension_numbers<[2], [1], [1], [2], [0, 0, 0, 1, 1, 2], [0], [0]>} : vector<8x8x8xf32>, vector<8x8x64xf32>, vector<8x8x64xf32> -> vector<8x8x64xf32>
    "tpu.trace_stop"() : () -> ()
    %cst_94 = arith.constant dense<0.000000e+00> : vector<8x64xf32>
    %146 = vector.multi_reduction <add>, %145, %cst_94 [0] : vector<8x8x64xf32> to vector<8x64xf32>
    %c1_95 = arith.constant 1 : index
    %c0_96 = arith.constant 0 : index
    %c0_97 = arith.constant 0 : index
    %147 = vector.load %arg7[%c1_95, %c0_96, %c0_97] : memref<2x1x64xf32, #tpu.memory_space<vmem>>, vector<1x1x64xf32>
    %148 = vector.shape_cast %147 : vector<1x1x64xf32> to vector<1x64xf32>
    %c1_98 = arith.constant 1 : index
    %c0_99 = arith.constant 0 : index
    %c0_100 = arith.constant 0 : index
    %149 = vector.load %arg8[%c1_98, %c0_99, %c0_100] : memref<2x1x64xf32, #tpu.memory_space<vmem>>, vector<1x1x64xf32>
    %150 = vector.shape_cast %149 : vector<1x1x64xf32> to vector<1x64xf32>
    %151 = arith.addf %146, %112 : vector<8x64xf32>
    %cst_101 = arith.constant dense<0.000000e+00> : vector<8xf32>
    %152 = vector.multi_reduction <add>, %151, %cst_101 [1] : vector<8x64xf32> to vector<8xf32>
    %153 = vector.shape_cast %152 : vector<8xf32> to vector<8x1xf32>
    %cst_102 = arith.constant 6.400000e+01 : f32
    %154 = vector.broadcast %cst_102 : f32 to vector<8x1xf32>
    %155 = arith.divf %153, %154 : vector<8x1xf32>
    %156 = vector.broadcast %155 : vector<8x1xf32> to vector<8x64xf32>
    %157 = arith.subf %151, %156 : vector<8x64xf32>
    %158 = arith.mulf %157, %157 : vector<8x64xf32>
    %cst_103 = arith.constant dense<0.000000e+00> : vector<8xf32>
    %159 = vector.multi_reduction <add>, %158, %cst_103 [1] : vector<8x64xf32> to vector<8xf32>
    %160 = vector.shape_cast %159 : vector<8xf32> to vector<8x1xf32>
    %cst_104 = arith.constant 6.400000e+01 : f32
    %161 = vector.broadcast %cst_104 : f32 to vector<8x1xf32>
    %162 = arith.divf %160, %161 : vector<8x1xf32>
    %163 = vector.broadcast %155 : vector<8x1xf32> to vector<8x64xf32>
    %164 = arith.subf %151, %163 : vector<8x64xf32>
    %cst_105 = arith.constant 9.99999997E-7 : f32
    %165 = vector.broadcast %cst_105 : f32 to vector<8x1xf32>
    %166 = arith.addf %162, %165 : vector<8x1xf32>
    %167 = math.rsqrt %166 : vector<8x1xf32>
    %168 = vector.broadcast %167 : vector<8x1xf32> to vector<8x64xf32>
    %169 = arith.mulf %164, %168 : vector<8x64xf32>
    %170 = vector.broadcast %148 : vector<1x64xf32> to vector<8x64xf32>
    %171 = arith.mulf %169, %170 : vector<8x64xf32>
    %172 = vector.broadcast %150 : vector<1x64xf32> to vector<8x64xf32>
    %173 = arith.addf %171, %172 : vector<8x64xf32>
    %c1_106 = arith.constant 1 : index
    %c0_107 = arith.constant 0 : index
    %c0_108 = arith.constant 0 : index
    %174 = vector.load %arg9[%c1_106, %c0_107, %c0_108] : memref<2x64x128xf32, #tpu.memory_space<vmem>>, vector<1x64x128xf32>
    %175 = vector.shape_cast %174 : vector<1x64x128xf32> to vector<64x128xf32>
    %c1_109 = arith.constant 1 : index
    %c0_110 = arith.constant 0 : index
    %c0_111 = arith.constant 0 : index
    %176 = vector.load %arg10[%c1_109, %c0_110, %c0_111] : memref<2x1x128xf32, #tpu.memory_space<vmem>>, vector<1x1x128xf32>
    %177 = vector.shape_cast %176 : vector<1x1x128xf32> to vector<1x128xf32>
    %c1_112 = arith.constant 1 : index
    %c0_113 = arith.constant 0 : index
    %c0_114 = arith.constant 0 : index
    %178 = vector.load %arg11[%c1_112, %c0_113, %c0_114] : memref<2x128x64xf32, #tpu.memory_space<vmem>>, vector<1x128x64xf32>
    %179 = vector.shape_cast %178 : vector<1x128x64xf32> to vector<128x64xf32>
    %c1_115 = arith.constant 1 : index
    %c0_116 = arith.constant 0 : index
    %c0_117 = arith.constant 0 : index
    %180 = vector.load %arg12[%c1_115, %c0_116, %c0_117] : memref<2x1x64xf32, #tpu.memory_space<vmem>>, vector<1x1x64xf32>
    %181 = vector.shape_cast %180 : vector<1x1x64xf32> to vector<1x64xf32>
    %cst_118 = arith.constant dense<0.000000e+00> : vector<8x128xf32>
    %182 = tpu.matmul %173, %175, %cst_118 {dimension_numbers = #tpu.dot_dimension_numbers<[1], [0], [0], [1], [0, 0, 1, 1], [], []>} : vector<8x64xf32>, vector<64x128xf32>, vector<8x128xf32> -> vector<8x128xf32>
    %183 = vector.broadcast %177 : vector<1x128xf32> to vector<8x128xf32>
    %184 = arith.addf %182, %183 : vector<8x128xf32>
    %cst_119 = arith.constant 0.000000e+00 : f32
    %185 = vector.broadcast %cst_119 : f32 to vector<8x128xf32>
    %186 = arith.maximumf %184, %185 : vector<8x128xf32>
    %cst_120 = arith.constant dense<0.000000e+00> : vector<8x64xf32>
    %187 = tpu.matmul %186, %179, %cst_120 {dimension_numbers = #tpu.dot_dimension_numbers<[1], [0], [0], [1], [0, 0, 1, 1], [], []>} : vector<8x128xf32>, vector<128x64xf32>, vector<8x64xf32> -> vector<8x64xf32>
    %188 = vector.broadcast %181 : vector<1x64xf32> to vector<8x64xf32>
    %189 = arith.addf %187, %188 : vector<8x64xf32>
    %c1_121 = arith.constant 1 : index
    %c0_122 = arith.constant 0 : index
    %c0_123 = arith.constant 0 : index
    %190 = vector.load %arg13[%c1_121, %c0_122, %c0_123] : memref<2x1x64xf32, #tpu.memory_space<vmem>>, vector<1x1x64xf32>
    %191 = vector.shape_cast %190 : vector<1x1x64xf32> to vector<1x64xf32>
    %c1_124 = arith.constant 1 : index
    %c0_125 = arith.constant 0 : index
    %c0_126 = arith.constant 0 : index
    %192 = vector.load %arg14[%c1_124, %c0_125, %c0_126] : memref<2x1x64xf32, #tpu.memory_space<vmem>>, vector<1x1x64xf32>
    %193 = vector.shape_cast %192 : vector<1x1x64xf32> to vector<1x64xf32>
    %194 = arith.addf %189, %173 : vector<8x64xf32>
    %cst_127 = arith.constant dense<0.000000e+00> : vector<8xf32>
    %195 = vector.multi_reduction <add>, %194, %cst_127 [1] : vector<8x64xf32> to vector<8xf32>
    %196 = vector.shape_cast %195 : vector<8xf32> to vector<8x1xf32>
    %cst_128 = arith.constant 6.400000e+01 : f32
    %197 = vector.broadcast %cst_128 : f32 to vector<8x1xf32>
    %198 = arith.divf %196, %197 : vector<8x1xf32>
    %199 = vector.broadcast %198 : vector<8x1xf32> to vector<8x64xf32>
    %200 = arith.subf %194, %199 : vector<8x64xf32>
    %201 = arith.mulf %200, %200 : vector<8x64xf32>
    %cst_129 = arith.constant dense<0.000000e+00> : vector<8xf32>
    %202 = vector.multi_reduction <add>, %201, %cst_129 [1] : vector<8x64xf32> to vector<8xf32>
    %203 = vector.shape_cast %202 : vector<8xf32> to vector<8x1xf32>
    %cst_130 = arith.constant 6.400000e+01 : f32
    %204 = vector.broadcast %cst_130 : f32 to vector<8x1xf32>
    %205 = arith.divf %203, %204 : vector<8x1xf32>
    %206 = vector.broadcast %198 : vector<8x1xf32> to vector<8x64xf32>
    %207 = arith.subf %194, %206 : vector<8x64xf32>
    %cst_131 = arith.constant 9.99999997E-7 : f32
    %208 = vector.broadcast %cst_131 : f32 to vector<8x1xf32>
    %209 = arith.addf %205, %208 : vector<8x1xf32>
    %210 = math.rsqrt %209 : vector<8x1xf32>
    %211 = vector.broadcast %210 : vector<8x1xf32> to vector<8x64xf32>
    %212 = arith.mulf %207, %211 : vector<8x64xf32>
    %213 = vector.broadcast %191 : vector<1x64xf32> to vector<8x64xf32>
    %214 = arith.mulf %212, %213 : vector<8x64xf32>
    %215 = vector.broadcast %193 : vector<1x64xf32> to vector<8x64xf32>
    %216 = arith.addf %214, %215 : vector<8x64xf32>
    %c0_132 = arith.constant 0 : index
    %c0_133 = arith.constant 0 : index
    %c0_134 = arith.constant 0 : index
    %217 = vector.load %arg15[%c0_132, %c0_133, %c0_134] : memref<1x8x64xf32, #tpu.memory_space<vmem>>, vector<1x8x64xf32>
    %218 = vector.shape_cast %217 : vector<1x8x64xf32> to vector<8x64xf32>
    %219 = vector.shape_cast %216 : vector<8x64xf32> to vector<1x8x64xf32>
    tpu.vector_store %arg15[%c0_132, %c0_133, %c0_134], %219 {strides = array<i32>} : memref<1x8x64xf32, #tpu.memory_space<vmem>>, vector<1x8x64xf32>,
    return
  }
  func.func @transform_0(%arg0: i32) -> (i32, i32, i32) {
    %c0_i32 = arith.constant 0 : i32
    %c0_i32_0 = arith.constant 0 : i32
    %c0_i32_1 = arith.constant 0 : i32
    return %arg0, %c0_i32, %c0_i32_0 : i32, i32, i32
  }
  func.func @transform_1(%arg0: i32) -> (i32, i32, i32) {
    %c0_i32 = arith.constant 0 : i32
    %c0_i32_0 = arith.constant 0 : i32
    %c0_i32_1 = arith.constant 0 : i32
    return %arg0, %c0_i32, %c0_i32_0 : i32, i32, i32
  }
  func.func @transform_2(%arg0: i32) -> (i32, i32, i32, i32) {
    %c0_i32 = arith.constant 0 : i32
    %c0_i32_0 = arith.constant 0 : i32
    %c0_i32_1 = arith.constant 0 : i32
    %c0_i32_2 = arith.constant 0 : i32
    %c0_i32_3 = arith.constant 0 : i32
    return %c0_i32, %c0_i32_0, %c0_i32_1, %c0_i32_2 : i32, i32, i32, i32
  }
  func.func @transform_3(%arg0: i32) -> (i32, i32, i32, i32) {
    %c0_i32 = arith.constant 0 : i32
    %c0_i32_0 = arith.constant 0 : i32
    %c0_i32_1 = arith.constant 0 : i32
    %c0_i32_2 = arith.constant 0 : i32
    %c0_i32_3 = arith.constant 0 : i32
    return %c0_i32, %c0_i32_0, %c0_i32_1, %c0_i32_2 : i32, i32, i32, i32
  }
  func.func @transform_4(%arg0: i32) -> (i32, i32, i32, i32) {
    %c0_i32 = arith.constant 0 : i32
    %c0_i32_0 = arith.constant 0 : i32
    %c0_i32_1 = arith.constant 0 : i32
    %c0_i32_2 = arith.constant 0 : i32
    %c0_i32_3 = arith.constant 0 : i32
    return %c0_i32, %c0_i32_0, %c0_i32_1, %c0_i32_2 : i32, i32, i32, i32
  }
  func.func @transform_5(%arg0: i32) -> (i32, i32, i32, i32) {
    %c0_i32 = arith.constant 0 : i32
    %c0_i32_0 = arith.constant 0 : i32
    %c0_i32_1 = arith.constant 0 : i32
    %c0_i32_2 = arith.constant 0 : i32
    %c0_i32_3 = arith.constant 0 : i32
    return %c0_i32, %c0_i32_0, %c0_i32_1, %c0_i32_2 : i32, i32, i32, i32
  }
  func.func @transform_6(%arg0: i32) -> (i32, i32, i32) {
    %c0_i32 = arith.constant 0 : i32
    %c0_i32_0 = arith.constant 0 : i32
    %c0_i32_1 = arith.constant 0 : i32
    %c0_i32_2 = arith.constant 0 : i32
    return %c0_i32, %c0_i32_0, %c0_i32_1 : i32, i32, i32
  }
  func.func @transform_7(%arg0: i32) -> (i32, i32, i32) {
    %c0_i32 = arith.constant 0 : i32
    %c0_i32_0 = arith.constant 0 : i32
    %c0_i32_1 = arith.constant 0 : i32
    %c0_i32_2 = arith.constant 0 : i32
    return %c0_i32, %c0_i32_0, %c0_i32_1 : i32, i32, i32
  }
  func.func @transform_8(%arg0: i32) -> (i32, i32, i32) {
    %c0_i32 = arith.constant 0 : i32
    %c0_i32_0 = arith.constant 0 : i32
    %c0_i32_1 = arith.constant 0 : i32
    %c0_i32_2 = arith.constant 0 : i32
    return %c0_i32, %c0_i32_0, %c0_i32_1 : i32, i32, i32
  }
  func.func @transform_9(%arg0: i32) -> (i32, i32, i32) {
    %c0_i32 = arith.constant 0 : i32
    %c0_i32_0 = arith.constant 0 : i32
    %c0_i32_1 = arith.constant 0 : i32
    %c0_i32_2 = arith.constant 0 : i32
    return %c0_i32, %c0_i32_0, %c0_i32_1 : i32, i32, i32
  }
  func.func @transform_10(%arg0: i32) -> (i32, i32, i32) {
    %c0_i32 = arith.constant 0 : i32
    %c0_i32_0 = arith.constant 0 : i32
    %c0_i32_1 = arith.constant 0 : i32
    %c0_i32_2 = arith.constant 0 : i32
    return %c0_i32, %c0_i32_0, %c0_i32_1 : i32, i32, i32
  }
  func.func @transform_11(%arg0: i32) -> (i32, i32, i32) {
    %c0_i32 = arith.constant 0 : i32
    %c0_i32_0 = arith.constant 0 : i32
    %c0_i32_1 = arith.constant 0 : i32
    %c0_i32_2 = arith.constant 0 : i32
    return %c0_i32, %c0_i32_0, %c0_i32_1 : i32, i32, i32
  }
  func.func @transform_12(%arg0: i32) -> (i32, i32, i32) {
    %c0_i32 = arith.constant 0 : i32
    %c0_i32_0 = arith.constant 0 : i32
    %c0_i32_1 = arith.constant 0 : i32
    %c0_i32_2 = arith.constant 0 : i32
    return %c0_i32, %c0_i32_0, %c0_i32_1 : i32, i32, i32
  }
  func.func @transform_13(%arg0: i32) -> (i32, i32, i32) {
    %c0_i32 = arith.constant 0 : i32
    %c0_i32_0 = arith.constant 0 : i32
    %c0_i32_1 = arith.constant 0 : i32
    %c0_i32_2 = arith.constant 0 : i32
    return %c0_i32, %c0_i32_0, %c0_i32_1 : i32, i32, i32
  }
  func.func @transform_14(%arg0: i32) -> (i32, i32, i32) {
    %c0_i32 = arith.constant 0 : i32
    %c0_i32_0 = arith.constant 0 : i32
    %c0_i32_1 = arith.constant 0 : i32
    return %arg0, %c0_i32, %c0_i32_0 : i32, i32, i32
  }
}

module attributes {stable_mosaic.version = 11 : i64} {
  func.func @_decoder_stack_kernel(%arg0: i32, %arg1: memref<1x8x64xf32, #tpu.memory_space<vmem>>, %arg2: memref<1x8x64xf32, #tpu.memory_space<vmem>>, %arg3: memref<1x1x8xf32, #tpu.memory_space<vmem>>, %arg4: memref<2x8x64x8xf32, #tpu.memory_space<vmem>>, %arg5: memref<2x8x64x8xf32, #tpu.memory_space<vmem>>, %arg6: memref<2x8x64x8xf32, #tpu.memory_space<vmem>>, %arg7: memref<2x8x8x64xf32, #tpu.memory_space<vmem>>, %arg8: memref<2x1x64xf32, #tpu.memory_space<vmem>>, %arg9: memref<2x1x64xf32, #tpu.memory_space<vmem>>, %arg10: memref<2x8x64x8xf32, #tpu.memory_space<vmem>>, %arg11: memref<2x8x64x8xf32, #tpu.memory_space<vmem>>, %arg12: memref<2x8x64x8xf32, #tpu.memory_space<vmem>>, %arg13: memref<2x8x8x64xf32, #tpu.memory_space<vmem>>, %arg14: memref<2x1x64xf32, #tpu.memory_space<vmem>>, %arg15: memref<2x1x64xf32, #tpu.memory_space<vmem>>, %arg16: memref<2x64x128xf32, #tpu.memory_space<vmem>>, %arg17: memref<2x1x128xf32, #tpu.memory_space<vmem>>, %arg18: memref<2x128x64xf32, #tpu.memory_space<vmem>>, %arg19: memref<2x1x64xf32, #tpu.memory_space<vmem>>, %arg20: memref<2x1x64xf32, #tpu.memory_space<vmem>>, %arg21: memref<2x1x64xf32, #tpu.memory_space<vmem>>, %arg22: memref<64x128xf32, #tpu.memory_space<vmem>>, %arg23: memref<1x128xf32, #tpu.memory_space<vmem>>, %arg24: memref<1x8x128xf32, #tpu.memory_space<vmem>>) attributes {dimension_semantics = [#tpu.dimension_semantics<parallel>], iteration_bounds = array<i64: 2>, scalar_prefetch = 0 : i64, scratch_operands = 0 : i64, tpu.core_type = #tpu.core_type<tc>, window_params = [{transform_indices = @transform_0, window_bounds = array<i64: 1, 8, 64>}, {transform_indices = @transform_1, window_bounds = array<i64: 1, 8, 64>}, {transform_indices = @transform_2, window_bounds = array<i64: 1, 1, 8>}, {pipeline_mode = #tpu.pipeline_mode<synchronous>, transform_indices = @transform_3, window_bounds = array<i64: 2, 8, 64, 8>}, {pipeline_mode = #tpu.pipeline_mode<synchronous>, transform_indices = @transform_4, window_bounds = array<i64: 2, 8, 64, 8>}, {pipeline_mode = #tpu.pipeline_mode<synchronous>, transform_indices = @transform_5, window_bounds = array<i64: 2, 8, 64, 8>}, {pipeline_mode = #tpu.pipeline_mode<synchronous>, transform_indices = @transform_6, window_bounds = array<i64: 2, 8, 8, 64>}, {pipeline_mode = #tpu.pipeline_mode<synchronous>, transform_indices = @transform_7, window_bounds = array<i64: 2, 1, 64>}, {pipeline_mode = #tpu.pipeline_mode<synchronous>, transform_indices = @transform_8, window_bounds = array<i64: 2, 1, 64>}, {pipeline_mode = #tpu.pipeline_mode<synchronous>, transform_indices = @transform_9, window_bounds = array<i64: 2, 8, 64, 8>}, {pipeline_mode = #tpu.pipeline_mode<synchronous>, transform_indices = @transform_10, window_bounds = array<i64: 2, 8, 64, 8>}, {pipeline_mode = #tpu.pipeline_mode<synchronous>, transform_indices = @transform_11, window_bounds = array<i64: 2, 8, 64, 8>}, {pipeline_mode = #tpu.pipeline_mode<synchronous>, transform_indices = @transform_12, window_bounds = array<i64: 2, 8, 8, 64>}, {pipeline_mode = #tpu.pipeline_mode<synchronous>, transform_indices = @transform_13, window_bounds = array<i64: 2, 1, 64>}, {pipeline_mode = #tpu.pipeline_mode<synchronous>, transform_indices = @transform_14, window_bounds = array<i64: 2, 1, 64>}, {pipeline_mode = #tpu.pipeline_mode<synchronous>, transform_indices = @transform_15, window_bounds = array<i64: 2, 64, 128>}, {pipeline_mode = #tpu.pipeline_mode<synchronous>, transform_indices = @transform_16, window_bounds = array<i64: 2, 1, 128>}, {pipeline_mode = #tpu.pipeline_mode<synchronous>, transform_indices = @transform_17, window_bounds = array<i64: 2, 128, 64>}, {pipeline_mode = #tpu.pipeline_mode<synchronous>, transform_indices = @transform_18, window_bounds = array<i64: 2, 1, 64>}, {pipeline_mode = #tpu.pipeline_mode<synchronous>, transform_indices = @transform_19, window_bounds = array<i64: 2, 1, 64>}, {pipeline_mode = #tpu.pipeline_mode<synchronous>, transform_indices = @transform_20, window_bounds = array<i64: 2, 1, 64>}, {pipeline_mode = #tpu.pipeline_mode<synchronous>, transform_indices = @transform_21, window_bounds = array<i64: 64, 128>}, {pipeline_mode = #tpu.pipeline_mode<synchronous>, transform_indices = @transform_22, window_bounds = array<i64: 1, 128>}, {transform_indices = @transform_23, window_bounds = array<i64: 1, 8, 128>}]} {
    %c0 = arith.constant 0 : index
    %c0_0 = arith.constant 0 : index
    %c0_1 = arith.constant 0 : index
    %0 = vector.load %arg1[%c0, %c0_0, %c0_1] : memref<1x8x64xf32, #tpu.memory_space<vmem>>, vector<1x8x64xf32>
    %1 = vector.shape_cast %0 : vector<1x8x64xf32> to vector<8x64xf32>
    %c0_2 = arith.constant 0 : index
    %c0_3 = arith.constant 0 : index
    %c0_4 = arith.constant 0 : index
    %2 = vector.load %arg2[%c0_2, %c0_3, %c0_4] : memref<1x8x64xf32, #tpu.memory_space<vmem>>, vector<1x8x64xf32>
    %3 = vector.shape_cast %2 : vector<1x8x64xf32> to vector<8x64xf32>
    %4 = tpu.iota {dimensions = array<i32: 1>} : vector<8x8x8xi32>
    %5 = tpu.iota {dimensions = array<i32: 2>} : vector<8x8x8xi32>
    %6 = arith.cmpi sgt, %5, %4 : vector<8x8x8xi32>
    %c0_5 = arith.constant 0 : index
    %c0_6 = arith.constant 0 : index
    %c0_7 = arith.constant 0 : index
    %7 = vector.load %arg3[%c0_5, %c0_6, %c0_7] : memref<1x1x8xf32, #tpu.memory_space<vmem>>, vector<1x1x8xf32>
    %8 = vector.shape_cast %7 : vector<1x1x8xf32> to vector<1x8xf32>
    %9 = vector.shape_cast %8 : vector<1x8xf32> to vector<1x1x8xf32>
    %10 = vector.shape_cast %9 : vector<1x1x8xf32> to vector<1x1x8xf32>
    %11 = vector.broadcast %10 : vector<1x1x8xf32> to vector<8x8x8xf32>
    %cst = arith.constant 5.000000e-01 : f32
    %12 = vector.broadcast %cst : f32 to vector<8x8x8xf32>
    %13 = arith.cmpf ogt, %11, %12 : vector<8x8x8xf32>
    %c1 = arith.constant 1 : index
    %c0_8 = arith.constant 0 : index
    %c0_9 = arith.constant 0 : index
    %c0_10 = arith.constant 0 : index
    %14 = vector.load %arg4[%c1, %c0_8, %c0_9, %c0_10] : memref<2x8x64x8xf32, #tpu.memory_space<vmem>>, vector<1x8x64x8xf32>
    %15 = vector.shape_cast %14 : vector<1x8x64x8xf32> to vector<8x64x8xf32>
    %c1_11 = arith.constant 1 : index
    %c0_12 = arith.constant 0 : index
    %c0_13 = arith.constant 0 : index
    %c0_14 = arith.constant 0 : index
    %16 = vector.load %arg5[%c1_11, %c0_12, %c0_13, %c0_14] : memref<2x8x64x8xf32, #tpu.memory_space<vmem>>, vector<1x8x64x8xf32>
    %17 = vector.shape_cast %16 : vector<1x8x64x8xf32> to vector<8x64x8xf32>
    %c1_15 = arith.constant 1 : index
    %c0_16 = arith.constant 0 : index
    %c0_17 = arith.constant 0 : index
    %c0_18 = arith.constant 0 : index
    %18 = vector.load %arg6[%c1_15, %c0_16, %c0_17, %c0_18] : memref<2x8x64x8xf32, #tpu.memory_space<vmem>>, vector<1x8x64x8xf32>
    %19 = vector.shape_cast %18 : vector<1x8x64x8xf32> to vector<8x64x8xf32>
    %c1_19 = arith.constant 1 : index
    %c0_20 = arith.constant 0 : index
    %c0_21 = arith.constant 0 : index
    %c0_22 = arith.constant 0 : index
    %20 = vector.load %arg7[%c1_19, %c0_20, %c0_21, %c0_22] : memref<2x8x8x64xf32, #tpu.memory_space<vmem>>, vector<1x8x8x64xf32>
    %21 = vector.shape_cast %20 : vector<1x8x8x64xf32> to vector<8x8x64xf32>
    %22 = vector.shape_cast %1 : vector<8x64xf32> to vector<1x8x64xf32>
    %23 = vector.shape_cast %22 : vector<1x8x64xf32> to vector<1x8x64xf32>
    %24 = vector.broadcast %23 : vector<1x8x64xf32> to vector<8x8x64xf32>
    %25 = vector.shape_cast %1 : vector<8x64xf32> to vector<1x8x64xf32>
    %26 = vector.shape_cast %25 : vector<1x8x64xf32> to vector<1x8x64xf32>
    %27 = vector.broadcast %26 : vector<1x8x64xf32> to vector<8x8x64xf32>
    "tpu.trace_start"() <{level = 10 : i32, message = "hld,hde->hle"}> : () -> ()
    %cst_23 = arith.constant dense<0.000000e+00> : vector<8x8x8xf32>
    %28 = tpu.matmul %24, %15, %cst_23 {dimension_numbers = #tpu.dot_dimension_numbers<[2], [1], [1], [2], [0, 0, 0, 1, 1, 2], [0], [0]>} : vector<8x8x64xf32>, vector<8x64x8xf32>, vector<8x8x8xf32> -> vector<8x8x8xf32>
    %cst_24 = arith.constant dense<0.000000e+00> : vector<8x8x8xf32>
    %29 = tpu.matmul %27, %17, %cst_24 {dimension_numbers = #tpu.dot_dimension_numbers<[2], [1], [1], [2], [0, 0, 0, 1, 1, 2], [0], [0]>} : vector<8x8x64xf32>, vector<8x64x8xf32>, vector<8x8x8xf32> -> vector<8x8x8xf32>
    %cst_25 = arith.constant dense<0.000000e+00> : vector<8x8x8xf32>
    %30 = tpu.matmul %27, %19, %cst_25 {dimension_numbers = #tpu.dot_dimension_numbers<[2], [1], [1], [2], [0, 0, 0, 1, 1, 2], [0], [0]>} : vector<8x8x64xf32>, vector<8x64x8xf32>, vector<8x8x8xf32> -> vector<8x8x8xf32>
    "tpu.trace_stop"() : () -> ()
    "tpu.trace_start"() <{level = 10 : i32, message = "hqe,hke->hqk"}> : () -> ()
    %cst_26 = arith.constant dense<0.000000e+00> : vector<8x8x8xf32>
    %31 = tpu.matmul %28, %29, %cst_26 {dimension_numbers = #tpu.dot_dimension_numbers<[2], [2], [1], [1], [0, 0, 0, 1, 1, 1], [0], [0]>} : vector<8x8x8xf32>, vector<8x8x8xf32>, vector<8x8x8xf32> -> vector<8x8x8xf32>
    "tpu.trace_stop"() : () -> ()
    %cst_27 = arith.constant 0.353553385 : f32
    %32 = vector.broadcast %cst_27 : f32 to vector<8x8x8xf32>
    %33 = arith.mulf %31, %32 : vector<8x8x8xf32>
    %cst_28 = arith.constant -1.000000e+09 : f32
    %34 = vector.broadcast %cst_28 : f32 to vector<8x8x8xf32>
    %35 = arith.select %6, %34, %33 : vector<8x8x8xi1>, vector<8x8x8xf32>
    %cst_29 = arith.constant dense<0xFF800000> : vector<8x8xf32>
    %36 = vector.multi_reduction <maximumf>, %35, %cst_29 [2] : vector<8x8x8xf32> to vector<8x8xf32>
    %37 = vector.shape_cast %36 : vector<8x8xf32> to vector<8x8x1xf32>
    %38 = vector.broadcast %37 : vector<8x8x1xf32> to vector<8x8x8xf32>
    %39 = arith.subf %35, %38 : vector<8x8x8xf32>
    %40 = math.exp %39 : vector<8x8x8xf32>
    %cst_30 = arith.constant dense<0.000000e+00> : vector<8x8xf32>
    %41 = vector.multi_reduction <add>, %40, %cst_30 [2] : vector<8x8x8xf32> to vector<8x8xf32>
    %42 = vector.shape_cast %41 : vector<8x8xf32> to vector<8x8x1xf32>
    %43 = vector.broadcast %42 : vector<8x8x1xf32> to vector<8x8x8xf32>
    %44 = arith.divf %40, %43 : vector<8x8x8xf32>
    "tpu.trace_start"() <{level = 10 : i32, message = "hqk,hke->hqe"}> : () -> ()
    %cst_31 = arith.constant dense<0.000000e+00> : vector<8x8x8xf32>
    %45 = tpu.matmul %44, %30, %cst_31 {dimension_numbers = #tpu.dot_dimension_numbers<[2], [1], [1], [2], [0, 0, 0, 1, 1, 2], [0], [0]>} : vector<8x8x8xf32>, vector<8x8x8xf32>, vector<8x8x8xf32> -> vector<8x8x8xf32>
    "tpu.trace_stop"() : () -> ()
    "tpu.trace_start"() <{level = 10 : i32, message = "hle,hed->hld"}> : () -> ()
    %cst_32 = arith.constant dense<0.000000e+00> : vector<8x8x64xf32>
    %46 = tpu.matmul %45, %21, %cst_32 {dimension_numbers = #tpu.dot_dimension_numbers<[2], [1], [1], [2], [0, 0, 0, 1, 1, 2], [0], [0]>} : vector<8x8x8xf32>, vector<8x8x64xf32>, vector<8x8x64xf32> -> vector<8x8x64xf32>
    "tpu.trace_stop"() : () -> ()
    %cst_33 = arith.constant dense<0.000000e+00> : vector<8x64xf32>
    %47 = vector.multi_reduction <add>, %46, %cst_33 [0] : vector<8x8x64xf32> to vector<8x64xf32>
    %c1_34 = arith.constant 1 : index
    %c0_35 = arith.constant 0 : index
    %c0_36 = arith.constant 0 : index
    %48 = vector.load %arg8[%c1_34, %c0_35, %c0_36] : memref<2x1x64xf32, #tpu.memory_space<vmem>>, vector<1x1x64xf32>
    %49 = vector.shape_cast %48 : vector<1x1x64xf32> to vector<1x64xf32>
    %c1_37 = arith.constant 1 : index
    %c0_38 = arith.constant 0 : index
    %c0_39 = arith.constant 0 : index
    %50 = vector.load %arg9[%c1_37, %c0_38, %c0_39] : memref<2x1x64xf32, #tpu.memory_space<vmem>>, vector<1x1x64xf32>
    %51 = vector.shape_cast %50 : vector<1x1x64xf32> to vector<1x64xf32>
    %52 = arith.addf %47, %1 : vector<8x64xf32>
    %cst_40 = arith.constant dense<0.000000e+00> : vector<8xf32>
    %53 = vector.multi_reduction <add>, %52, %cst_40 [1] : vector<8x64xf32> to vector<8xf32>
    %54 = vector.shape_cast %53 : vector<8xf32> to vector<8x1xf32>
    %cst_41 = arith.constant 6.400000e+01 : f32
    %55 = vector.broadcast %cst_41 : f32 to vector<8x1xf32>
    %56 = arith.divf %54, %55 : vector<8x1xf32>
    %57 = vector.broadcast %56 : vector<8x1xf32> to vector<8x64xf32>
    %58 = arith.subf %52, %57 : vector<8x64xf32>
    %59 = arith.mulf %58, %58 : vector<8x64xf32>
    %cst_42 = arith.constant dense<0.000000e+00> : vector<8xf32>
    %60 = vector.multi_reduction <add>, %59, %cst_42 [1] : vector<8x64xf32> to vector<8xf32>
    %61 = vector.shape_cast %60 : vector<8xf32> to vector<8x1xf32>
    %cst_43 = arith.constant 6.400000e+01 : f32
    %62 = vector.broadcast %cst_43 : f32 to vector<8x1xf32>
    %63 = arith.divf %61, %62 : vector<8x1xf32>
    %64 = vector.broadcast %56 : vector<8x1xf32> to vector<8x64xf32>
    %65 = arith.subf %52, %64 : vector<8x64xf32>
    %cst_44 = arith.constant 9.99999997E-7 : f32
    %66 = vector.broadcast %cst_44 : f32 to vector<8x1xf32>
    %67 = arith.addf %63, %66 : vector<8x1xf32>
    %68 = math.rsqrt %67 : vector<8x1xf32>
    %69 = vector.broadcast %68 : vector<8x1xf32> to vector<8x64xf32>
    %70 = arith.mulf %65, %69 : vector<8x64xf32>
    %71 = vector.broadcast %49 : vector<1x64xf32> to vector<8x64xf32>
    %72 = arith.mulf %70, %71 : vector<8x64xf32>
    %73 = vector.broadcast %51 : vector<1x64xf32> to vector<8x64xf32>
    %74 = arith.addf %72, %73 : vector<8x64xf32>
    %c1_45 = arith.constant 1 : index
    %c0_46 = arith.constant 0 : index
    %c0_47 = arith.constant 0 : index
    %c0_48 = arith.constant 0 : index
    %75 = vector.load %arg10[%c1_45, %c0_46, %c0_47, %c0_48] : memref<2x8x64x8xf32, #tpu.memory_space<vmem>>, vector<1x8x64x8xf32>
    %76 = vector.shape_cast %75 : vector<1x8x64x8xf32> to vector<8x64x8xf32>
    %c1_49 = arith.constant 1 : index
    %c0_50 = arith.constant 0 : index
    %c0_51 = arith.constant 0 : index
    %c0_52 = arith.constant 0 : index
    %77 = vector.load %arg11[%c1_49, %c0_50, %c0_51, %c0_52] : memref<2x8x64x8xf32, #tpu.memory_space<vmem>>, vector<1x8x64x8xf32>
    %78 = vector.shape_cast %77 : vector<1x8x64x8xf32> to vector<8x64x8xf32>
    %c1_53 = arith.constant 1 : index
    %c0_54 = arith.constant 0 : index
    %c0_55 = arith.constant 0 : index
    %c0_56 = arith.constant 0 : index
    %79 = vector.load %arg12[%c1_53, %c0_54, %c0_55, %c0_56] : memref<2x8x64x8xf32, #tpu.memory_space<vmem>>, vector<1x8x64x8xf32>
    %80 = vector.shape_cast %79 : vector<1x8x64x8xf32> to vector<8x64x8xf32>
    %c1_57 = arith.constant 1 : index
    %c0_58 = arith.constant 0 : index
    %c0_59 = arith.constant 0 : index
    %c0_60 = arith.constant 0 : index
    %81 = vector.load %arg13[%c1_57, %c0_58, %c0_59, %c0_60] : memref<2x8x8x64xf32, #tpu.memory_space<vmem>>, vector<1x8x8x64xf32>
    %82 = vector.shape_cast %81 : vector<1x8x8x64xf32> to vector<8x8x64xf32>
    %83 = vector.shape_cast %74 : vector<8x64xf32> to vector<1x8x64xf32>
    %84 = vector.shape_cast %83 : vector<1x8x64xf32> to vector<1x8x64xf32>
    %85 = vector.broadcast %84 : vector<1x8x64xf32> to vector<8x8x64xf32>
    %86 = vector.shape_cast %3 : vector<8x64xf32> to vector<1x8x64xf32>
    %87 = vector.shape_cast %86 : vector<1x8x64xf32> to vector<1x8x64xf32>
    %88 = vector.broadcast %87 : vector<1x8x64xf32> to vector<8x8x64xf32>
    "tpu.trace_start"() <{level = 10 : i32, message = "hld,hde->hle"}> : () -> ()
    %cst_61 = arith.constant dense<0.000000e+00> : vector<8x8x8xf32>
    %89 = tpu.matmul %85, %76, %cst_61 {dimension_numbers = #tpu.dot_dimension_numbers<[2], [1], [1], [2], [0, 0, 0, 1, 1, 2], [0], [0]>} : vector<8x8x64xf32>, vector<8x64x8xf32>, vector<8x8x8xf32> -> vector<8x8x8xf32>
    %cst_62 = arith.constant dense<0.000000e+00> : vector<8x8x8xf32>
    %90 = tpu.matmul %88, %78, %cst_62 {dimension_numbers = #tpu.dot_dimension_numbers<[2], [1], [1], [2], [0, 0, 0, 1, 1, 2], [0], [0]>} : vector<8x8x64xf32>, vector<8x64x8xf32>, vector<8x8x8xf32> -> vector<8x8x8xf32>
    %cst_63 = arith.constant dense<0.000000e+00> : vector<8x8x8xf32>
    %91 = tpu.matmul %88, %80, %cst_63 {dimension_numbers = #tpu.dot_dimension_numbers<[2], [1], [1], [2], [0, 0, 0, 1, 1, 2], [0], [0]>} : vector<8x8x64xf32>, vector<8x64x8xf32>, vector<8x8x8xf32> -> vector<8x8x8xf32>
    "tpu.trace_stop"() : () -> ()
    "tpu.trace_start"() <{level = 10 : i32, message = "hqe,hke->hqk"}> : () -> ()
    %cst_64 = arith.constant dense<0.000000e+00> : vector<8x8x8xf32>
    %92 = tpu.matmul %89, %90, %cst_64 {dimension_numbers = #tpu.dot_dimension_numbers<[2], [2], [1], [1], [0, 0, 0, 1, 1, 1], [0], [0]>} : vector<8x8x8xf32>, vector<8x8x8xf32>, vector<8x8x8xf32> -> vector<8x8x8xf32>
    "tpu.trace_stop"() : () -> ()
    %cst_65 = arith.constant 0.353553385 : f32
    %93 = vector.broadcast %cst_65 : f32 to vector<8x8x8xf32>
    %94 = arith.mulf %92, %93 : vector<8x8x8xf32>
    %cst_66 = arith.constant -1.000000e+09 : f32
    %95 = vector.broadcast %cst_66 : f32 to vector<8x8x8xf32>
    %96 = arith.select %13, %95, %94 : vector<8x8x8xi1>, vector<8x8x8xf32>
    %cst_67 = arith.constant dense<0xFF800000> : vector<8x8xf32>
    %97 = vector.multi_reduction <maximumf>, %96, %cst_67 [2] : vector<8x8x8xf32> to vector<8x8xf32>
    %98 = vector.shape_cast %97 : vector<8x8xf32> to vector<8x8x1xf32>
    %99 = vector.broadcast %98 : vector<8x8x1xf32> to vector<8x8x8xf32>
    %100 = arith.subf %96, %99 : vector<8x8x8xf32>
    %101 = math.exp %100 : vector<8x8x8xf32>
    %cst_68 = arith.constant dense<0.000000e+00> : vector<8x8xf32>
    %102 = vector.multi_reduction <add>, %101, %cst_68 [2] : vector<8x8x8xf32> to vector<8x8xf32>
    %103 = vector.shape_cast %102 : vector<8x8xf32> to vector<8x8x1xf32>
    %104 = vector.broadcast %103 : vector<8x8x1xf32> to vector<8x8x8xf32>
    %105 = arith.divf %101, %104 : vector<8x8x8xf32>
    "tpu.trace_start"() <{level = 10 : i32, message = "hqk,hke->hqe"}> : () -> ()
    %cst_69 = arith.constant dense<0.000000e+00> : vector<8x8x8xf32>
    %106 = tpu.matmul %105, %91, %cst_69 {dimension_numbers = #tpu.dot_dimension_numbers<[2], [1], [1], [2], [0, 0, 0, 1, 1, 2], [0], [0]>} : vector<8x8x8xf32>, vector<8x8x8xf32>, vector<8x8x8xf32> -> vector<8x8x8xf32>
    "tpu.trace_stop"() : () -> ()
    "tpu.trace_start"() <{level = 10 : i32, message = "hle,hed->hld"}> : () -> ()
    %cst_70 = arith.constant dense<0.000000e+00> : vector<8x8x64xf32>
    %107 = tpu.matmul %106, %82, %cst_70 {dimension_numbers = #tpu.dot_dimension_numbers<[2], [1], [1], [2], [0, 0, 0, 1, 1, 2], [0], [0]>} : vector<8x8x8xf32>, vector<8x8x64xf32>, vector<8x8x64xf32> -> vector<8x8x64xf32>
    "tpu.trace_stop"() : () -> ()
    %cst_71 = arith.constant dense<0.000000e+00> : vector<8x64xf32>
    %108 = vector.multi_reduction <add>, %107, %cst_71 [0] : vector<8x8x64xf32> to vector<8x64xf32>
    %c1_72 = arith.constant 1 : index
    %c0_73 = arith.constant 0 : index
    %c0_74 = arith.constant 0 : index
    %109 = vector.load %arg14[%c1_72, %c0_73, %c0_74] : memref<2x1x64xf32, #tpu.memory_space<vmem>>, vector<1x1x64xf32>
    %110 = vector.shape_cast %109 : vector<1x1x64xf32> to vector<1x64xf32>
    %c1_75 = arith.constant 1 : index
    %c0_76 = arith.constant 0 : index
    %c0_77 = arith.constant 0 : index
    %111 = vector.load %arg15[%c1_75, %c0_76, %c0_77] : memref<2x1x64xf32, #tpu.memory_space<vmem>>, vector<1x1x64xf32>
    %112 = vector.shape_cast %111 : vector<1x1x64xf32> to vector<1x64xf32>
    %113 = arith.addf %108, %74 : vector<8x64xf32>
    %cst_78 = arith.constant dense<0.000000e+00> : vector<8xf32>
    %114 = vector.multi_reduction <add>, %113, %cst_78 [1] : vector<8x64xf32> to vector<8xf32>
    %115 = vector.shape_cast %114 : vector<8xf32> to vector<8x1xf32>
    %cst_79 = arith.constant 6.400000e+01 : f32
    %116 = vector.broadcast %cst_79 : f32 to vector<8x1xf32>
    %117 = arith.divf %115, %116 : vector<8x1xf32>
    %118 = vector.broadcast %117 : vector<8x1xf32> to vector<8x64xf32>
    %119 = arith.subf %113, %118 : vector<8x64xf32>
    %120 = arith.mulf %119, %119 : vector<8x64xf32>
    %cst_80 = arith.constant dense<0.000000e+00> : vector<8xf32>
    %121 = vector.multi_reduction <add>, %120, %cst_80 [1] : vector<8x64xf32> to vector<8xf32>
    %122 = vector.shape_cast %121 : vector<8xf32> to vector<8x1xf32>
    %cst_81 = arith.constant 6.400000e+01 : f32
    %123 = vector.broadcast %cst_81 : f32 to vector<8x1xf32>
    %124 = arith.divf %122, %123 : vector<8x1xf32>
    %125 = vector.broadcast %117 : vector<8x1xf32> to vector<8x64xf32>
    %126 = arith.subf %113, %125 : vector<8x64xf32>
    %cst_82 = arith.constant 9.99999997E-7 : f32
    %127 = vector.broadcast %cst_82 : f32 to vector<8x1xf32>
    %128 = arith.addf %124, %127 : vector<8x1xf32>
    %129 = math.rsqrt %128 : vector<8x1xf32>
    %130 = vector.broadcast %129 : vector<8x1xf32> to vector<8x64xf32>
    %131 = arith.mulf %126, %130 : vector<8x64xf32>
    %132 = vector.broadcast %110 : vector<1x64xf32> to vector<8x64xf32>
    %133 = arith.mulf %131, %132 : vector<8x64xf32>
    %134 = vector.broadcast %112 : vector<1x64xf32> to vector<8x64xf32>
    %135 = arith.addf %133, %134 : vector<8x64xf32>
    %c1_83 = arith.constant 1 : index
    %c0_84 = arith.constant 0 : index
    %c0_85 = arith.constant 0 : index
    %136 = vector.load %arg16[%c1_83, %c0_84, %c0_85] : memref<2x64x128xf32, #tpu.memory_space<vmem>>, vector<1x64x128xf32>
    %137 = vector.shape_cast %136 : vector<1x64x128xf32> to vector<64x128xf32>
    %c1_86 = arith.constant 1 : index
    %c0_87 = arith.constant 0 : index
    %c0_88 = arith.constant 0 : index
    %138 = vector.load %arg17[%c1_86, %c0_87, %c0_88] : memref<2x1x128xf32, #tpu.memory_space<vmem>>, vector<1x1x128xf32>
    %139 = vector.shape_cast %138 : vector<1x1x128xf32> to vector<1x128xf32>
    %c1_89 = arith.constant 1 : index
    %c0_90 = arith.constant 0 : index
    %c0_91 = arith.constant 0 : index
    %140 = vector.load %arg18[%c1_89, %c0_90, %c0_91] : memref<2x128x64xf32, #tpu.memory_space<vmem>>, vector<1x128x64xf32>
    %141 = vector.shape_cast %140 : vector<1x128x64xf32> to vector<128x64xf32>
    %c1_92 = arith.constant 1 : index
    %c0_93 = arith.constant 0 : index
    %c0_94 = arith.constant 0 : index
    %142 = vector.load %arg19[%c1_92, %c0_93, %c0_94] : memref<2x1x64xf32, #tpu.memory_space<vmem>>, vector<1x1x64xf32>
    %143 = vector.shape_cast %142 : vector<1x1x64xf32> to vector<1x64xf32>
    %cst_95 = arith.constant dense<0.000000e+00> : vector<8x128xf32>
    %144 = tpu.matmul %135, %137, %cst_95 {dimension_numbers = #tpu.dot_dimension_numbers<[1], [0], [0], [1], [0, 0, 1, 1], [], []>} : vector<8x64xf32>, vector<64x128xf32>, vector<8x128xf32> -> vector<8x128xf32>
    %145 = vector.broadcast %139 : vector<1x128xf32> to vector<8x128xf32>
    %146 = arith.addf %144, %145 : vector<8x128xf32>
    %cst_96 = arith.constant 0.000000e+00 : f32
    %147 = vector.broadcast %cst_96 : f32 to vector<8x128xf32>
    %148 = arith.maximumf %146, %147 : vector<8x128xf32>
    %cst_97 = arith.constant dense<0.000000e+00> : vector<8x64xf32>
    %149 = tpu.matmul %148, %141, %cst_97 {dimension_numbers = #tpu.dot_dimension_numbers<[1], [0], [0], [1], [0, 0, 1, 1], [], []>} : vector<8x128xf32>, vector<128x64xf32>, vector<8x64xf32> -> vector<8x64xf32>
    %150 = vector.broadcast %143 : vector<1x64xf32> to vector<8x64xf32>
    %151 = arith.addf %149, %150 : vector<8x64xf32>
    %c1_98 = arith.constant 1 : index
    %c0_99 = arith.constant 0 : index
    %c0_100 = arith.constant 0 : index
    %152 = vector.load %arg20[%c1_98, %c0_99, %c0_100] : memref<2x1x64xf32, #tpu.memory_space<vmem>>, vector<1x1x64xf32>
    %153 = vector.shape_cast %152 : vector<1x1x64xf32> to vector<1x64xf32>
    %c1_101 = arith.constant 1 : index
    %c0_102 = arith.constant 0 : index
    %c0_103 = arith.constant 0 : index
    %154 = vector.load %arg21[%c1_101, %c0_102, %c0_103] : memref<2x1x64xf32, #tpu.memory_space<vmem>>, vector<1x1x64xf32>
    %155 = vector.shape_cast %154 : vector<1x1x64xf32> to vector<1x64xf32>
    %156 = arith.addf %151, %135 : vector<8x64xf32>
    %cst_104 = arith.constant dense<0.000000e+00> : vector<8xf32>
    %157 = vector.multi_reduction <add>, %156, %cst_104 [1] : vector<8x64xf32> to vector<8xf32>
    %158 = vector.shape_cast %157 : vector<8xf32> to vector<8x1xf32>
    %cst_105 = arith.constant 6.400000e+01 : f32
    %159 = vector.broadcast %cst_105 : f32 to vector<8x1xf32>
    %160 = arith.divf %158, %159 : vector<8x1xf32>
    %161 = vector.broadcast %160 : vector<8x1xf32> to vector<8x64xf32>
    %162 = arith.subf %156, %161 : vector<8x64xf32>
    %163 = arith.mulf %162, %162 : vector<8x64xf32>
    %cst_106 = arith.constant dense<0.000000e+00> : vector<8xf32>
    %164 = vector.multi_reduction <add>, %163, %cst_106 [1] : vector<8x64xf32> to vector<8xf32>
    %165 = vector.shape_cast %164 : vector<8xf32> to vector<8x1xf32>
    %cst_107 = arith.constant 6.400000e+01 : f32
    %166 = vector.broadcast %cst_107 : f32 to vector<8x1xf32>
    %167 = arith.divf %165, %166 : vector<8x1xf32>
    %168 = vector.broadcast %160 : vector<8x1xf32> to vector<8x64xf32>
    %169 = arith.subf %156, %168 : vector<8x64xf32>
    %cst_108 = arith.constant 9.99999997E-7 : f32
    %170 = vector.broadcast %cst_108 : f32 to vector<8x1xf32>
    %171 = arith.addf %167, %170 : vector<8x1xf32>
    %172 = math.rsqrt %171 : vector<8x1xf32>
    %173 = vector.broadcast %172 : vector<8x1xf32> to vector<8x64xf32>
    %174 = arith.mulf %169, %173 : vector<8x64xf32>
    %175 = vector.broadcast %153 : vector<1x64xf32> to vector<8x64xf32>
    %176 = arith.mulf %174, %175 : vector<8x64xf32>
    %177 = vector.broadcast %155 : vector<1x64xf32> to vector<8x64xf32>
    %178 = arith.addf %176, %177 : vector<8x64xf32>
    %c0_109 = arith.constant 0 : index
    %c0_110 = arith.constant 0 : index
    %179 = vector.load %arg22[%c0_109, %c0_110] : memref<64x128xf32, #tpu.memory_space<vmem>>, vector<64x128xf32>
    %cst_111 = arith.constant dense<0.000000e+00> : vector<8x128xf32>
    %180 = tpu.matmul %178, %179, %cst_111 {dimension_numbers = #tpu.dot_dimension_numbers<[1], [0], [0], [1], [0, 0, 1, 1], [], []>} : vector<8x64xf32>, vector<64x128xf32>, vector<8x128xf32> -> vector<8x128xf32>
    %c0_112 = arith.constant 0 : index
    %c0_113 = arith.constant 0 : index
    %181 = vector.load %arg23[%c0_112, %c0_113] : memref<1x128xf32, #tpu.memory_space<vmem>>, vector<1x128xf32>
    %182 = vector.broadcast %181 : vector<1x128xf32> to vector<8x128xf32>
    %183 = arith.addf %180, %182 : vector<8x128xf32>
    %c0_114 = arith.constant 0 : index
    %c0_115 = arith.constant 0 : index
    %c0_116 = arith.constant 0 : index
    %184 = vector.load %arg24[%c0_114, %c0_115, %c0_116] : memref<1x8x128xf32, #tpu.memory_space<vmem>>, vector<1x8x128xf32>
    %185 = vector.shape_cast %184 : vector<1x8x128xf32> to vector<8x128xf32>
    %186 = vector.shape_cast %183 : vector<8x128xf32> to vector<1x8x128xf32>
    tpu.vector_store %arg24[%c0_114, %c0_115, %c0_116], %186 {strides = array<i32>} : memref<1x8x128xf32, #tpu.memory_space<vmem>>, vector<1x8x128xf32>,
    return
  }
  func.func @transform_0(%arg0: i32) -> (i32, i32, i32) {
    %c0_i32 = arith.constant 0 : i32
    %c0_i32_0 = arith.constant 0 : i32
    %c0_i32_1 = arith.constant 0 : i32
    return %arg0, %c0_i32, %c0_i32_0 : i32, i32, i32
  }
  func.func @transform_1(%arg0: i32) -> (i32, i32, i32) {
    %c0_i32 = arith.constant 0 : i32
    %c0_i32_0 = arith.constant 0 : i32
    %c0_i32_1 = arith.constant 0 : i32
    return %arg0, %c0_i32, %c0_i32_0 : i32, i32, i32
  }
  func.func @transform_2(%arg0: i32) -> (i32, i32, i32) {
    %c0_i32 = arith.constant 0 : i32
    %c0_i32_0 = arith.constant 0 : i32
    %c0_i32_1 = arith.constant 0 : i32
    return %arg0, %c0_i32, %c0_i32_0 : i32, i32, i32
  }
  func.func @transform_3(%arg0: i32) -> (i32, i32, i32, i32) {
    %c0_i32 = arith.constant 0 : i32
    %c0_i32_0 = arith.constant 0 : i32
    %c0_i32_1 = arith.constant 0 : i32
    %c0_i32_2 = arith.constant 0 : i32
    %c0_i32_3 = arith.constant 0 : i32
    return %c0_i32, %c0_i32_0, %c0_i32_1, %c0_i32_2 : i32, i32, i32, i32
  }
  func.func @transform_4(%arg0: i32) -> (i32, i32, i32, i32) {
    %c0_i32 = arith.constant 0 : i32
    %c0_i32_0 = arith.constant 0 : i32
    %c0_i32_1 = arith.constant 0 : i32
    %c0_i32_2 = arith.constant 0 : i32
    %c0_i32_3 = arith.constant 0 : i32
    return %c0_i32, %c0_i32_0, %c0_i32_1, %c0_i32_2 : i32, i32, i32, i32
  }
  func.func @transform_5(%arg0: i32) -> (i32, i32, i32, i32) {
    %c0_i32 = arith.constant 0 : i32
    %c0_i32_0 = arith.constant 0 : i32
    %c0_i32_1 = arith.constant 0 : i32
    %c0_i32_2 = arith.constant 0 : i32
    %c0_i32_3 = arith.constant 0 : i32
    return %c0_i32, %c0_i32_0, %c0_i32_1, %c0_i32_2 : i32, i32, i32, i32
  }
  func.func @transform_6(%arg0: i32) -> (i32, i32, i32, i32) {
    %c0_i32 = arith.constant 0 : i32
    %c0_i32_0 = arith.constant 0 : i32
    %c0_i32_1 = arith.constant 0 : i32
    %c0_i32_2 = arith.constant 0 : i32
    %c0_i32_3 = arith.constant 0 : i32
    return %c0_i32, %c0_i32_0, %c0_i32_1, %c0_i32_2 : i32, i32, i32, i32
  }
  func.func @transform_7(%arg0: i32) -> (i32, i32, i32) {
    %c0_i32 = arith.constant 0 : i32
    %c0_i32_0 = arith.constant 0 : i32
    %c0_i32_1 = arith.constant 0 : i32
    %c0_i32_2 = arith.constant 0 : i32
    return %c0_i32, %c0_i32_0, %c0_i32_1 : i32, i32, i32
  }
  func.func @transform_8(%arg0: i32) -> (i32, i32, i32) {
    %c0_i32 = arith.constant 0 : i32
    %c0_i32_0 = arith.constant 0 : i32
    %c0_i32_1 = arith.constant 0 : i32
    %c0_i32_2 = arith.constant 0 : i32
    return %c0_i32, %c0_i32_0, %c0_i32_1 : i32, i32, i32
  }
  func.func @transform_9(%arg0: i32) -> (i32, i32, i32, i32) {
    %c0_i32 = arith.constant 0 : i32
    %c0_i32_0 = arith.constant 0 : i32
    %c0_i32_1 = arith.constant 0 : i32
    %c0_i32_2 = arith.constant 0 : i32
    %c0_i32_3 = arith.constant 0 : i32
    return %c0_i32, %c0_i32_0, %c0_i32_1, %c0_i32_2 : i32, i32, i32, i32
  }
  func.func @transform_10(%arg0: i32) -> (i32, i32, i32, i32) {
    %c0_i32 = arith.constant 0 : i32
    %c0_i32_0 = arith.constant 0 : i32
    %c0_i32_1 = arith.constant 0 : i32
    %c0_i32_2 = arith.constant 0 : i32
    %c0_i32_3 = arith.constant 0 : i32
    return %c0_i32, %c0_i32_0, %c0_i32_1, %c0_i32_2 : i32, i32, i32, i32
  }
  func.func @transform_11(%arg0: i32) -> (i32, i32, i32, i32) {
    %c0_i32 = arith.constant 0 : i32
    %c0_i32_0 = arith.constant 0 : i32
    %c0_i32_1 = arith.constant 0 : i32
    %c0_i32_2 = arith.constant 0 : i32
    %c0_i32_3 = arith.constant 0 : i32
    return %c0_i32, %c0_i32_0, %c0_i32_1, %c0_i32_2 : i32, i32, i32, i32
  }
  func.func @transform_12(%arg0: i32) -> (i32, i32, i32, i32) {
    %c0_i32 = arith.constant 0 : i32
    %c0_i32_0 = arith.constant 0 : i32
    %c0_i32_1 = arith.constant 0 : i32
    %c0_i32_2 = arith.constant 0 : i32
    %c0_i32_3 = arith.constant 0 : i32
    return %c0_i32, %c0_i32_0, %c0_i32_1, %c0_i32_2 : i32, i32, i32, i32
  }
  func.func @transform_13(%arg0: i32) -> (i32, i32, i32) {
    %c0_i32 = arith.constant 0 : i32
    %c0_i32_0 = arith.constant 0 : i32
    %c0_i32_1 = arith.constant 0 : i32
    %c0_i32_2 = arith.constant 0 : i32
    return %c0_i32, %c0_i32_0, %c0_i32_1 : i32, i32, i32
  }
  func.func @transform_14(%arg0: i32) -> (i32, i32, i32) {
    %c0_i32 = arith.constant 0 : i32
    %c0_i32_0 = arith.constant 0 : i32
    %c0_i32_1 = arith.constant 0 : i32
    %c0_i32_2 = arith.constant 0 : i32
    return %c0_i32, %c0_i32_0, %c0_i32_1 : i32, i32, i32
  }
  func.func @transform_15(%arg0: i32) -> (i32, i32, i32) {
    %c0_i32 = arith.constant 0 : i32
    %c0_i32_0 = arith.constant 0 : i32
    %c0_i32_1 = arith.constant 0 : i32
    %c0_i32_2 = arith.constant 0 : i32
    return %c0_i32, %c0_i32_0, %c0_i32_1 : i32, i32, i32
  }
  func.func @transform_16(%arg0: i32) -> (i32, i32, i32) {
    %c0_i32 = arith.constant 0 : i32
    %c0_i32_0 = arith.constant 0 : i32
    %c0_i32_1 = arith.constant 0 : i32
    %c0_i32_2 = arith.constant 0 : i32
    return %c0_i32, %c0_i32_0, %c0_i32_1 : i32, i32, i32
  }
  func.func @transform_17(%arg0: i32) -> (i32, i32, i32) {
    %c0_i32 = arith.constant 0 : i32
    %c0_i32_0 = arith.constant 0 : i32
    %c0_i32_1 = arith.constant 0 : i32
    %c0_i32_2 = arith.constant 0 : i32
    return %c0_i32, %c0_i32_0, %c0_i32_1 : i32, i32, i32
  }
  func.func @transform_18(%arg0: i32) -> (i32, i32, i32) {
    %c0_i32 = arith.constant 0 : i32
    %c0_i32_0 = arith.constant 0 : i32
    %c0_i32_1 = arith.constant 0 : i32
    %c0_i32_2 = arith.constant 0 : i32
    return %c0_i32, %c0_i32_0, %c0_i32_1 : i32, i32, i32
  }
  func.func @transform_19(%arg0: i32) -> (i32, i32, i32) {
    %c0_i32 = arith.constant 0 : i32
    %c0_i32_0 = arith.constant 0 : i32
    %c0_i32_1 = arith.constant 0 : i32
    %c0_i32_2 = arith.constant 0 : i32
    return %c0_i32, %c0_i32_0, %c0_i32_1 : i32, i32, i32
  }
  func.func @transform_20(%arg0: i32) -> (i32, i32, i32) {
    %c0_i32 = arith.constant 0 : i32
    %c0_i32_0 = arith.constant 0 : i32
    %c0_i32_1 = arith.constant 0 : i32
    %c0_i32_2 = arith.constant 0 : i32
    return %c0_i32, %c0_i32_0, %c0_i32_1 : i32, i32, i32
  }
  func.func @transform_21(%arg0: i32) -> (i32, i32) {
    %c0_i32 = arith.constant 0 : i32
    %c0_i32_0 = arith.constant 0 : i32
    %c0_i32_1 = arith.constant 0 : i32
    return %c0_i32, %c0_i32_0 : i32, i32
  }
  func.func @transform_22(%arg0: i32) -> (i32, i32) {
    %c0_i32 = arith.constant 0 : i32
    %c0_i32_0 = arith.constant 0 : i32
    %c0_i32_1 = arith.constant 0 : i32
    return %c0_i32, %c0_i32_0 : i32, i32
  }
  func.func @transform_23(%arg0: i32) -> (i32, i32, i32) {
    %c0_i32 = arith.constant 0 : i32
    %c0_i32_0 = arith.constant 0 : i32
    %c0_i32_1 = arith.constant 0 : i32
    return %arg0, %c0_i32, %c0_i32_0 : i32, i32, i32
  }
}

</mosaic_0001>

<bundles_post_ra>
// kernel: my_transformer_forward.2
= control target key start
LH: loop header
LB: loop body
LE: loop exit
PB: predicated region body
PF: predicated region fallthrough
CT: control target
= control target key end

     0   :  { %s10978_s29 = smov 0   ;;  %s13391_s0 = inlined_call_operand.vmem [shape: f32[2,8,64], index: 0, kind: input, shape index: {}]   ;;  %s13392_s1 = inlined_call_operand.vmem [shape: f32[2,1,8], index: 1, kind: input, shape index: {}]   ;;  %s13393_s2 = inlined_call_operand.vmem [shape: f32[2,8,64,8], index: 2, kind: input, shape index: {}]   ;;  %s13394_s3 = inlined_call_operand.vmem [shape: f32[2,8,64,8], index: 3, kind: input, shape index: {}]   ;;  %s13395_s4 = inlined_call_operand.vmem [shape: f32[2,8,64,8], index: 4, kind: input, shape index: {}]   ;;  %s13396_s5 = inlined_call_operand.vmem [shape: f32[2,8,8,64], index: 5, kind: input, shape index: {}]   ;;  %s13397_s6 = inlined_call_operand.vmem [shape: f32[2,1,64], index: 6, kind: input, shape index: {}]   ;;  %s13398_s7 = inlined_call_operand.vmem [shape: f32[2,1,64], index: 7, kind: input, shape index: {}]   ;;  %s13399_s8 = inlined_call_operand.vmem [shape: f32[2,64,128], index: 8, kind: input, shape index: {}]   ;;  %s13400_s9 = inlined_call_operand.vmem [shape: f32[2,1,128], index: 9, kind: input, shape index: {}]   ;;  %s13401_s10 = inlined_call_operand.vmem [shape: f32[2,128,64], index: 10, kind: input, shape index: {}]   ;;  %s13402_s11 = inlined_call_operand.vmem [shape: f32[2,1,64], index: 11, kind: input, shape index: {}]   ;;  %s13403_s12 = inlined_call_operand.vmem [shape: f32[2,1,64], index: 12, kind: input, shape index: {}]   ;;  %s13404_s13 = inlined_call_operand.vmem [shape: f32[2,1,64], index: 13, kind: input, shape index: {}]   ;;  %s13405_s14 = inlined_call_operand.vmem [shape: f32[2,8,64], index: 14, kind: output, shape index: {}]  }
   0x1 LB: > { %s8604_s30 = sadd.s32 4294967295, %s10899_s29   ;;  %p8608_p0 = scmp.ge.s32.totalorder %s10899_s29, 1  ;;  %s10899_s29 = sphi %s10978_s29, %s24_s29  }
   0x2   : > { %p419_p1 = scmp.lt.s32.totalorder %s10899_s29, 3 }
   0x4   : > { %p420_p2 = pnand %p8608_p0, %p419_p1 }
   0x5   : > { %p10992_p3 = scmp.lt.s32.totalorder (!%p420_p2), %s8604_s30, 1 }
   0x6   : > { %423 = sbr.rel (%p420_p2) target bundleno = 4512 (0x11a0), region = 76 }
   0xb   : > { %v493_v0 = vld [vmem:[%s13393_s2 + $0x38] sm:$0xff]  ;;  %v10901_v2 = vmov 0.0   ;;  %v492_v3 = vld [vmem:[%s13393_s2 + $0x30] sm:$0xff]  ;;  %v491_v5 = vld [vmem:[%s13393_s2 + $0x28] sm:$0xff]  ;;  %s13408_s30 = smov (!%p10992_p3, %s8604_s30), 1  ;;  %vm686_vm0 = vcmask 523264  }
   0xc   : > { %v501_v1 = vld [vmem:[%s13393_s2 + $0x78] sm:$0xff]  ;;  %9550 = vmatprep.subr.mxu0 %v10901_v2  ;;  %9569 = vmatprep.subr.mxu1 %v10901_v2  ;;  %v500_v4 = vld [vmem:[%s13393_s2 + $0x70] sm:$0xff]  ;;  %v499_v6 = vld [vmem:[%s13393_s2 + $0x68] sm:$0xff]  ;;  %s8609_s22 = sshll.u32 %s13408_s30, 3  ;;  %vm10902_vm1 = vmmov 0   ;;  %vm2370_vm2 = vcmask 64512   ;;  %s472_s28 = scalar_lea.vmem %s13392_s1, %s13408_s30 }
   0xd   : > { %9551 = vmatpush3.msra.mxu0 %v493_v0  ;;  %9570 = vmatpush3.msra.mxu1 %v501_v1  ;;  %v490_v7 = vld [vmem:[%s13393_s2 + $0x20] sm:$0xff]  ;;  %v489_v9 = vld [vmem:[%s13393_s2 + $0x18] sm:$0xff]  ;;  %v488_v11 = vld [vmem:[%s13393_s2 + $0x10] sm:$0xff]  ;;  %s11054_s19 = scalar_lea.vmem %s13391_s0, %s8609_s22  ;;  %s476_s20 = scalar_lea.vmem %s13405_s14, %s8609_s22 }
   0xe   : > { %9552 = vmatprep.subr.mxu0 %v10901_v2  ;;  %9571 = vmatprep.subr.mxu1 %v10901_v2  ;;  %v498_v8 = vld [vmem:[%s13393_s2 + $0x60] sm:$0xff]  ;;  %v497_v10 = vld [vmem:[%s13393_s2 + $0x58] sm:$0xff]  ;;  %v496_v12 = vld [vmem:[%s13393_s2 + $0x50] sm:$0xff] }
   0xf   : > { %9553 = vmatpush3.msra.mxu0 %v492_v3  ;;  %9572 = vmatpush3.msra.mxu1 %v500_v4  ;;  %v487_v13 = vld [vmem:[%s13393_s2 + $0x8] sm:$0xff]  ;;  %v486_v15 = vld [vmem:[%s13393_s2] sm:$0xff]  ;;  %v509_v18 = vld [vmem:[%s13393_s2 + $0xb8] sm:$0xff] }
  0x10   : > { %9554 = vmatprep.subr.mxu0 %v10901_v2  ;;  %9573 = vmatprep.subr.mxu1 %v10901_v2  ;;  %v495_v14 = vld [vmem:[%s13393_s2 + $0x48] sm:$0xff]  ;;  %v494_v16 = vld [vmem:[%s13393_s2 + $0x40] sm:$0xff]  ;;  %v517_v19 = vld [vmem:[%s13393_s2 + $0xf8] sm:$0xff] }
  0x11   : > { %9555 = vmatpush3.msra.mxu0 %v491_v5  ;;  %9574 = vmatpush3.msra.mxu1 %v499_v6  ;;  %v11065_v17 = vld [vmem:[%s11054_s19] sm:$0xff]  ;;  %v508_v20 = vld [vmem:[%s13393_s2 + $0xb0] sm:$0xff]  ;;  %v507_v22 = vld [vmem:[%s13393_s2 + $0xa8] sm:$0xff] }
  0x12   : > { %9556 = vmatprep.subr.mxu0 %v10901_v2  ;;  %9575 = vmatprep.subr.mxu1 %v10901_v2  ;;  %v516_v21 = vld [vmem:[%s13393_s2 + $0xf0] sm:$0xff]  ;;  %v515_v23 = vld [vmem:[%s13393_s2 + $0xe8] sm:$0xff]  ;;  %v506_v24 = vld [vmem:[%s13393_s2 + $0xa0] sm:$0xff] }
  0x13   : > { %9557 = vmatpush3.msra.mxu0 %v490_v7  ;;  %9576 = vmatpush3.msra.mxu1 %v498_v8  ;;  %v514_v25 = vld [vmem:[%s13393_s2 + $0xe0] sm:$0xff]  ;;  %v505_v26 = vld [vmem:[%s13393_s2 + $0x98] sm:$0xff]  ;;  %v504_v28 = vld [vmem:[%s13393_s2 + $0x90] sm:$0xff] }
  0x14   : > { %9558 = vmatprep.subr.mxu0 %v10901_v2  ;;  %9577 = vmatprep.subr.mxu1 %v10901_v2  ;;  %v513_v27 = vld [vmem:[%s13393_s2 + $0xd8] sm:$0xff]  ;;  %v512_v29 = vld [vmem:[%s13393_s2 + $0xd0] sm:$0xff]  ;;  %v503_v30 = vld [vmem:[%s13393_s2 + $0x88] sm:$0xff] }
  0x15   : > { %9559 = vmatpush3.msra.mxu0 %v489_v9  ;;  %9578 = vmatpush3.msra.mxu1 %v497_v10  ;;  %v511_v31 = vld [vmem:[%s13393_s2 + $0xc8] sm:$0xff]  ;;  %v502_v32 = vld [vmem:[%s13393_s2 + $0x80] sm:$0xff]  ;;  %v525_v34 = vld [vmem:[%s13393_s2 + $0x138] sm:$0xff] }
  0x16   : > { %9560 = vmatprep.subr.mxu0 %v10901_v2  ;;  %9579 = vmatprep.subr.mxu1 %v10901_v2  ;;  %v510_v33 = vld [vmem:[%s13393_s2 + $0xc0] sm:$0xff]  ;;  %v533_v35 = vld [vmem:[%s13393_s2 + $0x178] sm:$0xff]  ;;  %v524_v36 = vld [vmem:[%s13393_s2 + $0x130] sm:$0xff] }
  0x17   : > { %9561 = vmatpush3.msra.mxu0 %v488_v11  ;;  %9580 = vmatpush3.msra.mxu1 %v496_v12  ;;  %v532_v37 = vld [vmem:[%s13393_s2 + $0x170] sm:$0xff]  ;;  %v523_v38 = vld [vmem:[%s13393_s2 + $0x128] sm:$0xff]  ;;  %v522_v40 = vld [vmem:[%s13393_s2 + $0x120] sm:$0xff] }
  0x18   : > { %9562 = vmatprep.subr.mxu0 %v10901_v2  ;;  %9581 = vmatprep.subr.mxu1 %v10901_v2  ;;  %v531_v39 = vld [vmem:[%s13393_s2 + $0x168] sm:$0xff]  ;;  %v530_v41 = vld [vmem:[%s13393_s2 + $0x160] sm:$0xff]  ;;  %v521_v42 = vld [vmem:[%s13393_s2 + $0x118] sm:$0xff] }
  0x19   : > { %9563 = vmatpush3.msra.mxu0 %v487_v13  ;;  %9582 = vmatpush3.msra.mxu1 %v495_v14  ;;  %v529_v43 = vld [vmem:[%s13393_s2 + $0x158] sm:$0xff]  ;;  %v520_v44 = vld [vmem:[%s13393_s2 + $0x110] sm:$0xff]  ;;  %v519_v46 = vld [vmem:[%s13393_s2 + $0x108] sm:$0xff] }
  0x1a   : > { %9564 = vmatprep.subr.mxu0 %v10901_v2  ;;  %9583 = vmatprep.subr.mxu1 %v10901_v2  ;;  %v528_v45 = vld [vmem:[%s13393_s2 + $0x150] sm:$0xff]  ;;  %v527_v47 = vld [vmem:[%s13393_s2 + $0x148] sm:$0xff]  ;;  %v518_v48 = vld [vmem:[%s13393_s2 + $0x100] sm:$0xff] }
  0x1b   : > { %9565 = vmatpush3.msra.mxu0 %v486_v15  ;;  %9566 = vmatprep.mubr.msk.f32.mxu0 %vm10902_vm1, %v10901_v2  ;;  %v526_v49 = vld [vmem:[%s13393_s2 + $0x140] sm:$0xff]  ;;  %v541_v50 = vld [vmem:[%s13393_s2 + $0x1b8] sm:$0xff]  ;;  %v540_v52 = vld [vmem:[%s13393_s2 + $0x1b0] sm:$0xff] }
  0x1c   : > { %9584 = vmatpush3.msra.mxu1 %v494_v16  ;;  %9567 = vmatmul.mubr.msk.f32.vlgmr.msra.gmra.mxu0 %vm686_vm0, %v11065_v17  ;;  %v549_v51 = vld [vmem:[%s13393_s2 + $0x1f8] sm:$0xff]  ;;  %v548_v53 = vld [vmem:[%s13393_s2 + $0x1f0] sm:$0xff]  ;;  %v539_v54 = vld [vmem:[%s13393_s2 + $0x1a8] sm:$0xff] }
  0x1d   : > { %9585 = vmatprep.mubr.msk.f32.mxu1 %vm10902_vm1, %v10901_v2  ;;  %9588 = vmatprep.subr.mxu0 %v10901_v2  ;;  %v547_v55 = vld [vmem:[%s13393_s2 + $0x1e8] sm:$0xff]  ;;  %v538_v56 = vld [vmem:[%s13393_s2 + $0x1a0] sm:$0xff]  ;;  %v537_v58 = vld [vmem:[%s13393_s2 + $0x198] sm:$0xff] }
  0x1e   : > { %9607 = vmatprep.subr.mxu1 %v10901_v2  ;;  %9586 = vmatmul.mubr.msk.f32.vlgmr.msra.gmra.mxu1 %vm686_vm0, %v11065_v17  ;;  %v546_v57 = vld [vmem:[%s13393_s2 + $0x1e0] sm:$0xff]  ;;  %v545_v59 = vld [vmem:[%s13393_s2 + $0x1d8] sm:$0xff]  ;;  %v536_v60 = vld [vmem:[%s13393_s2 + $0x190] sm:$0xff] }
  0x1f   : > { %9589 = vmatpush3.msra.mxu0 %v509_v18  ;;  %9608 = vmatpush3.msra.mxu1 %v517_v19  ;;  %v544_v61 = vld [vmem:[%s13393_s2 + $0x1d0] sm:$0xff]  ;;  %v535_v62 = vld [vmem:[%s13393_s2 + $0x188] sm:$0xff]  ;;  %v534_v0 = vld [vmem:[%s13393_s2 + $0x180] sm:$0xff] }
  0x20   : > { %9590 = vmatprep.subr.mxu0 %v10901_v2  ;;  %9609 = vmatprep.subr.mxu1 %v10901_v2  ;;  %v543_v63 = vld [vmem:[%s13393_s2 + $0x1c8] sm:$0xff]  ;;  %v542_v1 = vld [vmem:[%s13393_s2 + $0x1c0] sm:$0xff]  ;;  %v557_v3 = vld [vmem:[%s13394_s3 + $0x38] sm:$0xff] }
  0x21   : > { %9591 = vmatpush3.msra.mxu0 %v508_v20  ;;  %9610 = vmatpush3.msra.mxu1 %v516_v21  ;;  %v565_v4 = vld [vmem:[%s13394_s3 + $0x78] sm:$0xff]  ;;  %v556_v5 = vld [vmem:[%s13394_s3 + $0x30] sm:$0xff]  ;;  %v555_v7 = vld [vmem:[%s13394_s3 + $0x28] sm:$0xff] }
  0x22   : > { %9592 = vmatprep.subr.mxu0 %v10901_v2  ;;  %9611 = vmatprep.subr.mxu1 %v10901_v2  ;;  %v564_v6 = vld [vmem:[%s13394_s3 + $0x70] sm:$0xff]  ;;  %v563_v8 = vld [vmem:[%s13394_s3 + $0x68] sm:$0xff]  ;;  %v554_v9 = vld [vmem:[%s13394_s3 + $0x20] sm:$0xff] }
  0x23   : > { %9593 = vmatpush3.msra.mxu0 %v507_v22  ;;  %9612 = vmatpush3.msra.mxu1 %v515_v23  ;;  %v562_v10 = vld [vmem:[%s13394_s3 + $0x60] sm:$0xff]  ;;  %v553_v11 = vld [vmem:[%s13394_s3 + $0x18] sm:$0xff]  ;;  %v552_v13 = vld [vmem:[%s13394_s3 + $0x10] sm:$0xff] }
  0x24   : > { %9594 = vmatprep.subr.mxu0 %v10901_v2  ;;  %9613 = vmatprep.subr.mxu1 %v10901_v2  ;;  %v561_v12 = vld [vmem:[%s13394_s3 + $0x58] sm:$0xff]  ;;  %v560_v14 = vld [vmem:[%s13394_s3 + $0x50] sm:$0xff]  ;;  %v551_v15 = vld [vmem:[%s13394_s3 + $0x8] sm:$0xff] }
  0x25   : > { %9595 = vmatpush3.msra.mxu0 %v506_v24  ;;  %9614 = vmatpush3.msra.mxu1 %v514_v25  ;;  %v559_v16 = vld [vmem:[%s13394_s3 + $0x48] sm:$0xff]  ;;  %v550_v18 = vld [vmem:[%s13394_s3] sm:$0xff]  ;;  %v573_v20 = vld [vmem:[%s13394_s3 + $0xb8] sm:$0xff] }
  0x26   : > { %9596 = vmatprep.subr.mxu0 %v10901_v2  ;;  %9615 = vmatprep.subr.mxu1 %v10901_v2  ;;  %v558_v19 = vld [vmem:[%s13394_s3 + $0x40] sm:$0xff]  ;;  %v581_v21 = vld [vmem:[%s13394_s3 + $0xf8] sm:$0xff]  ;;  %v572_v22 = vld [vmem:[%s13394_s3 + $0xb0] sm:$0xff] }
  0x27   : > { %9597 = vmatpush3.msra.mxu0 %v505_v26  ;;  %9616 = vmatpush3.msra.mxu1 %v513_v27  ;;  %v580_v23 = vld [vmem:[%s13394_s3 + $0xf0] sm:$0xff]  ;;  %v571_v24 = vld [vmem:[%s13394_s3 + $0xa8] sm:$0xff]  ;;  %v570_v26 = vld [vmem:[%s13394_s3 + $0xa0] sm:$0xff] }
  0x28   : > { %9598 = vmatprep.subr.mxu0 %v10901_v2  ;;  %9617 = vmatprep.subr.mxu1 %v10901_v2  ;;  %v579_v25 = vld [vmem:[%s13394_s3 + $0xe8] sm:$0xff]  ;;  %v578_v27 = vld [vmem:[%s13394_s3 + $0xe0] sm:$0xff] }
  0x29   : > { %9599 = vmatpush3.msra.mxu0 %v504_v28  ;;  %9618 = vmatpush3.msra.mxu1 %v512_v29  ;;  %v569_v28 = vld [vmem:[%s13394_s3 + $0x98] sm:$0xff] }
  0x2a   : > { %9600 = vmatprep.subr.mxu0 %v10901_v2  ;;  %9619 = vmatprep.subr.mxu1 %v10901_v2  ;;  %v577_v29 = vld [vmem:[%s13394_s3 + $0xd8] sm:$0xff] }
  0x2b   : > { %9601 = vmatpush3.msra.mxu0 %v503_v30  ;;  %9620 = vmatpush3.msra.mxu1 %v511_v31  ;;  %v568_v30 = vld [vmem:[%s13394_s3 + $0x90] sm:$0xff] }
  0x2c   : > { %9602 = vmatprep.subr.mxu0 %v10901_v2  ;;  %9621 = vmatprep.subr.mxu1 %v10901_v2  ;;  %v576_v31 = vld [vmem:[%s13394_s3 + $0xd0] sm:$0xff] }
  0x2d   : > { %9603 = vmatpush3.msra.mxu0 %v502_v32  ;;  %9604 = vmatprep.mubr.msk.f32.mxu0 %vm10902_vm1, %v10901_v2  ;;  %v567_v32 = vld [vmem:[%s13394_s3 + $0x88] sm:$0xff] }
  0x2e   : > { %9622 = vmatpush3.msra.mxu1 %v510_v33  ;;  %9605 = vmatmul.mubr.msk.f32.vlgmr.msra.gmra.mxu0 %vm686_vm0, %v11065_v17  ;;  %v575_v33 = vld [vmem:[%s13394_s3 + $0xc8] sm:$0xff] }
  0x2f   : > { %9623 = vmatprep.mubr.msk.f32.mxu1 %vm10902_vm1, %v10901_v2  ;;  %9626 = vmatprep.subr.mxu0 %v10901_v2 }
  0x30   : > { %9645 = vmatprep.subr.mxu1 %v10901_v2  ;;  %9624 = vmatmul.mubr.msk.f32.vlgmr.msra.gmra.mxu1 %vm686_vm0, %v11065_v17 }
  0x31   : > { %9627 = vmatpush3.msra.mxu0 %v525_v34  ;;  %9646 = vmatpush3.msra.mxu1 %v533_v35  ;;  %v566_v34 = vld [vmem:[%s13394_s3 + $0x80] sm:$0xff] }
  0x32   : > { %9628 = vmatprep.subr.mxu0 %v10901_v2  ;;  %9647 = vmatprep.subr.mxu1 %v10901_v2  ;;  %v574_v35 = vld [vmem:[%s13394_s3 + $0xc0] sm:$0xff] }
  0x33   : > { %9629 = vmatpush3.msra.mxu0 %v524_v36  ;;  %9648 = vmatpush3.msra.mxu1 %v532_v37  ;;  %v589_v36 = vld [vmem:[%s13394_s3 + $0x138] sm:$0xff] }
  0x34   : > { %9630 = vmatprep.subr.mxu0 %v10901_v2  ;;  %9649 = vmatprep.subr.mxu1 %v10901_v2  ;;  %v597_v37 = vld [vmem:[%s13394_s3 + $0x178] sm:$0xff] }
  0x35   : > { %9631 = vmatpush3.msra.mxu0 %v523_v38  ;;  %9650 = vmatpush3.msra.mxu1 %v531_v39  ;;  %v588_v38 = vld [vmem:[%s13394_s3 + $0x130] sm:$0xff] }
  0x36   : > { %9632 = vmatprep.subr.mxu0 %v10901_v2  ;;  %9651 = vmatprep.subr.mxu1 %v10901_v2  ;;  %v596_v39 = vld [vmem:[%s13394_s3 + $0x170] sm:$0xff] }
  0x37   : > { %9633 = vmatpush3.msra.mxu0 %v522_v40  ;;  %9652 = vmatpush3.msra.mxu1 %v530_v41  ;;  %v587_v40 = vld [vmem:[%s13394_s3 + $0x128] sm:$0xff] }
  0x38   : > { %9634 = vmatprep.subr.mxu0 %v10901_v2  ;;  %9653 = vmatprep.subr.mxu1 %v10901_v2  ;;  %v595_v41 = vld [vmem:[%s13394_s3 + $0x168] sm:$0xff] }
  0x39   : > { %9635 = vmatpush3.msra.mxu0 %v521_v42  ;;  %9654 = vmatpush3.msra.mxu1 %v529_v43  ;;  %v586_v42 = vld [vmem:[%s13394_s3 + $0x120] sm:$0xff] }
  0x3a   : > { %9636 = vmatprep.subr.mxu0 %v10901_v2  ;;  %9655 = vmatprep.subr.mxu1 %v10901_v2  ;;  %v594_v43 = vld [vmem:[%s13394_s3 + $0x160] sm:$0xff] }
  0x3b   : > { %9637 = vmatpush3.msra.mxu0 %v520_v44  ;;  %9656 = vmatpush3.msra.mxu1 %v528_v45  ;;  %v585_v44 = vld [vmem:[%s13394_s3 + $0x118] sm:$0xff] }
  0x3c   : > { %9638 = vmatprep.subr.mxu0 %v10901_v2  ;;  %9657 = vmatprep.subr.mxu1 %v10901_v2  ;;  %v593_v45 = vld [vmem:[%s13394_s3 + $0x158] sm:$0xff] }
  0x3d   : > { %9639 = vmatpush3.msra.mxu0 %v519_v46  ;;  %9658 = vmatpush3.msra.mxu1 %v527_v47  ;;  %v584_v46 = vld [vmem:[%s13394_s3 + $0x110] sm:$0xff] }
  0x3e   : > { %9640 = vmatprep.subr.mxu0 %v10901_v2  ;;  %9659 = vmatprep.subr.mxu1 %v10901_v2  ;;  %v592_v47 = vld [vmem:[%s13394_s3 + $0x150] sm:$0xff] }
  0x3f   : > { %9641 = vmatpush3.msra.mxu0 %v518_v48  ;;  %9642 = vmatprep.mubr.msk.f32.mxu0 %vm10902_vm1, %v10901_v2  ;;  %v583_v48 = vld [vmem:[%s13394_s3 + $0x108] sm:$0xff] }
  0x40   : > { %9660 = vmatpush3.msra.mxu1 %v526_v49  ;;  %9643 = vmatmul.mubr.msk.f32.vlgmr.msra.gmra.mxu0 %vm686_vm0, %v11065_v17  ;;  %v591_v49 = vld [vmem:[%s13394_s3 + $0x148] sm:$0xff] }
  0x41   : > { %9661 = vmatprep.mubr.msk.f32.mxu1 %vm10902_vm1, %v10901_v2  ;;  %9664 = vmatprep.subr.mxu0 %v10901_v2 }
  0x42   : > { %9683 = vmatprep.subr.mxu1 %v10901_v2  ;;  %9662 = vmatmul.mubr.msk.f32.vlgmr.msra.gmra.mxu1 %vm686_vm0, %v11065_v17 }
  0x43   : > { %9665 = vmatpush3.msra.mxu0 %v541_v50  ;;  %9684 = vmatpush3.msra.mxu1 %v549_v51  ;;  %v582_v50 = vld [vmem:[%s13394_s3 + $0x100] sm:$0xff] }
  0x44   : > { %9666 = vmatprep.subr.mxu0 %v10901_v2  ;;  %9685 = vmatprep.subr.mxu1 %v10901_v2  ;;  %v590_v51 = vld [vmem:[%s13394_s3 + $0x140] sm:$0xff] }
  0x45   : > { %9667 = vmatpush3.msra.mxu0 %v540_v52  ;;  %9686 = vmatpush3.msra.mxu1 %v548_v53  ;;  %v605_v52 = vld [vmem:[%s13394_s3 + $0x1b8] sm:$0xff] }
  0x46   : > { %9668 = vmatprep.subr.mxu0 %v10901_v2  ;;  %9687 = vmatprep.subr.mxu1 %v10901_v2  ;;  %v613_v53 = vld [vmem:[%s13394_s3 + $0x1f8] sm:$0xff] }
  0x47   : > { %9669 = vmatpush3.msra.mxu0 %v539_v54  ;;  %9688 = vmatpush3.msra.mxu1 %v547_v55  ;;  %v604_v54 = vld [vmem:[%s13394_s3 + $0x1b0] sm:$0xff] }
  0x48   : > { %9670 = vmatprep.subr.mxu0 %v10901_v2  ;;  %9689 = vmatprep.subr.mxu1 %v10901_v2  ;;  %v612_v55 = vld [vmem:[%s13394_s3 + $0x1f0] sm:$0xff] }
  0x49   : > { %9671 = vmatpush3.msra.mxu0 %v538_v56  ;;  %9690 = vmatpush3.msra.mxu1 %v546_v57  ;;  %v603_v56 = vld [vmem:[%s13394_s3 + $0x1a8] sm:$0xff] }
  0x4a   : > { %9672 = vmatprep.subr.mxu0 %v10901_v2  ;;  %9691 = vmatprep.subr.mxu1 %v10901_v2  ;;  %v611_v57 = vld [vmem:[%s13394_s3 + $0x1e8] sm:$0xff] }
  0x4b   : > { %9673 = vmatpush3.msra.mxu0 %v537_v58  ;;  %9692 = vmatpush3.msra.mxu1 %v545_v59  ;;  %v602_v58 = vld [vmem:[%s13394_s3 + $0x1a0] sm:$0xff] }
  0x4c   : > { %9674 = vmatprep.subr.mxu0 %v10901_v2  ;;  %9693 = vmatprep.subr.mxu1 %v10901_v2  ;;  %v610_v59 = vld [vmem:[%s13394_s3 + $0x1e0] sm:$0xff] }
  0x4d   : > { %9675 = vmatpush3.msra.mxu0 %v536_v60  ;;  %9694 = vmatpush3.msra.mxu1 %v544_v61  ;;  %v601_v60 = vld [vmem:[%s13394_s3 + $0x198] sm:$0xff] }
  0x4e   : > { %9676 = vmatprep.subr.mxu0 %v10901_v2  ;;  %9695 = vmatprep.subr.mxu1 %v10901_v2  ;;  %v609_v61 = vld [vmem:[%s13394_s3 + $0x1d8] sm:$0xff] }
  0x4f   : > { %9677 = vmatpush3.msra.mxu0 %v535_v62  ;;  %9696 = vmatpush3.msra.mxu1 %v543_v63  ;;  %v600_v62 = vld [vmem:[%s13394_s3 + $0x190] sm:$0xff] }
  0x50   : > { %9678 = vmatprep.subr.mxu0 %v10901_v2  ;;  %9697 = vmatprep.subr.mxu1 %v10901_v2  ;;  %v608_v63 = vld [vmem:[%s13394_s3 + $0x1d0] sm:$0xff] }
  0x51   : > { %9679 = vmatpush3.msra.mxu0 %v534_v0  ;;  %9680 = vmatprep.mubr.msk.f32.mxu0 %vm10902_vm1, %v10901_v2  ;;  %v599_v0 = vld [vmem:[%s13394_s3 + $0x188] sm:$0xff] }
  0x52   : > { %9698 = vmatpush3.msra.mxu1 %v542_v1  ;;  %9681 = vmatmul.mubr.msk.f32.vlgmr.msra.gmra.mxu0 %vm686_vm0, %v11065_v17  ;;  %v607_v1 = vld [vmem:[%s13394_s3 + $0x1c8] sm:$0xff] }
  0x53   : > { %9699 = vmatprep.mubr.msk.f32.mxu1 %vm10902_vm1, %v10901_v2  ;;  %9702 = vmatprep.subr.mxu0 %v10901_v2 }
  0x54   : > { %9721 = vmatprep.subr.mxu1 %v10901_v2  ;;  %9700 = vmatmul.mubr.msk.f32.vlgmr.msra.gmra.mxu1 %vm686_vm0, %v11065_v17 }
  0x55   : > { %9703 = vmatpush3.msra.mxu0 %v557_v3  ;;  %9722 = vmatpush3.msra.mxu1 %v565_v4  ;;  %v598_v3 = vld [vmem:[%s13394_s3 + $0x180] sm:$0xff] }
  0x56   : > { %9704 = vmatprep.subr.mxu0 %v10901_v2  ;;  %9723 = vmatprep.subr.mxu1 %v10901_v2  ;;  %v606_v4 = vld [vmem:[%s13394_s3 + $0x1c0] sm:$0xff] }
  0x57   : > { %9705 = vmatpush3.msra.mxu0 %v556_v5  ;;  %9724 = vmatpush3.msra.mxu1 %v564_v6  ;;  %v621_v5 = vld [vmem:[%s13395_s4 + $0x38] sm:$0xff] }
  0x58   : > { %9706 = vmatprep.subr.mxu0 %v10901_v2  ;;  %9725 = vmatprep.subr.mxu1 %v10901_v2  ;;  %v629_v6 = vld [vmem:[%s13395_s4 + $0x78] sm:$0xff] }
  0x59   : > { %9707 = vmatpush3.msra.mxu0 %v555_v7  ;;  %9726 = vmatpush3.msra.mxu1 %v563_v8  ;;  %v620_v7 = vld [vmem:[%s13395_s4 + $0x30] sm:$0xff] }
  0x5a   : > { %9708 = vmatprep.subr.mxu0 %v10901_v2  ;;  %9727 = vmatprep.subr.mxu1 %v10901_v2  ;;  %v628_v8 = vld [vmem:[%s13395_s4 + $0x70] sm:$0xff] }
  0x5b   : > { %9709 = vmatpush3.msra.mxu0 %v554_v9  ;;  %9728 = vmatpush3.msra.mxu1 %v562_v10  ;;  %v619_v9 = vld [vmem:[%s13395_s4 + $0x28] sm:$0xff] }
  0x5c   : > { %9710 = vmatprep.subr.mxu0 %v10901_v2  ;;  %9729 = vmatprep.subr.mxu1 %v10901_v2  ;;  %v627_v10 = vld [vmem:[%s13395_s4 + $0x68] sm:$0xff] }
  0x5d   : > { %9711 = vmatpush3.msra.mxu0 %v553_v11  ;;  %9730 = vmatpush3.msra.mxu1 %v561_v12  ;;  %v618_v11 = vld [vmem:[%s13395_s4 + $0x20] sm:$0xff] }
  0x5e   : > { %9712 = vmatprep.subr.mxu0 %v10901_v2  ;;  %9731 = vmatprep.subr.mxu1 %v10901_v2  ;;  %v626_v12 = vld [vmem:[%s13395_s4 + $0x60] sm:$0xff] }
  0x5f   : > { %9713 = vmatpush3.msra.mxu0 %v552_v13  ;;  %9732 = vmatpush3.msra.mxu1 %v560_v14  ;;  %v617_v13 = vld [vmem:[%s13395_s4 + $0x18] sm:$0xff] }
  0x60   : > { %9714 = vmatprep.subr.mxu0 %v10901_v2  ;;  %9733 = vmatprep.subr.mxu1 %v10901_v2  ;;  %v625_v14 = vld [vmem:[%s13395_s4 + $0x58] sm:$0xff] }
  0x61   : > { %9715 = vmatpush3.msra.mxu0 %v551_v15  ;;  %9734 = vmatpush3.msra.mxu1 %v559_v16  ;;  %v616_v15 = vld [vmem:[%s13395_s4 + $0x10] sm:$0xff] }
  0x62   : > { %9716 = vmatprep.subr.mxu0 %v10901_v2  ;;  %9735 = vmatprep.subr.mxu1 %v10901_v2  ;;  %v624_v16 = vld [vmem:[%s13395_s4 + $0x50] sm:$0xff] }
  0x63   : > { %9717 = vmatpush3.msra.mxu0 %v550_v18  ;;  %9718 = vmatprep.mubr.msk.f32.mxu0 %vm10902_vm1, %v10901_v2  ;;  %v615_v18 = vld [vmem:[%s13395_s4 + $0x8] sm:$0xff] }
  0x64   : > { %9736 = vmatpush3.msra.mxu1 %v558_v19  ;;  %9719 = vmatmul.mubr.msk.f32.vlgmr.msra.gmra.mxu0 %vm686_vm0, %v11065_v17  ;;  %v623_v19 = vld [vmem:[%s13395_s4 + $0x48] sm:$0xff] }
  0x65   : > { %9737 = vmatprep.mubr.msk.f32.mxu1 %vm10902_vm1, %v10901_v2  ;;  %9740 = vmatprep.subr.mxu0 %v10901_v2 }
  0x66   : > { %9759 = vmatprep.subr.mxu1 %v10901_v2  ;;  %9738 = vmatmul.mubr.msk.f32.vlgmr.msra.gmra.mxu1 %vm686_vm0, %v11065_v17 }
  0x67   : > { %9741 = vmatpush3.msra.mxu0 %v573_v20  ;;  %9760 = vmatpush3.msra.mxu1 %v581_v21  ;;  %v614_v20 = vld [vmem:[%s13395_s4] sm:$0xff]  ;;  %v637_v21 = vld [vmem:[%s13395_s4 + $0xb8] sm:$0xff] }
  0x68   : > { %9742 = vmatprep.subr.mxu0 %v10901_v2  ;;  %9761 = vmatprep.subr.mxu1 %v10901_v2 }
  0x69   : > { %9743 = vmatpush3.msra.mxu0 %v572_v22  ;;  %9762 = vmatpush3.msra.mxu1 %v580_v23  ;;  %v622_v22 = vld [vmem:[%s13395_s4 + $0x40] sm:$0xff]  ;;  %v636_v23 = vld [vmem:[%s13395_s4 + $0xb0] sm:$0xff] }
  0x6a   : > { %9744 = vmatprep.subr.mxu0 %v10901_v2  ;;  %9763 = vmatprep.subr.mxu1 %v10901_v2 }
  0x6b   : > { %9745 = vmatpush3.msra.mxu0 %v571_v24  ;;  %9764 = vmatpush3.msra.mxu1 %v579_v25  ;;  %v635_v24 = vld [vmem:[%s13395_s4 + $0xa8] sm:$0xff]  ;;  %v645_v25 = vld [vmem:[%s13395_s4 + $0xf8] sm:$0xff] }
  0x6c   : > { %9746 = vmatprep.subr.mxu0 %v10901_v2  ;;  %9765 = vmatprep.subr.mxu1 %v10901_v2 }
  0x6d   : > { %9747 = vmatpush3.msra.mxu0 %v570_v26  ;;  %9766 = vmatpush3.msra.mxu1 %v578_v27  ;;  %v634_v26 = vld [vmem:[%s13395_s4 + $0xa0] sm:$0xff]  ;;  %v644_v27 = vld [vmem:[%s13395_s4 + $0xf0] sm:$0xff] }
  0x6e   : > { %9748 = vmatprep.subr.mxu0 %v10901_v2  ;;  %9767 = vmatprep.subr.mxu1 %v10901_v2 }
  0x6f   : > { %9749 = vmatpush3.msra.mxu0 %v569_v28  ;;  %9768 = vmatpush3.msra.mxu1 %v577_v29  ;;  %v633_v28 = vld [vmem:[%s13395_s4 + $0x98] sm:$0xff]  ;;  %v643_v29 = vld [vmem:[%s13395_s4 + $0xe8] sm:$0xff] }
  0x70   : > { %9750 = vmatprep.subr.mxu0 %v10901_v2  ;;  %9769 = vmatprep.subr.mxu1 %v10901_v2 }
  0x71   : > { %9751 = vmatpush3.msra.mxu0 %v568_v30  ;;  %9770 = vmatpush3.msra.mxu1 %v576_v31  ;;  %v632_v30 = vld [vmem:[%s13395_s4 + $0x90] sm:$0xff]  ;;  %v642_v31 = vld [vmem:[%s13395_s4 + $0xe0] sm:$0xff] }
  0x72   : > { %9752 = vmatprep.subr.mxu0 %v10901_v2  ;;  %9771 = vmatprep.subr.mxu1 %v10901_v2 }
  0x73   : > { %9753 = vmatpush3.msra.mxu0 %v567_v32  ;;  %9772 = vmatpush3.msra.mxu1 %v575_v33  ;;  %v631_v32 = vld [vmem:[%s13395_s4 + $0x88] sm:$0xff]  ;;  %v641_v33 = vld [vmem:[%s13395_s4 + $0xd8] sm:$0xff] }
  0x74   : > { %9754 = vmatprep.subr.mxu0 %v10901_v2  ;;  %9773 = vmatprep.subr.mxu1 %v10901_v2 }
  0x75   : > { %9755 = vmatpush3.msra.mxu0 %v566_v34  ;;  %9756 = vmatprep.mubr.msk.f32.mxu0 %vm10902_vm1, %v10901_v2  ;;  %v630_v34 = vld [vmem:[%s13395_s4 + $0x80] sm:$0xff] }
  0x76   : > { %9774 = vmatpush3.msra.mxu1 %v574_v35  ;;  %9757 = vmatmul.mubr.msk.f32.vlgmr.msra.gmra.mxu0 %vm686_vm0, %v11065_v17  ;;  %v653_v35 = vld [vmem:[%s13395_s4 + $0x138] sm:$0xff] }
  0x77   : > { %9775 = vmatprep.mubr.msk.f32.mxu1 %vm10902_vm1, %v10901_v2  ;;  %9778 = vmatprep.subr.mxu0 %v10901_v2 }
  0x78   : > { %9797 = vmatprep.subr.mxu1 %v10901_v2  ;;  %9776 = vmatmul.mubr.msk.f32.vlgmr.msra.gmra.mxu1 %vm686_vm0, %v11065_v17 }
  0x79   : > { %9779 = vmatpush3.msra.mxu0 %v589_v36  ;;  %9798 = vmatpush3.msra.mxu1 %v597_v37  ;;  %v640_v36 = vld [vmem:[%s13395_s4 + $0xd0] sm:$0xff] }
  0x7a   : > { %9780 = vmatprep.subr.mxu0 %v10901_v2  ;;  %9799 = vmatprep.subr.mxu1 %v10901_v2  ;;  %v652_v37 = vld [vmem:[%s13395_s4 + $0x130] sm:$0xff] }
  0x7b   : > { %9781 = vmatpush3.msra.mxu0 %v588_v38  ;;  %9800 = vmatpush3.msra.mxu1 %v596_v39  ;;  %v639_v38 = vld [vmem:[%s13395_s4 + $0xc8] sm:$0xff] }
  0x7c   : > { %9782 = vmatprep.subr.mxu0 %v10901_v2  ;;  %9801 = vmatprep.subr.mxu1 %v10901_v2  ;;  %v651_v39 = vld [vmem:[%s13395_s4 + $0x128] sm:$0xff] }
  0x7d   : > { %9783 = vmatpush3.msra.mxu0 %v587_v40  ;;  %9802 = vmatpush3.msra.mxu1 %v595_v41  ;;  %v638_v40 = vld [vmem:[%s13395_s4 + $0xc0] sm:$0xff] }
  0x7e   : > { %9784 = vmatprep.subr.mxu0 %v10901_v2  ;;  %9803 = vmatprep.subr.mxu1 %v10901_v2  ;;  %v650_v41 = vld [vmem:[%s13395_s4 + $0x120] sm:$0xff] }
  0x7f   : > { %9785 = vmatpush3.msra.mxu0 %v586_v42  ;;  %9804 = vmatpush3.msra.mxu1 %v594_v43  ;;  %v649_v42 = vld [vmem:[%s13395_s4 + $0x118] sm:$0xff] }
  0x80   : > { %9786 = vmatprep.subr.mxu0 %v10901_v2  ;;  %9805 = vmatprep.subr.mxu1 %v10901_v2  ;;  %v661_v43 = vld [vmem:[%s13395_s4 + $0x178] sm:$0xff] }
  0x81   : > { %9787 = vmatpush3.msra.mxu0 %v585_v44  ;;  %9806 = vmatpush3.msra.mxu1 %v593_v45  ;;  %v648_v44 = vld [vmem:[%s13395_s4 + $0x110] sm:$0xff] }
  0x82   : > { %9788 = vmatprep.subr.mxu0 %v10901_v2  ;;  %9807 = vmatprep.subr.mxu1 %v10901_v2  ;;  %v660_v45 = vld [vmem:[%s13395_s4 + $0x170] sm:$0xff] }
  0x83   : > { %9789 = vmatpush3.msra.mxu0 %v584_v46  ;;  %9808 = vmatpush3.msra.mxu1 %v592_v47  ;;  %v647_v46 = vld [vmem:[%s13395_s4 + $0x108] sm:$0xff] }
  0x84   : > { %9790 = vmatprep.subr.mxu0 %v10901_v2  ;;  %9809 = vmatprep.subr.mxu1 %v10901_v2  ;;  %v659_v47 = vld [vmem:[%s13395_s4 + $0x168] sm:$0xff] }
  0x85   : > { %9791 = vmatpush3.msra.mxu0 %v583_v48  ;;  %9810 = vmatpush3.msra.mxu1 %v591_v49  ;;  %v669_v48 = vld [vmem:[%s13395_s4 + $0x1b8] sm:$0xff]  ;;  %v658_v49 = vld [vmem:[%s13395_s4 + $0x160] sm:$0xff] }
  0x86   : > { %9792 = vmatprep.subr.mxu0 %v10901_v2  ;;  %9811 = vmatprep.subr.mxu1 %v10901_v2 }
  0x87   : > { %9793 = vmatpush3.msra.mxu0 %v582_v50  ;;  %9794 = vmatprep.mubr.msk.f32.mxu0 %vm10902_vm1, %v10901_v2  ;;  %v11780_v50 = vld [vmem:[%s11054_s19] sm:$0xff] }
  0x88   : > { %9812 = vmatpush3.msra.mxu1 %v590_v51  ;;  %9813 = vmatprep.mubr.msk.f32.mxu1 %vm10902_vm1, %v10901_v2  ;;  %v668_v51 = vld [vmem:[%s13395_s4 + $0x1b0] sm:$0xff] }
  0x89   : > { %9795 = vmatmul.mubr.msk.f32.vlgmr.msra.gmra.mxu0 %vm686_vm0, %v11065_v17  ;;  %9814 = vmatmul.mubr.msk.f32.vlgmr.msra.gmra.mxu1 %vm686_vm0, %v11065_v17 }
  0x8a   : > { %9816 = vmatprep.subr.mxu0 %v10901_v2  ;;  %9835 = vmatprep.subr.mxu1 %v10901_v2 }
  0x8b   : > { %9817 = vmatpush3.msra.mxu0 %v605_v52  ;;  %9836 = vmatpush3.msra.mxu1 %v613_v53  ;;  %v657_v52 = vld [vmem:[%s13395_s4 + $0x158] sm:$0xff]  ;;  %v667_v53 = vld [vmem:[%s13395_s4 + $0x1a8] sm:$0xff] }
  0x8c   : > { %9818 = vmatprep.subr.mxu0 %v10901_v2  ;;  %9837 = vmatprep.subr.mxu1 %v10901_v2 }
  0x8d   : > { %9819 = vmatpush3.msra.mxu0 %v604_v54  ;;  %9838 = vmatpush3.msra.mxu1 %v612_v55  ;;  %v656_v54 = vld [vmem:[%s13395_s4 + $0x150] sm:$0xff]  ;;  %v666_v55 = vld [vmem:[%s13395_s4 + $0x1a0] sm:$0xff] }
  0x8e   : > { %9820 = vmatprep.subr.mxu0 %v10901_v2  ;;  %9839 = vmatprep.subr.mxu1 %v10901_v2 }
  0x8f   : > { %9821 = vmatpush3.msra.mxu0 %v603_v56  ;;  %9840 = vmatpush3.msra.mxu1 %v611_v57  ;;  %v655_v56 = vld [vmem:[%s13395_s4 + $0x148] sm:$0xff]  ;;  %v665_v57 = vld [vmem:[%s13395_s4 + $0x198] sm:$0xff] }
  0x90   : > { %9822 = vmatprep.subr.mxu0 %v10901_v2  ;;  %9841 = vmatprep.subr.mxu1 %v10901_v2 }
  0x91   : > { %9823 = vmatpush3.msra.mxu0 %v602_v58  ;;  %9842 = vmatpush3.msra.mxu1 %v610_v59  ;;  %v654_v58 = vld [vmem:[%s13395_s4 + $0x140] sm:$0xff]  ;;  %v664_v59 = vld [vmem:[%s13395_s4 + $0x190] sm:$0xff] }
  0x92   : > { %9824 = vmatprep.subr.mxu0 %v10901_v2  ;;  %9843 = vmatprep.subr.mxu1 %v10901_v2 }
  0x93   : > { %9825 = vmatpush3.msra.mxu0 %v601_v60  ;;  %9844 = vmatpush3.msra.mxu1 %v609_v61  ;;  %v663_v60 = vld [vmem:[%s13395_s4 + $0x188] sm:$0xff]  ;;  %v677_v61 = vld [vmem:[%s13395_s4 + $0x1f8] sm:$0xff] }
  0x94   : > { %9826 = vmatprep.subr.mxu0 %v10901_v2  ;;  %9845 = vmatprep.subr.mxu1 %v10901_v2 }
  0x95   : > { %9827 = vmatpush3.msra.mxu0 %v600_v62  ;;  %9846 = vmatpush3.msra.mxu1 %v608_v63  ;;  %v662_v62 = vld [vmem:[%s13395_s4 + $0x180] sm:$0xff]  ;;  %v676_v63 = vld [vmem:[%s13395_s4 + $0x1f0] sm:$0xff] }
  0x96   : > { %9828 = vmatprep.subr.mxu0 %v10901_v2  ;;  %9847 = vmatprep.subr.mxu1 %v10901_v2 }
  0x97   : > { %9829 = vmatpush3.msra.mxu0 %v599_v0  ;;  %9848 = vmatpush3.msra.mxu1 %v607_v1  ;;  %v675_v1 = vld [vmem:[%s13395_s4 + $0x1e8] sm:$0xff] }
  0x98   : > { %9830 = vmatprep.subr.mxu0 %v10901_v2  ;;  %9849 = vmatprep.subr.mxu1 %v10901_v2 }
  0x99   : > { %9831 = vmatpush3.msra.mxu0 %v598_v3  ;;  %9832 = vmatprep.mubr.msk.f32.mxu0 %vm10902_vm1, %v10901_v2 }
  0x9a   : > { %9850 = vmatpush3.msra.mxu1 %v606_v4  ;;  %9851 = vmatprep.mubr.msk.f32.mxu1 %vm10902_vm1, %v10901_v2 }
  0x9b   : > { %9833 = vmatmul.mubr.msk.f32.vlgmr.msra.gmra.mxu0 %vm686_vm0, %v11065_v17  ;;  %9852 = vmatmul.mubr.msk.f32.vlgmr.msra.gmra.mxu1 %vm686_vm0, %v11065_v17 }
  0x9c   : > { %9854 = vmatprep.subr.mxu0 %v10901_v2  ;;  %9870 = vmatprep.mubr.msk.f32.mxu0 %vm10902_vm1, %v10901_v2 }
  0x9d   : > { %9855 = vmatpush3.msra.mxu0 %v621_v5  ;;  %9873 = vmatprep.subr.mxu1 %v10901_v2  ;;  %v674_v5 = vld [vmem:[%s13395_s4 + $0x1e0] sm:$0xff] }
  0x9e   : > { %9856 = vmatprep.subr.mxu0 %v10901_v2  ;;  %9874 = vmatpush3.msra.mxu1 %v629_v6 }
  0x9f   : > { %9857 = vmatpush3.msra.mxu0 %v620_v7  ;;  %9875 = vmatprep.subr.mxu1 %v10901_v2  ;;  %v673_v7 = vld [vmem:[%s13395_s4 + $0x1d8] sm:$0xff] }
  0xa0   : > { %9858 = vmatprep.subr.mxu0 %v10901_v2  ;;  %9876 = vmatpush3.msra.mxu1 %v628_v8  ;;  %v672_v8 = vld [vmem:[%s13395_s4 + $0x1d0] sm:$0xff] }
  0xa1   : > { %9859 = vmatpush3.msra.mxu0 %v619_v9  ;;  %9877 = vmatprep.subr.mxu1 %v10901_v2  ;;  %v671_v9 = vld [vmem:[%s13395_s4 + $0x1c8] sm:$0xff] }
  0xa2   : > { %9860 = vmatprep.subr.mxu0 %v10901_v2  ;;  %9878 = vmatpush3.msra.mxu1 %v627_v10  ;;  %v670_v10 = vld [vmem:[%s13395_s4 + $0x1c0] sm:$0xff] }
  0xa3   : > { %9861 = vmatpush3.msra.mxu0 %v618_v11  ;;  %9879 = vmatprep.subr.mxu1 %v10901_v2 }
  0xa4   : > { %9862 = vmatprep.subr.mxu0 %v10901_v2  ;;  %9880 = vmatpush3.msra.mxu1 %v626_v12 }
  0xa5   : > { %9863 = vmatpush3.msra.mxu0 %v617_v13  ;;  %9881 = vmatprep.subr.mxu1 %v10901_v2 }
  0xa6   : > { %9864 = vmatprep.subr.mxu0 %v10901_v2  ;;  %9882 = vmatpush3.msra.mxu1 %v625_v14 }
  0xa7   : > { %9865 = vmatpush3.msra.mxu0 %v616_v15  ;;  %9883 = vmatprep.subr.mxu1 %v10901_v2 }
  0xa8   : > { %9866 = vmatprep.subr.mxu0 %v10901_v2  ;;  %9884 = vmatpush3.msra.mxu1 %v624_v16 }
  0xa9   : > { %9867 = vmatpush3.msra.mxu0 %v615_v18  ;;  %9885 = vmatprep.subr.mxu1 %v10901_v2 }
  0xaa   : > { %9868 = vmatprep.subr.mxu0 %v10901_v2  ;;  %9886 = vmatpush3.msra.mxu1 %v623_v19 }
  0xab   : > { %9869 = vmatpush3.msra.mxu0 %v614_v20  ;;  %9887 = vmatprep.subr.mxu1 %v10901_v2 }
  0xac   : > { %9892 = vmatprep.subr.mxu0 %v10901_v2  ;;  %9871 = vmatmul.mubr.msk.f32.vlgmr.msra.gmra.mxu0 %vm686_vm0, %v11065_v17 }
  0xad   : > { %9893 = vmatpush3.msra.mxu0 %v637_v21  ;;  %9908 = vmatprep.mubr.msk.f32.mxu0 %vm10902_vm1, %v10901_v2 }
  0xae   : > { %9894 = vmatprep.subr.mxu0 %v10901_v2  ;;  %9888 = vmatpush3.msra.mxu1 %v622_v22 }
  0xaf   : > { %9895 = vmatpush3.msra.mxu0 %v636_v23  ;;  %9889 = vmatprep.mubr.msk.f32.mxu1 %vm10902_vm1, %v10901_v2 }
  0xb0   : > { %9896 = vmatprep.subr.mxu0 %v10901_v2  ;;  %9911 = vmatprep.subr.mxu1 %v10901_v2 }
  0xb1   : > { %9897 = vmatpush3.msra.mxu0 %v635_v24  ;;  %9890 = vmatmul.mubr.msk.f32.vlgmr.msra.gmra.mxu1 %vm686_vm0, %v11065_v17 }
  0xb2   : > { %9898 = vmatprep.subr.mxu0 %v10901_v2  ;;  %9912 = vmatpush3.msra.mxu1 %v645_v25 }
  0xb3   : > { %9899 = vmatpush3.msra.mxu0 %v634_v26  ;;  %9913 = vmatprep.subr.mxu1 %v10901_v2 }
  0xb4   : > { %9900 = vmatprep.subr.mxu0 %v10901_v2  ;;  %9914 = vmatpush3.msra.mxu1 %v644_v27 }
  0xb5   : > { %9901 = vmatpush3.msra.mxu0 %v633_v28  ;;  %9915 = vmatprep.subr.mxu1 %v10901_v2 }
  0xb6   : > { %9902 = vmatprep.subr.mxu0 %v10901_v2  ;;  %9916 = vmatpush3.msra.mxu1 %v643_v29 }
  0xb7   : > { %9903 = vmatpush3.msra.mxu0 %v632_v30  ;;  %9917 = vmatprep.subr.mxu1 %v10901_v2 }
  0xb8   : > { %9904 = vmatprep.subr.mxu0 %v10901_v2  ;;  %9918 = vmatpush3.msra.mxu1 %v642_v31 }
  0xb9   : > { %9905 = vmatpush3.msra.mxu0 %v631_v32  ;;  %9919 = vmatprep.subr.mxu1 %v10901_v2 }
  0xba   : > { %9906 = vmatprep.subr.mxu0 %v10901_v2  ;;  %9920 = vmatpush3.msra.mxu1 %v641_v33 }
  0xbb   : > { %9907 = vmatpush3.msra.mxu0 %v630_v34  ;;  %9921 = vmatprep.subr.mxu1 %v10901_v2 }
  0xbc   : > { %9930 = vmatprep.subr.mxu0 %v10901_v2  ;;  %9909 = vmatmul.mubr.msk.f32.vlgmr.msra.gmra.mxu0 %vm686_vm0, %v11065_v17 }
  0xbd   : > { %9931 = vmatpush3.msra.mxu0 %v653_v35  ;;  %9946 = vmatprep.mubr.msk.f32.mxu0 %vm10902_vm1, %v10901_v2 }
  0xbe   : > { %9932 = vmatprep.subr.mxu0 %v10901_v2  ;;  %9922 = vmatpush3.msra.mxu1 %v640_v36 }
  0xbf   : > { %9933 = vmatpush3.msra.mxu0 %v652_v37  ;;  %9923 = vmatprep.subr.mxu1 %v10901_v2 }
  0xc0   : > { %9934 = vmatprep.subr.mxu0 %v10901_v2  ;;  %9924 = vmatpush3.msra.mxu1 %v639_v38 }
  0xc1   : > { %9935 = vmatpush3.msra.mxu0 %v651_v39  ;;  %9925 = vmatprep.subr.mxu1 %v10901_v2 }
  0xc2   : > { %9936 = vmatprep.subr.mxu0 %v10901_v2  ;;  %9926 = vmatpush3.msra.mxu1 %v638_v40 }
  0xc3   : > { %9937 = vmatpush3.msra.mxu0 %v650_v41  ;;  %9927 = vmatprep.mubr.msk.f32.mxu1 %vm10902_vm1, %v10901_v2 }
  0xc4   : > { %9938 = vmatprep.subr.mxu0 %v10901_v2  ;;  %9949 = vmatprep.subr.mxu1 %v10901_v2 }
  0xc5   : > { %9939 = vmatpush3.msra.mxu0 %v649_v42  ;;  %9928 = vmatmul.mubr.msk.f32.vlgmr.msra.gmra.mxu1 %vm686_vm0, %v11065_v17  ;;  %v646_v17 = vld [vmem:[%s13395_s4 + $0x100] sm:$0xff] }
  0xc6   : > { %9940 = vmatprep.subr.mxu0 %v10901_v2  ;;  %9950 = vmatpush3.msra.mxu1 %v661_v43 }
  0xc7   : > { %9941 = vmatpush3.msra.mxu0 %v648_v44  ;;  %9951 = vmatprep.subr.mxu1 %v10901_v2 }
  0xc8   : > { %9942 = vmatprep.subr.mxu0 %v10901_v2  ;;  %9952 = vmatpush3.msra.mxu1 %v660_v45 }
  0xc9   : > { %9943 = vmatpush3.msra.mxu0 %v647_v46  ;;  %9953 = vmatprep.subr.mxu1 %v10901_v2 }
  0xca   : > { %9944 = vmatprep.subr.mxu0 %v10901_v2  ;;  %9954 = vmatpush3.msra.mxu1 %v659_v47 }
  0xcb   : > { %9945 = vmatpush3.msra.mxu0 %v646_v17  ;;  %9955 = vmatprep.subr.mxu1 %v10901_v2 }
  0xcc   : > { %9968 = vmatprep.subr.mxu0 %v10901_v2  ;;  %9947 = vmatmul.mubr.msk.f32.vlgmr.msra.gmra.mxu0 %vm686_vm0, %v11780_v50 }
  0xcd   : > { %9969 = vmatpush3.msra.mxu0 %v669_v48  ;;  %9984 = vmatprep.mubr.msk.f32.mxu0 %vm10902_vm1, %v10901_v2 }
  0xce   : > { %9970 = vmatprep.subr.mxu0 %v10901_v2  ;;  %9956 = vmatpush3.msra.mxu1 %v658_v49 }
  0xcf   : > { %9971 = vmatpush3.msra.mxu0 %v668_v51  ;;  %9957 = vmatprep.subr.mxu1 %v10901_v2 }
  0xd0   : > { %9972 = vmatprep.subr.mxu0 %v10901_v2  ;;  %9958 = vmatpush3.msra.mxu1 %v657_v52 }
  0xd1   : > { %9973 = vmatpush3.msra.mxu0 %v667_v53  ;;  %9959 = vmatprep.subr.mxu1 %v10901_v2 }
  0xd2   : > { %9974 = vmatprep.subr.mxu0 %v10901_v2  ;;  %9960 = vmatpush3.msra.mxu1 %v656_v54 }
  0xd3   : > { %9975 = vmatpush3.msra.mxu0 %v666_v55  ;;  %9961 = vmatprep.subr.mxu1 %v10901_v2 }
  0xd4   : > { %9976 = vmatprep.subr.mxu0 %v10901_v2  ;;  %9962 = vmatpush3.msra.mxu1 %v655_v56  ;;  %v11936_v56 = vld [vmem:[%s472_s28] ss:$0 sm:$0xff] }
  0xd5   : > { %9977 = vmatpush3.msra.mxu0 %v665_v57  ;;  %9963 = vmatprep.subr.mxu1 %v10901_v2  ;;  %vm485_vm3 = vcmp.gt.f32.partialorder %v11936_v56, 0.5 }
  0xd6   : > { %9978 = vmatprep.subr.mxu0 %v10901_v2  ;;  %9964 = vmatpush3.msra.mxu1 %v654_v58 }
  0xd7   : > { %9979 = vmatpush3.msra.mxu0 %v664_v59  ;;  %9965 = vmatprep.mubr.msk.f32.mxu1 %vm10902_vm1, %v10901_v2 }
  0xd8   : > { %9980 = vmatprep.subr.mxu0 %v10901_v2  ;;  %9987 = vmatprep.subr.mxu1 %v10901_v2 }
  0xd9   : > { %9981 = vmatpush3.msra.mxu0 %v663_v60  ;;  %9966 = vmatmul.mubr.msk.f32.vlgmr.msra.gmra.mxu1 %vm686_vm0, %v11780_v50 }
  0xda   : > { %9982 = vmatprep.subr.mxu0 %v10901_v2  ;;  %9988 = vmatpush3.msra.mxu1 %v677_v61 }
  0xdb   : > { %9983 = vmatpush3.msra.mxu0 %v662_v62  ;;  %9989 = vmatprep.subr.mxu1 %v10901_v2 }
  0xdc   : > { %v756_v0 = vpop.f32.mrf.mxu0  ;;  %9985 = vmatmul.mubr.msk.f32.vlgmr.msra.gmra.mxu0 %vm686_vm0, %v11780_v50  ;;  %10006 = vmatprep.subr.mxu0 %v10901_v2 }
  0xdd   : > { %10008 = vmatprep.mubr.msk.f32.mxu0 %vm10902_vm1, %v10901_v2  ;;  %9990 = vmatpush3.msra.mxu1 %v676_v63 }
  0xde   : > { %v826_v3 = vpop.f32.mrf.mxu1  ;;  %v9568_v4 = vpop.f32.mrf.mxu0  ;;  %9991 = vmatprep.subr.mxu1 %v10901_v2  ;;  %10003 = vmatprep.mubr.msk.f32.mxu1 %vm10902_vm1, %v10901_v2 }
  0xdf   : > { %9992 = vmatpush3.msra.mxu1 %v675_v1 }
  0xe0   : > { %v9587_v6 = vpop.f32.mrf.mxu1  ;;  %9993 = vmatprep.subr.mxu1 %v10901_v2 }
  0xe1   : > { %9994 = vmatpush3.msra.mxu1 %v674_v5 }
  0xe2   : > { %9995 = vmatprep.subr.mxu1 %v10901_v2 }
  0xe3   : > { %9996 = vmatpush3.msra.mxu1 %v673_v7 }
  0xe4   : > { %9997 = vmatprep.subr.mxu1 %v10901_v2 }
  0xe5   : > { %9998 = vmatpush3.msra.mxu1 %v672_v8 }
  0xe6   : > { %9999 = vmatprep.subr.mxu1 %v10901_v2 }
  0xe7   : > { %10000 = vmatpush3.msra.mxu1 %v671_v9 }
  0xe8   : > { %10001 = vmatprep.subr.mxu1 %v10901_v2 }
  0xe9   : > { %10002 = vmatpush3.msra.mxu1 %v670_v10 }
  0xea   : > { %10004 = vmatmul.mubr.msk.f32.vlgmr.msra.gmra.mxu1 %vm686_vm0, %v11780_v50  ;;  %10031 = vmatprep.subr.mxu1 %v10901_v2 }
  0xeb   : > { %10033 = vmatprep.mubr.msk.f32.mxu1 %vm10902_vm1, %v10901_v2 }
  0xee   : > { %v896_v11 = vpop.f32.mrf.mxu0 }
  0xf0   : > { %v966_v12 = vpop.f32.mrf.mxu1  ;;  %v9606_v13 = vpop.f32.mrf.mxu0 }
  0xf2   : > { %v9625_v14 = vpop.f32.mrf.mxu1 }
 0x100   : > { %v1036_v15 = vpop.f32.mrf.mxu0 }
 0x102   : > { %v1106_v16 = vpop.f32.mrf.mxu1  ;;  %v9644_v18 = vpop.f32.mrf.mxu0 }
 0x104   : > { %v9663_v19 = vpop.f32.mrf.mxu1 }
 0x112   : > { %v1176_v20 = vpop.f32.mrf.mxu0 }
 0x114   : > { %v1246_v21 = vpop.f32.mrf.mxu1  ;;  %v9682_v22 = vpop.f32.mrf.mxu0 }
 0x116   : > { %v9701_v23 = vpop.f32.mrf.mxu1 }
 0x124   : > { %v1316_v24 = vpop.f32.mrf.mxu0 }
 0x125   : > { %10007 = vmatpush3.xpose.msk.msra.mxu0 %vm2370_vm2, %v1316_v24 }
 0x126   : > { %v1386_v25 = vpop.f32.mrf.mxu1  ;;  %v9720_v26 = vpop.f32.mrf.mxu0  ;;  %10011 = vmatprep.subr.mxu0 %v10901_v2 }
 0x128   : > { %v9739_v27 = vpop.f32.mrf.mxu1  ;;  %10009 = vmatmul.mubr.msk.f32.vlgmr.msra.gmra.mxu0 %vm2370_vm2, %v756_v0 }
 0x129   : > { %10012 = vmatpush3.xpose.msk.msra.mxu0 %vm2370_vm2, %v1386_v25  ;;  %10013 = vmatprep.mubr.msk.f32.mxu0 %vm10902_vm1, %v10901_v2 }
 0x12a   : > { %10016 = vmatprep.subr.mxu0 %v10901_v2 }
 0x12c   : > { %10014 = vmatmul.mubr.msk.f32.vlgmr.msra.gmra.mxu0 %vm2370_vm2, %v826_v3 }
 0x12d   : > { %10018 = vmatprep.mubr.msk.f32.mxu0 %vm10902_vm1, %v10901_v2 }
 0x136   : > { %v1456_v28 = vpop.f32.mrf.mxu0 }
 0x137   : > { %10017 = vmatpush3.xpose.msk.msra.mxu0 %vm2370_vm2, %v1456_v28 }
 0x138   : > { %v1526_v29 = vpop.f32.mrf.mxu1  ;;  %v9758_v30 = vpop.f32.mrf.mxu0  ;;  %10021 = vmatprep.subr.mxu0 %v10901_v2 }
 0x13a   : > { %v9777_v31 = vpop.f32.mrf.mxu1  ;;  %10019 = vmatmul.mubr.msk.f32.vlgmr.msra.gmra.mxu0 %vm2370_vm2, %v896_v11 }
 0x13b   : > { %10022 = vmatpush3.xpose.msk.msra.mxu0 %vm2370_vm2, %v1526_v29  ;;  %10023 = vmatprep.mubr.msk.f32.mxu0 %vm10902_vm1, %v10901_v2 }
 0x13c   : > { %10026 = vmatprep.subr.mxu0 %v10901_v2 }
 0x13e   : > { %10024 = vmatmul.mubr.msk.f32.vlgmr.msra.gmra.mxu0 %vm2370_vm2, %v966_v12 }
 0x13f   : > { %10028 = vmatprep.mubr.msk.f32.mxu0 %vm10902_vm1, %v10901_v2 }
 0x149   : > { %v1596_v32 = vpop.f32.mrf.mxu0  ;;  %v1666_v33 = vpop.f32.mrf.mxu1 }
 0x14a   : > { %10027 = vmatpush3.xpose.msk.msra.mxu0 %vm2370_vm2, %v1596_v32  ;;  %10032 = vmatpush3.xpose.msk.msra.mxu1 %vm2370_vm2, %v1666_v33 }
 0x14b   : > { %v9796_v34 = vpop.f32.mrf.mxu0  ;;  %v9815_v35 = vpop.f32.mrf.mxu1  ;;  %10036 = vmatprep.subr.mxu0 %v10901_v2  ;;  %10041 = vmatprep.subr.mxu1 %v10901_v2 }
 0x14d   : > { %10029 = vmatmul.mubr.msk.f32.vlgmr.msra.gmra.mxu0 %vm2370_vm2, %v1036_v15  ;;  %10034 = vmatmul.mubr.msk.f32.vlgmr.msra.gmra.mxu1 %vm2370_vm2, %v1106_v16 }
 0x14e   : > { %10038 = vmatprep.mubr.msk.f32.mxu0 %vm10902_vm1, %v10901_v2  ;;  %10043 = vmatprep.mubr.msk.f32.mxu1 %vm10902_vm1, %v10901_v2 }
 0x15b   : > { %v1736_v36 = vpop.f32.mrf.mxu0  ;;  %v1806_v37 = vpop.f32.mrf.mxu1 }
 0x15c   : > { %10037 = vmatpush3.xpose.msk.msra.mxu0 %vm2370_vm2, %v1736_v36  ;;  %10042 = vmatpush3.xpose.msk.msra.mxu1 %vm2370_vm2, %v1806_v37 }
 0x15d   : > { %v9834_v38 = vpop.f32.mrf.mxu0  ;;  %v9853_v39 = vpop.f32.mrf.mxu1  ;;  %10046 = vmatprep.subr.mxu0 %v10901_v2  ;;  %10051 = vmatprep.subr.mxu1 %v10901_v2 }
 0x15f   : > { %10039 = vmatmul.mubr.msk.f32.vlgmr.msra.gmra.mxu0 %vm2370_vm2, %v1176_v20  ;;  %10044 = vmatmul.mubr.msk.f32.vlgmr.msra.gmra.mxu1 %vm2370_vm2, %v1246_v21 }
 0x160   : > { %10048 = vmatprep.mubr.msk.f32.mxu0 %vm10902_vm1, %v10901_v2  ;;  %10053 = vmatprep.mubr.msk.f32.mxu1 %vm10902_vm1, %v10901_v2 }
 0x16c   : > { %v1876_v40 = vpop.f32.mrf.mxu0 }
 0x16d   : > { %10047 = vmatpush3.msra.mxu0 %v1876_v40 }
 0x16e   : > { %v9872_v41 = vpop.f32.mrf.mxu0  ;;  %10056 = vmatprep.subr.mxu0 %v10901_v2 }
 0x171   : > { %v1946_v42 = vpop.f32.mrf.mxu1 }
 0x172   : > { %10052 = vmatpush3.msra.mxu1 %v1946_v42 }
 0x173   : > { %v9891_v43 = vpop.f32.mrf.mxu1  ;;  %10061 = vmatprep.subr.mxu1 %v10901_v2 }
 0x17c   : > { %v11920_v44 = vpop.f32.mrf.mxu0 }
 0x17e   : > { %v9910_v45 = vpop.f32.mrf.mxu0 }
 0x185   : > { %v11922_v46 = vpop.f32.mrf.mxu1 }
 0x187   : > { %v9929_v47 = vpop.f32.mrf.mxu1 }
 0x18c   : > { %v11924_v17 = vpop.f32.mrf.mxu0 }
 0x18e   : > { %v9948_v48 = vpop.f32.mrf.mxu0 }
 0x199   : > { %v11926_v49 = vpop.f32.mrf.mxu1 }
 0x19b   : > { %v9967_v51 = vpop.f32.mrf.mxu1 }
 0x19c   : > { %v11928_v52 = vpop.f32.mrf.mxu0 }
 0x19e   : > { %v9986_v53 = vpop.f32.mrf.mxu0 }
 0x1aa   : > { %v11930_v54 = vpop.f32.mrf.mxu1 }
 0x1ac   : > { %v10005_v55 = vpop.f32.mrf.mxu1 }
 0x1e8   : > { %v2443_v57 = vpop.f32.mrf.mxu0 }
 0x1e9   : > { %v2979_v58 = vmul.f32 0.35355338, %v2443_v57 }
 0x1ea   : > { %v10010_v59 = vpop.f32.mrf.mxu0 }
 0x1eb   : > { %v2987_v60 = vsel %vm485_vm3, -1e+09, %v2979_v58 }
 0x1ec   : > { %v2519_v61 = vpop.f32.mrf.mxu0  ;;  %v2995_v62 = vsel %vm2370_vm2, %v2987_v60, -inf }
 0x1ed   : > { %v2980_v63 = vmul.f32 0.35355338, %v2519_v61  ;;  %2996 = vmax.xlane.f32.xlu0 %v2995_v62 }
 0x1ee   : > { %v10015_v0 = vpop.f32.mrf.mxu0 }
 0x1ef   : > { %v2988_v1 = vsel %vm485_vm3, -1e+09, %v2980_v63 }
 0x1f0   : > { %v2998_v3 = vsel %vm2370_vm2, %v2988_v1, -inf }
 0x1f1   : > { %2999 = vmax.xlane.f32.xlu0 %v2998_v3 }
 0x1fa   : > { %v2595_v4 = vpop.f32.mrf.mxu0 }
 0x1fb   : > { %v2981_v5 = vmul.f32 0.35355338, %v2595_v4 }
 0x1fc   : > { %v10020_v6 = vpop.f32.mrf.mxu0 }
 0x1fd   : > { %v2989_v7 = vsel %vm485_vm3, -1e+09, %v2981_v5 }
 0x1fe   : > { %v2671_v8 = vpop.f32.mrf.mxu0  ;;  %v3001_v9 = vsel %vm2370_vm2, %v2989_v7, -inf }
 0x1ff   : > { %v2982_v10 = vmul.f32 0.35355338, %v2671_v8  ;;  %3002 = vmax.xlane.f32.xlu1 %v3001_v9 }
 0x200   : > { %v10025_v11 = vpop.f32.mrf.mxu0 }
 0x201   : > { %v2990_v12 = vsel %vm485_vm3, -1e+09, %v2982_v10 }
 0x202   : > { %v3004_v13 = vsel %vm2370_vm2, %v2990_v12, -inf }
 0x203   : > { %3005 = vmax.xlane.f32.xlu1 %v3004_v13 }
 0x20d   : > { %v2747_v14 = vpop.f32.mrf.mxu0  ;;  %v2823_v15 = vpop.f32.mrf.mxu1 }
 0x20e   : > { %v2983_v16 = vmul.f32 0.35355338, %v2747_v14  ;;  %v2984_v18 = vmul.f32 0.35355338, %v2823_v15 }
 0x20f   : > { %v10030_v19 = vpop.f32.mrf.mxu0  ;;  %v10035_v20 = vpop.f32.mrf.mxu1 }
 0x210   : > { %v2992_v21 = vsel %vm485_vm3, -1e+09, %v2984_v18  ;;  %v2991_v22 = vsel %vm485_vm3, -1e+09, %v2983_v16 }
 0x211   : > { %v3010_v23 = vsel %vm2370_vm2, %v2992_v21, -inf  ;;  %v3007_v24 = vsel %vm2370_vm2, %v2991_v22, -inf }
 0x212   : > { %3011 = vmax.xlane.f32.xlu1 %v3010_v23  ;;  %3008 = vmax.xlane.f32.xlu0 %v3007_v24 }
 0x21f   : > { %v2899_v25 = vpop.f32.mrf.mxu0  ;;  %v2975_v26 = vpop.f32.mrf.mxu1 }
 0x220   : > { %v2985_v27 = vmul.f32 0.35355338, %v2899_v25  ;;  %v2986_v28 = vmul.f32 0.35355338, %v2975_v26 }
 0x221   : > { %v10040_v29 = vpop.f32.mrf.mxu0  ;;  %v10045_v30 = vpop.f32.mrf.mxu1 }
 0x222   : > { %v2994_v31 = vsel %vm485_vm3, -1e+09, %v2986_v28  ;;  %v2993_v32 = vsel %vm485_vm3, -1e+09, %v2985_v27 }
 0x223   : > { %v3016_v33 = vsel %vm2370_vm2, %v2994_v31, -inf  ;;  %v3013_v34 = vsel %vm2370_vm2, %v2993_v32, -inf }
 0x224   : > { %3017 = vmax.xlane.f32.xlu1 %v3016_v33  ;;  %3014 = vmax.xlane.f32.xlu0 %v3013_v34 }
 0x276   : > { %v2997_v35 = vpop.xlane.xlu0 %2996 }
 0x277   : > { %v3019_v36 = vsub.f32 %v2987_v60, %v2997_v35 }
 0x279   : > { %v3027_v37 = vmul.f32 1.442695, %v3019_v36 }
 0x27a   : > { %v3000_v38 = vpop.xlane.xlu0 %2999 }
 0x27b   : > { %10820 = vpow2.f32 %v3027_v37  ;;  %v3020_v39 = vsub.f32 %v2988_v1, %v3000_v38 }
 0x27d   : > { %v3029_v40 = vmul.f32 1.442695, %v3020_v39 }
 0x27f   : > { %10822 = vpow2.f32 %v3029_v40  ;;  %v680_v40 = vld [vmem:[%s13396_s5 + $0x10] sm:$0xff] }
 0x288   : > { %v10821_v41 = vpop.eup %10820  ;;  %v3003_v42 = vpop.xlane.xlu1 %3002 }
 0x289   : > { %v3021_v43 = vsub.f32 %v2989_v7, %v3003_v42  ;;  %v3043_v45 = vsel %vm2370_vm2, %v10821_v41, 0.0 }
 0x28a   : > { %3044 = vadd.xlane.f32.xlu0 %v3043_v45 }
 0x28b   : > { %v3031_v47 = vmul.f32 1.442695, %v3021_v43  ;;  %v681_v43 = vld [vmem:[%s13396_s5 + $0x18] sm:$0xff] }
 0x28c   : > { %v10823_v48 = vpop.eup %10822  ;;  %v3006_v51 = vpop.xlane.xlu1 %3005 }
 0x28d   : > { %10824 = vpow2.f32 %v3031_v47  ;;  %v3022_v53 = vsub.f32 %v2990_v12, %v3006_v51  ;;  %v3046_v55 = vsel %vm2370_vm2, %v10823_v48, 0.0 }
 0x28e   : > { %3047 = vadd.xlane.f32.xlu1 %v3046_v55  ;;  %v683_v55 = vld [vmem:[%s13396_s5 + $0x28] sm:$0xff] }
 0x28f   : > { %v3033_v57 = vmul.f32 1.442695, %v3022_v53 }
 0x291   : > { %10826 = vpow2.f32 %v3033_v57 }
 0x29a   : > { %v10825_v58 = vpop.eup %10824 }
 0x29b   : > { %v3012_v59 = vpop.xlane.xlu1 %3011  ;;  %v3009_v60 = vpop.xlane.xlu0 %3008  ;;  %v3049_v61 = vsel %vm2370_vm2, %v10825_v58, 0.0 }
 0x29c   : > { %v3024_v62 = vsub.f32 %v2992_v21, %v3012_v59  ;;  %v3023_v63 = vsub.f32 %v2991_v22, %v3009_v60  ;;  %3050 = vadd.xlane.f32.xlu0 %v3049_v61  ;;  %v685_v59 = vld [vmem:[%s13396_s5 + $0x38] sm:$0xff]  ;;  %v684_v61 = vld [vmem:[%s13396_s5 + $0x30] sm:$0xff] }
 0x29e   : > { %v10827_v0 = vpop.eup %10826  ;;  %v3037_v1 = vmul.f32 1.442695, %v3024_v62  ;;  %v3035_v3 = vmul.f32 1.442695, %v3023_v63 }
 0x29f   : > { %v3052_v4 = vsel %vm2370_vm2, %v10827_v0, 0.0 }
 0x2a0   : > { %10828 = vpow2.f32 %v3037_v1  ;;  %3053 = vadd.xlane.f32.xlu1 %v3052_v4 }
 0x2a1   : > { %10830 = vpow2.f32 %v3035_v3 }
 0x2ad   : > { %v10829_v5 = vpop.eup %10828  ;;  %v3018_v6 = vpop.xlane.xlu1 %3017 }
 0x2ae   : > { %v3015_v7 = vpop.xlane.xlu0 %3014  ;;  %v10831_v8 = vpop.eup %10830  ;;  %v3026_v9 = vsub.f32 %v2994_v31, %v3018_v6  ;;  %v3058_v11 = vsel %vm2370_vm2, %v10829_v5, 0.0 }
 0x2af   : > { %v3025_v10 = vsub.f32 %v2993_v32, %v3015_v7  ;;  %3059 = vadd.xlane.f32.xlu1 %v3058_v11  ;;  %v3055_v12 = vsel %vm2370_vm2, %v10831_v8, 0.0 }
 0x2b0   : > { %v3041_v13 = vmul.f32 1.442695, %v3026_v9  ;;  %3056 = vadd.xlane.f32.xlu0 %v3055_v12 }
 0x2b1   : > { %v3039_v14 = vmul.f32 1.442695, %v3025_v10 }
 0x2b2   : > { %10832 = vpow2.f32 %v3041_v13 }
 0x2b3   : > { %10834 = vpow2.f32 %v3039_v14 }
 0x2bf   : > { %v10833_v15 = vpop.eup %10832 }
 0x2c0   : > { %v10835_v16 = vpop.eup %10834  ;;  %v3064_v18 = vsel %vm2370_vm2, %v10833_v15, 0.0 }
 0x2c1   : > { %3065 = vadd.xlane.f32.xlu1 %v3064_v18  ;;  %v3061_v19 = vsel %vm2370_vm2, %v10835_v16, 0.0 }
 0x2c2   : > { %3062 = vadd.xlane.f32.xlu0 %v3061_v19 }
 0x313   : > { %v3045_v20 = vpop.xlane.xlu0 %3044 }
 0x314   : > { %10836 = vrcp.f32 %v3045_v20 }
 0x317   : > { %v3048_v21 = vpop.xlane.xlu1 %3047 }
 0x318   : > { %10838 = vrcp.f32 %v3048_v21 }
 0x321   : > { %v10837_v22 = vpop.eup %10836 }
 0x322   : > { %v3068_v23 = vmul.f32 %v10837_v22, %v10821_v41 }
 0x324   : > { %10049 = vmatmul.mubr.msk.f32.vlgmr.msra.gmra.mxu0 %vm2370_vm2, %v3068_v23 }
 0x325   : > { %v10839_v24 = vpop.eup %10838  ;;  %v3051_v25 = vpop.xlane.xlu0 %3050  ;;  %10057 = vmatpush3.msra.mxu0 %v11920_v44  ;;  %10058 = vmatprep.mubr.msk.f32.mxu0 %vm10902_vm1, %v10901_v2 }
 0x326   : > { %10840 = vrcp.f32 %v3051_v25  ;;  %v3070_v26 = vmul.f32 %v10839_v24, %v10823_v48  ;;  %10066 = vmatprep.subr.mxu0 %v10901_v2  ;;  %v682_v48 = vld [vmem:[%s13396_s5 + $0x20] sm:$0xff] }
 0x328   : > { %10054 = vmatmul.mubr.msk.f32.vlgmr.msra.gmra.mxu1 %vm2370_vm2, %v3070_v26 }
 0x329   : > { %v3054_v27 = vpop.xlane.xlu1 %3053  ;;  %10062 = vmatpush3.msra.mxu1 %v11922_v46  ;;  %10063 = vmatprep.mubr.msk.f32.mxu1 %vm10902_vm1, %v10901_v2 }
 0x32a   : > { %10842 = vrcp.f32 %v3054_v27  ;;  %10071 = vmatprep.subr.mxu1 %v10901_v2 }
 0x333   : > { %v10841_v28 = vpop.eup %10840 }
 0x334   : > { %v3072_v44 = vmul.f32 %v10841_v28, %v10825_v58 }
 0x336   : > { %10059 = vmatmul.mubr.msk.f32.vlgmr.msra.gmra.mxu0 %vm2370_vm2, %v3072_v44 }
 0x337   : > { %v10843_v29 = vpop.eup %10842  ;;  %10067 = vmatpush3.msra.mxu0 %v11924_v17  ;;  %10068 = vmatprep.mubr.msk.f32.mxu0 %vm10902_vm1, %v10901_v2 }
 0x338   : > { %v3060_v30 = vpop.xlane.xlu1 %3059  ;;  %v3074_v31 = vmul.f32 %v10843_v29, %v10827_v0  ;;  %10076 = vmatprep.subr.mxu0 %v10901_v2 }
 0x339   : > { %10844 = vrcp.f32 %v3060_v30  ;;  %v3057_v46 = vpop.xlane.xlu0 %3056 }
 0x33a   : > { %10846 = vrcp.f32 %v3057_v46  ;;  %10064 = vmatmul.mubr.msk.f32.vlgmr.msra.gmra.mxu1 %vm2370_vm2, %v3074_v31 }
 0x33b   : > { %10072 = vmatpush3.msra.mxu1 %v11926_v49  ;;  %10073 = vmatprep.mubr.msk.f32.mxu1 %vm10902_vm1, %v10901_v2 }
 0x33c   : > { %10081 = vmatprep.subr.mxu1 %v10901_v2 }
 0x346   : > { %v10845_v17 = vpop.eup %10844 }
 0x347   : > { %v10847_v32 = vpop.eup %10846  ;;  %v3078_v33 = vmul.f32 %v10845_v17, %v10829_v5 }
 0x348   : > { %v3076_v34 = vmul.f32 %v10847_v32, %v10831_v8 }
 0x349   : > { %10074 = vmatmul.mubr.msk.f32.vlgmr.msra.gmra.mxu1 %vm2370_vm2, %v3078_v33 }
 0x34a   : > { %v3066_v35 = vpop.xlane.xlu1 %3065  ;;  %10069 = vmatmul.mubr.msk.f32.vlgmr.msra.gmra.mxu0 %vm2370_vm2, %v3076_v34  ;;  %10082 = vmatpush3.msra.mxu1 %v11930_v54  ;;  %v679_v54 = vld [vmem:[%s13396_s5 + $0x8] sm:$0xff] }
 0x34b   : > { %10848 = vrcp.f32 %v3066_v35  ;;  %v3063_v36 = vpop.xlane.xlu0 %3062  ;;  %10077 = vmatpush3.msra.mxu0 %v11928_v52  ;;  %10078 = vmatprep.mubr.msk.f32.mxu0 %vm10902_vm1, %v10901_v2  ;;  %v678_v52 = vld [vmem:[%s13396_s5] sm:$0xff] }
 0x34c   : > { %10850 = vrcp.f32 %v3063_v36  ;;  %10083 = vmatprep.mubr.msk.f32.mxu1 %vm10902_vm1, %v10901_v2  ;;  %10086 = vmatprep.subr.mxu0 %v10901_v2 }
 0x34d   : > { %10091 = vmatprep.subr.mxu1 %v10901_v2 }
 0x358   : > { %v10849_v49 = vpop.eup %10848 }
 0x359   : > { %v10851_v37 = vpop.eup %10850  ;;  %v3082_v38 = vmul.f32 %v10849_v49, %v10833_v15 }
 0x35a   : > { %v3080_v39 = vmul.f32 %v10851_v37, %v10835_v16 }
 0x35b   : > { %10084 = vmatmul.mubr.msk.f32.vlgmr.msra.gmra.mxu1 %vm2370_vm2, %v3082_v38 }
 0x35c   : > { %10079 = vmatmul.mubr.msk.f32.vlgmr.msra.gmra.mxu0 %vm2370_vm2, %v3080_v39  ;;  %10093 = vmatprep.mubr.msk.f32.mxu1 %vm10902_vm1, %v10901_v2 }
 0x35d   : > { %10088 = vmatprep.mubr.msk.f32.mxu0 %vm10902_vm1, %v10901_v2  ;;  %10087 = vmatpush3.msra.mxu0 %v678_v52 }
 0x35e   : > { %10096 = vmatprep.subr.mxu0 %v10901_v2  ;;  %10092 = vmatpush3.msra.mxu1 %v679_v54  ;;  %v4304_v54 = vld [vmem:[%s13399_s8 + $0x38] sm:$0xff] }
 0x35f   : > { %10101 = vmatprep.subr.mxu1 %v10901_v2 }
 0x3e4   : > { %v3152_v41 = vpop.f32.mrf.mxu0 }
 0x3e5   : > { %10089 = vmatmul.mubr.msk.f32.vlgmr.msra.gmra.mxu0 %vm2370_vm2, %v3152_v41  ;;  %v4301_v41 = vld [vmem:[%s13399_s8 + $0x20] sm:$0xff] }
 0x3e6   : > { %v10050_v42 = vpop.f32.mrf.mxu0  ;;  %10097 = vmatpush3.msra.mxu0 %v680_v40  ;;  %10098 = vmatprep.mubr.msk.f32.mxu0 %vm10902_vm1, %v10901_v2  ;;  %v4302_v40 = vld [vmem:[%s13399_s8 + $0x28] sm:$0xff] }
 0x3e7   : > { %10106 = vmatprep.subr.mxu0 %v10901_v2  ;;  %v4300_v42 = vld [vmem:[%s13399_s8 + $0x18] sm:$0xff] }
 0x3e8   : > { %v3225_v45 = vpop.f32.mrf.mxu1 }
 0x3e9   : > { %10094 = vmatmul.mubr.msk.f32.vlgmr.msra.gmra.mxu1 %vm2370_vm2, %v3225_v45  ;;  %v4298_v45 = vld [vmem:[%s13399_s8 + $0x8] sm:$0xff] }
 0x3ea   : > { %v10055_v47 = vpop.f32.mrf.mxu1  ;;  %10102 = vmatpush3.msra.mxu1 %v681_v43  ;;  %10103 = vmatprep.mubr.msk.f32.mxu1 %vm10902_vm1, %v10901_v2  ;;  %v4299_v43 = vld [vmem:[%s13399_s8 + $0x10] sm:$0xff] }
 0x3eb   : > { %10111 = vmatprep.subr.mxu1 %v10901_v2  ;;  %v4297_v47 = vld [vmem:[%s13399_s8] sm:$0xff] }
 0x3f6   : > { %v3298_v51 = vpop.f32.mrf.mxu0 }
 0x3f7   : > { %10099 = vmatmul.mubr.msk.f32.vlgmr.msra.gmra.mxu0 %vm2370_vm2, %v3298_v51  ;;  %v4320_v51 = vld [vmem:[%s13401_s10 + $0x70] sm:$0xff] }
 0x3f8   : > { %v10060_v53 = vpop.f32.mrf.mxu0  ;;  %10107 = vmatpush3.msra.mxu0 %v682_v48  ;;  %10108 = vmatprep.mubr.msk.f32.mxu0 %vm10902_vm1, %v10901_v2  ;;  %v4321_v48 = vld [vmem:[%s13401_s10 + $0x78] sm:$0xff] }
 0x3f9   : > { %10116 = vmatprep.subr.mxu0 %v10901_v2  ;;  %v4319_v53 = vld [vmem:[%s13401_s10 + $0x68] sm:$0xff] }
 0x3fa   : > { %v3371_v57 = vpop.f32.mrf.mxu1 }
 0x3fb   : > { %10104 = vmatmul.mubr.msk.f32.vlgmr.msra.gmra.mxu1 %vm2370_vm2, %v3371_v57  ;;  %v4317_v57 = vld [vmem:[%s13401_s10 + $0x58] sm:$0xff] }
 0x3fc   : > { %v10065_v58 = vpop.f32.mrf.mxu1  ;;  %10112 = vmatpush3.msra.mxu1 %v683_v55  ;;  %10113 = vmatprep.mubr.msk.f32.mxu1 %vm10902_vm1, %v10901_v2  ;;  %v4318_v55 = vld [vmem:[%s13401_s10 + $0x60] sm:$0xff] }
 0x3fd   : > { %10121 = vmatprep.subr.mxu1 %v10901_v2  ;;  %v4316_v58 = vld [vmem:[%s13401_s10 + $0x50] sm:$0xff] }
 0x409   : > { %v3517_v60 = vpop.f32.mrf.mxu1 }
 0x40a   : > { %v3444_v62 = vpop.f32.mrf.mxu0  ;;  %10114 = vmatmul.mubr.msk.f32.vlgmr.msra.gmra.mxu1 %vm2370_vm2, %v3517_v60  ;;  %v4314_v60 = vld [vmem:[%s13401_s10 + $0x40] sm:$0xff] }
 0x40b   : > { %10109 = vmatmul.mubr.msk.f32.vlgmr.msra.gmra.mxu0 %vm2370_vm2, %v3444_v62  ;;  %v10075_v63 = vpop.f32.mrf.mxu1  ;;  %10122 = vmatpush3.msra.mxu1 %v685_v59  ;;  %v4315_v59 = vld [vmem:[%s13401_s10 + $0x48] sm:$0xff]  ;;  %v4312_v62 = vld [vmem:[%s13401_s10 + $0x30] sm:$0xff] }
 0x40c   : > { %v10070_v0 = vpop.f32.mrf.mxu0  ;;  %10117 = vmatpush3.msra.mxu0 %v684_v61  ;;  %10118 = vmatprep.mubr.msk.f32.mxu0 %vm10902_vm1, %v10901_v2  ;;  %v4313_v61 = vld [vmem:[%s13401_s10 + $0x38] sm:$0xff]  ;;  %v4311_v63 = vld [vmem:[%s13401_s10 + $0x28] sm:$0xff] }
 0x40d   : > { %10123 = vmatprep.mubr.msk.f32.mxu1 %vm10902_vm1, %v10901_v2  ;;  %10126 = vmatprep.subr.mxu0 %v10901_v2  ;;  %v4310_v0 = vld [vmem:[%s13401_s10 + $0x20] sm:$0xff] }
 0x40e   : > { %10145 = vmatprep.subr.mxu1 %v10901_v2 }
 0x41b   : > { %v3663_v1 = vpop.f32.mrf.mxu1 }
 0x41c   : > { %v3590_v3 = vpop.f32.mrf.mxu0  ;;  %10124 = vmatmul.mubr.msk.f32.vlgmr.msra.gmra.mxu1 %vm2370_vm2, %v3663_v1  ;;  %v4309_v1 = vld [vmem:[%s13401_s10 + $0x18] sm:$0xff] }
 0x41d   : > { %10119 = vmatmul.mubr.msk.f32.vlgmr.msra.gmra.mxu0 %vm2370_vm2, %v3590_v3  ;;  %v10085_v4 = vpop.f32.mrf.mxu1  ;;  %10177 = vmatprep.mubr.msk.f32.mxu1 %vm10902_vm1, %v10901_v2 }
 0x41e   : > { %v10080_v5 = vpop.f32.mrf.mxu0  ;;  %10142 = vmatprep.mubr.msk.f32.mxu0 %vm10902_vm1, %v10901_v2  ;;  %10127 = vmatpush3.msra.mxu0 %v4304_v54  ;;  %v8692_v54 = vld [vmem:[%s13393_s2 + $0x288] sm:$0xff] }
 0x41f   : > { %10128 = vmatprep.subr.mxu0 %v10901_v2  ;;  %10146 = vmatpush3.msra.mxu1 %v4321_v48 }
 0x420   : > { %10147 = vmatprep.subr.mxu1 %v10901_v2 }
 0x421   : > { %10148 = vmatpush3.msra.mxu1 %v4320_v51  ;;  %v8674_v51 = vld [vmem:[%s13404_s13] ss:$0 sm:$0xff] }
 0x422   : > { %10149 = vmatprep.subr.mxu1 %v10901_v2 }
 0x423   : > { %10150 = vmatpush3.msra.mxu1 %v4319_v53 }
 0x424   : > { %10151 = vmatprep.subr.mxu1 %v10901_v2 }
 0x425   : > { %10152 = vmatpush3.msra.mxu1 %v4318_v55 }
 0x426   : > { %10153 = vmatprep.subr.mxu1 %v10901_v2 }
 0x427   : > { %10154 = vmatpush3.msra.mxu1 %v4317_v57  ;;  %v8690_v57 = vld [vmem:[%s13393_s2 + $0x278] sm:$0xff] }
 0x428   : > { %10155 = vmatprep.subr.mxu1 %v10901_v2 }
 0x429   : > { %10156 = vmatpush3.msra.mxu1 %v4316_v58  ;;  %v8714_v58 = vld [vmem:[%s13393_s2 + $0x338] sm:$0xff] }
 0x42a   : > { %10157 = vmatprep.subr.mxu1 %v10901_v2 }
 0x42b   : > { %10158 = vmatpush3.msra.mxu1 %v4315_v59  ;;  %v8689_v59 = vld [vmem:[%s13393_s2 + $0x270] sm:$0xff] }
 0x42c   : > { %10159 = vmatprep.subr.mxu1 %v10901_v2 }
 0x42d   : > { %10160 = vmatpush3.msra.mxu1 %v4314_v60  ;;  %v8713_v60 = vld [vmem:[%s13393_s2 + $0x330] sm:$0xff] }
 0x42e   : > { %10161 = vmatprep.subr.mxu1 %v10901_v2 }
 0x42f   : > { %10162 = vmatpush3.msra.mxu1 %v4313_v61  ;;  %v8688_v61 = vld [vmem:[%s13393_s2 + $0x268] sm:$0xff] }
 0x430   : > { %10163 = vmatprep.subr.mxu1 %v10901_v2 }
 0x431   : > { %10164 = vmatpush3.msra.mxu1 %v4312_v62  ;;  %v8712_v62 = vld [vmem:[%s13393_s2 + $0x328] sm:$0xff] }
 0x432   : > { %10165 = vmatprep.subr.mxu1 %v10901_v2 }
 0x433   : > { %10166 = vmatpush3.msra.mxu1 %v4311_v63  ;;  %v8687_v63 = vld [vmem:[%s13393_s2 + $0x260] sm:$0xff] }
 0x434   : > { %10167 = vmatprep.subr.mxu1 %v10901_v2 }
 0x435   : > { %10168 = vmatpush3.msra.mxu1 %v4310_v0  ;;  %v8711_v0 = vld [vmem:[%s13393_s2 + $0x320] sm:$0xff] }
 0x436   : > { %10169 = vmatprep.subr.mxu1 %v10901_v2 }
 0x437   : > { %10170 = vmatpush3.msra.mxu1 %v4309_v1  ;;  %v8686_v1 = vld [vmem:[%s13393_s2 + $0x258] sm:$0xff] }
 0x438   : > { %10171 = vmatprep.subr.mxu1 %v10901_v2 }
 0x4a5   : > { %v3736_v6 = vpop.f32.mrf.mxu0 }
 0x4a6   : > { %v4251_v20 = vsel %vm686_vm0, %v3736_v6, 0.0 }
 0x4a7   : > { %v10090_v7 = vpop.f32.mrf.mxu0 }
 0x4a8   : > { %v8668_v7 = vld [vmem:[%s13397_s6] ss:$0 sm:$0xff] }
 0x4a9   : > { %v3809_v8 = vpop.f32.mrf.mxu1 }
 0x4aa   : > { %v4252_v19 = vsel %vm686_vm0, %v3809_v8, 0.0 }
 0x4ab   : > { %v10095_v9 = vpop.f32.mrf.mxu1  ;;  %v4253_v22 = vadd.f32 %v4252_v19, %v4251_v20 }
 0x4ac   : > { %v8669_v9 = vld [vmem:[%s13398_s7] ss:$0 sm:$0xff] }
 0x4b7   : > { %v3882_v10 = vpop.f32.mrf.mxu0 }
 0x4b8   : > { %v4254_v21 = vsel %vm686_vm0, %v3882_v10, 0.0 }
 0x4b9   : > { %v10100_v11 = vpop.f32.mrf.mxu0  ;;  %v4255_v24 = vadd.f32 %v4254_v21, %v4253_v22  ;;  %v8672_v21 = vld [vmem:[%s13402_s11] ss:$0 sm:$0xff] }
 0x4bb   : > { %v3955_v12 = vpop.f32.mrf.mxu1 }
 0x4bc   : > { %v4256_v23 = vsel %vm686_vm0, %v3955_v12, 0.0  ;;  %v4308_v12 = vld [vmem:[%s13401_s10 + $0x10] sm:$0xff] }
 0x4bd   : > { %v10105_v13 = vpop.f32.mrf.mxu1  ;;  %v4257_v26 = vadd.f32 %v4256_v23, %v4255_v24  ;;  %10172 = vmatpush3.msra.mxu1 %v4308_v12  ;;  %v8705_v12 = vld [vmem:[%s13393_s2 + $0x2f0] sm:$0xff] }
 0x4be   : > { %10173 = vmatprep.subr.mxu1 %v10901_v2  ;;  %v4307_v13 = vld [vmem:[%s13401_s10 + $0x8] sm:$0xff] }
 0x4bf   : > { %10174 = vmatpush3.msra.mxu1 %v4307_v13  ;;  %v8729_v13 = vld [vmem:[%s13393_s2 + $0x3b0] sm:$0xff] }
 0x4c0   : > { %10175 = vmatprep.subr.mxu1 %v10901_v2 }
 0x4ca   : > { %v4101_v14 = vpop.f32.mrf.mxu1 }
 0x4cb   : > { %v4028_v15 = vpop.f32.mrf.mxu0  ;;  %v4260_v28 = vsel %vm686_vm0, %v4101_v14, 0.0  ;;  %v4306_v14 = vld [vmem:[%s13401_s10] sm:$0xff] }
 0x4cc   : > { %v10115_v16 = vpop.f32.mrf.mxu1  ;;  %v4258_v25 = vsel %vm686_vm0, %v4028_v15, 0.0  ;;  %10176 = vmatpush3.msra.mxu1 %v4306_v14  ;;  %v8670_v15 = vld [vmem:[%s13400_s9] ss:$0 sm:$0xff]  ;;  %v8704_v14 = vld [vmem:[%s13393_s2 + $0x2e8] sm:$0xff] }
 0x4cd   : > { %v10110_v18 = vpop.f32.mrf.mxu0  ;;  %v4259_v27 = vadd.f32 %v4258_v25, %v4257_v26  ;;  %10218 = vmatprep.subr.mxu1 %v10901_v2 }
 0x4cf   : > { %v4261_v29 = vadd.f32 %v4260_v28, %v4259_v27 }
 0x4dc   : > { %v4247_v44 = vpop.f32.mrf.mxu1 }
 0x4dd   : > { %v4174_v30 = vpop.f32.mrf.mxu0  ;;  %v4264_v33 = vsel %vm686_vm0, %v4247_v44, 0.0 }
 0x4de   : > { %v4262_v31 = vsel %vm686_vm0, %v4174_v30, 0.0  ;;  %v10125_v46 = vpop.f32.mrf.mxu1 }
 0x4df   : > { %v4263_v17 = vadd.f32 %v4262_v31, %v4261_v29  ;;  %v10120_v32 = vpop.f32.mrf.mxu0  ;;  %v8682_v31 = vld [vmem:[%s13393_s2 + $0x238] sm:$0xff] }
 0x4e0   : > { %v8698_v46 = vld [vmem:[%s13393_s2 + $0x2b8] sm:$0xff]  ;;  %v8697_v32 = vld [vmem:[%s13393_s2 + $0x2b0] sm:$0xff] }
 0x4e1   : > { %v4265_v34 = vadd.f32 %v4264_v33, %v4263_v17  ;;  %v8681_v17 = vld [vmem:[%s13393_s2 + $0x230] sm:$0xff]  ;;  %v8680_v33 = vld [vmem:[%s13393_s2 + $0x228] sm:$0xff] }
 0x4e3   : > { %v4268_v35 = vadd.f32 %v11780_v50, %v4265_v34  ;;  %v4303_v50 = vld [vmem:[%s13399_s8 + $0x30] sm:$0xff]  ;;  %v8696_v34 = vld [vmem:[%s13393_s2 + $0x2a8] sm:$0xff] }
 0x4e4   : > { %10129 = vmatpush3.msra.mxu0 %v4303_v50  ;;  %v8675_v50 = vld [vmem:[%s13393_s2 + $0x200] sm:$0xff] }
 0x4e5   : > { %v4269_v36 = vsel %vm686_vm0, %v4268_v35, 0.0  ;;  %10130 = vmatprep.subr.mxu0 %v10901_v2 }
 0x4e6   : > { %4270 = vadd.xlane.f32.xlu0 %v4269_v36  ;;  %10131 = vmatpush3.msra.mxu0 %v4302_v40  ;;  %v8695_v36 = vld [vmem:[%s13393_s2 + $0x2a0] sm:$0xff] }
 0x4e7   : > { %10132 = vmatprep.subr.mxu0 %v10901_v2  ;;  %v8691_v40 = vld [vmem:[%s13393_s2 + $0x280] sm:$0xff] }
 0x4e8   : > { %10133 = vmatpush3.msra.mxu0 %v4301_v41 }
 0x4e9   : > { %10134 = vmatprep.subr.mxu0 %v10901_v2 }
 0x4ea   : > { %10135 = vmatpush3.msra.mxu0 %v4300_v42 }
 0x4eb   : > { %10136 = vmatprep.subr.mxu0 %v10901_v2 }
 0x4ec   : > { %10137 = vmatpush3.msra.mxu0 %v4299_v43 }
 0x4ed   : > { %10138 = vmatprep.subr.mxu0 %v10901_v2 }
 0x4ee   : > { %10139 = vmatpush3.msra.mxu0 %v4298_v45 }
 0x4ef   : > { %10140 = vmatprep.subr.mxu0 %v10901_v2 }
 0x4f0   : > { %10141 = vmatpush3.msra.mxu0 %v4297_v47  ;;  %v8673_v47 = vld [vmem:[%s13403_s12] ss:$0 sm:$0xff] }
 0x4f1   : > { %10180 = vmatprep.subr.mxu0 %v10901_v2 }
 0x56f   : > { %v4271_v49 = vpop.xlane.xlu0 %4270 }
 0x570   : > { %v4273_v37 = vmul.f32 0.015625, %v4271_v49  ;;  %v8678_v49 = vld [vmem:[%s13393_s2 + $0x218] sm:$0xff] }
 0x572   : > { %v12073_v38 = vsub.f32 %v4268_v35, %v4273_v37  ;;  %v8679_v35 = vld [vmem:[%s13393_s2 + $0x220] sm:$0xff]  ;;  %v8694_v37 = vld [vmem:[%s13393_s2 + $0x298] sm:$0xff] }
 0x574   : > { %v4275_v39 = vmul.f32 %v12073_v38, %v12073_v38 }
 0x576   : > { %v4276_v52 = vsel %vm686_vm0, %v4275_v39, 0.0  ;;  %v8693_v39 = vld [vmem:[%s13393_s2 + $0x290] sm:$0xff] }
 0x577   : > { %4277 = vadd.xlane.f32.xlu1 %v4276_v52  ;;  %v8676_v52 = vld [vmem:[%s13393_s2 + $0x208] sm:$0xff] }
 0x600   : > { %v4278_v3 = vpop.xlane.xlu1 %4277 }
 0x601   : > { %v4279_v4 = vmul.f32 0.015625, %v4278_v3  ;;  %v8710_v3 = vld [vmem:[%s13393_s2 + $0x318] sm:$0xff] }
 0x603   : > { %v4280_v5 = vadd.f32 1e-06, %v4279_v4  ;;  %v8685_v4 = vld [vmem:[%s13393_s2 + $0x250] sm:$0xff] }
 0x605   : > { %10852 = vrsqrt.f32 %v4280_v5  ;;  %v8709_v5 = vld [vmem:[%s13393_s2 + $0x310] sm:$0xff] }
 0x612   : > { %v10853_v6 = vpop.eup %10852 }
 0x613   : > { %v4282_v8 = vmul.f32 %v10853_v6, %v12073_v38  ;;  %v8677_v38 = vld [vmem:[%s13393_s2 + $0x210] sm:$0xff]  ;;  %v8684_v6 = vld [vmem:[%s13393_s2 + $0x248] sm:$0xff] }
 0x615   : > { %v4289_v10 = vmul.f32 %v8668_v7, %v4282_v8  ;;  %v8708_v7 = vld [vmem:[%s13393_s2 + $0x308] sm:$0xff]  ;;  %v8683_v8 = vld [vmem:[%s13393_s2 + $0x240] sm:$0xff] }
 0x617   : > { %v4296_v11 = vadd.f32 %v8669_v9, %v4289_v10  ;;  %v8707_v9 = vld [vmem:[%s13393_s2 + $0x300] sm:$0xff]  ;;  %v8706_v10 = vld [vmem:[%s13393_s2 + $0x2f8] sm:$0xff] }
 0x619   : > { %10143 = vmatmul.mubr.msk.f32.vlgmr.msra.gmra.mxu0 %vm686_vm0, %v4296_v11 }
 0x61a   : > { %10196 = vmatprep.mubr.msk.f32.mxu0 %vm10902_vm1, %v10901_v2  ;;  %10181 = vmatpush3.msra.mxu0 %v8682_v31  ;;  %v8744_v31 = vld [vmem:[%s13394_s3 + $0x228] sm:$0xff] }
 0x61b   : > { %10182 = vmatprep.subr.mxu0 %v10901_v2 }
 0x61c   : > { %10183 = vmatpush3.msra.mxu0 %v8681_v17  ;;  %v8743_v17 = vld [vmem:[%s13394_s3 + $0x220] sm:$0xff] }
 0x61d   : > { %10184 = vmatprep.subr.mxu0 %v10901_v2 }
 0x61e   : > { %10185 = vmatpush3.msra.mxu0 %v8680_v33  ;;  %v8742_v33 = vld [vmem:[%s13394_s3 + $0x218] sm:$0xff] }
 0x61f   : > { %10186 = vmatprep.subr.mxu0 %v10901_v2 }
 0x620   : > { %10187 = vmatpush3.msra.mxu0 %v8679_v35  ;;  %v8741_v35 = vld [vmem:[%s13394_s3 + $0x210] sm:$0xff] }
 0x621   : > { %10188 = vmatprep.subr.mxu0 %v10901_v2 }
 0x622   : > { %10189 = vmatpush3.msra.mxu0 %v8678_v49  ;;  %v8740_v49 = vld [vmem:[%s13394_s3 + $0x208] sm:$0xff] }
 0x623   : > { %10190 = vmatprep.subr.mxu0 %v10901_v2 }
 0x624   : > { %10191 = vmatpush3.msra.mxu0 %v8677_v38  ;;  %v8739_v38 = vld [vmem:[%s13394_s3 + $0x200] sm:$0xff] }
 0x625   : > { %10192 = vmatprep.subr.mxu0 %v10901_v2 }
 0x626   : > { %10193 = vmatpush3.msra.mxu0 %v8676_v52  ;;  %v8762_v52 = vld [vmem:[%s13394_s3 + $0x2b8] sm:$0xff] }
 0x627   : > { %10194 = vmatprep.subr.mxu0 %v10901_v2 }
 0x628   : > { %10195 = vmatpush3.msra.mxu0 %v8675_v50  ;;  %v8761_v50 = vld [vmem:[%s13394_s3 + $0x2b0] sm:$0xff] }
 0x629   : > { %10199 = vmatprep.subr.mxu0 %v10901_v2 }
 0x6d9   : > { %v4398_v16 = vpop.f32.mrf.mxu0 }
 0x6da   : > { %v4399_v18 = vadd.f32 %v8670_v15, %v4398_v16  ;;  %v8728_v15 = vld [vmem:[%s13393_s2 + $0x3a8] sm:$0xff]  ;;  %v8703_v16 = vld [vmem:[%s13393_s2 + $0x2e0] sm:$0xff] }
 0x6db   : > { %v10144_v19 = vpop.f32.mrf.mxu0 }
 0x6dc   : > { %v4402_v20 = vmax.f32 %v4399_v18, 0.0  ;;  %v8727_v18 = vld [vmem:[%s13393_s2 + $0x3a0] sm:$0xff]  ;;  %v8702_v19 = vld [vmem:[%s13393_s2 + $0x2d8] sm:$0xff] }
 0x6de   : > { %10178 = vmatmul.mubr.f32.vlgmr.msra.gmra.mxu1 %v4402_v20  ;;  %v8726_v20 = vld [vmem:[%s13393_s2 + $0x398] sm:$0xff] }
 0x6df   : > { %10234 = vmatprep.mubr.msk.f32.mxu1 %vm10902_vm1, %v10901_v2  ;;  %10219 = vmatpush3.msra.mxu1 %v8698_v46  ;;  %v8719_v46 = vld [vmem:[%s13393_s2 + $0x360] sm:$0xff] }
 0x6e0   : > { %10220 = vmatprep.subr.mxu1 %v10901_v2 }
 0x6e1   : > { %10221 = vmatpush3.msra.mxu1 %v8697_v32  ;;  %v8718_v32 = vld [vmem:[%s13393_s2 + $0x358] sm:$0xff] }
 0x6e2   : > { %10222 = vmatprep.subr.mxu1 %v10901_v2 }
 0x6e3   : > { %10223 = vmatpush3.msra.mxu1 %v8696_v34  ;;  %v8717_v34 = vld [vmem:[%s13393_s2 + $0x350] sm:$0xff] }
 0x6e4   : > { %10224 = vmatprep.subr.mxu1 %v10901_v2 }
 0x6e5   : > { %10225 = vmatpush3.msra.mxu1 %v8695_v36  ;;  %v8716_v36 = vld [vmem:[%s13393_s2 + $0x348] sm:$0xff] }
 0x6e6   : > { %10226 = vmatprep.subr.mxu1 %v10901_v2 }
 0x6e7   : > { %10227 = vmatpush3.msra.mxu1 %v8694_v37  ;;  %v8715_v37 = vld [vmem:[%s13393_s2 + $0x340] sm:$0xff] }
 0x6e8   : > { %10228 = vmatprep.subr.mxu1 %v10901_v2 }
 0x6e9   : > { %10229 = vmatpush3.msra.mxu1 %v8693_v39  ;;  %v8738_v39 = vld [vmem:[%s13393_s2 + $0x3f8] sm:$0xff] }
 0x6ea   : > { %10230 = vmatprep.subr.mxu1 %v10901_v2 }
 0x6eb   : > { %10231 = vmatpush3.msra.mxu1 %v8692_v54  ;;  %v8737_v54 = vld [vmem:[%s13393_s2 + $0x3f0] sm:$0xff] }
 0x6ec   : > { %10232 = vmatprep.subr.mxu1 %v10901_v2 }
 0x6ed   : > { %10233 = vmatpush3.msra.mxu1 %v8691_v40  ;;  %v8736_v40 = vld [vmem:[%s13393_s2 + $0x3e8] sm:$0xff] }
 0x6ee   : > { %10256 = vmatprep.subr.mxu1 %v10901_v2 }
 0x79e   : > { %v4475_v22 = vpop.f32.mrf.mxu1 }
 0x79f   : > { %v4476_v23 = vadd.f32 %v8672_v21, %v4475_v22  ;;  %v8701_v21 = vld [vmem:[%s13393_s2 + $0x2d0] sm:$0xff] }
 0x7a0   : > { %v10179_v24 = vpop.f32.mrf.mxu1  ;;  %v8725_v22 = vld [vmem:[%s13393_s2 + $0x390] sm:$0xff] }
 0x7a1   : > { %v4481_v25 = vadd.f32 %v4476_v23, %v4296_v11  ;;  %v8730_v11 = vld [vmem:[%s13393_s2 + $0x3b8] sm:$0xff]  ;;  %v8700_v23 = vld [vmem:[%s13393_s2 + $0x2c8] sm:$0xff] }
 0x7a2   : > { %v8724_v24 = vld [vmem:[%s13393_s2 + $0x388] sm:$0xff] }
 0x7a3   : > { %v4482_v26 = vsel %vm686_vm0, %v4481_v25, 0.0 }
 0x7a4   : > { %4483 = vadd.xlane.f32.xlu0 %v4482_v26  ;;  %v8723_v26 = vld [vmem:[%s13393_s2 + $0x380] sm:$0xff] }
 0x82d   : > { %v4484_v27 = vpop.xlane.xlu0 %4483 }
 0x82e   : > { %v4485_v28 = vmul.f32 0.015625, %v4484_v27  ;;  %v8722_v27 = vld [vmem:[%s13393_s2 + $0x378] sm:$0xff] }
 0x830   : > { %v4486_v44 = vsub.f32 %v4481_v25, %v4485_v28  ;;  %v8699_v25 = vld [vmem:[%s13393_s2 + $0x2c0] sm:$0xff]  ;;  %v8746_v28 = vld [vmem:[%s13394_s3 + $0x238] sm:$0xff] }
 0x832   : > { %v4487_v29 = vmul.f32 %v4486_v44, %v4486_v44 }
 0x834   : > { %v4488_v30 = vsel %vm686_vm0, %v4487_v29, 0.0  ;;  %v8745_v29 = vld [vmem:[%s13394_s3 + $0x230] sm:$0xff] }
 0x835   : > { %4489 = vadd.xlane.f32.xlu1 %v4488_v30  ;;  %v8720_v30 = vld [vmem:[%s13393_s2 + $0x368] sm:$0xff] }
 0x8be   : > { %v4490_v41 = vpop.xlane.xlu1 %4489 }
 0x8bf   : > { %v4491_v42 = vmul.f32 0.015625, %v4490_v41  ;;  %v8760_v41 = vld [vmem:[%s13394_s3 + $0x2a8] sm:$0xff] }
 0x8c1   : > { %v4492_v43 = vadd.f32 1e-06, %v4491_v42  ;;  %v8735_v42 = vld [vmem:[%s13393_s2 + $0x3e0] sm:$0xff] }
 0x8c3   : > { %10854 = vrsqrt.f32 %v4492_v43  ;;  %v8759_v43 = vld [vmem:[%s13394_s3 + $0x2a0] sm:$0xff] }
 0x8d0   : > { %v10855_v45 = vpop.eup %10854 }
 0x8d1   : > { %v4494_v48 = vmul.f32 %v10855_v45, %v4486_v44  ;;  %v8721_v44 = vld [vmem:[%s13393_s2 + $0x370] sm:$0xff]  ;;  %v8734_v45 = vld [vmem:[%s13393_s2 + $0x3d8] sm:$0xff] }
 0x8d3   : > { %v4501_v53 = vmul.f32 %v8673_v47, %v4494_v48  ;;  %v8758_v47 = vld [vmem:[%s13394_s3 + $0x298] sm:$0xff]  ;;  %v8733_v48 = vld [vmem:[%s13393_s2 + $0x3d0] sm:$0xff] }
 0x8d5   : > { %v12264_v55 = vadd.f32 %v8674_v51, %v4501_v53  ;;  %v8757_v51 = vld [vmem:[%s13394_s3 + $0x290] sm:$0xff]  ;;  %v8732_v53 = vld [vmem:[%s13393_s2 + $0x3c8] sm:$0xff] }
 0x8d7   : > { %10197 = vmatmul.mubr.msk.f32.vlgmr.msra.gmra.mxu0 %vm686_vm0, %v12264_v55  ;;  %10235 = vmatmul.mubr.msk.f32.vlgmr.msra.gmra.mxu1 %vm686_vm0, %v12264_v55 }
 0x8d8   : > { %10200 = vmatpush3.msra.mxu0 %v8690_v57  ;;  %10257 = vmatpush3.msra.mxu1 %v8714_v58  ;;  %v8756_v57 = vld [vmem:[%s13394_s3 + $0x288] sm:$0xff]  ;;  %v8731_v58 = vld [vmem:[%s13393_s2 + $0x3c0] sm:$0xff] }
 0x8d9   : > { %10201 = vmatprep.subr.mxu0 %v10901_v2  ;;  %10258 = vmatprep.subr.mxu1 %v10901_v2 }
 0x8da   : > { %10202 = vmatpush3.msra.mxu0 %v8689_v59  ;;  %10259 = vmatpush3.msra.mxu1 %v8713_v60  ;;  %v8755_v59 = vld [vmem:[%s13394_s3 + $0x280] sm:$0xff]  ;;  %v8754_v60 = vld [vmem:[%s13394_s3 + $0x278] sm:$0xff] }
 0x8db   : > { %10203 = vmatprep.subr.mxu0 %v10901_v2  ;;  %10260 = vmatprep.subr.mxu1 %v10901_v2 }
 0x8dc   : > { %10204 = vmatpush3.msra.mxu0 %v8688_v61  ;;  %10261 = vmatpush3.msra.mxu1 %v8712_v62  ;;  %v8778_v61 = vld [vmem:[%s13394_s3 + $0x338] sm:$0xff]  ;;  %v8753_v62 = vld [vmem:[%s13394_s3 + $0x270] sm:$0xff] }
 0x8dd   : > { %10205 = vmatprep.subr.mxu0 %v10901_v2  ;;  %10262 = vmatprep.subr.mxu1 %v10901_v2 }
 0x8de   : > { %10206 = vmatpush3.msra.mxu0 %v8687_v63  ;;  %10263 = vmatpush3.msra.mxu1 %v8711_v0  ;;  %v8777_v63 = vld [vmem:[%s13394_s3 + $0x330] sm:$0xff]  ;;  %v8752_v0 = vld [vmem:[%s13394_s3 + $0x268] sm:$0xff] }
 0x8df   : > { %10207 = vmatprep.subr.mxu0 %v10901_v2  ;;  %10264 = vmatprep.subr.mxu1 %v10901_v2 }
 0x8e0   : > { %10208 = vmatpush3.msra.mxu0 %v8686_v1  ;;  %10265 = vmatpush3.msra.mxu1 %v8710_v3  ;;  %v8776_v1 = vld [vmem:[%s13394_s3 + $0x328] sm:$0xff]  ;;  %v8751_v3 = vld [vmem:[%s13394_s3 + $0x260] sm:$0xff] }
 0x8e1   : > { %10209 = vmatprep.subr.mxu0 %v10901_v2  ;;  %10266 = vmatprep.subr.mxu1 %v10901_v2 }
 0x8e2   : > { %10210 = vmatpush3.msra.mxu0 %v8685_v4  ;;  %10267 = vmatpush3.msra.mxu1 %v8709_v5  ;;  %v8775_v4 = vld [vmem:[%s13394_s3 + $0x320] sm:$0xff]  ;;  %v8750_v5 = vld [vmem:[%s13394_s3 + $0x258] sm:$0xff] }
 0x8e3   : > { %10211 = vmatprep.subr.mxu0 %v10901_v2  ;;  %10268 = vmatprep.subr.mxu1 %v10901_v2 }
 0x8e4   : > { %10212 = vmatpush3.msra.mxu0 %v8684_v6  ;;  %10269 = vmatpush3.msra.mxu1 %v8708_v7  ;;  %v8774_v6 = vld [vmem:[%s13394_s3 + $0x318] sm:$0xff]  ;;  %v8749_v7 = vld [vmem:[%s13394_s3 + $0x250] sm:$0xff] }
 0x8e5   : > { %10213 = vmatprep.subr.mxu0 %v10901_v2  ;;  %10270 = vmatprep.subr.mxu1 %v10901_v2 }
 0x8e6   : > { %10214 = vmatpush3.msra.mxu0 %v8683_v8  ;;  %10215 = vmatprep.mubr.msk.f32.mxu0 %vm10902_vm1, %v10901_v2  ;;  %v8773_v8 = vld [vmem:[%s13394_s3 + $0x310] sm:$0xff] }
 0x8e7   : > { %10271 = vmatpush3.msra.mxu1 %v8707_v9  ;;  %10272 = vmatprep.mubr.msk.f32.mxu1 %vm10902_vm1, %v10901_v2  ;;  %v8748_v9 = vld [vmem:[%s13394_s3 + $0x248] sm:$0xff] }
 0x8e8   : > { %10216 = vmatmul.mubr.msk.f32.vlgmr.msra.gmra.mxu0 %vm686_vm0, %v12264_v55  ;;  %10237 = vmatprep.subr.mxu0 %v10901_v2 }
 0x8e9   : > { %10273 = vmatmul.mubr.msk.f32.vlgmr.msra.gmra.mxu1 %vm686_vm0, %v12264_v55  ;;  %10294 = vmatprep.subr.mxu1 %v10901_v2 }
 0x8ea   : > { %10238 = vmatpush3.msra.mxu0 %v8706_v10  ;;  %10295 = vmatpush3.msra.mxu1 %v8730_v11  ;;  %v8772_v10 = vld [vmem:[%s13394_s3 + $0x308] sm:$0xff]  ;;  %v8747_v11 = vld [vmem:[%s13394_s3 + $0x240] sm:$0xff] }
 0x8eb   : > { %10239 = vmatprep.subr.mxu0 %v10901_v2  ;;  %10296 = vmatprep.subr.mxu1 %v10901_v2 }
 0x8ec   : > { %10240 = vmatpush3.msra.mxu0 %v8705_v12  ;;  %10297 = vmatpush3.msra.mxu1 %v8729_v13  ;;  %v8771_v12 = vld [vmem:[%s13394_s3 + $0x300] sm:$0xff]  ;;  %v8770_v13 = vld [vmem:[%s13394_s3 + $0x2f8] sm:$0xff] }
 0x8ed   : > { %10241 = vmatprep.subr.mxu0 %v10901_v2  ;;  %10298 = vmatprep.subr.mxu1 %v10901_v2 }
 0x8ee   : > { %10242 = vmatpush3.msra.mxu0 %v8704_v14  ;;  %10299 = vmatpush3.msra.mxu1 %v8728_v15  ;;  %v8794_v14 = vld [vmem:[%s13394_s3 + $0x3b8] sm:$0xff]  ;;  %v8769_v15 = vld [vmem:[%s13394_s3 + $0x2f0] sm:$0xff] }
 0x8ef   : > { %10243 = vmatprep.subr.mxu0 %v10901_v2  ;;  %10300 = vmatprep.subr.mxu1 %v10901_v2 }
 0x8f0   : > { %10244 = vmatpush3.msra.mxu0 %v8703_v16  ;;  %10301 = vmatpush3.msra.mxu1 %v8727_v18  ;;  %v8793_v16 = vld [vmem:[%s13394_s3 + $0x3b0] sm:$0xff]  ;;  %v8768_v18 = vld [vmem:[%s13394_s3 + $0x2e8] sm:$0xff] }
 0x8f1   : > { %10245 = vmatprep.subr.mxu0 %v10901_v2  ;;  %10302 = vmatprep.subr.mxu1 %v10901_v2 }
 0x8f2   : > { %10246 = vmatpush3.msra.mxu0 %v8702_v19  ;;  %10303 = vmatpush3.msra.mxu1 %v8726_v20  ;;  %v8792_v19 = vld [vmem:[%s13394_s3 + $0x3a8] sm:$0xff]  ;;  %v8767_v20 = vld [vmem:[%s13394_s3 + $0x2e0] sm:$0xff] }
 0x8f3   : > { %10247 = vmatprep.subr.mxu0 %v10901_v2  ;;  %10304 = vmatprep.subr.mxu1 %v10901_v2 }
 0x8f4   : > { %10248 = vmatpush3.msra.mxu0 %v8701_v21  ;;  %10305 = vmatpush3.msra.mxu1 %v8725_v22  ;;  %v8791_v21 = vld [vmem:[%s13394_s3 + $0x3a0] sm:$0xff]  ;;  %v8766_v22 = vld [vmem:[%s13394_s3 + $0x2d8] sm:$0xff] }
 0x8f5   : > { %10249 = vmatprep.subr.mxu0 %v10901_v2  ;;  %10306 = vmatprep.subr.mxu1 %v10901_v2 }
 0x8f6   : > { %10250 = vmatpush3.msra.mxu0 %v8700_v23  ;;  %10307 = vmatpush3.msra.mxu1 %v8724_v24  ;;  %v8790_v23 = vld [vmem:[%s13394_s3 + $0x398] sm:$0xff]  ;;  %v8765_v24 = vld [vmem:[%s13394_s3 + $0x2d0] sm:$0xff] }
 0x8f7   : > { %10251 = vmatprep.subr.mxu0 %v10901_v2  ;;  %10308 = vmatprep.subr.mxu1 %v10901_v2 }
 0x8f8   : > { %10252 = vmatpush3.msra.mxu0 %v8699_v25  ;;  %10253 = vmatprep.mubr.msk.f32.mxu0 %vm10902_vm1, %v10901_v2  ;;  %v8789_v25 = vld [vmem:[%s13394_s3 + $0x390] sm:$0xff] }
 0x8f9   : > { %10309 = vmatpush3.msra.mxu1 %v8723_v26  ;;  %10310 = vmatprep.mubr.msk.f32.mxu1 %vm10902_vm1, %v10901_v2  ;;  %v8764_v26 = vld [vmem:[%s13394_s3 + $0x2c8] sm:$0xff] }
 0x8fa   : > { %10254 = vmatmul.mubr.msk.f32.vlgmr.msra.gmra.mxu0 %vm686_vm0, %v12264_v55  ;;  %10275 = vmatprep.subr.mxu0 %v10901_v2 }
 0x8fb   : > { %10311 = vmatmul.mubr.msk.f32.vlgmr.msra.gmra.mxu1 %vm686_vm0, %v12264_v55  ;;  %10332 = vmatprep.subr.mxu1 %v10901_v2 }
 0x8fc   : > { %10276 = vmatpush3.msra.mxu0 %v8722_v27  ;;  %10333 = vmatpush3.msra.mxu1 %v8746_v28  ;;  %v8788_v27 = vld [vmem:[%s13394_s3 + $0x388] sm:$0xff]  ;;  %v8763_v28 = vld [vmem:[%s13394_s3 + $0x2c0] sm:$0xff] }
 0x8fd   : > { %10277 = vmatprep.subr.mxu0 %v10901_v2  ;;  %10334 = vmatprep.subr.mxu1 %v10901_v2 }
 0x8fe   : > { %10278 = vmatpush3.msra.mxu0 %v8721_v44  ;;  %10335 = vmatpush3.msra.mxu1 %v8745_v29  ;;  %v8787_v44 = vld [vmem:[%s13394_s3 + $0x380] sm:$0xff]  ;;  %v8786_v29 = vld [vmem:[%s13394_s3 + $0x378] sm:$0xff] }
 0x8ff   : > { %10279 = vmatprep.subr.mxu0 %v10901_v2  ;;  %10336 = vmatprep.subr.mxu1 %v10901_v2 }
 0x900   : > { %10280 = vmatpush3.msra.mxu0 %v8720_v30  ;;  %10337 = vmatpush3.msra.mxu1 %v8744_v31  ;;  %v8810_v30 = vld [vmem:[%s13395_s4 + $0x238] sm:$0xff]  ;;  %v8785_v31 = vld [vmem:[%s13394_s3 + $0x370] sm:$0xff] }
 0x901   : > { %10281 = vmatprep.subr.mxu0 %v10901_v2  ;;  %10338 = vmatprep.subr.mxu1 %v10901_v2 }
 0x902   : > { %10282 = vmatpush3.msra.mxu0 %v8719_v46  ;;  %10339 = vmatpush3.msra.mxu1 %v8743_v17  ;;  %v8809_v46 = vld [vmem:[%s13395_s4 + $0x230] sm:$0xff]  ;;  %v8784_v17 = vld [vmem:[%s13394_s3 + $0x368] sm:$0xff] }
 0x903   : > { %10283 = vmatprep.subr.mxu0 %v10901_v2  ;;  %10340 = vmatprep.subr.mxu1 %v10901_v2 }
 0x904   : > { %10284 = vmatpush3.msra.mxu0 %v8718_v32  ;;  %10341 = vmatpush3.msra.mxu1 %v8742_v33  ;;  %v8808_v32 = vld [vmem:[%s13395_s4 + $0x228] sm:$0xff]  ;;  %v8783_v33 = vld [vmem:[%s13394_s3 + $0x360] sm:$0xff] }
 0x905   : > { %10285 = vmatprep.subr.mxu0 %v10901_v2  ;;  %10342 = vmatprep.subr.mxu1 %v10901_v2 }
 0x906   : > { %10286 = vmatpush3.msra.mxu0 %v8717_v34  ;;  %10343 = vmatpush3.msra.mxu1 %v8741_v35  ;;  %v8807_v34 = vld [vmem:[%s13395_s4 + $0x220] sm:$0xff]  ;;  %v8782_v35 = vld [vmem:[%s13394_s3 + $0x358] sm:$0xff] }
 0x907   : > { %10287 = vmatprep.subr.mxu0 %v10901_v2  ;;  %10344 = vmatprep.subr.mxu1 %v10901_v2 }
 0x908   : > { %10288 = vmatpush3.msra.mxu0 %v8716_v36  ;;  %10345 = vmatpush3.msra.mxu1 %v8740_v49  ;;  %v8806_v36 = vld [vmem:[%s13395_s4 + $0x218] sm:$0xff]  ;;  %v8781_v49 = vld [vmem:[%s13394_s3 + $0x350] sm:$0xff] }
 0x909   : > { %10289 = vmatprep.subr.mxu0 %v10901_v2  ;;  %10346 = vmatprep.subr.mxu1 %v10901_v2 }
 0x90a   : > { %10290 = vmatpush3.msra.mxu0 %v8715_v37  ;;  %10291 = vmatprep.mubr.msk.f32.mxu0 %vm10902_vm1, %v10901_v2  ;;  %v8805_v37 = vld [vmem:[%s13395_s4 + $0x210] sm:$0xff] }
 0x90b   : > { %10347 = vmatpush3.msra.mxu1 %v8739_v38  ;;  %10348 = vmatprep.mubr.msk.f32.mxu1 %vm10902_vm1, %v10901_v2  ;;  %v8780_v38 = vld [vmem:[%s13394_s3 + $0x348] sm:$0xff] }
 0x90c   : > { %10292 = vmatmul.mubr.msk.f32.vlgmr.msra.gmra.mxu0 %vm686_vm0, %v12264_v55  ;;  %10313 = vmatprep.subr.mxu0 %v10901_v2 }
 0x90d   : > { %10349 = vmatmul.mubr.msk.f32.vlgmr.msra.gmra.mxu1 %vm686_vm0, %v12264_v55  ;;  %10370 = vmatprep.subr.mxu1 %v10901_v2 }
 0x90e   : > { %10314 = vmatpush3.msra.mxu0 %v8738_v39  ;;  %10371 = vmatpush3.msra.mxu1 %v8762_v52  ;;  %v8804_v39 = vld [vmem:[%s13395_s4 + $0x208] sm:$0xff]  ;;  %v8779_v52 = vld [vmem:[%s13394_s3 + $0x340] sm:$0xff] }
 0x90f   : > { %10315 = vmatprep.subr.mxu0 %v10901_v2  ;;  %10372 = vmatprep.subr.mxu1 %v10901_v2 }
 0x910   : > { %10316 = vmatpush3.msra.mxu0 %v8737_v54  ;;  %10373 = vmatpush3.msra.mxu1 %v8761_v50  ;;  %v8803_v54 = vld [vmem:[%s13395_s4 + $0x200] sm:$0xff]  ;;  %v8802_v50 = vld [vmem:[%s13394_s3 + $0x3f8] sm:$0xff] }
 0x911   : > { %10317 = vmatprep.subr.mxu0 %v10901_v2  ;;  %10374 = vmatprep.subr.mxu1 %v10901_v2 }
 0x912   : > { %10318 = vmatpush3.msra.mxu0 %v8736_v40  ;;  %10375 = vmatpush3.msra.mxu1 %v8760_v41  ;;  %v8826_v40 = vld [vmem:[%s13395_s4 + $0x2b8] sm:$0xff]  ;;  %v8801_v41 = vld [vmem:[%s13394_s3 + $0x3f0] sm:$0xff] }
 0x913   : > { %10319 = vmatprep.subr.mxu0 %v10901_v2  ;;  %10376 = vmatprep.subr.mxu1 %v10901_v2 }
 0x914   : > { %10320 = vmatpush3.msra.mxu0 %v8735_v42  ;;  %10377 = vmatpush3.msra.mxu1 %v8759_v43  ;;  %v8825_v42 = vld [vmem:[%s13395_s4 + $0x2b0] sm:$0xff]  ;;  %v8800_v43 = vld [vmem:[%s13394_s3 + $0x3e8] sm:$0xff] }
 0x915   : > { %10321 = vmatprep.subr.mxu0 %v10901_v2  ;;  %10378 = vmatprep.subr.mxu1 %v10901_v2 }
 0x916   : > { %10322 = vmatpush3.msra.mxu0 %v8734_v45  ;;  %10379 = vmatpush3.msra.mxu1 %v8758_v47  ;;  %v8824_v45 = vld [vmem:[%s13395_s4 + $0x2a8] sm:$0xff]  ;;  %v8799_v47 = vld [vmem:[%s13394_s3 + $0x3e0] sm:$0xff] }
 0x917   : > { %10323 = vmatprep.subr.mxu0 %v10901_v2  ;;  %10380 = vmatprep.subr.mxu1 %v10901_v2 }
 0x918   : > { %10324 = vmatpush3.msra.mxu0 %v8733_v48  ;;  %10381 = vmatpush3.msra.mxu1 %v8757_v51  ;;  %v8823_v48 = vld [vmem:[%s13395_s4 + $0x2a0] sm:$0xff]  ;;  %v8798_v51 = vld [vmem:[%s13394_s3 + $0x3d8] sm:$0xff] }
 0x919   : > { %10325 = vmatprep.subr.mxu0 %v10901_v2  ;;  %10382 = vmatprep.subr.mxu1 %v10901_v2 }
 0x91a   : > { %10326 = vmatpush3.msra.mxu0 %v8732_v53  ;;  %10383 = vmatpush3.msra.mxu1 %v8756_v57  ;;  %v8822_v53 = vld [vmem:[%s13395_s4 + $0x298] sm:$0xff]  ;;  %v8797_v57 = vld [vmem:[%s13394_s3 + $0x3d0] sm:$0xff] }
 0x91b   : > { %10327 = vmatprep.subr.mxu0 %v10901_v2  ;;  %10384 = vmatprep.subr.mxu1 %v10901_v2 }
 0x91c   : > { %10328 = vmatpush3.msra.mxu0 %v8731_v58  ;;  %10329 = vmatprep.mubr.msk.f32.mxu0 %vm10902_vm1, %v10901_v2  ;;  %v8821_v58 = vld [vmem:[%s13395_s4 + $0x290] sm:$0xff] }
 0x91d   : > { %10385 = vmatpush3.msra.mxu1 %v8755_v59  ;;  %10386 = vmatprep.mubr.msk.f32.mxu1 %vm10902_vm1, %v10901_v2  ;;  %v8796_v59 = vld [vmem:[%s13394_s3 + $0x3c8] sm:$0xff] }
 0x91e   : > { %10330 = vmatmul.mubr.msk.f32.vlgmr.msra.gmra.mxu0 %vm686_vm0, %v12264_v55  ;;  %10351 = vmatprep.subr.mxu0 %v10901_v2 }
 0x91f   : > { %10387 = vmatmul.mubr.msk.f32.vlgmr.msra.gmra.mxu1 %vm686_vm0, %v12264_v55  ;;  %10408 = vmatprep.subr.mxu1 %v10901_v2 }
 0x920   : > { %10352 = vmatpush3.msra.mxu0 %v8754_v60  ;;  %10409 = vmatpush3.msra.mxu1 %v8778_v61  ;;  %v8820_v60 = vld [vmem:[%s13395_s4 + $0x288] sm:$0xff]  ;;  %v8795_v61 = vld [vmem:[%s13394_s3 + $0x3c0] sm:$0xff] }
 0x921   : > { %10353 = vmatprep.subr.mxu0 %v10901_v2  ;;  %10410 = vmatprep.subr.mxu1 %v10901_v2 }
 0x922   : > { %10354 = vmatpush3.msra.mxu0 %v8753_v62  ;;  %10411 = vmatpush3.msra.mxu1 %v8777_v63  ;;  %v8819_v62 = vld [vmem:[%s13395_s4 + $0x280] sm:$0xff]  ;;  %v8818_v63 = vld [vmem:[%s13395_s4 + $0x278] sm:$0xff] }
 0x923   : > { %10355 = vmatprep.subr.mxu0 %v10901_v2  ;;  %10412 = vmatprep.subr.mxu1 %v10901_v2 }
 0x924   : > { %10356 = vmatpush3.msra.mxu0 %v8752_v0  ;;  %10413 = vmatpush3.msra.mxu1 %v8776_v1  ;;  %v8842_v0 = vld [vmem:[%s13395_s4 + $0x338] sm:$0xff]  ;;  %v8817_v1 = vld [vmem:[%s13395_s4 + $0x270] sm:$0xff] }
 0x925   : > { %10357 = vmatprep.subr.mxu0 %v10901_v2  ;;  %10414 = vmatprep.subr.mxu1 %v10901_v2 }
 0x926   : > { %10358 = vmatpush3.msra.mxu0 %v8751_v3  ;;  %10415 = vmatpush3.msra.mxu1 %v8775_v4  ;;  %v8841_v3 = vld [vmem:[%s13395_s4 + $0x330] sm:$0xff]  ;;  %v8816_v4 = vld [vmem:[%s13395_s4 + $0x268] sm:$0xff] }
 0x927   : > { %10359 = vmatprep.subr.mxu0 %v10901_v2  ;;  %10416 = vmatprep.subr.mxu1 %v10901_v2 }
 0x928   : > { %10360 = vmatpush3.msra.mxu0 %v8750_v5  ;;  %10417 = vmatpush3.msra.mxu1 %v8774_v6  ;;  %v8840_v5 = vld [vmem:[%s13395_s4 + $0x328] sm:$0xff]  ;;  %v8815_v6 = vld [vmem:[%s13395_s4 + $0x260] sm:$0xff] }
 0x929   : > { %10361 = vmatprep.subr.mxu0 %v10901_v2  ;;  %10418 = vmatprep.subr.mxu1 %v10901_v2 }
 0x92a   : > { %10362 = vmatpush3.msra.mxu0 %v8749_v7  ;;  %10419 = vmatpush3.msra.mxu1 %v8773_v8  ;;  %v8839_v7 = vld [vmem:[%s13395_s4 + $0x320] sm:$0xff]  ;;  %v8814_v8 = vld [vmem:[%s13395_s4 + $0x258] sm:$0xff] }
 0x92b   : > { %10363 = vmatprep.subr.mxu0 %v10901_v2  ;;  %10420 = vmatprep.subr.mxu1 %v10901_v2 }
 0x92c   : > { %10364 = vmatpush3.msra.mxu0 %v8748_v9  ;;  %10421 = vmatpush3.msra.mxu1 %v8772_v10  ;;  %v8838_v9 = vld [vmem:[%s13395_s4 + $0x318] sm:$0xff]  ;;  %v8813_v10 = vld [vmem:[%s13395_s4 + $0x250] sm:$0xff] }
 0x92d   : > { %10365 = vmatprep.subr.mxu0 %v10901_v2  ;;  %10422 = vmatprep.subr.mxu1 %v10901_v2 }
 0x92e   : > { %10366 = vmatpush3.msra.mxu0 %v8747_v11  ;;  %10367 = vmatprep.mubr.msk.f32.mxu0 %vm10902_vm1, %v10901_v2  ;;  %v8837_v11 = vld [vmem:[%s13395_s4 + $0x310] sm:$0xff] }
 0x92f   : > { %10423 = vmatpush3.msra.mxu1 %v8771_v12  ;;  %10424 = vmatprep.mubr.msk.f32.mxu1 %vm10902_vm1, %v10901_v2  ;;  %v8812_v12 = vld [vmem:[%s13395_s4 + $0x248] sm:$0xff] }
 0x930   : > { %10368 = vmatmul.mubr.msk.f32.vlgmr.msra.gmra.mxu0 %vm686_vm0, %v12264_v55  ;;  %10389 = vmatprep.subr.mxu0 %v10901_v2 }
 0x931   : > { %10425 = vmatmul.mubr.msk.f32.vlgmr.msra.gmra.mxu1 %vm686_vm0, %v12264_v55  ;;  %10446 = vmatprep.subr.mxu1 %v10901_v2 }
 0x932   : > { %10390 = vmatpush3.msra.mxu0 %v8770_v13  ;;  %10447 = vmatpush3.msra.mxu1 %v8794_v14  ;;  %v8836_v13 = vld [vmem:[%s13395_s4 + $0x308] sm:$0xff]  ;;  %v8811_v14 = vld [vmem:[%s13395_s4 + $0x240] sm:$0xff] }
 0x933   : > { %10391 = vmatprep.subr.mxu0 %v10901_v2  ;;  %10448 = vmatprep.subr.mxu1 %v10901_v2 }
 0x934   : > { %10392 = vmatpush3.msra.mxu0 %v8769_v15  ;;  %10449 = vmatpush3.msra.mxu1 %v8793_v16  ;;  %v8835_v15 = vld [vmem:[%s13395_s4 + $0x300] sm:$0xff]  ;;  %v8834_v16 = vld [vmem:[%s13395_s4 + $0x2f8] sm:$0xff] }
 0x935   : > { %10393 = vmatprep.subr.mxu0 %v10901_v2  ;;  %10450 = vmatprep.subr.mxu1 %v10901_v2 }
 0x936   : > { %10394 = vmatpush3.msra.mxu0 %v8768_v18  ;;  %10451 = vmatpush3.msra.mxu1 %v8792_v19  ;;  %v8858_v18 = vld [vmem:[%s13395_s4 + $0x3b8] sm:$0xff]  ;;  %v8833_v19 = vld [vmem:[%s13395_s4 + $0x2f0] sm:$0xff] }
 0x937   : > { %10395 = vmatprep.subr.mxu0 %v10901_v2  ;;  %10452 = vmatprep.subr.mxu1 %v10901_v2 }
 0x938   : > { %10396 = vmatpush3.msra.mxu0 %v8767_v20  ;;  %10453 = vmatpush3.msra.mxu1 %v8791_v21  ;;  %v8857_v20 = vld [vmem:[%s13395_s4 + $0x3b0] sm:$0xff]  ;;  %v8832_v21 = vld [vmem:[%s13395_s4 + $0x2e8] sm:$0xff] }
 0x939   : > { %10397 = vmatprep.subr.mxu0 %v10901_v2  ;;  %10454 = vmatprep.subr.mxu1 %v10901_v2 }
 0x93a   : > { %10398 = vmatpush3.msra.mxu0 %v8766_v22  ;;  %10455 = vmatpush3.msra.mxu1 %v8790_v23  ;;  %v8856_v22 = vld [vmem:[%s13395_s4 + $0x3a8] sm:$0xff]  ;;  %v8831_v23 = vld [vmem:[%s13395_s4 + $0x2e0] sm:$0xff] }
 0x93b   : > { %10399 = vmatprep.subr.mxu0 %v10901_v2  ;;  %10456 = vmatprep.subr.mxu1 %v10901_v2 }
 0x93c   : > { %10400 = vmatpush3.msra.mxu0 %v8765_v24  ;;  %10457 = vmatpush3.msra.mxu1 %v8789_v25  ;;  %v8855_v24 = vld [vmem:[%s13395_s4 + $0x3a0] sm:$0xff]  ;;  %v8830_v25 = vld [vmem:[%s13395_s4 + $0x2d8] sm:$0xff] }
 0x93d   : > { %10401 = vmatprep.subr.mxu0 %v10901_v2  ;;  %10458 = vmatprep.subr.mxu1 %v10901_v2 }
 0x93e   : > { %10402 = vmatpush3.msra.mxu0 %v8764_v26  ;;  %10459 = vmatpush3.msra.mxu1 %v8788_v27  ;;  %v8854_v26 = vld [vmem:[%s13395_s4 + $0x398] sm:$0xff]  ;;  %v8829_v27 = vld [vmem:[%s13395_s4 + $0x2d0] sm:$0xff] }
 0x93f   : > { %10403 = vmatprep.subr.mxu0 %v10901_v2  ;;  %10460 = vmatprep.subr.mxu1 %v10901_v2 }
 0x940   : > { %10404 = vmatpush3.msra.mxu0 %v8763_v28  ;;  %10405 = vmatprep.mubr.msk.f32.mxu0 %vm10902_vm1, %v10901_v2  ;;  %v8853_v28 = vld [vmem:[%s13395_s4 + $0x390] sm:$0xff] }
 0x941   : > { %10461 = vmatpush3.msra.mxu1 %v8787_v44  ;;  %10462 = vmatprep.mubr.msk.f32.mxu1 %vm10902_vm1, %v10901_v2  ;;  %v8828_v44 = vld [vmem:[%s13395_s4 + $0x2c8] sm:$0xff] }
 0x942   : > { %10406 = vmatmul.mubr.msk.f32.vlgmr.msra.gmra.mxu0 %vm686_vm0, %v12264_v55  ;;  %10427 = vmatprep.subr.mxu0 %v10901_v2 }
 0x943   : > { %10463 = vmatmul.mubr.msk.f32.vlgmr.msra.gmra.mxu1 %vm686_vm0, %v12264_v55  ;;  %10484 = vmatprep.subr.mxu1 %v10901_v2 }
 0x944   : > { %10428 = vmatpush3.msra.mxu0 %v8786_v29  ;;  %10485 = vmatpush3.msra.mxu1 %v8810_v30  ;;  %v8852_v29 = vld [vmem:[%s13395_s4 + $0x388] sm:$0xff]  ;;  %v8827_v30 = vld [vmem:[%s13395_s4 + $0x2c0] sm:$0xff] }
 0x945   : > { %10429 = vmatprep.subr.mxu0 %v10901_v2  ;;  %10486 = vmatprep.subr.mxu1 %v10901_v2 }
 0x946   : > { %10430 = vmatpush3.msra.mxu0 %v8785_v31  ;;  %10487 = vmatpush3.msra.mxu1 %v8809_v46  ;;  %v8851_v31 = vld [vmem:[%s13395_s4 + $0x380] sm:$0xff]  ;;  %v8850_v46 = vld [vmem:[%s13395_s4 + $0x378] sm:$0xff] }
 0x947   : > { %10431 = vmatprep.subr.mxu0 %v10901_v2  ;;  %10488 = vmatprep.subr.mxu1 %v10901_v2 }
 0x948   : > { %10432 = vmatpush3.msra.mxu0 %v8784_v17  ;;  %10489 = vmatpush3.msra.mxu1 %v8808_v32  ;;  %v8849_v17 = vld [vmem:[%s13395_s4 + $0x370] sm:$0xff]  ;;  %v8848_v32 = vld [vmem:[%s13395_s4 + $0x368] sm:$0xff] }
 0x949   : > { %10433 = vmatprep.subr.mxu0 %v10901_v2  ;;  %10490 = vmatprep.subr.mxu1 %v10901_v2 }
 0x94a   : > { %10434 = vmatpush3.msra.mxu0 %v8783_v33  ;;  %10491 = vmatpush3.msra.mxu1 %v8807_v34  ;;  %v8847_v33 = vld [vmem:[%s13395_s4 + $0x360] sm:$0xff]  ;;  %v8846_v34 = vld [vmem:[%s13395_s4 + $0x358] sm:$0xff] }
 0x94b   : > { %10435 = vmatprep.subr.mxu0 %v10901_v2  ;;  %10492 = vmatprep.subr.mxu1 %v10901_v2 }
 0x94c   : > { %10436 = vmatpush3.msra.mxu0 %v8782_v35  ;;  %10493 = vmatpush3.msra.mxu1 %v8806_v36  ;;  %v8845_v35 = vld [vmem:[%s13395_s4 + $0x350] sm:$0xff]  ;;  %v8844_v36 = vld [vmem:[%s13395_s4 + $0x348] sm:$0xff] }
 0x94d   : > { %10437 = vmatprep.subr.mxu0 %v10901_v2  ;;  %10494 = vmatprep.subr.mxu1 %v10901_v2 }
 0x94e   : > { %10438 = vmatpush3.msra.mxu0 %v8781_v49  ;;  %10495 = vmatpush3.msra.mxu1 %v8805_v37  ;;  %v8843_v49 = vld [vmem:[%s13395_s4 + $0x340] sm:$0xff] }
 0x94f   : > { %10439 = vmatprep.subr.mxu0 %v10901_v2  ;;  %10496 = vmatprep.subr.mxu1 %v10901_v2 }
 0x950   : > { %10440 = vmatpush3.msra.mxu0 %v8780_v38  ;;  %10497 = vmatpush3.msra.mxu1 %v8804_v39  ;;  %v8866_v39 = vld [vmem:[%s13395_s4 + $0x3f8] sm:$0xff] }
 0x951   : > { %10441 = vmatprep.subr.mxu0 %v10901_v2  ;;  %10498 = vmatprep.subr.mxu1 %v10901_v2 }
 0x952   : > { %10442 = vmatpush3.msra.mxu0 %v8779_v52  ;;  %10443 = vmatprep.mubr.msk.f32.mxu0 %vm10902_vm1, %v10901_v2 }
 0x953   : > { %10499 = vmatpush3.msra.mxu1 %v8803_v54  ;;  %10500 = vmatprep.mubr.msk.f32.mxu1 %vm10902_vm1, %v10901_v2 }
 0x954   : > { %10444 = vmatmul.mubr.msk.f32.vlgmr.msra.gmra.mxu0 %vm686_vm0, %v12264_v55  ;;  %10465 = vmatprep.subr.mxu0 %v10901_v2 }
 0x955   : > { %10501 = vmatmul.mubr.msk.f32.vlgmr.msra.gmra.mxu1 %vm686_vm0, %v12264_v55  ;;  %10522 = vmatprep.subr.mxu1 %v10901_v2 }
 0x956   : > { %10466 = vmatpush3.msra.mxu0 %v8802_v50  ;;  %10523 = vmatpush3.msra.mxu1 %v8826_v40  ;;  %v8865_v50 = vld [vmem:[%s13395_s4 + $0x3f0] sm:$0xff]  ;;  %v8864_v40 = vld [vmem:[%s13395_s4 + $0x3e8] sm:$0xff] }
 0x957   : > { %10467 = vmatprep.subr.mxu0 %v10901_v2  ;;  %10524 = vmatprep.subr.mxu1 %v10901_v2 }
 0x958   : > { %10468 = vmatpush3.msra.mxu0 %v8801_v41  ;;  %10525 = vmatpush3.msra.mxu1 %v8825_v42  ;;  %v8863_v41 = vld [vmem:[%s13395_s4 + $0x3e0] sm:$0xff]  ;;  %v8862_v42 = vld [vmem:[%s13395_s4 + $0x3d8] sm:$0xff] }
 0x959   : > { %10469 = vmatprep.subr.mxu0 %v10901_v2  ;;  %10526 = vmatprep.subr.mxu1 %v10901_v2 }
 0x95a   : > { %10470 = vmatpush3.msra.mxu0 %v8800_v43  ;;  %10527 = vmatpush3.msra.mxu1 %v8824_v45  ;;  %v8861_v43 = vld [vmem:[%s13395_s4 + $0x3d0] sm:$0xff]  ;;  %v8860_v45 = vld [vmem:[%s13395_s4 + $0x3c8] sm:$0xff] }
 0x95b   : > { %10471 = vmatprep.subr.mxu0 %v10901_v2  ;;  %10528 = vmatprep.subr.mxu1 %v10901_v2 }
 0x95c   : > { %10472 = vmatpush3.msra.mxu0 %v8799_v47  ;;  %10529 = vmatpush3.msra.mxu1 %v8823_v48  ;;  %v8859_v47 = vld [vmem:[%s13395_s4 + $0x3c0] sm:$0xff] }
 0x95d   : > { %10473 = vmatprep.subr.mxu0 %v10901_v2  ;;  %10530 = vmatprep.subr.mxu1 %v10901_v2 }
 0x95e   : > { %10474 = vmatpush3.msra.mxu0 %v8798_v51  ;;  %10531 = vmatpush3.msra.mxu1 %v8822_v53 }
 0x95f   : > { %10475 = vmatprep.subr.mxu0 %v10901_v2  ;;  %10532 = vmatprep.subr.mxu1 %v10901_v2 }
 0x960   : > { %10476 = vmatpush3.msra.mxu0 %v8797_v57  ;;  %10533 = vmatpush3.msra.mxu1 %v8821_v58 }
 0x961   : > { %10477 = vmatprep.subr.mxu0 %v10901_v2  ;;  %10534 = vmatprep.subr.mxu1 %v10901_v2 }
 0x962   : > { %10478 = vmatpush3.msra.mxu0 %v8796_v59  ;;  %10535 = vmatpush3.msra.mxu1 %v8820_v60 }
 0x963   : > { %10479 = vmatprep.subr.mxu0 %v10901_v2  ;;  %10536 = vmatprep.subr.mxu1 %v10901_v2 }
 0x964   : > { %10480 = vmatpush3.msra.mxu0 %v8795_v61  ;;  %10481 = vmatprep.mubr.msk.f32.mxu0 %vm10902_vm1, %v10901_v2 }
 0x965   : > { %10537 = vmatpush3.msra.mxu1 %v8819_v62  ;;  %10538 = vmatprep.mubr.msk.f32.mxu1 %vm10902_vm1, %v10901_v2 }
 0x966   : > { %10482 = vmatmul.mubr.msk.f32.vlgmr.msra.gmra.mxu0 %vm686_vm0, %v12264_v55  ;;  %10503 = vmatprep.subr.mxu0 %v10901_v2 }
 0x967   : > { %10539 = vmatmul.mubr.msk.f32.vlgmr.msra.gmra.mxu1 %vm686_vm0, %v12264_v55  ;;  %10560 = vmatprep.subr.mxu1 %v10901_v2 }
 0x968   : > { %10504 = vmatpush3.msra.mxu0 %v8818_v63  ;;  %10561 = vmatpush3.msra.mxu1 %v8842_v0 }
 0x969   : > { %10505 = vmatprep.subr.mxu0 %v10901_v2  ;;  %10562 = vmatprep.subr.mxu1 %v10901_v2 }
 0x96a   : > { %10506 = vmatpush3.msra.mxu0 %v8817_v1  ;;  %10563 = vmatpush3.msra.mxu1 %v8841_v3 }
 0x96b   : > { %10507 = vmatprep.subr.mxu0 %v10901_v2  ;;  %10564 = vmatprep.subr.mxu1 %v10901_v2 }
 0x96c   : > { %10508 = vmatpush3.msra.mxu0 %v8816_v4  ;;  %10565 = vmatpush3.msra.mxu1 %v8840_v5 }
 0x96d   : > { %10509 = vmatprep.subr.mxu0 %v10901_v2  ;;  %10566 = vmatprep.subr.mxu1 %v10901_v2 }
 0x96e   : > { %10510 = vmatpush3.msra.mxu0 %v8815_v6  ;;  %10567 = vmatpush3.msra.mxu1 %v8839_v7 }
 0x96f   : > { %10511 = vmatprep.subr.mxu0 %v10901_v2  ;;  %10568 = vmatprep.subr.mxu1 %v10901_v2 }
 0x970   : > { %10512 = vmatpush3.msra.mxu0 %v8814_v8  ;;  %10569 = vmatpush3.msra.mxu1 %v8838_v9 }
 0x971   : > { %10513 = vmatprep.subr.mxu0 %v10901_v2  ;;  %10570 = vmatprep.subr.mxu1 %v10901_v2 }
 0x972   : > { %10514 = vmatpush3.msra.mxu0 %v8813_v10  ;;  %10571 = vmatpush3.msra.mxu1 %v8837_v11 }
 0x973   : > { %10515 = vmatprep.subr.mxu0 %v10901_v2  ;;  %10572 = vmatprep.subr.mxu1 %v10901_v2 }
 0x974   : > { %10516 = vmatpush3.msra.mxu0 %v8812_v12  ;;  %10573 = vmatpush3.msra.mxu1 %v8836_v13 }
 0x975   : > { %10517 = vmatprep.subr.mxu0 %v10901_v2  ;;  %10574 = vmatprep.subr.mxu1 %v10901_v2 }
 0x976   : > { %10518 = vmatpush3.msra.mxu0 %v8811_v14  ;;  %10519 = vmatprep.mubr.msk.f32.mxu0 %vm10902_vm1, %v10901_v2 }
 0x977   : > { %10575 = vmatpush3.msra.mxu1 %v8835_v15  ;;  %10576 = vmatprep.mubr.msk.f32.mxu1 %vm10902_vm1, %v10901_v2 }
 0x978   : > { %10520 = vmatmul.mubr.msk.f32.vlgmr.msra.gmra.mxu0 %vm686_vm0, %v12264_v55  ;;  %10541 = vmatprep.subr.mxu0 %v10901_v2 }
 0x979   : > { %10577 = vmatmul.mubr.msk.f32.vlgmr.msra.gmra.mxu1 %vm686_vm0, %v12264_v55  ;;  %10598 = vmatprep.subr.mxu1 %v10901_v2 }
 0x97a   : > { %10542 = vmatpush3.msra.mxu0 %v8834_v16  ;;  %10599 = vmatpush3.msra.mxu1 %v8858_v18 }
 0x97b   : > { %10543 = vmatprep.subr.mxu0 %v10901_v2  ;;  %10600 = vmatprep.subr.mxu1 %v10901_v2 }
 0x97c   : > { %10544 = vmatpush3.msra.mxu0 %v8833_v19  ;;  %10601 = vmatpush3.msra.mxu1 %v8857_v20 }
 0x97d   : > { %10545 = vmatprep.subr.mxu0 %v10901_v2  ;;  %10602 = vmatprep.subr.mxu1 %v10901_v2 }
 0x97e   : > { %10546 = vmatpush3.msra.mxu0 %v8832_v21  ;;  %10603 = vmatpush3.msra.mxu1 %v8856_v22 }
 0x97f   : > { %10547 = vmatprep.subr.mxu0 %v10901_v2  ;;  %10604 = vmatprep.subr.mxu1 %v10901_v2 }
 0x980   : > { %10548 = vmatpush3.msra.mxu0 %v8831_v23  ;;  %10605 = vmatpush3.msra.mxu1 %v8855_v24 }
 0x981   : > { %10549 = vmatprep.subr.mxu0 %v10901_v2  ;;  %10606 = vmatprep.subr.mxu1 %v10901_v2 }
 0x982   : > { %10550 = vmatpush3.msra.mxu0 %v8830_v25  ;;  %10607 = vmatpush3.msra.mxu1 %v8854_v26 }
 0x983   : > { %10551 = vmatprep.subr.mxu0 %v10901_v2  ;;  %10608 = vmatprep.subr.mxu1 %v10901_v2 }
 0x984   : > { %10552 = vmatpush3.msra.mxu0 %v8829_v27  ;;  %10609 = vmatpush3.msra.mxu1 %v8853_v28 }
 0x985   : > { %10553 = vmatprep.subr.mxu0 %v10901_v2  ;;  %10610 = vmatprep.subr.mxu1 %v10901_v2 }
 0x986   : > { %10554 = vmatpush3.msra.mxu0 %v8828_v44  ;;  %10611 = vmatpush3.msra.mxu1 %v8852_v29 }
 0x987   : > { %10555 = vmatprep.subr.mxu0 %v10901_v2  ;;  %10612 = vmatprep.subr.mxu1 %v10901_v2 }
 0x988   : > { %10556 = vmatpush3.msra.mxu0 %v8827_v30  ;;  %10557 = vmatprep.mubr.msk.f32.mxu0 %vm10902_vm1, %v10901_v2 }
 0x989   : > { %10613 = vmatpush3.msra.mxu1 %v8851_v31  ;;  %10614 = vmatprep.mubr.msk.f32.mxu1 %vm10902_vm1, %v10901_v2 }
 0x98a   : > { %10558 = vmatmul.mubr.msk.f32.vlgmr.msra.gmra.mxu0 %vm686_vm0, %v12264_v55  ;;  %10579 = vmatprep.subr.mxu0 %v10901_v2 }
 0x98b   : > { %10615 = vmatmul.mubr.msk.f32.vlgmr.msra.gmra.mxu1 %vm686_vm0, %v12264_v55  ;;  %10580 = vmatpush3.msra.mxu0 %v8850_v46 }
 0x98c   : > { %10581 = vmatprep.subr.mxu0 %v10901_v2  ;;  %10595 = vmatprep.mubr.msk.f32.mxu0 %vm10902_vm1, %v10901_v2 }
 0x98d   : > { %10582 = vmatpush3.msra.mxu0 %v8849_v17  ;;  %10636 = vmatprep.subr.mxu1 %v10901_v2 }
 0x98e   : > { %10583 = vmatprep.subr.mxu0 %v10901_v2  ;;  %10638 = vmatprep.mubr.msk.f32.mxu1 %vm10902_vm1, %v10901_v2 }
 0x98f   : > { %10584 = vmatpush3.msra.mxu0 %v8848_v32 }
 0x990   : > { %10585 = vmatprep.subr.mxu0 %v10901_v2 }
 0x991   : > { %10586 = vmatpush3.msra.mxu0 %v8847_v33 }
 0x992   : > { %10587 = vmatprep.subr.mxu0 %v10901_v2 }
 0x993   : > { %10588 = vmatpush3.msra.mxu0 %v8846_v34 }
 0x994   : > { %10589 = vmatprep.subr.mxu0 %v10901_v2 }
 0x995   : > { %10590 = vmatpush3.msra.mxu0 %v8845_v35 }
 0x996   : > { %10591 = vmatprep.subr.mxu0 %v10901_v2 }
 0x997   : > { %10592 = vmatpush3.msra.mxu0 %v8844_v36  ;;  %v4782_v37 = vpop.f32.mrf.mxu0  ;;  %v13024_v38 = vpop.f32.mrf.mxu1 }
 0x998   : > { %10593 = vmatprep.subr.mxu0 %v10901_v2 }
 0x999   : > { %10594 = vmatpush3.msra.mxu0 %v8843_v49  ;;  %v10198_v52 = vpop.f32.mrf.mxu0  ;;  %v10236_v54 = vpop.f32.mrf.mxu1 }
 0x99a   : > { %10596 = vmatmul.mubr.msk.f32.vlgmr.msra.gmra.mxu0 %vm686_vm0, %v12264_v55  ;;  %10617 = vmatprep.subr.mxu0 %v10901_v2 }
 0x99b   : > { %10618 = vmatpush3.msra.mxu0 %v8866_v39  ;;  %10633 = vmatprep.mubr.msk.f32.mxu0 %vm10902_vm1, %v10901_v2 }
 0x99c   : > { %10619 = vmatprep.subr.mxu0 %v10901_v2 }
 0x99d   : > { %10620 = vmatpush3.msra.mxu0 %v8865_v50 }
 0x99e   : > { %10621 = vmatprep.subr.mxu0 %v10901_v2 }
 0x99f   : > { %10622 = vmatpush3.msra.mxu0 %v8864_v40 }
 0x9a0   : > { %10623 = vmatprep.subr.mxu0 %v10901_v2 }
 0x9a1   : > { %10624 = vmatpush3.msra.mxu0 %v8863_v41 }
 0x9a2   : > { %10625 = vmatprep.subr.mxu0 %v10901_v2 }
 0x9a3   : > { %10626 = vmatpush3.msra.mxu0 %v8862_v42 }
 0x9a4   : > { %10627 = vmatprep.subr.mxu0 %v10901_v2 }
 0x9a5   : > { %10628 = vmatpush3.msra.mxu0 %v8861_v43 }
 0x9a6   : > { %10629 = vmatprep.subr.mxu0 %v10901_v2 }
 0x9a7   : > { %10630 = vmatpush3.msra.mxu0 %v8860_v45 }
 0x9a8   : > { %10631 = vmatprep.subr.mxu0 %v10901_v2  ;;  %v4852_v48 = vpop.f32.mrf.mxu0 }
 0x9a9   : > { %10632 = vmatpush3.msra.mxu0 %v8859_v47  ;;  %v5062_v51 = vpop.f32.mrf.mxu1 }
 0x9aa   : > { %10634 = vmatmul.mubr.msk.f32.vlgmr.msra.gmra.mxu0 %vm686_vm0, %v12264_v55  ;;  %v10217_v53 = vpop.f32.mrf.mxu0  ;;  %10656 = vmatprep.subr.mxu0 %v10901_v2 }
 0x9ab   : > { %v10274_v57 = vpop.f32.mrf.mxu1  ;;  %10658 = vmatprep.mubr.msk.f32.mxu0 %vm10902_vm1, %v10901_v2 }
 0x9ba   : > { %v4992_v58 = vpop.f32.mrf.mxu0 }
 0x9bb   : > { %v5202_v59 = vpop.f32.mrf.mxu1 }
 0x9bc   : > { %v10255_v60 = vpop.f32.mrf.mxu0 }
 0x9bd   : > { %v10312_v61 = vpop.f32.mrf.mxu1 }
 0x9cc   : > { %v5132_v62 = vpop.f32.mrf.mxu0 }
 0x9cd   : > { %v5342_v63 = vpop.f32.mrf.mxu1 }
 0x9ce   : > { %10637 = vmatpush3.xpose.msk.msra.mxu1 %vm2370_vm2, %v5342_v63  ;;  %v10293_v0 = vpop.f32.mrf.mxu0 }
 0x9cf   : > { %v10350_v1 = vpop.f32.mrf.mxu1  ;;  %10641 = vmatprep.subr.mxu1 %v10901_v2 }
 0x9d1   : > { %10639 = vmatmul.mubr.msk.f32.vlgmr.msra.gmra.mxu1 %vm2370_vm2, %v4782_v37 }
 0x9d2   : > { %10643 = vmatprep.mubr.msk.f32.mxu1 %vm10902_vm1, %v10901_v2 }
 0x9de   : > { %v5272_v3 = vpop.f32.mrf.mxu0 }
 0x9df   : > { %v5482_v4 = vpop.f32.mrf.mxu1 }
 0x9e0   : > { %v10331_v5 = vpop.f32.mrf.mxu0 }
 0x9e1   : > { %v10388_v6 = vpop.f32.mrf.mxu1 }
 0x9f0   : > { %v5412_v7 = vpop.f32.mrf.mxu0 }
 0x9f1   : > { %v5622_v8 = vpop.f32.mrf.mxu1  ;;  %10642 = vmatpush3.xpose.msk.msra.mxu1 %vm2370_vm2, %v5412_v7 }
 0x9f2   : > { %10657 = vmatpush3.xpose.msk.msra.mxu0 %vm2370_vm2, %v5622_v8  ;;  %v10369_v9 = vpop.f32.mrf.mxu0  ;;  %10646 = vmatprep.subr.mxu1 %v10901_v2 }
 0x9f3   : > { %v10426_v10 = vpop.f32.mrf.mxu1  ;;  %10666 = vmatprep.subr.mxu0 %v10901_v2 }
 0x9f4   : > { %10644 = vmatmul.mubr.msk.f32.vlgmr.msra.gmra.mxu1 %vm2370_vm2, %v4852_v48 }
 0x9f5   : > { %10659 = vmatmul.mubr.msk.f32.vlgmr.msra.gmra.mxu0 %vm2370_vm2, %v5062_v51  ;;  %10647 = vmatpush3.xpose.msk.msra.mxu1 %vm2370_vm2, %v5482_v4 }
 0x9f6   : > { %10648 = vmatprep.mubr.msk.f32.mxu1 %vm10902_vm1, %v10901_v2  ;;  %10651 = vmatprep.subr.mxu1 %v10901_v2 }
 0x9f7   : > { %10668 = vmatprep.mubr.msk.f32.mxu0 %vm10902_vm1, %v10901_v2 }
 0x9f8   : > { %10649 = vmatmul.mubr.msk.f32.vlgmr.msra.gmra.mxu1 %vm2370_vm2, %v13024_v38 }
 0x9f9   : > { %10653 = vmatprep.mubr.msk.f32.mxu1 %vm10902_vm1, %v10901_v2 }
 0xa02   : > { %v5552_v11 = vpop.f32.mrf.mxu0 }
 0xa03   : > { %v5762_v12 = vpop.f32.mrf.mxu1  ;;  %10652 = vmatpush3.xpose.msk.msra.mxu1 %vm2370_vm2, %v5552_v11 }
 0xa04   : > { %10667 = vmatpush3.xpose.msk.msra.mxu0 %vm2370_vm2, %v5762_v12  ;;  %v10407_v13 = vpop.f32.mrf.mxu0  ;;  %10661 = vmatprep.subr.mxu1 %v10901_v2 }
 0xa05   : > { %v10464_v14 = vpop.f32.mrf.mxu1  ;;  %10676 = vmatprep.subr.mxu0 %v10901_v2 }
 0xa06   : > { %10654 = vmatmul.mubr.msk.f32.vlgmr.msra.gmra.mxu1 %vm2370_vm2, %v4992_v58 }
 0xa07   : > { %10669 = vmatmul.mubr.msk.f32.vlgmr.msra.gmra.mxu0 %vm2370_vm2, %v5202_v59  ;;  %10663 = vmatprep.mubr.msk.f32.mxu1 %vm10902_vm1, %v10901_v2 }
 0xa08   : > { %10678 = vmatprep.mubr.msk.f32.mxu0 %vm10902_vm1, %v10901_v2 }
 0xa14   : > { %v5692_v15 = vpop.f32.mrf.mxu0 }
 0xa15   : > { %v5902_v16 = vpop.f32.mrf.mxu1  ;;  %10662 = vmatpush3.xpose.msk.msra.mxu1 %vm2370_vm2, %v5692_v15 }
 0xa16   : > { %10677 = vmatpush3.msra.mxu0 %v5902_v16  ;;  %v10445_v18 = vpop.f32.mrf.mxu0  ;;  %10671 = vmatprep.subr.mxu1 %v10901_v2 }
 0xa17   : > { %v10502_v19 = vpop.f32.mrf.mxu1  ;;  %10686 = vmatprep.subr.mxu0 %v10901_v2 }
 0xa18   : > { %10664 = vmatmul.mubr.msk.f32.vlgmr.msra.gmra.mxu1 %vm2370_vm2, %v5132_v62 }
 0xa19   : > { %10673 = vmatprep.mubr.msk.f32.mxu1 %vm10902_vm1, %v10901_v2 }
 0xa26   : > { %v5832_v20 = vpop.f32.mrf.mxu0 }
 0xa27   : > { %v13105_v21 = vpop.f32.mrf.mxu1  ;;  %10672 = vmatpush3.xpose.msk.msra.mxu1 %vm2370_vm2, %v5832_v20 }
 0xa28   : > { %v10483_v22 = vpop.f32.mrf.mxu0  ;;  %10681 = vmatprep.subr.mxu1 %v10901_v2 }
 0xa29   : > { %v10540_v23 = vpop.f32.mrf.mxu1 }
 0xa2a   : > { %10674 = vmatmul.mubr.msk.f32.vlgmr.msra.gmra.mxu1 %vm2370_vm2, %v5272_v3 }
 0xa2b   : > { %10683 = vmatprep.mubr.msk.f32.mxu1 %vm10902_vm1, %v10901_v2 }
 0xa38   : > { %v5972_v24 = vpop.f32.mrf.mxu0 }
 0xa39   : > { %v13112_v25 = vpop.f32.mrf.mxu1  ;;  %10682 = vmatpush3.msra.mxu1 %v5972_v24 }
 0xa3a   : > { %v10521_v26 = vpop.f32.mrf.mxu0  ;;  %10691 = vmatprep.subr.mxu1 %v10901_v2 }
 0xa3b   : > { %v10578_v27 = vpop.f32.mrf.mxu1 }
 0xa4a   : > { %v13115_v28 = vpop.f32.mrf.mxu0 }
 0xa4b   : > { %v13117_v44 = vpop.f32.mrf.mxu1 }
 0xa4c   : > { %v10559_v29 = vpop.f32.mrf.mxu0 }
 0xa4d   : > { %v10616_v30 = vpop.f32.mrf.mxu1 }
 0xa5a   : > { %v13119_v31 = vpop.f32.mrf.mxu0 }
 0xa5c   : > { %v10597_v46 = vpop.f32.mrf.mxu0 }
 0xa6a   : > { %v13121_v17 = vpop.f32.mrf.mxu0 }
 0xa6c   : > { %v10635_v32 = vpop.f32.mrf.mxu0 }
 0xa91   : > { %v6468_v33 = vpop.f32.mrf.mxu1 }
 0xa92   : > { %v7004_v34 = vmul.f32 0.35355338, %v6468_v33 }
 0xa93   : > { %v10640_v35 = vpop.f32.mrf.mxu1 }
 0xa94   : > { %v7012_v36 = vsel %vm485_vm3, -1e+09, %v7004_v34 }
 0xa95   : > { %v7020_v49 = vsel %vm2370_vm2, %v7012_v36, -inf }
 0xa96   : > { %7021 = vmax.xlane.f32.xlu0 %v7020_v49 }
 0xab4   : > { %v6544_v37 = vpop.f32.mrf.mxu1 }
 0xab5   : > { %v7005_v38 = vmul.f32 0.35355338, %v6544_v37  ;;  %v6772_v39 = vpop.f32.mrf.mxu0 }
 0xab6   : > { %v10645_v52 = vpop.f32.mrf.mxu1  ;;  %v7008_v42 = vmul.f32 0.35355338, %v6772_v39 }
 0xab7   : > { %v10660_v54 = vpop.f32.mrf.mxu0  ;;  %v7013_v50 = vsel %vm485_vm3, -1e+09, %v7005_v38 }
 0xab8   : > { %v6620_v40 = vpop.f32.mrf.mxu1  ;;  %v7023_v41 = vsel %vm2370_vm2, %v7013_v50, -inf  ;;  %v7016_v51 = vsel %vm485_vm3, -1e+09, %v7008_v42 }
 0xab9   : > { %v7006_v43 = vmul.f32 0.35355338, %v6620_v40  ;;  %7024 = vmax.xlane.f32.xlu1 %v7023_v41  ;;  %v7032_v53 = vsel %vm2370_vm2, %v7016_v51, -inf }
 0xaba   : > { %v10650_v45 = vpop.f32.mrf.mxu1 }
 0xabb   : > { %v7014_v47 = vsel %vm485_vm3, -1e+09, %v7006_v43 }
 0xabc   : > { %v7026_v48 = vsel %vm2370_vm2, %v7014_v47, -inf }
 0xabd   : > { %7027 = vmax.xlane.f32.xlu0 %v7026_v48 }
 0xac1   : > { %7033 = vmax.xlane.f32.xlu0 %v7032_v53 }
 0xac6   : > { %v6696_v57 = vpop.f32.mrf.mxu1 }
 0xac7   : > { %v7007_v58 = vmul.f32 0.35355338, %v6696_v57  ;;  %v6924_v59 = vpop.f32.mrf.mxu0 }
 0xac8   : > { %v7010_v60 = vmul.f32 0.35355338, %v6924_v59  ;;  %v10655_v61 = vpop.f32.mrf.mxu1 }
 0xac9   : > { %v10670_v62 = vpop.f32.mrf.mxu0  ;;  %v7015_v63 = vsel %vm485_vm3, -1e+09, %v7007_v58 }
 0xaca   : > { %v7029_v0 = vsel %vm2370_vm2, %v7015_v63, -inf  ;;  %v7018_v1 = vsel %vm485_vm3, -1e+09, %v7010_v60 }
 0xacb   : > { %7030 = vmax.xlane.f32.xlu1 %v7029_v0  ;;  %v7038_v3 = vsel %vm2370_vm2, %v7018_v1, -inf }
 0xacc   : > { %7039 = vmax.xlane.f32.xlu0 %v7038_v3 }
 0xad8   : > { %v6848_v4 = vpop.f32.mrf.mxu1 }
 0xad9   : > { %v7009_v5 = vmul.f32 0.35355338, %v6848_v4 }
 0xada   : > { %v10665_v6 = vpop.f32.mrf.mxu1 }
 0xadb   : > { %v7017_v7 = vsel %vm485_vm3, -1e+09, %v7009_v5 }
 0xadc   : > { %v7035_v8 = vsel %vm2370_vm2, %v7017_v7, -inf }
 0xadd   : > { %7036 = vmax.xlane.f32.xlu1 %v7035_v8 }
 0xaea   : > { %v7000_v9 = vpop.f32.mrf.mxu1 }
 0xaeb   : > { %v7011_v10 = vmul.f32 0.35355338, %v7000_v9 }
 0xaec   : > { %v10675_v11 = vpop.f32.mrf.mxu1 }
 0xaed   : > { %v7019_v12 = vsel %vm485_vm3, -1e+09, %v7011_v10 }
 0xaee   : > { %v7041_v13 = vsel %vm2370_vm2, %v7019_v12, -inf }
 0xaef   : > { %7042 = vmax.xlane.f32.xlu1 %v7041_v13 }
 0xb1f   : > { %v7022_v14 = vpop.xlane.xlu0 %7021 }
 0xb20   : > { %v7044_v15 = vsub.f32 %v7012_v36, %v7022_v14 }
 0xb22   : > { %v7052_v16 = vmul.f32 1.442695, %v7044_v15 }
 0xb24   : > { %10856 = vpow2.f32 %v7052_v16 }
 0xb31   : > { %v10857_v18 = vpop.eup %10856 }
 0xb32   : > { %v7068_v19 = vsel %vm2370_vm2, %v10857_v18, 0.0 }
 0xb33   : > { %7069 = vadd.xlane.f32.xlu0 %v7068_v19  ;;  %v8868_v19 = vld [vmem:[%s13396_s5 + $0x48] sm:$0xff] }
 0xb42   : > { %v7025_v20 = vpop.xlane.xlu1 %7024 }
 0xb43   : > { %v7045_v22 = vsub.f32 %v7013_v50, %v7025_v20 }
 0xb45   : > { %v7054_v23 = vmul.f32 1.442695, %v7045_v22 }
 0xb46   : > { %v7028_v24 = vpop.xlane.xlu0 %7027 }
 0xb47   : > { %10858 = vpow2.f32 %v7054_v23  ;;  %v7046_v26 = vsub.f32 %v7014_v47, %v7028_v24  ;;  %v8870_v23 = vld [vmem:[%s13396_s5 + $0x58] sm:$0xff] }
 0xb49   : > { %v7056_v27 = vmul.f32 1.442695, %v7046_v26 }
 0xb4a   : > { %v7034_v56 = vpop.xlane.xlu0 %7033 }
 0xb4b   : > { %10860 = vpow2.f32 %v7056_v27  ;;  %v7048_v29 = vsub.f32 %v7016_v51, %v7034_v56  ;;  %v8871_v27 = vld [vmem:[%s13396_s5 + $0x60] sm:$0xff] }
 0xb4d   : > { %v7060_v30 = vmul.f32 1.442695, %v7048_v29 }
 0xb4f   : > { %10862 = vpow2.f32 %v7060_v30  ;;  %v8873_v30 = vld [vmem:[%s13396_s5 + $0x70] sm:$0xff] }
 0xb54   : > { %v10859_v46 = vpop.eup %10858  ;;  %v7031_v32 = vpop.xlane.xlu1 %7030 }
 0xb55   : > { %v7047_v33 = vsub.f32 %v7015_v63, %v7031_v32  ;;  %v7040_v34 = vpop.xlane.xlu0 %7039  ;;  %v7071_v35 = vsel %vm2370_vm2, %v10859_v46, 0.0 }
 0xb56   : > { %v7050_v36 = vsub.f32 %v7018_v1, %v7040_v34  ;;  %7072 = vadd.xlane.f32.xlu1 %v7071_v35 }
 0xb57   : > { %v7058_v49 = vmul.f32 1.442695, %v7047_v33  ;;  %v8872_v33 = vld [vmem:[%s13396_s5 + $0x68] sm:$0xff] }
 0xb58   : > { %v10861_v37 = vpop.eup %10860  ;;  %v7064_v38 = vmul.f32 1.442695, %v7050_v36 }
 0xb59   : > { %10864 = vpow2.f32 %v7058_v49  ;;  %v7074_v39 = vsel %vm2370_vm2, %v10861_v37, 0.0 }
 0xb5a   : > { %10866 = vpow2.f32 %v7064_v38  ;;  %7075 = vadd.xlane.f32.xlu0 %v7074_v39 }
 0xb5c   : > { %v10863_v52 = vpop.eup %10862 }
 0xb5d   : > { %v7080_v54 = vsel %vm2370_vm2, %v10863_v52, 0.0 }
 0xb5e   : > { %7081 = vadd.xlane.f32.xlu0 %v7080_v54 }
 0xb66   : > { %v10865_v50 = vpop.eup %10864  ;;  %v7037_v40 = vpop.xlane.xlu1 %7036 }
 0xb67   : > { %v10867_v41 = vpop.eup %10866  ;;  %v7049_v42 = vsub.f32 %v7017_v7, %v7037_v40  ;;  %v7077_v43 = vsel %vm2370_vm2, %v10865_v50, 0.0 }
 0xb68   : > { %7078 = vadd.xlane.f32.xlu1 %v7077_v43  ;;  %v7086_v45 = vsel %vm2370_vm2, %v10867_v41, 0.0 }
 0xb69   : > { %v7062_v47 = vmul.f32 1.442695, %v7049_v42  ;;  %7087 = vadd.xlane.f32.xlu0 %v7086_v45 }
 0xb6b   : > { %10868 = vpow2.f32 %v7062_v47 }
 0xb78   : > { %v10869_v48 = vpop.eup %10868  ;;  %v7043_v51 = vpop.xlane.xlu1 %7042 }
 0xb79   : > { %v7051_v53 = vsub.f32 %v7019_v12, %v7043_v51  ;;  %v7083_v57 = vsel %vm2370_vm2, %v10869_v48, 0.0 }
 0xb7a   : > { %7084 = vadd.xlane.f32.xlu1 %v7083_v57 }
 0xb7b   : > { %v7066_v58 = vmul.f32 1.442695, %v7051_v53 }
 0xb7d   : > { %10870 = vpow2.f32 %v7066_v58 }
 0xb8a   : > { %v13154_v59 = vpop.eup %10870 }
 0xb8b   : > { %v7089_v60 = vsel %vm2370_vm2, %v13154_v59, 0.0 }
 0xb8c   : > { %7090 = vadd.xlane.f32.xlu1 %v7089_v60 }
 0xbbc   : > { %v7070_v61 = vpop.xlane.xlu0 %7069 }
 0xbbd   : > { %10872 = vrcp.f32 %v7070_v61 }
 0xbca   : > { %v10873_v62 = vpop.eup %10872 }
 0xbcb   : > { %v7093_v63 = vmul.f32 %v10873_v62, %v10857_v18 }
 0xbcd   : > { %10679 = vmatmul.mubr.msk.f32.vlgmr.msra.gmra.mxu0 %vm2370_vm2, %v7093_v63 }
 0xbce   : > { %10687 = vmatpush3.msra.mxu0 %v13105_v21  ;;  %10688 = vmatprep.mubr.msk.f32.mxu0 %vm10902_vm1, %v10901_v2 }
 0xbcf   : > { %10696 = vmatprep.subr.mxu0 %v10901_v2 }
 0xbdf   : > { %v7073_v0 = vpop.xlane.xlu1 %7072 }
 0xbe0   : > { %10874 = vrcp.f32 %v7073_v0 }
 0xbe3   : > { %v7076_v1 = vpop.xlane.xlu0 %7075 }
 0xbe4   : > { %10876 = vrcp.f32 %v7076_v1 }
 0xbe7   : > { %v7082_v3 = vpop.xlane.xlu0 %7081 }
 0xbe8   : > { %10878 = vrcp.f32 %v7082_v3 }
 0xbed   : > { %v10875_v4 = vpop.eup %10874 }
 0xbee   : > { %v7095_v5 = vmul.f32 %v10875_v4, %v10859_v46 }
 0xbf0   : > { %10684 = vmatmul.mubr.msk.f32.vlgmr.msra.gmra.mxu1 %vm2370_vm2, %v7095_v5 }
 0xbf1   : > { %v10877_v6 = vpop.eup %10876  ;;  %v7079_v7 = vpop.xlane.xlu1 %7078  ;;  %10692 = vmatpush3.msra.mxu1 %v13115_v28  ;;  %10693 = vmatprep.mubr.msk.f32.mxu1 %vm10902_vm1, %v10901_v2 }
 0xbf2   : > { %10880 = vrcp.f32 %v7079_v7  ;;  %v7088_v21 = vpop.xlane.xlu0 %7087  ;;  %v7097_v8 = vmul.f32 %v10877_v6, %v10861_v37  ;;  %10701 = vmatprep.subr.mxu1 %v10901_v2  ;;  %v8874_v37 = vld [vmem:[%s13396_s5 + $0x78] sm:$0xff] }
 0xbf3   : > { %10882 = vrcp.f32 %v7088_v21 }
 0xbf4   : > { %10689 = vmatmul.mubr.msk.f32.vlgmr.msra.gmra.mxu0 %vm2370_vm2, %v7097_v8 }
 0xbf5   : > { %v10879_v9 = vpop.eup %10878  ;;  %10697 = vmatpush3.msra.mxu0 %v13112_v25  ;;  %10698 = vmatprep.mubr.msk.f32.mxu0 %vm10902_vm1, %v10901_v2 }
 0xbf6   : > { %10706 = vmatprep.subr.mxu0 %v10901_v2  ;;  %v7101_v28 = vmul.f32 %v10879_v9, %v10863_v52 }
 0xbf8   : > { %10699 = vmatmul.mubr.msk.f32.vlgmr.msra.gmra.mxu0 %vm2370_vm2, %v7101_v28 }
 0xbf9   : > { %10707 = vmatpush3.msra.mxu0 %v13117_v44  ;;  %10708 = vmatprep.mubr.msk.f32.mxu0 %vm10902_vm1, %v10901_v2  ;;  %v8867_v44 = vld [vmem:[%s13396_s5 + $0x40] sm:$0xff] }
 0xbfa   : > { %10716 = vmatprep.subr.mxu0 %v10901_v2 }
 0xbff   : > { %v10881_v10 = vpop.eup %10880 }
 0xc00   : > { %v10883_v11 = vpop.eup %10882  ;;  %v7099_v12 = vmul.f32 %v10881_v10, %v10865_v50 }
 0xc01   : > { %v7105_v13 = vmul.f32 %v10883_v11, %v10867_v41 }
 0xc02   : > { %10694 = vmatmul.mubr.msk.f32.vlgmr.msra.gmra.mxu1 %vm2370_vm2, %v7099_v12 }
 0xc03   : > { %v7085_v25 = vpop.xlane.xlu1 %7084  ;;  %10702 = vmatpush3.msra.mxu1 %v13119_v31  ;;  %10709 = vmatmul.mubr.msk.f32.vlgmr.msra.gmra.mxu0 %vm2370_vm2, %v7105_v13 }
 0xc04   : > { %10884 = vrcp.f32 %v7085_v25  ;;  %10703 = vmatprep.mubr.msk.f32.mxu1 %vm10902_vm1, %v10901_v2  ;;  %10711 = vmatprep.subr.mxu1 %v10901_v2 }
 0xc05   : > { %10718 = vmatprep.mubr.msk.f32.mxu0 %vm10902_vm1, %v10901_v2  ;;  %10717 = vmatpush3.msra.mxu0 %v8867_v44 }
 0xc06   : > { %10726 = vmatprep.subr.mxu0 %v10901_v2 }
 0xc11   : > { %v10885_v14 = vpop.eup %10884 }
 0xc12   : > { %v7103_v31 = vmul.f32 %v10885_v14, %v10869_v48 }
 0xc14   : > { %10704 = vmatmul.mubr.msk.f32.vlgmr.msra.gmra.mxu1 %vm2370_vm2, %v7103_v31 }
 0xc15   : > { %v7091_v15 = vpop.xlane.xlu1 %7090  ;;  %10712 = vmatpush3.msra.mxu1 %v13121_v17  ;;  %10713 = vmatprep.mubr.msk.f32.mxu1 %vm10902_vm1, %v10901_v2  ;;  %v8869_v17 = vld [vmem:[%s13396_s5 + $0x50] sm:$0xff] }
 0xc16   : > { %10886 = vrcp.f32 %v7091_v15  ;;  %10721 = vmatprep.subr.mxu1 %v10901_v2 }
 0xc23   : > { %v10887_v16 = vpop.eup %10886 }
 0xc24   : > { %v7107_v18 = vmul.f32 %v10887_v16, %v13154_v59 }
 0xc26   : > { %10714 = vmatmul.mubr.msk.f32.vlgmr.msra.gmra.mxu1 %vm2370_vm2, %v7107_v18  ;;  %v8942_v18 = vld [vmem:[%s13399_s8 + $0x78] sm:$0xff] }
 0xc27   : > { %10723 = vmatprep.mubr.msk.f32.mxu1 %vm10902_vm1, %v10901_v2  ;;  %10722 = vmatpush3.msra.mxu1 %v8868_v19  ;;  %v8940_v19 = vld [vmem:[%s13399_s8 + $0x68] sm:$0xff] }
 0xc28   : > { %10731 = vmatprep.subr.mxu1 %v10901_v2 }
 0xc8d   : > { %v7177_v20 = vpop.f32.mrf.mxu0 }
 0xc8e   : > { %10719 = vmatmul.mubr.msk.f32.vlgmr.msra.gmra.mxu0 %vm2370_vm2, %v7177_v20  ;;  %v8938_v20 = vld [vmem:[%s13399_s8 + $0x58] sm:$0xff] }
 0xc8f   : > { %v10680_v22 = vpop.f32.mrf.mxu0  ;;  %10727 = vmatpush3.msra.mxu0 %v8869_v17  ;;  %10728 = vmatprep.mubr.msk.f32.mxu0 %vm10902_vm1, %v10901_v2  ;;  %v8939_v17 = vld [vmem:[%s13399_s8 + $0x60] sm:$0xff] }
 0xc90   : > { %10736 = vmatprep.subr.mxu0 %v10901_v2  ;;  %v8937_v22 = vld [vmem:[%s13399_s8 + $0x50] sm:$0xff] }
 0xcb0   : > { %v7250_v24 = vpop.f32.mrf.mxu1 }
 0xcb1   : > { %10724 = vmatmul.mubr.msk.f32.vlgmr.msra.gmra.mxu1 %vm2370_vm2, %v7250_v24  ;;  %v8959_v24 = vld [vmem:[%s13401_s10 + $0xf8] sm:$0xff] }
 0xcb2   : > { %v10685_v26 = vpop.f32.mrf.mxu1  ;;  %10732 = vmatpush3.msra.mxu1 %v8870_v23  ;;  %10733 = vmatprep.mubr.msk.f32.mxu1 %vm10902_vm1, %v10901_v2  ;;  %v8936_v23 = vld [vmem:[%s13399_s8 + $0x48] sm:$0xff] }
 0xcb3   : > { %10741 = vmatprep.subr.mxu1 %v10901_v2  ;;  %v8958_v26 = vld [vmem:[%s13401_s10 + $0xf0] sm:$0xff] }
 0xcb4   : > { %v7323_v56 = vpop.f32.mrf.mxu0 }
 0xcb5   : > { %10729 = vmatmul.mubr.msk.f32.vlgmr.msra.gmra.mxu0 %vm2370_vm2, %v7323_v56  ;;  %v8957_v56 = vld [vmem:[%s13401_s10 + $0xe8] sm:$0xff] }
 0xcb6   : > { %v10690_v29 = vpop.f32.mrf.mxu0  ;;  %10737 = vmatpush3.msra.mxu0 %v8871_v27  ;;  %10738 = vmatprep.mubr.msk.f32.mxu0 %vm10902_vm1, %v10901_v2  ;;  %v8935_v27 = vld [vmem:[%s13399_s8 + $0x40] sm:$0xff] }
 0xcb7   : > { %10746 = vmatprep.subr.mxu0 %v10901_v2  ;;  %v8956_v29 = vld [vmem:[%s13401_s10 + $0xe0] sm:$0xff] }
 0xcb8   : > { %v7469_v46 = vpop.f32.mrf.mxu0 }
 0xcb9   : > { %10739 = vmatmul.mubr.msk.f32.vlgmr.msra.gmra.mxu0 %vm2370_vm2, %v7469_v46  ;;  %v8954_v46 = vld [vmem:[%s13401_s10 + $0xd0] sm:$0xff] }
 0xcba   : > { %v10700_v32 = vpop.f32.mrf.mxu0  ;;  %10747 = vmatpush3.msra.mxu0 %v8873_v30  ;;  %10748 = vmatprep.mubr.msk.f32.mxu0 %vm10902_vm1, %v10901_v2  ;;  %v8955_v30 = vld [vmem:[%s13401_s10 + $0xd8] sm:$0xff] }
 0xcbb   : > { %10756 = vmatprep.subr.mxu0 %v10901_v2  ;;  %v8953_v32 = vld [vmem:[%s13401_s10 + $0xc8] sm:$0xff] }
 0xcc2   : > { %v7396_v34 = vpop.f32.mrf.mxu1 }
 0xcc3   : > { %v7615_v35 = vpop.f32.mrf.mxu0  ;;  %10734 = vmatmul.mubr.msk.f32.vlgmr.msra.gmra.mxu1 %vm2370_vm2, %v7396_v34  ;;  %v8951_v34 = vld [vmem:[%s13401_s10 + $0xb8] sm:$0xff] }
 0xcc4   : > { %10749 = vmatmul.mubr.msk.f32.vlgmr.msra.gmra.mxu0 %vm2370_vm2, %v7615_v35  ;;  %v10695_v36 = vpop.f32.mrf.mxu1  ;;  %10742 = vmatpush3.msra.mxu1 %v8872_v33  ;;  %v8952_v33 = vld [vmem:[%s13401_s10 + $0xc0] sm:$0xff]  ;;  %v8950_v35 = vld [vmem:[%s13401_s10 + $0xb0] sm:$0xff] }
 0xcc5   : > { %v10710_v49 = vpop.f32.mrf.mxu0  ;;  %10743 = vmatprep.mubr.msk.f32.mxu1 %vm10902_vm1, %v10901_v2  ;;  %10751 = vmatprep.subr.mxu1 %v10901_v2  ;;  %v8949_v36 = vld [vmem:[%s13401_s10 + $0xa8] sm:$0xff] }
 0xcc6   : > { %10772 = vmatprep.mubr.msk.f32.mxu0 %vm10902_vm1, %v10901_v2  ;;  %10757 = vmatpush3.msra.mxu0 %v8942_v18  ;;  %v8948_v49 = vld [vmem:[%s13401_s10 + $0xa0] sm:$0xff] }
 0xcc7   : > { %10758 = vmatprep.subr.mxu0 %v10901_v2 }
 0xcd4   : > { %v7542_v38 = vpop.f32.mrf.mxu1 }
 0xcd5   : > { %10744 = vmatmul.mubr.msk.f32.vlgmr.msra.gmra.mxu1 %vm2370_vm2, %v7542_v38 }
 0xcd6   : > { %v10705_v39 = vpop.f32.mrf.mxu1  ;;  %10752 = vmatpush3.msra.mxu1 %v8874_v37  ;;  %10753 = vmatprep.mubr.msk.f32.mxu1 %vm10902_vm1, %v10901_v2  ;;  %v8947_v37 = vld [vmem:[%s13401_s10 + $0x98] sm:$0xff] }
 0xcd7   : > { %10775 = vmatprep.subr.mxu1 %v10901_v2 }
 0xce6   : > { %v7688_v52 = vpop.f32.mrf.mxu1 }
 0xce7   : > { %10754 = vmatmul.mubr.msk.f32.vlgmr.msra.gmra.mxu1 %vm2370_vm2, %v7688_v52 }
 0xce8   : > { %v10715_v54 = vpop.f32.mrf.mxu1  ;;  %10807 = vmatprep.mubr.msk.f32.mxu1 %vm10902_vm1, %v10901_v2  ;;  %10776 = vmatpush3.msra.mxu1 %v8959_v24 }
 0xce9   : > { %10777 = vmatprep.subr.mxu1 %v10901_v2 }
 0xcea   : > { %10778 = vmatpush3.msra.mxu1 %v8958_v26 }
 0xceb   : > { %10779 = vmatprep.subr.mxu1 %v10901_v2 }
 0xcec   : > { %10780 = vmatpush3.msra.mxu1 %v8957_v56 }
 0xced   : > { %10781 = vmatprep.subr.mxu1 %v10901_v2 }
 0xcee   : > { %10782 = vmatpush3.msra.mxu1 %v8956_v29 }
 0xcef   : > { %10783 = vmatprep.subr.mxu1 %v10901_v2 }
 0xcf0   : > { %10784 = vmatpush3.msra.mxu1 %v8955_v30 }
 0xcf1   : > { %10785 = vmatprep.subr.mxu1 %v10901_v2 }
 0xcf2   : > { %10786 = vmatpush3.msra.mxu1 %v8954_v46 }
 0xcf3   : > { %10787 = vmatprep.subr.mxu1 %v10901_v2 }
 0xcf4   : > { %10788 = vmatpush3.msra.mxu1 %v8953_v32 }
 0xcf5   : > { %10789 = vmatprep.subr.mxu1 %v10901_v2 }
 0xcf6   : > { %10790 = vmatpush3.msra.mxu1 %v8952_v33 }
 0xcf7   : > { %10791 = vmatprep.subr.mxu1 %v10901_v2 }
 0xcf8   : > { %10792 = vmatpush3.msra.mxu1 %v8951_v34 }
 0xcf9   : > { %10793 = vmatprep.subr.mxu1 %v10901_v2 }
 0xcfa   : > { %10794 = vmatpush3.msra.mxu1 %v8950_v35 }
 0xcfb   : > { %10795 = vmatprep.subr.mxu1 %v10901_v2 }
 0xcfc   : > { %10796 = vmatpush3.msra.mxu1 %v8949_v36 }
 0xcfd   : > { %10797 = vmatprep.subr.mxu1 %v10901_v2 }
 0xcfe   : > { %10798 = vmatpush3.msra.mxu1 %v8948_v49 }
 0xcff   : > { %10799 = vmatprep.subr.mxu1 %v10901_v2 }
 0xd00   : > { %10800 = vmatpush3.msra.mxu1 %v8947_v37 }
 0xd01   : > { %10801 = vmatprep.subr.mxu1 %v10901_v2 }
 0xd4e   : > { %v7761_v50 = vpop.f32.mrf.mxu0 }
 0xd4f   : > { %v8276_v62 = vsel %vm686_vm0, %v7761_v50, 0.0  ;;  %v8933_v50 = vld [vmem:[%s13397_s6 + $0x1] ss:$0 sm:$0xff] }
 0xd50   : > { %v10720_v40 = vpop.f32.mrf.mxu0 }
 0xd71   : > { %v7834_v41 = vpop.f32.mrf.mxu1 }
 0xd72   : > { %v8277_v60 = vsel %vm686_vm0, %v7834_v41, 0.0  ;;  %v8934_v41 = vld [vmem:[%s13398_s7 + $0x1] ss:$0 sm:$0xff] }
 0xd73   : > { %v10725_v42 = vpop.f32.mrf.mxu1  ;;  %v8278_v0 = vadd.f32 %v8277_v60, %v8276_v62  ;;  %v8963_v60 = vld [vmem:[%s13402_s11 + $0x1] ss:$0 sm:$0xff] }
 0xd75   : > { %v7907_v43 = vpop.f32.mrf.mxu0 }
 0xd76   : > { %v8279_v63 = vsel %vm686_vm0, %v7907_v43, 0.0 }
 0xd77   : > { %v10730_v45 = vpop.f32.mrf.mxu0  ;;  %v8280_v3 = vadd.f32 %v8279_v63, %v8278_v0 }
 0xd78   : > { %v8946_v45 = vld [vmem:[%s13401_s10 + $0x90] sm:$0xff] }
 0xd79   : > { %v8053_v47 = vpop.f32.mrf.mxu0  ;;  %10802 = vmatpush3.msra.mxu1 %v8946_v45 }
 0xd7a   : > { %v8283_v5 = vsel %vm686_vm0, %v8053_v47, 0.0  ;;  %v8945_v47 = vld [vmem:[%s13401_s10 + $0x88] sm:$0xff]  ;;  %10803 = vmatprep.subr.mxu1 %v10901_v2 }
 0xd7b   : > { %v10740_v48 = vpop.f32.mrf.mxu0  ;;  %10804 = vmatpush3.msra.mxu1 %v8945_v47 }
 0xd7c   : > { %v8944_v48 = vld [vmem:[%s13401_s10 + $0x80] sm:$0xff]  ;;  %10805 = vmatprep.subr.mxu1 %v10901_v2 }
 0xd7d   : > { %10806 = vmatpush3.msra.mxu1 %v8944_v48 }
 0xd83   : > { %v7980_v51 = vpop.f32.mrf.mxu1 }
 0xd84   : > { %v8199_v53 = vpop.f32.mrf.mxu0  ;;  %v8281_v1 = vsel %vm686_vm0, %v7980_v51, 0.0  ;;  %v8961_v51 = vld [vmem:[%s13400_s9 + $0x1] ss:$0 sm:$0xff] }
 0xd85   : > { %v10735_v57 = vpop.f32.mrf.mxu1  ;;  %v8282_v4 = vadd.f32 %v8281_v1, %v8280_v3  ;;  %v8287_v8 = vsel %vm686_vm0, %v8199_v53, 0.0 }
 0xd86   : > { %v10750_v58 = vpop.f32.mrf.mxu0 }
 0xd87   : > { %v8284_v7 = vadd.f32 %v8283_v5, %v8282_v4 }
 0xd95   : > { %v8126_v59 = vpop.f32.mrf.mxu1 }
 0xd96   : > { %v8285_v6 = vsel %vm686_vm0, %v8126_v59, 0.0 }
 0xd97   : > { %v10745_v61 = vpop.f32.mrf.mxu1  ;;  %v8286_v21 = vadd.f32 %v8285_v6, %v8284_v7 }
 0xd99   : > { %v8288_v28 = vadd.f32 %v8287_v8, %v8286_v21 }
 0xda7   : > { %v8272_v9 = vpop.f32.mrf.mxu1 }
 0xda8   : > { %v8289_v10 = vsel %vm686_vm0, %v8272_v9, 0.0 }
 0xda9   : > { %v8290_v11 = vadd.f32 %v8289_v10, %v8288_v28  ;;  %v10755_v12 = vpop.f32.mrf.mxu1  ;;  %v8966_v28 = vld [vmem:[%s13403_s12 + $0x1] ss:$0 sm:$0xff] }
 0xdab   : > { %v8295_v13 = vadd.f32 %v8290_v11, %v12264_v55  ;;  %v8941_v55 = vld [vmem:[%s13399_s8 + $0x70] sm:$0xff]  ;;  %v8967_v11 = vld [vmem:[%s13404_s13 + $0x1] ss:$0 sm:$0xff] }
 0xdac   : > { %10759 = vmatpush3.msra.mxu0 %v8941_v55 }
 0xdad   : > { %v8296_v25 = vsel %vm686_vm0, %v8295_v13, 0.0  ;;  %10760 = vmatprep.subr.mxu0 %v10901_v2 }
 0xdae   : > { %8297 = vadd.xlane.f32.xlu0 %v8296_v25  ;;  %10761 = vmatpush3.msra.mxu0 %v8940_v19 }
 0xdaf   : > { %10762 = vmatprep.subr.mxu0 %v10901_v2 }
 0xdb0   : > { %10763 = vmatpush3.msra.mxu0 %v8939_v17 }
 0xdb1   : > { %10764 = vmatprep.subr.mxu0 %v10901_v2 }
 0xdb2   : > { %10765 = vmatpush3.msra.mxu0 %v8938_v20 }
 0xdb3   : > { %10766 = vmatprep.subr.mxu0 %v10901_v2 }
 0xdb4   : > { %10767 = vmatpush3.msra.mxu0 %v8937_v22 }
 0xdb5   : > { %10768 = vmatprep.subr.mxu0 %v10901_v2 }
 0xdb6   : > { %10769 = vmatpush3.msra.mxu0 %v8936_v23 }
 0xdb7   : > { %10770 = vmatprep.subr.mxu0 %v10901_v2 }
 0xdb8   : > { %10771 = vmatpush3.msra.mxu0 %v8935_v27 }
 0xe37   : > { %v8298_v44 = vpop.xlane.xlu0 %8297 }
 0xe38   : > { %v8299_v14 = vmul.f32 0.015625, %v8298_v44 }
 0xe3a   : > { %v13261_v31 = vsub.f32 %v8295_v13, %v8299_v14 }
 0xe3c   : > { %v8301_v15 = vmul.f32 %v13261_v31, %v13261_v31 }
 0xe3e   : > { %v8302_v16 = vsel %vm686_vm0, %v8301_v15, 0.0 }
 0xe3f   : > { %8303 = vadd.xlane.f32.xlu1 %v8302_v16 }
 0xec8   : > { %v8304_v38 = vpop.xlane.xlu1 %8303 }
 0xec9   : > { %v8305_v39 = vmul.f32 0.015625, %v8304_v38 }
 0xecb   : > { %v8306_v52 = vadd.f32 1e-06, %v8305_v39 }
 0xecd   : > { %10888 = vrsqrt.f32 %v8306_v52 }
 0xeda   : > { %v10889_v54 = vpop.eup %10888 }
 0xedb   : > { %v8308_v40 = vmul.f32 %v10889_v54, %v13261_v31 }
 0xedd   : > { %v8315_v42 = vmul.f32 %v8933_v50, %v8308_v40 }
 0xedf   : > { %v8322_v43 = vadd.f32 %v8934_v41, %v8315_v42 }
 0xee1   : > { %10773 = vmatmul.mubr.msk.f32.vlgmr.msra.gmra.mxu0 %vm686_vm0, %v8322_v43 }
 0xfa1   : > { %v8428_v53 = vpop.f32.mrf.mxu0 }
 0xfa2   : > { %v8429_v57 = vadd.f32 %v8961_v51, %v8428_v53 }
 0xfa3   : > { %v10774_v58 = vpop.f32.mrf.mxu0 }
 0xfa4   : > { %v8432_v59 = vmax.f32 %v8429_v57, 0.0 }
 0xfa6   : > { %10808 = vmatmul.mubr.f32.vlgmr.msra.gmra.mxu1 %v8432_v59 }
0x1066   : > { %v8505_v61 = vpop.f32.mrf.mxu1 }
0x1067   : > { %v8506_v62 = vadd.f32 %v8963_v60, %v8505_v61 }
0x1068   : > { %v10809_v63 = vpop.f32.mrf.mxu1 }
0x1069   : > { %v8513_v0 = vadd.f32 %v8506_v62, %v8322_v43 }
0x106b   : > { %v8514_v2 = vsel %vm686_vm0, %v8513_v0, 0.0 }
0x106c   : > { %8515 = vadd.xlane.f32.xlu0 %v8514_v2 }
0x10f5   : > { %v8516_v1 = vpop.xlane.xlu0 %8515 }
0x10f6   : > { %v8517_v3 = vmul.f32 0.015625, %v8516_v1 }
0x10f8   : > { %v8518_v4 = vsub.f32 %v8513_v0, %v8517_v3 }
0x10fa   : > { %v8519_v5 = vmul.f32 %v8518_v4, %v8518_v4 }
0x10fc   : > { %v8520_v6 = vsel %vm686_vm0, %v8519_v5, 0.0 }
0x10fd   : > { %8521 = vadd.xlane.f32.xlu1 %v8520_v6 }
0x1186   : > { %v8522_v7 = vpop.xlane.xlu1 %8521 }
0x1187   : > { %v8523_v21 = vmul.f32 0.015625, %v8522_v7 }
0x1189   : > { %v8524_v8 = vadd.f32 1e-06, %v8523_v21 }
0x118b   : > { %10890 = vrsqrt.f32 %v8524_v8 }
0x1198   : > { %v10891_v9 = vpop.eup %10890 }
0x1199   : > { %v8526_v10 = vmul.f32 %v10891_v9, %v8518_v4 }
0x119b   : > { %v8533_v12 = vmul.f32 %v8966_v28, %v8526_v10 }
0x119d   : > { %v8540_v13 = vadd.f32 %v8967_v11, %v8533_v12 }
0x119f   : > { %8541 = vst.msk [vmem:[%s476_s20] sm:$0xff] %vm686_vm0, %v8540_v13 }
0x11a0 PF: > { %s24_s29 = sadd.s32 1, %s10899_s29  }
0x11a1   : > { %p21_p4 = scmp.ge.s32.totalorder %s24_s29, 4  }
0x11a3   :  { %23 = sbr.rel (!%p21_p4) target bundleno = 1 (0x1), region = 121 }

// kernel: my_transformer_forward.3
= control target key start
LH: loop header
LB: loop body
LE: loop exit
PB: predicated region body
PF: predicated region fallthrough
CT: control target
= control target key end

     0   :  { %s13832_s0 = inlined_call_operand.vmem [shape: f32[2,8,64], index: 0, kind: input, shape index: {}]   ;;  %s13833_s1 = inlined_call_operand.vmem [shape: f32[2,8,64], index: 1, kind: input, shape index: {}]   ;;  %s13834_s2 = inlined_call_operand.vmem [shape: f32[2,1,8], index: 2, kind: input, shape index: {}]   ;;  %s13835_s3 = inlined_call_operand.vmem [shape: f32[2,8,64,8], index: 3, kind: input, shape index: {}]   ;;  %s13836_s4 = inlined_call_operand.vmem [shape: f32[2,8,64,8], index: 4, kind: input, shape index: {}]   ;;  %s13837_s5 = inlined_call_operand.vmem [shape: f32[2,8,64,8], index: 5, kind: input, shape index: {}]   ;;  %s13838_s6 = inlined_call_operand.vmem [shape: f32[2,8,8,64], index: 6, kind: input, shape index: {}]   ;;  %s13839_s7 = inlined_call_operand.vmem [shape: f32[2,1,64], index: 7, kind: input, shape index: {}]   ;;  %s13840_s8 = inlined_call_operand.vmem [shape: f32[2,1,64], index: 8, kind: input, shape index: {}]   ;;  %s13841_s9 = inlined_call_operand.vmem [shape: f32[2,8,64,8], index: 9, kind: input, shape index: {}]   ;;  %s13842_s10 = inlined_call_operand.vmem [shape: f32[2,8,64,8], index: 10, kind: input, shape index: {}]   ;;  %s13843_s11 = inlined_call_operand.vmem [shape: f32[2,8,64,8], index: 11, kind: input, shape index: {}]   ;;  %s13844_s12 = inlined_call_operand.vmem [shape: f32[2,8,8,64], index: 12, kind: input, shape index: {}]   ;;  %s13845_s13 = inlined_call_operand.vmem [shape: f32[2,1,64], index: 13, kind: input, shape index: {}]   ;;  %s13846_s14 = inlined_call_operand.vmem [shape: f32[2,1,64], index: 14, kind: input, shape index: {}]   ;;  %s13847_s15 = inlined_call_operand.vmem [shape: f32[2,64,128], index: 15, kind: input, shape index: {}]   ;;  %s13848_s16 = inlined_call_operand.vmem [shape: f32[2,1,128], index: 16, kind: input, shape index: {}]   ;;  %s13849_s17 = inlined_call_operand.vmem [shape: f32[2,128,64], index: 17, kind: input, shape index: {}]   ;;  %s13850_s18 = inlined_call_operand.vmem [shape: f32[2,1,64], index: 18, kind: input, shape index: {}]   ;;  %s13851_s19 = inlined_call_operand.vmem [shape: f32[2,1,64], index: 19, kind: input, shape index: {}]   ;;  %s13852_s20 = inlined_call_operand.vmem [shape: f32[2,1,64], index: 20, kind: input, shape index: {}]   ;;  %s13853_s21 = inlined_call_operand.vmem [shape: f32[64,128], index: 21, kind: input, shape index: {}]   ;;  %s13854_s22 = inlined_call_operand.vmem [shape: f32[1,128], index: 22, kind: input, shape index: {}]   ;;  %s13855_s23 = inlined_call_operand.hbm [shape: f32[2,8,128], index: 23, kind: output, shape index: {}]  }
   0x1   :  { %13870 = sst [smem:[#allocation11_spill]] %s13832_s0 }
   0x2   :  { %13871 = sst [smem:[#allocation12_spill]] %s13833_s1 }
   0x3   :  { %13872 = sst [smem:[#allocation13_spill]] %s13834_s2 }
   0x4   :  { %13873 = sst [smem:[#allocation14_spill]] %s13835_s3 }
   0x5   :  { %13874 = sst [smem:[#allocation15_spill]] %s13836_s4 }
   0x6   :  { %13875 = sst [smem:[#allocation16_spill]] %s13837_s5 }
   0x7   :  { %13876 = sst [smem:[#allocation17_spill]] %s13838_s6 }
   0x8   :  { %13877 = sst [smem:[#allocation18_spill]] %s13839_s7 }
   0x9   :  { %13878 = sst [smem:[#allocation19_spill]] %s13840_s8 }
   0xa   :  { %28 = vsyncpa [#allocation3], 0 }
   0xb   :  { %30 = vsyncpa [#allocation3 + $0x1], 0  ;;  %s11439_s4 = smov 0   ;;  %s11441_s30 = smov 0  }
   0xc   :  { %s11443_s24 = smov 0   ;;  %s11445_s25 = smov 0  }
   0xd LB: > { %13879 = sst [smem:[#allocation5_spill]] %s11302_s4  ;;  %s11460_s5 = sadd.s32 4294967295, %s11314_s25   ;;  %s11314_s25 = sphi %s11445_s25, %s13903_s25   ;;  %s11310_s24 = sphi %s11443_s24, %s13905_s24   ;;  %s11306_s30 = sphi %s11441_s30, %s13907_s30   ;;  %s11302_s4 = sphi %s11439_s4, %s13906_s4  }
   0xe   : > { %13880 = sst [smem:[#allocation6_spill]] %s11310_s24  ;;  %s8787_s1 = sadd.s32 4294967294, %s11314_s25  }
   0xf   : > { %13881 = sst [smem:[#allocation7_spill]] %s11314_s25  ;;  %s11464_s26 = sadd.s32 1, %s11314_s25  }
  0x10   : > { %13882 = sst [smem:[#allocation8_spill]] %s11464_s26  ;;  %s541_s2 = sadd.s32 1, %s11310_s24 }
  0x11   : > { %s538_s6 = ssub.s32 %s11314_s25, %s11464_s26  ;;  %p551_p0 = scmp.ne.s32.totalorder %s11310_s24, %s11306_s30 }
  0x12   : > { %p539_p1 = scmp.eq.s32.totalorder %s538_s6, 0  ;;  %p552_p2 = scmp.eq.s32.totalorder %s11460_s5, 1 }
  0x13   : > { %p557_p3 = scmp.ne.s32.totalorder %s11306_s30, %s11302_s4  ;;  %p558_p4 = scmp.eq.s32.totalorder %s8787_s1, 1 }
  0x14   : > { %s11475_s27 = scalar_select %p539_p1, %s11310_s24, %s541_s2  }
  0x15   : > { %p11477_p5 = por %p552_p2, %p551_p0  ;;  %p11481_p6 = por %p558_p4, %p557_p3 }
  0x16   : > { %13883 = sst [smem:[#allocation9_spill]] %s11475_s27  ;;  %p8790_p7 = scmp.ge.s32.totalorder %s11314_s25, 1 }
  0x17   : > { %s13885_s28 = scalar_select %p11481_p6, 1, 0 }
  0x18   : > { %p656_p8 = scmp.lt.s32.totalorder %s11314_s25, 3 }
  0x19   : > { %13886 = sst [smem:[#allocation10_spill]] %s13885_s28 }
  0x1a   : > { %p657_p9 = pnand %p8790_p7, %p656_p8 }
  0x1b   : > { %s13887_s0 = sld [smem:[#allocation14_spill]] (!%p657_p9)  ;;  %p726_p10 = scmp.lt.s32.totalorder (!%p657_p9), %s11460_s5, 1 }
  0x1c   : > { %660 = sbr.rel (%p657_p9) target bundleno = 4024 (0xfb8), region = 112  ;;  %s13888_s25 = sld [smem:[#allocation11_spill]] (!%p657_p9) }
  0x1d   : > { %s13889_s6 = sld [smem:[#allocation15_spill]] (!%p657_p9) }
  0x1e   : > { %s13890_s29 = sld [smem:[#allocation16_spill]] (!%p657_p9) }
  0x1f   : > { %s13896_s8 = sld [smem:[#allocation19_spill]] (!%p657_p9) }
  0x20   : > { %s13898_s28 = sld [smem:[#allocation12_spill]] (!%p657_p9) }
  0x21   : > { %v8802_v0 = vld [vmem:[%s13887_s0 + $0x238] sm:$0xff]  ;;  %v11316_v2 = vmov 0.0   ;;  %v8801_v3 = vld [vmem:[%s13887_s0 + $0x230] sm:$0xff]  ;;  %v8800_v5 = vld [vmem:[%s13887_s0 + $0x228] sm:$0xff]  ;;  %s11513_s27 = scalar_select %p726_p10, %s11460_s5, 1  ;;  %vm956_vm0 = vcmask 523264  }
  0x22   : > { %v8810_v1 = vld [vmem:[%s13887_s0 + $0x278] sm:$0xff]  ;;  %9917 = vmatprep.subr.mxu0 %v11316_v2  ;;  %9936 = vmatprep.subr.mxu1 %v11316_v2  ;;  %v8809_v4 = vld [vmem:[%s13887_s0 + $0x270] sm:$0xff]  ;;  %v8808_v6 = vld [vmem:[%s13887_s0 + $0x268] sm:$0xff]  ;;  %vm11317_vm1 = vmmov 0   ;;  %vm2640_vm2 = vcmask 64512   ;;  %s13899_s3 = sld [smem:[#allocation13_spill]] }
  0x23   : > { %9918 = vmatpush3.msra.mxu0 %v8802_v0  ;;  %9937 = vmatpush3.msra.mxu1 %v8810_v1  ;;  %v8799_v7 = vld [vmem:[%s13887_s0 + $0x220] sm:$0xff]  ;;  %v8798_v9 = vld [vmem:[%s13887_s0 + $0x218] sm:$0xff]  ;;  %s13866_s24 = sshll.u32 %s11513_s27, 3  ;;  %v8797_v11 = vld [vmem:[%s13887_s0 + $0x210] sm:$0xff]  ;;  %s13897_s2 = sshll.u32 %s11513_s27, 3 }
  0x24   : > { %9919 = vmatprep.subr.mxu0 %v11316_v2  ;;  %9938 = vmatprep.subr.mxu1 %v11316_v2  ;;  %v8807_v8 = vld [vmem:[%s13887_s0 + $0x260] sm:$0xff]  ;;  %v8806_v10 = vld [vmem:[%s13887_s0 + $0x258] sm:$0xff]  ;;  %v8805_v12 = vld [vmem:[%s13887_s0 + $0x250] sm:$0xff]  ;;  %s11553_s4 = scalar_lea.vmem %s13888_s25, %s13866_s24  ;;  %s13893_s24 = sld [smem:[#allocation17_spill]] }
  0x25   : > { %9920 = vmatpush3.msra.mxu0 %v8801_v3  ;;  %9939 = vmatpush3.msra.mxu1 %v8809_v4  ;;  %v8796_v13 = vld [vmem:[%s13887_s0 + $0x208] sm:$0xff]  ;;  %v8795_v15 = vld [vmem:[%s13887_s0 + $0x200] sm:$0xff]  ;;  %v8818_v18 = vld [vmem:[%s13887_s0 + $0x2b8] sm:$0xff] }
  0x26   : > { %9921 = vmatprep.subr.mxu0 %v11316_v2  ;;  %9940 = vmatprep.subr.mxu1 %v11316_v2  ;;  %v8804_v14 = vld [vmem:[%s13887_s0 + $0x248] sm:$0xff]  ;;  %v8803_v16 = vld [vmem:[%s13887_s0 + $0x240] sm:$0xff]  ;;  %v8826_v19 = vld [vmem:[%s13887_s0 + $0x2f8] sm:$0xff]  ;;  %s733_s26 = scalar_lea.vmem %s13898_s28, %s13897_s2  ;;  %s723_s2 = sand.u32 1, %s11306_s30  }
  0x27   : > { %9922 = vmatpush3.msra.mxu0 %v8800_v5  ;;  %9941 = vmatpush3.msra.mxu1 %v8808_v6  ;;  %v11564_v17 = vld [vmem:[%s11553_s4] sm:$0xff]  ;;  %v8817_v20 = vld [vmem:[%s13887_s0 + $0x2b0] sm:$0xff]  ;;  %v8816_v22 = vld [vmem:[%s13887_s0 + $0x2a8] sm:$0xff] }
  0x28   : > { %9923 = vmatprep.subr.mxu0 %v11316_v2  ;;  %9942 = vmatprep.subr.mxu1 %v11316_v2  ;;  %v8825_v21 = vld [vmem:[%s13887_s0 + $0x2f0] sm:$0xff]  ;;  %v8824_v23 = vld [vmem:[%s13887_s0 + $0x2e8] sm:$0xff]  ;;  %v8815_v24 = vld [vmem:[%s13887_s0 + $0x2a0] sm:$0xff]  ;;  %s736_s28 = scalar_lea.vmem %s13899_s3, %s11513_s27  ;;  %s9351_s27 = sshll.u32 %s11460_s5, 7 }
  0x29   : > { %9924 = vmatpush3.msra.mxu0 %v8799_v7  ;;  %9943 = vmatpush3.msra.mxu1 %v8807_v8  ;;  %v8823_v25 = vld [vmem:[%s13887_s0 + $0x2e0] sm:$0xff]  ;;  %v8814_v26 = vld [vmem:[%s13887_s0 + $0x298] sm:$0xff]  ;;  %v8813_v28 = vld [vmem:[%s13887_s0 + $0x290] sm:$0xff]  ;;  %s11318_s3 = smov [#allocation2]  }
  0x2a   : > { %9925 = vmatprep.subr.mxu0 %v11316_v2  ;;  %9944 = vmatprep.subr.mxu1 %v11316_v2  ;;  %v8822_v27 = vld [vmem:[%s13887_s0 + $0x2d8] sm:$0xff]  ;;  %v8821_v29 = vld [vmem:[%s13887_s0 + $0x2d0] sm:$0xff]  ;;  %v8812_v30 = vld [vmem:[%s13887_s0 + $0x288] sm:$0xff]  ;;  %s11258_s5 = sshll.u32 %s11318_s3, 4  ;;  %s11259_s5 = int_to_ptr.vmem [resolvable:$false] %s11258_s5 }
  0x2b   : > { %9926 = vmatpush3.msra.mxu0 %v8798_v9  ;;  %9945 = vmatpush3.msra.mxu1 %v8806_v10  ;;  %v8820_v31 = vld [vmem:[%s13887_s0 + $0x2c8] sm:$0xff]  ;;  %v8811_v32 = vld [vmem:[%s13887_s0 + $0x280] sm:$0xff]  ;;  %v8834_v34 = vld [vmem:[%s13887_s0 + $0x338] sm:$0xff] }
  0x2c   : > { %9927 = vmatprep.subr.mxu0 %v11316_v2  ;;  %9946 = vmatprep.subr.mxu1 %v11316_v2  ;;  %v8819_v33 = vld [vmem:[%s13887_s0 + $0x2c0] sm:$0xff]  ;;  %v8842_v35 = vld [vmem:[%s13887_s0 + $0x378] sm:$0xff]  ;;  %v8833_v36 = vld [vmem:[%s13887_s0 + $0x330] sm:$0xff] }
  0x2d   : > { %9928 = vmatpush3.msra.mxu0 %v8797_v11  ;;  %9947 = vmatpush3.msra.mxu1 %v8805_v12  ;;  %v8841_v37 = vld [vmem:[%s13887_s0 + $0x370] sm:$0xff]  ;;  %v8832_v38 = vld [vmem:[%s13887_s0 + $0x328] sm:$0xff]  ;;  %v8831_v40 = vld [vmem:[%s13887_s0 + $0x320] sm:$0xff] }
  0x2e   : > { %9929 = vmatprep.subr.mxu0 %v11316_v2  ;;  %9948 = vmatprep.subr.mxu1 %v11316_v2  ;;  %v8840_v39 = vld [vmem:[%s13887_s0 + $0x368] sm:$0xff]  ;;  %v8839_v41 = vld [vmem:[%s13887_s0 + $0x360] sm:$0xff]  ;;  %v8830_v42 = vld [vmem:[%s13887_s0 + $0x318] sm:$0xff] }
  0x2f   : > { %9930 = vmatpush3.msra.mxu0 %v8796_v13  ;;  %9949 = vmatpush3.msra.mxu1 %v8804_v14  ;;  %v8838_v43 = vld [vmem:[%s13887_s0 + $0x358] sm:$0xff]  ;;  %v8829_v44 = vld [vmem:[%s13887_s0 + $0x310] sm:$0xff]  ;;  %v8828_v46 = vld [vmem:[%s13887_s0 + $0x308] sm:$0xff] }
  0x30   : > { %9931 = vmatprep.subr.mxu0 %v11316_v2  ;;  %9950 = vmatprep.subr.mxu1 %v11316_v2  ;;  %v8837_v45 = vld [vmem:[%s13887_s0 + $0x350] sm:$0xff]  ;;  %v8836_v47 = vld [vmem:[%s13887_s0 + $0x348] sm:$0xff]  ;;  %v8827_v48 = vld [vmem:[%s13887_s0 + $0x300] sm:$0xff] }
  0x31   : > { %9932 = vmatpush3.msra.mxu0 %v8795_v15  ;;  %9933 = vmatprep.mubr.msk.f32.mxu0 %vm11317_vm1, %v11316_v2  ;;  %v8835_v49 = vld [vmem:[%s13887_s0 + $0x340] sm:$0xff]  ;;  %v8850_v50 = vld [vmem:[%s13887_s0 + $0x3b8] sm:$0xff]  ;;  %v8849_v52 = vld [vmem:[%s13887_s0 + $0x3b0] sm:$0xff] }
  0x32   : > { %9951 = vmatpush3.msra.mxu1 %v8803_v16  ;;  %9934 = vmatmul.mubr.msk.f32.vlgmr.msra.gmra.mxu0 %vm956_vm0, %v11564_v17  ;;  %v8858_v51 = vld [vmem:[%s13887_s0 + $0x3f8] sm:$0xff]  ;;  %v8857_v53 = vld [vmem:[%s13887_s0 + $0x3f0] sm:$0xff]  ;;  %v8848_v54 = vld [vmem:[%s13887_s0 + $0x3a8] sm:$0xff] }
  0x33   : > { %9952 = vmatprep.mubr.msk.f32.mxu1 %vm11317_vm1, %v11316_v2  ;;  %9955 = vmatprep.subr.mxu0 %v11316_v2  ;;  %v8856_v55 = vld [vmem:[%s13887_s0 + $0x3e8] sm:$0xff]  ;;  %v8847_v56 = vld [vmem:[%s13887_s0 + $0x3a0] sm:$0xff]  ;;  %v8846_v58 = vld [vmem:[%s13887_s0 + $0x398] sm:$0xff] }
  0x34   : > { %9974 = vmatprep.subr.mxu1 %v11316_v2  ;;  %9953 = vmatmul.mubr.msk.f32.vlgmr.msra.gmra.mxu1 %vm956_vm0, %v11564_v17  ;;  %v8855_v57 = vld [vmem:[%s13887_s0 + $0x3e0] sm:$0xff]  ;;  %v8854_v59 = vld [vmem:[%s13887_s0 + $0x3d8] sm:$0xff]  ;;  %v8845_v60 = vld [vmem:[%s13887_s0 + $0x390] sm:$0xff] }
  0x35   : > { %9956 = vmatpush3.msra.mxu0 %v8818_v18  ;;  %9975 = vmatpush3.msra.mxu1 %v8826_v19  ;;  %v8853_v61 = vld [vmem:[%s13887_s0 + $0x3d0] sm:$0xff]  ;;  %v8844_v62 = vld [vmem:[%s13887_s0 + $0x388] sm:$0xff]  ;;  %v8843_v0 = vld [vmem:[%s13887_s0 + $0x380] sm:$0xff] }
  0x36   : > { %9957 = vmatprep.subr.mxu0 %v11316_v2  ;;  %9976 = vmatprep.subr.mxu1 %v11316_v2  ;;  %v8852_v63 = vld [vmem:[%s13887_s0 + $0x3c8] sm:$0xff]  ;;  %v8851_v1 = vld [vmem:[%s13887_s0 + $0x3c0] sm:$0xff]  ;;  %v8866_v3 = vld [vmem:[%s13889_s6 + $0x238] sm:$0xff]  ;;  %s13894_s0 = smov %s13893_s24 }
  0x37   : > { %9958 = vmatpush3.msra.mxu0 %v8817_v20  ;;  %9977 = vmatpush3.msra.mxu1 %v8825_v21  ;;  %v8874_v4 = vld [vmem:[%s13889_s6 + $0x278] sm:$0xff]  ;;  %v8865_v5 = vld [vmem:[%s13889_s6 + $0x230] sm:$0xff]  ;;  %v8864_v7 = vld [vmem:[%s13889_s6 + $0x228] sm:$0xff] }
  0x38   : > { %9959 = vmatprep.subr.mxu0 %v11316_v2  ;;  %9978 = vmatprep.subr.mxu1 %v11316_v2  ;;  %v8873_v6 = vld [vmem:[%s13889_s6 + $0x270] sm:$0xff]  ;;  %v8872_v8 = vld [vmem:[%s13889_s6 + $0x268] sm:$0xff]  ;;  %v8863_v9 = vld [vmem:[%s13889_s6 + $0x220] sm:$0xff] }
  0x39   : > { %9960 = vmatpush3.msra.mxu0 %v8816_v22  ;;  %9979 = vmatpush3.msra.mxu1 %v8824_v23  ;;  %v8871_v10 = vld [vmem:[%s13889_s6 + $0x260] sm:$0xff]  ;;  %v8862_v11 = vld [vmem:[%s13889_s6 + $0x218] sm:$0xff]  ;;  %v8861_v13 = vld [vmem:[%s13889_s6 + $0x210] sm:$0xff] }
  0x3a   : > { %9961 = vmatprep.subr.mxu0 %v11316_v2  ;;  %9980 = vmatprep.subr.mxu1 %v11316_v2  ;;  %v8870_v12 = vld [vmem:[%s13889_s6 + $0x258] sm:$0xff]  ;;  %v8869_v14 = vld [vmem:[%s13889_s6 + $0x250] sm:$0xff]  ;;  %v8860_v15 = vld [vmem:[%s13889_s6 + $0x208] sm:$0xff] }
  0x3b   : > { %9962 = vmatpush3.msra.mxu0 %v8815_v24  ;;  %9981 = vmatpush3.msra.mxu1 %v8823_v25  ;;  %v8868_v16 = vld [vmem:[%s13889_s6 + $0x248] sm:$0xff]  ;;  %v8859_v18 = vld [vmem:[%s13889_s6 + $0x200] sm:$0xff]  ;;  %v8882_v20 = vld [vmem:[%s13889_s6 + $0x2b8] sm:$0xff] }
  0x3c   : > { %9963 = vmatprep.subr.mxu0 %v11316_v2  ;;  %9982 = vmatprep.subr.mxu1 %v11316_v2  ;;  %v8867_v19 = vld [vmem:[%s13889_s6 + $0x240] sm:$0xff]  ;;  %v8890_v21 = vld [vmem:[%s13889_s6 + $0x2f8] sm:$0xff]  ;;  %v8881_v22 = vld [vmem:[%s13889_s6 + $0x2b0] sm:$0xff] }
  0x3d   : > { %9964 = vmatpush3.msra.mxu0 %v8814_v26  ;;  %9983 = vmatpush3.msra.mxu1 %v8822_v27  ;;  %v8889_v23 = vld [vmem:[%s13889_s6 + $0x2f0] sm:$0xff]  ;;  %v8880_v24 = vld [vmem:[%s13889_s6 + $0x2a8] sm:$0xff]  ;;  %v8879_v26 = vld [vmem:[%s13889_s6 + $0x2a0] sm:$0xff] }
  0x3e   : > { %9965 = vmatprep.subr.mxu0 %v11316_v2  ;;  %9984 = vmatprep.subr.mxu1 %v11316_v2  ;;  %v8888_v25 = vld [vmem:[%s13889_s6 + $0x2e8] sm:$0xff]  ;;  %v8887_v27 = vld [vmem:[%s13889_s6 + $0x2e0] sm:$0xff] }
  0x3f   : > { %9966 = vmatpush3.msra.mxu0 %v8813_v28  ;;  %9985 = vmatpush3.msra.mxu1 %v8821_v29  ;;  %v8878_v28 = vld [vmem:[%s13889_s6 + $0x298] sm:$0xff] }
  0x40   : > { %9967 = vmatprep.subr.mxu0 %v11316_v2  ;;  %9986 = vmatprep.subr.mxu1 %v11316_v2  ;;  %v8886_v29 = vld [vmem:[%s13889_s6 + $0x2d8] sm:$0xff] }
  0x41   : > { %9968 = vmatpush3.msra.mxu0 %v8812_v30  ;;  %9987 = vmatpush3.msra.mxu1 %v8820_v31  ;;  %v8877_v30 = vld [vmem:[%s13889_s6 + $0x290] sm:$0xff] }
  0x42   : > { %9969 = vmatprep.subr.mxu0 %v11316_v2  ;;  %9988 = vmatprep.subr.mxu1 %v11316_v2  ;;  %v8885_v31 = vld [vmem:[%s13889_s6 + $0x2d0] sm:$0xff] }
  0x43   : > { %9970 = vmatpush3.msra.mxu0 %v8811_v32  ;;  %9971 = vmatprep.mubr.msk.f32.mxu0 %vm11317_vm1, %v11316_v2  ;;  %v8876_v32 = vld [vmem:[%s13889_s6 + $0x288] sm:$0xff] }
  0x44   : > { %9989 = vmatpush3.msra.mxu1 %v8819_v33  ;;  %9972 = vmatmul.mubr.msk.f32.vlgmr.msra.gmra.mxu0 %vm956_vm0, %v11564_v17  ;;  %v8884_v33 = vld [vmem:[%s13889_s6 + $0x2c8] sm:$0xff] }
  0x45   : > { %9990 = vmatprep.mubr.msk.f32.mxu1 %vm11317_vm1, %v11316_v2  ;;  %9993 = vmatprep.subr.mxu0 %v11316_v2 }
  0x46   : > { %10012 = vmatprep.subr.mxu1 %v11316_v2  ;;  %9991 = vmatmul.mubr.msk.f32.vlgmr.msra.gmra.mxu1 %vm956_vm0, %v11564_v17 }
  0x47   : > { %9994 = vmatpush3.msra.mxu0 %v8834_v34  ;;  %10013 = vmatpush3.msra.mxu1 %v8842_v35  ;;  %v8875_v34 = vld [vmem:[%s13889_s6 + $0x280] sm:$0xff] }
  0x48   : > { %9995 = vmatprep.subr.mxu0 %v11316_v2  ;;  %10014 = vmatprep.subr.mxu1 %v11316_v2  ;;  %v8883_v35 = vld [vmem:[%s13889_s6 + $0x2c0] sm:$0xff] }
  0x49   : > { %9996 = vmatpush3.msra.mxu0 %v8833_v36  ;;  %10015 = vmatpush3.msra.mxu1 %v8841_v37  ;;  %v8898_v36 = vld [vmem:[%s13889_s6 + $0x338] sm:$0xff] }
  0x4a   : > { %9997 = vmatprep.subr.mxu0 %v11316_v2  ;;  %10016 = vmatprep.subr.mxu1 %v11316_v2  ;;  %v8906_v37 = vld [vmem:[%s13889_s6 + $0x378] sm:$0xff] }
  0x4b   : > { %9998 = vmatpush3.msra.mxu0 %v8832_v38  ;;  %10017 = vmatpush3.msra.mxu1 %v8840_v39  ;;  %v8897_v38 = vld [vmem:[%s13889_s6 + $0x330] sm:$0xff] }
  0x4c   : > { %9999 = vmatprep.subr.mxu0 %v11316_v2  ;;  %10018 = vmatprep.subr.mxu1 %v11316_v2  ;;  %v8905_v39 = vld [vmem:[%s13889_s6 + $0x370] sm:$0xff] }
  0x4d   : > { %10000 = vmatpush3.msra.mxu0 %v8831_v40  ;;  %10019 = vmatpush3.msra.mxu1 %v8839_v41  ;;  %v8896_v40 = vld [vmem:[%s13889_s6 + $0x328] sm:$0xff] }
  0x4e   : > { %10001 = vmatprep.subr.mxu0 %v11316_v2  ;;  %10020 = vmatprep.subr.mxu1 %v11316_v2  ;;  %v8904_v41 = vld [vmem:[%s13889_s6 + $0x368] sm:$0xff] }
  0x4f   : > { %10002 = vmatpush3.msra.mxu0 %v8830_v42  ;;  %10021 = vmatpush3.msra.mxu1 %v8838_v43  ;;  %v8895_v42 = vld [vmem:[%s13889_s6 + $0x320] sm:$0xff] }
  0x50   : > { %10003 = vmatprep.subr.mxu0 %v11316_v2  ;;  %10022 = vmatprep.subr.mxu1 %v11316_v2  ;;  %v8903_v43 = vld [vmem:[%s13889_s6 + $0x360] sm:$0xff] }
  0x51   : > { %10004 = vmatpush3.msra.mxu0 %v8829_v44  ;;  %10023 = vmatpush3.msra.mxu1 %v8837_v45  ;;  %v8894_v44 = vld [vmem:[%s13889_s6 + $0x318] sm:$0xff] }
  0x52   : > { %10005 = vmatprep.subr.mxu0 %v11316_v2  ;;  %10024 = vmatprep.subr.mxu1 %v11316_v2  ;;  %v8902_v45 = vld [vmem:[%s13889_s6 + $0x358] sm:$0xff] }
  0x53   : > { %10006 = vmatpush3.msra.mxu0 %v8828_v46  ;;  %10025 = vmatpush3.msra.mxu1 %v8836_v47  ;;  %v8893_v46 = vld [vmem:[%s13889_s6 + $0x310] sm:$0xff] }
  0x54   : > { %10007 = vmatprep.subr.mxu0 %v11316_v2  ;;  %10026 = vmatprep.subr.mxu1 %v11316_v2  ;;  %v8901_v47 = vld [vmem:[%s13889_s6 + $0x350] sm:$0xff] }
  0x55   : > { %10008 = vmatpush3.msra.mxu0 %v8827_v48  ;;  %10009 = vmatprep.mubr.msk.f32.mxu0 %vm11317_vm1, %v11316_v2  ;;  %v8892_v48 = vld [vmem:[%s13889_s6 + $0x308] sm:$0xff] }
  0x56   : > { %10027 = vmatpush3.msra.mxu1 %v8835_v49  ;;  %10010 = vmatmul.mubr.msk.f32.vlgmr.msra.gmra.mxu0 %vm956_vm0, %v11564_v17  ;;  %v8900_v49 = vld [vmem:[%s13889_s6 + $0x348] sm:$0xff] }
  0x57   : > { %10028 = vmatprep.mubr.msk.f32.mxu1 %vm11317_vm1, %v11316_v2  ;;  %10031 = vmatprep.subr.mxu0 %v11316_v2 }
  0x58   : > { %10050 = vmatprep.subr.mxu1 %v11316_v2  ;;  %10029 = vmatmul.mubr.msk.f32.vlgmr.msra.gmra.mxu1 %vm956_vm0, %v11564_v17 }
  0x59   : > { %10032 = vmatpush3.msra.mxu0 %v8850_v50  ;;  %10051 = vmatpush3.msra.mxu1 %v8858_v51  ;;  %v8891_v50 = vld [vmem:[%s13889_s6 + $0x300] sm:$0xff] }
  0x5a   : > { %10033 = vmatprep.subr.mxu0 %v11316_v2  ;;  %10052 = vmatprep.subr.mxu1 %v11316_v2  ;;  %v8899_v51 = vld [vmem:[%s13889_s6 + $0x340] sm:$0xff] }
  0x5b   : > { %10034 = vmatpush3.msra.mxu0 %v8849_v52  ;;  %10053 = vmatpush3.msra.mxu1 %v8857_v53  ;;  %v8914_v52 = vld [vmem:[%s13889_s6 + $0x3b8] sm:$0xff] }
  0x5c   : > { %10035 = vmatprep.subr.mxu0 %v11316_v2  ;;  %10054 = vmatprep.subr.mxu1 %v11316_v2  ;;  %v8922_v53 = vld [vmem:[%s13889_s6 + $0x3f8] sm:$0xff] }
  0x5d   : > { %10036 = vmatpush3.msra.mxu0 %v8848_v54  ;;  %10055 = vmatpush3.msra.mxu1 %v8856_v55  ;;  %v8913_v54 = vld [vmem:[%s13889_s6 + $0x3b0] sm:$0xff] }
  0x5e   : > { %10037 = vmatprep.subr.mxu0 %v11316_v2  ;;  %10056 = vmatprep.subr.mxu1 %v11316_v2  ;;  %v8921_v55 = vld [vmem:[%s13889_s6 + $0x3f0] sm:$0xff] }
  0x5f   : > { %10038 = vmatpush3.msra.mxu0 %v8847_v56  ;;  %10057 = vmatpush3.msra.mxu1 %v8855_v57  ;;  %v8912_v56 = vld [vmem:[%s13889_s6 + $0x3a8] sm:$0xff] }
  0x60   : > { %10039 = vmatprep.subr.mxu0 %v11316_v2  ;;  %10058 = vmatprep.subr.mxu1 %v11316_v2  ;;  %v8920_v57 = vld [vmem:[%s13889_s6 + $0x3e8] sm:$0xff] }
  0x61   : > { %10040 = vmatpush3.msra.mxu0 %v8846_v58  ;;  %10059 = vmatpush3.msra.mxu1 %v8854_v59  ;;  %v8911_v58 = vld [vmem:[%s13889_s6 + $0x3a0] sm:$0xff] }
  0x62   : > { %10041 = vmatprep.subr.mxu0 %v11316_v2  ;;  %10060 = vmatprep.subr.mxu1 %v11316_v2  ;;  %v8919_v59 = vld [vmem:[%s13889_s6 + $0x3e0] sm:$0xff] }
  0x63   : > { %10042 = vmatpush3.msra.mxu0 %v8845_v60  ;;  %10061 = vmatpush3.msra.mxu1 %v8853_v61  ;;  %v8910_v60 = vld [vmem:[%s13889_s6 + $0x398] sm:$0xff] }
  0x64   : > { %10043 = vmatprep.subr.mxu0 %v11316_v2  ;;  %10062 = vmatprep.subr.mxu1 %v11316_v2  ;;  %v8918_v61 = vld [vmem:[%s13889_s6 + $0x3d8] sm:$0xff] }
  0x65   : > { %10044 = vmatpush3.msra.mxu0 %v8844_v62  ;;  %10063 = vmatpush3.msra.mxu1 %v8852_v63  ;;  %v8909_v62 = vld [vmem:[%s13889_s6 + $0x390] sm:$0xff] }
  0x66   : > { %10045 = vmatprep.subr.mxu0 %v11316_v2  ;;  %10064 = vmatprep.subr.mxu1 %v11316_v2  ;;  %v8917_v63 = vld [vmem:[%s13889_s6 + $0x3d0] sm:$0xff] }
  0x67   : > { %10046 = vmatpush3.msra.mxu0 %v8843_v0  ;;  %10047 = vmatprep.mubr.msk.f32.mxu0 %vm11317_vm1, %v11316_v2  ;;  %v8908_v0 = vld [vmem:[%s13889_s6 + $0x388] sm:$0xff] }
  0x68   : > { %10065 = vmatpush3.msra.mxu1 %v8851_v1  ;;  %10048 = vmatmul.mubr.msk.f32.vlgmr.msra.gmra.mxu0 %vm956_vm0, %v11564_v17  ;;  %v8916_v1 = vld [vmem:[%s13889_s6 + $0x3c8] sm:$0xff] }
  0x69   : > { %10066 = vmatprep.mubr.msk.f32.mxu1 %vm11317_vm1, %v11316_v2  ;;  %10069 = vmatprep.subr.mxu0 %v11316_v2 }
  0x6a   : > { %10088 = vmatprep.subr.mxu1 %v11316_v2  ;;  %10067 = vmatmul.mubr.msk.f32.vlgmr.msra.gmra.mxu1 %vm956_vm0, %v11564_v17 }
  0x6b   : > { %10070 = vmatpush3.msra.mxu0 %v8866_v3  ;;  %10089 = vmatpush3.msra.mxu1 %v8874_v4  ;;  %v8907_v3 = vld [vmem:[%s13889_s6 + $0x380] sm:$0xff] }
  0x6c   : > { %10071 = vmatprep.subr.mxu0 %v11316_v2  ;;  %10090 = vmatprep.subr.mxu1 %v11316_v2  ;;  %v8915_v4 = vld [vmem:[%s13889_s6 + $0x3c0] sm:$0xff]  ;;  %s13797_s6 = scalar_lea.hbm %s13855_s23, %s9351_s27 }
  0x6d   : > { %10072 = vmatpush3.msra.mxu0 %v8865_v5  ;;  %10091 = vmatpush3.msra.mxu1 %v8873_v6  ;;  %v8930_v5 = vld [vmem:[%s13890_s29 + $0x238] sm:$0xff] }
  0x6e   : > { %10073 = vmatprep.subr.mxu0 %v11316_v2  ;;  %10092 = vmatprep.subr.mxu1 %v11316_v2  ;;  %v8938_v6 = vld [vmem:[%s13890_s29 + $0x278] sm:$0xff] }
  0x6f   : > { %10074 = vmatpush3.msra.mxu0 %v8864_v7  ;;  %10093 = vmatpush3.msra.mxu1 %v8872_v8  ;;  %v8929_v7 = vld [vmem:[%s13890_s29 + $0x230] sm:$0xff] }
  0x70   : > { %10075 = vmatprep.subr.mxu0 %v11316_v2  ;;  %10094 = vmatprep.subr.mxu1 %v11316_v2  ;;  %v8937_v8 = vld [vmem:[%s13890_s29 + $0x270] sm:$0xff] }
  0x71   : > { %10076 = vmatpush3.msra.mxu0 %v8863_v9  ;;  %10095 = vmatpush3.msra.mxu1 %v8871_v10  ;;  %v8928_v9 = vld [vmem:[%s13890_s29 + $0x228] sm:$0xff] }
  0x72   : > { %10077 = vmatprep.subr.mxu0 %v11316_v2  ;;  %10096 = vmatprep.subr.mxu1 %v11316_v2  ;;  %v8936_v10 = vld [vmem:[%s13890_s29 + $0x268] sm:$0xff] }
  0x73   : > { %10078 = vmatpush3.msra.mxu0 %v8862_v11  ;;  %10097 = vmatpush3.msra.mxu1 %v8870_v12  ;;  %v8927_v11 = vld [vmem:[%s13890_s29 + $0x220] sm:$0xff] }
  0x74   : > { %10079 = vmatprep.subr.mxu0 %v11316_v2  ;;  %10098 = vmatprep.subr.mxu1 %v11316_v2  ;;  %v8935_v12 = vld [vmem:[%s13890_s29 + $0x260] sm:$0xff] }
  0x75   : > { %10080 = vmatpush3.msra.mxu0 %v8861_v13  ;;  %10099 = vmatpush3.msra.mxu1 %v8869_v14  ;;  %v8926_v13 = vld [vmem:[%s13890_s29 + $0x218] sm:$0xff] }
  0x76   : > { %10081 = vmatprep.subr.mxu0 %v11316_v2  ;;  %10100 = vmatprep.subr.mxu1 %v11316_v2  ;;  %v8934_v14 = vld [vmem:[%s13890_s29 + $0x258] sm:$0xff] }
  0x77   : > { %10082 = vmatpush3.msra.mxu0 %v8860_v15  ;;  %10101 = vmatpush3.msra.mxu1 %v8868_v16  ;;  %v8925_v15 = vld [vmem:[%s13890_s29 + $0x210] sm:$0xff] }
  0x78   : > { %10083 = vmatprep.subr.mxu0 %v11316_v2  ;;  %10102 = vmatprep.subr.mxu1 %v11316_v2  ;;  %v8933_v16 = vld [vmem:[%s13890_s29 + $0x250] sm:$0xff] }
  0x79   : > { %10084 = vmatpush3.msra.mxu0 %v8859_v18  ;;  %10085 = vmatprep.mubr.msk.f32.mxu0 %vm11317_vm1, %v11316_v2  ;;  %v8924_v18 = vld [vmem:[%s13890_s29 + $0x208] sm:$0xff] }
  0x7a   : > { %10103 = vmatpush3.msra.mxu1 %v8867_v19  ;;  %10104 = vmatprep.mubr.msk.f32.mxu1 %vm11317_vm1, %v11316_v2  ;;  %v8932_v19 = vld [vmem:[%s13890_s29 + $0x248] sm:$0xff] }
  0x7b   : > { %10086 = vmatmul.mubr.msk.f32.vlgmr.msra.gmra.mxu0 %vm956_vm0, %v11564_v17  ;;  %10105 = vmatmul.mubr.msk.f32.vlgmr.msra.gmra.mxu1 %vm956_vm0, %v11564_v17 }
  0x7c   : > { %10107 = vmatprep.subr.mxu0 %v11316_v2  ;;  %10126 = vmatprep.subr.mxu1 %v11316_v2 }
  0x7d   : > { %10108 = vmatpush3.msra.mxu0 %v8882_v20  ;;  %10127 = vmatpush3.msra.mxu1 %v8890_v21  ;;  %v8923_v20 = vld [vmem:[%s13890_s29 + $0x200] sm:$0xff] }
  0x7e   : > { %10109 = vmatprep.subr.mxu0 %v11316_v2  ;;  %10128 = vmatprep.subr.mxu1 %v11316_v2  ;;  %v8931_v21 = vld [vmem:[%s13890_s29 + $0x240] sm:$0xff] }
  0x7f   : > { %10110 = vmatpush3.msra.mxu0 %v8881_v22  ;;  %10129 = vmatpush3.msra.mxu1 %v8889_v23  ;;  %v8946_v22 = vld [vmem:[%s13890_s29 + $0x2b8] sm:$0xff] }
  0x80   : > { %10111 = vmatprep.subr.mxu0 %v11316_v2  ;;  %10130 = vmatprep.subr.mxu1 %v11316_v2  ;;  %v8954_v23 = vld [vmem:[%s13890_s29 + $0x2f8] sm:$0xff] }
  0x81   : > { %10112 = vmatpush3.msra.mxu0 %v8880_v24  ;;  %10131 = vmatpush3.msra.mxu1 %v8888_v25  ;;  %v8945_v24 = vld [vmem:[%s13890_s29 + $0x2b0] sm:$0xff] }
  0x82   : > { %10113 = vmatprep.subr.mxu0 %v11316_v2  ;;  %10132 = vmatprep.subr.mxu1 %v11316_v2  ;;  %v8953_v25 = vld [vmem:[%s13890_s29 + $0x2f0] sm:$0xff] }
  0x83   : > { %10114 = vmatpush3.msra.mxu0 %v8879_v26  ;;  %10133 = vmatpush3.msra.mxu1 %v8887_v27  ;;  %v8944_v26 = vld [vmem:[%s13890_s29 + $0x2a8] sm:$0xff] }
  0x84   : > { %10115 = vmatprep.subr.mxu0 %v11316_v2  ;;  %10134 = vmatprep.subr.mxu1 %v11316_v2  ;;  %v8952_v27 = vld [vmem:[%s13890_s29 + $0x2e8] sm:$0xff] }
  0x85   : > { %10116 = vmatpush3.msra.mxu0 %v8878_v28  ;;  %10135 = vmatpush3.msra.mxu1 %v8886_v29  ;;  %v8943_v28 = vld [vmem:[%s13890_s29 + $0x2a0] sm:$0xff] }
  0x86   : > { %10117 = vmatprep.subr.mxu0 %v11316_v2  ;;  %10136 = vmatprep.subr.mxu1 %v11316_v2  ;;  %v8951_v29 = vld [vmem:[%s13890_s29 + $0x2e0] sm:$0xff] }
  0x87   : > { %10118 = vmatpush3.msra.mxu0 %v8877_v30  ;;  %10137 = vmatpush3.msra.mxu1 %v8885_v31  ;;  %v8942_v30 = vld [vmem:[%s13890_s29 + $0x298] sm:$0xff] }
  0x88   : > { %10119 = vmatprep.subr.mxu0 %v11316_v2  ;;  %10138 = vmatprep.subr.mxu1 %v11316_v2  ;;  %v8950_v31 = vld [vmem:[%s13890_s29 + $0x2d8] sm:$0xff] }
  0x89   : > { %10120 = vmatpush3.msra.mxu0 %v8876_v32  ;;  %10139 = vmatpush3.msra.mxu1 %v8884_v33  ;;  %v8941_v32 = vld [vmem:[%s13890_s29 + $0x290] sm:$0xff] }
  0x8a   : > { %10121 = vmatprep.subr.mxu0 %v11316_v2  ;;  %10140 = vmatprep.subr.mxu1 %v11316_v2  ;;  %v8949_v33 = vld [vmem:[%s13890_s29 + $0x2d0] sm:$0xff] }
  0x8b   : > { %10122 = vmatpush3.msra.mxu0 %v8875_v34  ;;  %10123 = vmatprep.mubr.msk.f32.mxu0 %vm11317_vm1, %v11316_v2  ;;  %v8940_v34 = vld [vmem:[%s13890_s29 + $0x288] sm:$0xff] }
  0x8c   : > { %10141 = vmatpush3.msra.mxu1 %v8883_v35  ;;  %10142 = vmatprep.mubr.msk.f32.mxu1 %vm11317_vm1, %v11316_v2  ;;  %v8948_v35 = vld [vmem:[%s13890_s29 + $0x2c8] sm:$0xff] }
  0x8d   : > { %10124 = vmatmul.mubr.msk.f32.vlgmr.msra.gmra.mxu0 %vm956_vm0, %v11564_v17  ;;  %10143 = vmatmul.mubr.msk.f32.vlgmr.msra.gmra.mxu1 %vm956_vm0, %v11564_v17 }
  0x8e   : > { %10145 = vmatprep.subr.mxu0 %v11316_v2  ;;  %10164 = vmatprep.subr.mxu1 %v11316_v2 }
  0x8f   : > { %10146 = vmatpush3.msra.mxu0 %v8898_v36  ;;  %10165 = vmatpush3.msra.mxu1 %v8906_v37  ;;  %v8939_v36 = vld [vmem:[%s13890_s29 + $0x280] sm:$0xff] }
  0x90   : > { %10147 = vmatprep.subr.mxu0 %v11316_v2  ;;  %10166 = vmatprep.subr.mxu1 %v11316_v2  ;;  %v8947_v37 = vld [vmem:[%s13890_s29 + $0x2c0] sm:$0xff] }
  0x91   : > { %10148 = vmatpush3.msra.mxu0 %v8897_v38  ;;  %10167 = vmatpush3.msra.mxu1 %v8905_v39  ;;  %v8962_v38 = vld [vmem:[%s13890_s29 + $0x338] sm:$0xff] }
  0x92   : > { %10149 = vmatprep.subr.mxu0 %v11316_v2  ;;  %10168 = vmatprep.subr.mxu1 %v11316_v2  ;;  %v8970_v39 = vld [vmem:[%s13890_s29 + $0x378] sm:$0xff] }
  0x93   : > { %10150 = vmatpush3.msra.mxu0 %v8896_v40  ;;  %10169 = vmatpush3.msra.mxu1 %v8904_v41  ;;  %v8961_v40 = vld [vmem:[%s13890_s29 + $0x330] sm:$0xff] }
  0x94   : > { %10151 = vmatprep.subr.mxu0 %v11316_v2  ;;  %10170 = vmatprep.subr.mxu1 %v11316_v2  ;;  %v8969_v41 = vld [vmem:[%s13890_s29 + $0x370] sm:$0xff] }
  0x95   : > { %10152 = vmatpush3.msra.mxu0 %v8895_v42  ;;  %10171 = vmatpush3.msra.mxu1 %v8903_v43  ;;  %v8960_v42 = vld [vmem:[%s13890_s29 + $0x328] sm:$0xff]  ;;  %v8959_v43 = vld [vmem:[%s13890_s29 + $0x320] sm:$0xff] }
  0x96   : > { %10153 = vmatprep.subr.mxu0 %v11316_v2  ;;  %10172 = vmatprep.subr.mxu1 %v11316_v2 }
  0x97   : > { %10154 = vmatpush3.msra.mxu0 %v8894_v44  ;;  %10173 = vmatpush3.msra.mxu1 %v8902_v45  ;;  %v8967_v44 = vld [vmem:[%s13890_s29 + $0x360] sm:$0xff]  ;;  %v8958_v45 = vld [vmem:[%s13890_s29 + $0x318] sm:$0xff] }
  0x98   : > { %10155 = vmatprep.subr.mxu0 %v11316_v2  ;;  %10174 = vmatprep.subr.mxu1 %v11316_v2 }
  0x99   : > { %10156 = vmatpush3.msra.mxu0 %v8893_v46  ;;  %10175 = vmatpush3.msra.mxu1 %v8901_v47  ;;  %v8966_v46 = vld [vmem:[%s13890_s29 + $0x358] sm:$0xff]  ;;  %v8957_v47 = vld [vmem:[%s13890_s29 + $0x310] sm:$0xff] }
  0x9a   : > { %10157 = vmatprep.subr.mxu0 %v11316_v2  ;;  %10176 = vmatprep.subr.mxu1 %v11316_v2 }
  0x9b   : > { %10158 = vmatpush3.msra.mxu0 %v8892_v48  ;;  %10177 = vmatpush3.msra.mxu1 %v8900_v49  ;;  %v8965_v48 = vld [vmem:[%s13890_s29 + $0x350] sm:$0xff]  ;;  %v8956_v49 = vld [vmem:[%s13890_s29 + $0x308] sm:$0xff] }
  0x9c   : > { %10159 = vmatprep.subr.mxu0 %v11316_v2  ;;  %10178 = vmatprep.subr.mxu1 %v11316_v2 }
  0x9d   : > { %10160 = vmatpush3.msra.mxu0 %v8891_v50  ;;  %10161 = vmatprep.mubr.msk.f32.mxu0 %vm11317_vm1, %v11316_v2  ;;  %v8964_v50 = vld [vmem:[%s13890_s29 + $0x348] sm:$0xff] }
  0x9e   : > { %10179 = vmatpush3.msra.mxu1 %v8899_v51  ;;  %10180 = vmatprep.mubr.msk.f32.mxu1 %vm11317_vm1, %v11316_v2  ;;  %v8955_v51 = vld [vmem:[%s13890_s29 + $0x300] sm:$0xff] }
  0x9f   : > { %10162 = vmatmul.mubr.msk.f32.vlgmr.msra.gmra.mxu0 %vm956_vm0, %v11564_v17  ;;  %10181 = vmatmul.mubr.msk.f32.vlgmr.msra.gmra.mxu1 %vm956_vm0, %v11564_v17 }
  0xa0   : > { %10183 = vmatprep.subr.mxu0 %v11316_v2  ;;  %10202 = vmatprep.subr.mxu1 %v11316_v2 }
  0xa1   : > { %10184 = vmatpush3.msra.mxu0 %v8914_v52  ;;  %10203 = vmatpush3.msra.mxu1 %v8922_v53  ;;  %v8963_v52 = vld [vmem:[%s13890_s29 + $0x340] sm:$0xff]  ;;  %v8978_v53 = vld [vmem:[%s13890_s29 + $0x3b8] sm:$0xff] }
  0xa2   : > { %10185 = vmatprep.subr.mxu0 %v11316_v2  ;;  %10204 = vmatprep.subr.mxu1 %v11316_v2 }
  0xa3   : > { %10186 = vmatpush3.msra.mxu0 %v8913_v54  ;;  %10205 = vmatpush3.msra.mxu1 %v8921_v55  ;;  %v8986_v54 = vld [vmem:[%s13890_s29 + $0x3f8] sm:$0xff]  ;;  %v12301_v55 = vld [vmem:[%s11553_s4] sm:$0xff]  ;;  %s13895_s4 = sld [smem:[#allocation18_spill]] }
  0xa4   : > { %10187 = vmatprep.subr.mxu0 %v11316_v2  ;;  %10206 = vmatprep.subr.mxu1 %v11316_v2 }
  0xa5   : > { %10188 = vmatpush3.msra.mxu0 %v8912_v56  ;;  %10207 = vmatpush3.msra.mxu1 %v8920_v57  ;;  %v8977_v56 = vld [vmem:[%s13890_s29 + $0x3b0] sm:$0xff] }
  0xa6   : > { %10189 = vmatprep.subr.mxu0 %v11316_v2  ;;  %10208 = vmatprep.subr.mxu1 %v11316_v2  ;;  %v8985_v57 = vld [vmem:[%s13890_s29 + $0x3f0] sm:$0xff] }
  0xa7   : > { %10190 = vmatpush3.msra.mxu0 %v8911_v58  ;;  %10209 = vmatpush3.msra.mxu1 %v8919_v59  ;;  %v8976_v58 = vld [vmem:[%s13890_s29 + $0x3a8] sm:$0xff] }
  0xa8   : > { %10191 = vmatprep.subr.mxu0 %v11316_v2  ;;  %10210 = vmatprep.subr.mxu1 %v11316_v2  ;;  %v8984_v59 = vld [vmem:[%s13890_s29 + $0x3e8] sm:$0xff] }
  0xa9   : > { %10192 = vmatpush3.msra.mxu0 %v8910_v60  ;;  %10211 = vmatpush3.msra.mxu1 %v8918_v61  ;;  %v8975_v60 = vld [vmem:[%s13890_s29 + $0x3a0] sm:$0xff] }
  0xaa   : > { %10193 = vmatprep.subr.mxu0 %v11316_v2  ;;  %10212 = vmatprep.subr.mxu1 %v11316_v2  ;;  %v8983_v61 = vld [vmem:[%s13890_s29 + $0x3e0] sm:$0xff] }
  0xab   : > { %10194 = vmatpush3.msra.mxu0 %v8909_v62  ;;  %10213 = vmatpush3.msra.mxu1 %v8917_v63  ;;  %v8974_v62 = vld [vmem:[%s13890_s29 + $0x398] sm:$0xff] }
  0xac   : > { %10195 = vmatprep.subr.mxu0 %v11316_v2  ;;  %10214 = vmatprep.subr.mxu1 %v11316_v2  ;;  %v8982_v63 = vld [vmem:[%s13890_s29 + $0x3d8] sm:$0xff] }
  0xad   : > { %10196 = vmatpush3.msra.mxu0 %v8908_v0  ;;  %10215 = vmatpush3.msra.mxu1 %v8916_v1  ;;  %v8973_v0 = vld [vmem:[%s13890_s29 + $0x390] sm:$0xff] }
  0xae   : > { %10197 = vmatprep.subr.mxu0 %v11316_v2  ;;  %10216 = vmatprep.subr.mxu1 %v11316_v2  ;;  %v8981_v1 = vld [vmem:[%s13890_s29 + $0x3d0] sm:$0xff] }
  0xaf   : > { %10198 = vmatpush3.msra.mxu0 %v8907_v3  ;;  %10199 = vmatprep.mubr.msk.f32.mxu0 %vm11317_vm1, %v11316_v2 }
  0xb0   : > { %10217 = vmatpush3.msra.mxu1 %v8915_v4  ;;  %10218 = vmatprep.mubr.msk.f32.mxu1 %vm11317_vm1, %v11316_v2  ;;  %v8972_v4 = vld [vmem:[%s13890_s29 + $0x388] sm:$0xff] }
  0xb1   : > { %10200 = vmatmul.mubr.msk.f32.vlgmr.msra.gmra.mxu0 %vm956_vm0, %v11564_v17  ;;  %10219 = vmatmul.mubr.msk.f32.vlgmr.msra.gmra.mxu1 %vm956_vm0, %v11564_v17 }
  0xb2   : > { %10221 = vmatprep.subr.mxu0 %v11316_v2  ;;  %10240 = vmatprep.subr.mxu1 %v11316_v2 }
  0xb3   : > { %10222 = vmatpush3.msra.mxu0 %v8930_v5  ;;  %10241 = vmatpush3.msra.mxu1 %v8938_v6  ;;  %v8980_v5 = vld [vmem:[%s13890_s29 + $0x3c8] sm:$0xff] }
  0xb4   : > { %10223 = vmatprep.subr.mxu0 %v11316_v2  ;;  %10242 = vmatprep.subr.mxu1 %v11316_v2 }
  0xb5   : > { %10224 = vmatpush3.msra.mxu0 %v8929_v7  ;;  %10243 = vmatpush3.msra.mxu1 %v8937_v8  ;;  %v8971_v8 = vld [vmem:[%s13890_s29 + $0x380] sm:$0xff] }
  0xb6   : > { %10225 = vmatprep.subr.mxu0 %v11316_v2  ;;  %10244 = vmatprep.subr.mxu1 %v11316_v2 }
  0xb7   : > { %10226 = vmatpush3.msra.mxu0 %v8928_v9  ;;  %10245 = vmatpush3.msra.mxu1 %v8936_v10  ;;  %v8979_v9 = vld [vmem:[%s13890_s29 + $0x3c0] sm:$0xff] }
  0xb8   : > { %10227 = vmatprep.subr.mxu0 %v11316_v2  ;;  %10246 = vmatprep.subr.mxu1 %v11316_v2 }
  0xb9   : > { %10228 = vmatpush3.msra.mxu0 %v8927_v11  ;;  %10247 = vmatpush3.msra.mxu1 %v8935_v12 }
  0xba   : > { %10229 = vmatprep.subr.mxu0 %v11316_v2  ;;  %10248 = vmatprep.subr.mxu1 %v11316_v2 }
  0xbb   : > { %10230 = vmatpush3.msra.mxu0 %v8926_v13  ;;  %10249 = vmatpush3.msra.mxu1 %v8934_v14 }
  0xbc   : > { %10231 = vmatprep.subr.mxu0 %v11316_v2  ;;  %10250 = vmatprep.subr.mxu1 %v11316_v2 }
  0xbd   : > { %10232 = vmatpush3.msra.mxu0 %v8925_v15  ;;  %10251 = vmatpush3.msra.mxu1 %v8933_v16 }
  0xbe   : > { %10233 = vmatprep.subr.mxu0 %v11316_v2  ;;  %10252 = vmatprep.subr.mxu1 %v11316_v2 }
  0xbf   : > { %10234 = vmatpush3.msra.mxu0 %v8924_v18  ;;  %10253 = vmatpush3.msra.mxu1 %v8932_v19 }
  0xc0   : > { %10235 = vmatprep.subr.mxu0 %v11316_v2  ;;  %10254 = vmatprep.subr.mxu1 %v11316_v2 }
  0xc1   : > { %10236 = vmatpush3.msra.mxu0 %v8923_v20  ;;  %10255 = vmatpush3.msra.mxu1 %v8931_v21 }
  0xc2   : > { %10237 = vmatprep.mubr.msk.f32.mxu0 %vm11317_vm1, %v11316_v2  ;;  %10256 = vmatprep.mubr.msk.f32.mxu1 %vm11317_vm1, %v11316_v2 }
  0xc3   : > { %10259 = vmatprep.subr.mxu0 %v11316_v2  ;;  %10278 = vmatprep.subr.mxu1 %v11316_v2 }
  0xc4   : > { %10238 = vmatmul.mubr.msk.f32.vlgmr.msra.gmra.mxu0 %vm956_vm0, %v11564_v17  ;;  %10257 = vmatmul.mubr.msk.f32.vlgmr.msra.gmra.mxu1 %vm956_vm0, %v11564_v17 }
  0xc5   : > { %10260 = vmatpush3.msra.mxu0 %v8946_v22  ;;  %10279 = vmatpush3.msra.mxu1 %v8954_v23 }
  0xc6   : > { %10261 = vmatprep.subr.mxu0 %v11316_v2  ;;  %10280 = vmatprep.subr.mxu1 %v11316_v2 }
  0xc7   : > { %10262 = vmatpush3.msra.mxu0 %v8945_v24  ;;  %10281 = vmatpush3.msra.mxu1 %v8953_v25 }
  0xc8   : > { %10263 = vmatprep.subr.mxu0 %v11316_v2  ;;  %10282 = vmatprep.subr.mxu1 %v11316_v2 }
  0xc9   : > { %10264 = vmatpush3.msra.mxu0 %v8944_v26  ;;  %10283 = vmatpush3.msra.mxu1 %v8952_v27 }
  0xca   : > { %10265 = vmatprep.subr.mxu0 %v11316_v2  ;;  %10284 = vmatprep.subr.mxu1 %v11316_v2 }
  0xcb   : > { %10266 = vmatpush3.msra.mxu0 %v8943_v28  ;;  %10285 = vmatpush3.msra.mxu1 %v8951_v29 }
  0xcc   : > { %10267 = vmatprep.subr.mxu0 %v11316_v2  ;;  %10286 = vmatprep.subr.mxu1 %v11316_v2 }
  0xcd   : > { %10268 = vmatpush3.msra.mxu0 %v8942_v30  ;;  %10287 = vmatpush3.msra.mxu1 %v8950_v31 }
  0xce   : > { %10269 = vmatprep.subr.mxu0 %v11316_v2  ;;  %10288 = vmatprep.subr.mxu1 %v11316_v2 }
  0xcf   : > { %10270 = vmatpush3.msra.mxu0 %v8941_v32  ;;  %10289 = vmatpush3.msra.mxu1 %v8949_v33 }
  0xd0   : > { %10271 = vmatprep.subr.mxu0 %v11316_v2  ;;  %10290 = vmatprep.subr.mxu1 %v11316_v2 }
  0xd1   : > { %10272 = vmatpush3.msra.mxu0 %v8940_v34  ;;  %10291 = vmatpush3.msra.mxu1 %v8948_v35 }
  0xd2   : > { %10273 = vmatprep.subr.mxu0 %v11316_v2  ;;  %10292 = vmatprep.subr.mxu1 %v11316_v2 }
  0xd3   : > { %10274 = vmatpush3.msra.mxu0 %v8939_v36  ;;  %10293 = vmatpush3.msra.mxu1 %v8947_v37 }
  0xd4   : > { %10275 = vmatprep.mubr.msk.f32.mxu0 %vm11317_vm1, %v11316_v2  ;;  %10294 = vmatprep.mubr.msk.f32.mxu1 %vm11317_vm1, %v11316_v2 }
  0xd5   : > { %10297 = vmatprep.subr.mxu0 %v11316_v2  ;;  %10316 = vmatprep.subr.mxu1 %v11316_v2 }
  0xd6   : > { %10276 = vmatmul.mubr.msk.f32.vlgmr.msra.gmra.mxu0 %vm956_vm0, %v11564_v17  ;;  %10295 = vmatmul.mubr.msk.f32.vlgmr.msra.gmra.mxu1 %vm956_vm0, %v11564_v17  ;;  %v8968_v17 = vld [vmem:[%s13890_s29 + $0x368] sm:$0xff] }
  0xd7   : > { %10298 = vmatpush3.msra.mxu0 %v8962_v38  ;;  %10317 = vmatpush3.msra.mxu1 %v8970_v39 }
  0xd8   : > { %10299 = vmatprep.subr.mxu0 %v11316_v2  ;;  %10318 = vmatprep.subr.mxu1 %v11316_v2 }
  0xd9   : > { %10300 = vmatpush3.msra.mxu0 %v8961_v40  ;;  %10319 = vmatpush3.msra.mxu1 %v8969_v41 }
  0xda   : > { %10301 = vmatprep.subr.mxu0 %v11316_v2  ;;  %10320 = vmatprep.subr.mxu1 %v11316_v2 }
  0xdb   : > { %10302 = vmatpush3.msra.mxu0 %v8960_v42  ;;  %10321 = vmatpush3.msra.mxu1 %v8968_v17 }
  0xdc   : > { %10303 = vmatprep.subr.mxu0 %v11316_v2  ;;  %10322 = vmatprep.subr.mxu1 %v11316_v2 }
  0xdd   : > { %10304 = vmatpush3.msra.mxu0 %v8959_v43  ;;  %10323 = vmatpush3.msra.mxu1 %v8967_v44 }
  0xde   : > { %10305 = vmatprep.subr.mxu0 %v11316_v2  ;;  %10324 = vmatprep.subr.mxu1 %v11316_v2 }
  0xdf   : > { %10306 = vmatpush3.msra.mxu0 %v8958_v45  ;;  %10325 = vmatpush3.msra.mxu1 %v8966_v46 }
  0xe0   : > { %10307 = vmatprep.subr.mxu0 %v11316_v2  ;;  %10326 = vmatprep.subr.mxu1 %v11316_v2 }
  0xe1   : > { %10308 = vmatpush3.msra.mxu0 %v8957_v47  ;;  %10327 = vmatpush3.msra.mxu1 %v8965_v48 }
  0xe2   : > { %10309 = vmatprep.subr.mxu0 %v11316_v2  ;;  %10328 = vmatprep.subr.mxu1 %v11316_v2 }
  0xe3   : > { %10310 = vmatpush3.msra.mxu0 %v8956_v49  ;;  %10329 = vmatpush3.msra.mxu1 %v8964_v50 }
  0xe4   : > { %10311 = vmatprep.subr.mxu0 %v11316_v2  ;;  %10330 = vmatprep.subr.mxu1 %v11316_v2 }
  0xe5   : > { %10312 = vmatpush3.msra.mxu0 %v8955_v51  ;;  %10331 = vmatpush3.msra.mxu1 %v8963_v52 }
  0xe6   : > { %10313 = vmatprep.mubr.msk.f32.mxu0 %vm11317_vm1, %v11316_v2  ;;  %10332 = vmatprep.mubr.msk.f32.mxu1 %vm11317_vm1, %v11316_v2 }
  0xe7   : > { %10335 = vmatprep.subr.mxu0 %v11316_v2  ;;  %10354 = vmatprep.subr.mxu1 %v11316_v2 }
  0xe8   : > { %10314 = vmatmul.mubr.msk.f32.vlgmr.msra.gmra.mxu0 %vm956_vm0, %v12301_v55  ;;  %10333 = vmatmul.mubr.msk.f32.vlgmr.msra.gmra.mxu1 %vm956_vm0, %v12301_v55 }
  0xe9   : > { %10336 = vmatpush3.msra.mxu0 %v8978_v53  ;;  %10355 = vmatpush3.msra.mxu1 %v8986_v54 }
  0xea   : > { %10337 = vmatprep.subr.mxu0 %v11316_v2  ;;  %10356 = vmatprep.subr.mxu1 %v11316_v2 }
  0xeb   : > { %10338 = vmatpush3.msra.mxu0 %v8977_v56  ;;  %10357 = vmatpush3.msra.mxu1 %v8985_v57  ;;  %v739_v56 = vlaneseq }
  0xec   : > { %10339 = vmatprep.subr.mxu0 %v11316_v2  ;;  %10358 = vmatprep.subr.mxu1 %v11316_v2 }
  0xed   : > { %10340 = vmatpush3.msra.mxu0 %v8976_v58  ;;  %10359 = vmatpush3.msra.mxu1 %v8984_v59  ;;  %v740_v57 = vshrl.u32 %v739_v56, 7  ;;  %v742_v58 = vand.u32 127, %v739_v56 }
  0xee   : > { %10341 = vmatprep.subr.mxu0 %v11316_v2  ;;  %10360 = vmatprep.subr.mxu1 %v11316_v2 }
  0xef   : > { %10342 = vmatpush3.msra.mxu0 %v8975_v60  ;;  %10361 = vmatpush3.msra.mxu1 %v8983_v61  ;;  %vm12431_vm3 = vcmp.gt.s32.totalorder %v742_v58, %v740_v57 }
  0xf0   : > { %10343 = vmatprep.subr.mxu0 %v11316_v2  ;;  %10362 = vmatprep.subr.mxu1 %v11316_v2 }
  0xf1   : > { %10344 = vmatpush3.msra.mxu0 %v8974_v62  ;;  %10363 = vmatpush3.msra.mxu1 %v8982_v63 }
  0xf2   : > { %v1026_v3 = vpop.f32.mrf.mxu0  ;;  %10345 = vmatprep.subr.mxu0 %v11316_v2  ;;  %10364 = vmatprep.subr.mxu1 %v11316_v2 }
  0xf3   : > { %10346 = vmatpush3.msra.mxu0 %v8973_v0  ;;  %10365 = vmatpush3.msra.mxu1 %v8981_v1 }
  0xf4   : > { %v1096_v6 = vpop.f32.mrf.mxu1  ;;  %v9935_v7 = vpop.f32.mrf.mxu0  ;;  %10347 = vmatprep.subr.mxu0 %v11316_v2  ;;  %10366 = vmatprep.subr.mxu1 %v11316_v2 }
  0xf5   : > { %10348 = vmatpush3.msra.mxu0 %v8972_v4  ;;  %10367 = vmatpush3.msra.mxu1 %v8980_v5 }
  0xf6   : > { %v9954_v10 = vpop.f32.mrf.mxu1  ;;  %10349 = vmatprep.subr.mxu0 %v11316_v2  ;;  %10368 = vmatprep.subr.mxu1 %v11316_v2 }
  0xf7   : > { %10350 = vmatpush3.msra.mxu0 %v8971_v8  ;;  %10351 = vmatprep.mubr.msk.f32.mxu0 %vm11317_vm1, %v11316_v2 }
  0xf8   : > { %10369 = vmatpush3.msra.mxu1 %v8979_v9  ;;  %10370 = vmatprep.mubr.msk.f32.mxu1 %vm11317_vm1, %v11316_v2 }
  0xf9   : > { %10352 = vmatmul.mubr.msk.f32.vlgmr.msra.gmra.mxu0 %vm956_vm0, %v12301_v55  ;;  %10371 = vmatmul.mubr.msk.f32.vlgmr.msra.gmra.mxu1 %vm956_vm0, %v12301_v55 }
  0xfa   : > { %10373 = vmatprep.subr.mxu0 %v11316_v2  ;;  %10378 = vmatprep.subr.mxu1 %v11316_v2 }
  0xfb   : > { %10375 = vmatprep.mubr.msk.f32.mxu0 %vm11317_vm1, %v11316_v2  ;;  %10380 = vmatprep.mubr.msk.f32.mxu1 %vm11317_vm1, %v11316_v2 }
 0x104   : > { %v1166_v11 = vpop.f32.mrf.mxu0 }
 0x106   : > { %v1236_v12 = vpop.f32.mrf.mxu1  ;;  %v9973_v13 = vpop.f32.mrf.mxu0 }
 0x108   : > { %v9992_v14 = vpop.f32.mrf.mxu1 }
 0x116   : > { %v1306_v15 = vpop.f32.mrf.mxu0 }
 0x118   : > { %v1376_v16 = vpop.f32.mrf.mxu1  ;;  %v10011_v18 = vpop.f32.mrf.mxu0 }
 0x11a   : > { %v10030_v19 = vpop.f32.mrf.mxu1 }
 0x128   : > { %v1446_v20 = vpop.f32.mrf.mxu0 }
 0x12a   : > { %v1516_v21 = vpop.f32.mrf.mxu1  ;;  %v10049_v22 = vpop.f32.mrf.mxu0 }
 0x12c   : > { %v10068_v23 = vpop.f32.mrf.mxu1 }
 0x13b   : > { %v1586_v24 = vpop.f32.mrf.mxu0  ;;  %v1656_v25 = vpop.f32.mrf.mxu1 }
 0x13c   : > { %10374 = vmatpush3.xpose.msk.msra.mxu0 %vm2640_vm2, %v1586_v24  ;;  %10379 = vmatpush3.xpose.msk.msra.mxu1 %vm2640_vm2, %v1656_v25 }
 0x13d   : > { %v10087_v26 = vpop.f32.mrf.mxu0  ;;  %v10106_v27 = vpop.f32.mrf.mxu1  ;;  %10383 = vmatprep.subr.mxu0 %v11316_v2  ;;  %10388 = vmatprep.subr.mxu1 %v11316_v2 }
 0x13f   : > { %10376 = vmatmul.mubr.msk.f32.vlgmr.msra.gmra.mxu0 %vm2640_vm2, %v1026_v3  ;;  %10381 = vmatmul.mubr.msk.f32.vlgmr.msra.gmra.mxu1 %vm2640_vm2, %v1096_v6 }
 0x140   : > { %10385 = vmatprep.mubr.msk.f32.mxu0 %vm11317_vm1, %v11316_v2  ;;  %10390 = vmatprep.mubr.msk.f32.mxu1 %vm11317_vm1, %v11316_v2 }
 0x14d   : > { %v1726_v28 = vpop.f32.mrf.mxu0  ;;  %v1796_v29 = vpop.f32.mrf.mxu1 }
 0x14e   : > { %10384 = vmatpush3.xpose.msk.msra.mxu0 %vm2640_vm2, %v1726_v28  ;;  %10389 = vmatpush3.xpose.msk.msra.mxu1 %vm2640_vm2, %v1796_v29 }
 0x14f   : > { %v10125_v30 = vpop.f32.mrf.mxu0  ;;  %v10144_v31 = vpop.f32.mrf.mxu1  ;;  %10393 = vmatprep.subr.mxu0 %v11316_v2  ;;  %10398 = vmatprep.subr.mxu1 %v11316_v2 }
 0x151   : > { %10386 = vmatmul.mubr.msk.f32.vlgmr.msra.gmra.mxu0 %vm2640_vm2, %v1166_v11  ;;  %10391 = vmatmul.mubr.msk.f32.vlgmr.msra.gmra.mxu1 %vm2640_vm2, %v1236_v12 }
 0x152   : > { %10395 = vmatprep.mubr.msk.f32.mxu0 %vm11317_vm1, %v11316_v2  ;;  %10400 = vmatprep.mubr.msk.f32.mxu1 %vm11317_vm1, %v11316_v2 }
 0x15f   : > { %v1866_v32 = vpop.f32.mrf.mxu0  ;;  %v1936_v33 = vpop.f32.mrf.mxu1 }
 0x160   : > { %10394 = vmatpush3.xpose.msk.msra.mxu0 %vm2640_vm2, %v1866_v32  ;;  %10399 = vmatpush3.xpose.msk.msra.mxu1 %vm2640_vm2, %v1936_v33 }
 0x161   : > { %v10163_v34 = vpop.f32.mrf.mxu0  ;;  %v10182_v35 = vpop.f32.mrf.mxu1  ;;  %10403 = vmatprep.subr.mxu0 %v11316_v2  ;;  %10408 = vmatprep.subr.mxu1 %v11316_v2 }
 0x163   : > { %10396 = vmatmul.mubr.msk.f32.vlgmr.msra.gmra.mxu0 %vm2640_vm2, %v1306_v15  ;;  %10401 = vmatmul.mubr.msk.f32.vlgmr.msra.gmra.mxu1 %vm2640_vm2, %v1376_v16 }
 0x164   : > { %10405 = vmatprep.mubr.msk.f32.mxu0 %vm11317_vm1, %v11316_v2  ;;  %10410 = vmatprep.mubr.msk.f32.mxu1 %vm11317_vm1, %v11316_v2 }
 0x171   : > { %v2006_v36 = vpop.f32.mrf.mxu0  ;;  %v2076_v37 = vpop.f32.mrf.mxu1 }
 0x172   : > { %10404 = vmatpush3.xpose.msk.msra.mxu0 %vm2640_vm2, %v2006_v36  ;;  %10409 = vmatpush3.xpose.msk.msra.mxu1 %vm2640_vm2, %v2076_v37 }
 0x173   : > { %v10201_v38 = vpop.f32.mrf.mxu0  ;;  %v10220_v39 = vpop.f32.mrf.mxu1  ;;  %10413 = vmatprep.subr.mxu0 %v11316_v2  ;;  %10418 = vmatprep.subr.mxu1 %v11316_v2 }
 0x175   : > { %10406 = vmatmul.mubr.msk.f32.vlgmr.msra.gmra.mxu0 %vm2640_vm2, %v1446_v20  ;;  %10411 = vmatmul.mubr.msk.f32.vlgmr.msra.gmra.mxu1 %vm2640_vm2, %v1516_v21 }
 0x176   : > { %10415 = vmatprep.mubr.msk.f32.mxu0 %vm11317_vm1, %v11316_v2  ;;  %10420 = vmatprep.mubr.msk.f32.mxu1 %vm11317_vm1, %v11316_v2 }
 0x184   : > { %v2146_v40 = vpop.f32.mrf.mxu0  ;;  %v2216_v41 = vpop.f32.mrf.mxu1 }
 0x185   : > { %10414 = vmatpush3.msra.mxu0 %v2146_v40  ;;  %10419 = vmatpush3.msra.mxu1 %v2216_v41 }
 0x186   : > { %v10239_v42 = vpop.f32.mrf.mxu0  ;;  %v10258_v17 = vpop.f32.mrf.mxu1  ;;  %10423 = vmatprep.subr.mxu0 %v11316_v2  ;;  %10428 = vmatprep.subr.mxu1 %v11316_v2 }
 0x196   : > { %v12419_v43 = vpop.f32.mrf.mxu0  ;;  %v12421_v44 = vpop.f32.mrf.mxu1 }
 0x198   : > { %v10277_v45 = vpop.f32.mrf.mxu0  ;;  %v10296_v46 = vpop.f32.mrf.mxu1 }
 0x1a8   : > { %v12423_v47 = vpop.f32.mrf.mxu0  ;;  %v12425_v48 = vpop.f32.mrf.mxu1 }
 0x1aa   : > { %v10315_v49 = vpop.f32.mrf.mxu0  ;;  %v10334_v50 = vpop.f32.mrf.mxu1 }
 0x1b9   : > { %v12427_v51 = vpop.f32.mrf.mxu0  ;;  %v12429_v52 = vpop.f32.mrf.mxu1 }
 0x1bb   : > { %v10353_v53 = vpop.f32.mrf.mxu0  ;;  %v10372_v54 = vpop.f32.mrf.mxu1 }
 0x1ff   : > { %v2713_v59 = vpop.f32.mrf.mxu0  ;;  %v2789_v60 = vpop.f32.mrf.mxu1 }
 0x200   : > { %v3249_v62 = vmul.f32 0.35355338, %v2713_v59  ;;  %v3250_v63 = vmul.f32 0.35355338, %v2789_v60 }
 0x201   : > { %v10377_v0 = vpop.f32.mrf.mxu0  ;;  %v10382_v1 = vpop.f32.mrf.mxu1 }
 0x202   : > { %v3257_v3 = vsel %vm12431_vm3, -1e+09, %v3249_v62  ;;  %v3258_v5 = vsel %vm12431_vm3, -1e+09, %v3250_v63 }
 0x203   : > { %v3265_v4 = vsel %vm2640_vm2, %v3257_v3, -inf  ;;  %v3268_v6 = vsel %vm2640_vm2, %v3258_v5, -inf }
 0x204   : > { %3266 = vmax.xlane.f32.xlu0 %v3265_v4 }
 0x208   : > { %3269 = vmax.xlane.f32.xlu0 %v3268_v6 }
 0x211   : > { %v2865_v7 = vpop.f32.mrf.mxu0  ;;  %v2941_v8 = vpop.f32.mrf.mxu1 }
 0x212   : > { %v3251_v9 = vmul.f32 0.35355338, %v2865_v7  ;;  %v3252_v10 = vmul.f32 0.35355338, %v2941_v8 }
 0x213   : > { %v10387_v11 = vpop.f32.mrf.mxu0  ;;  %v10392_v12 = vpop.f32.mrf.mxu1 }
 0x214   : > { %v3259_v13 = vsel %vm12431_vm3, -1e+09, %v3251_v9  ;;  %v3260_v15 = vsel %vm12431_vm3, -1e+09, %v3252_v10 }
 0x215   : > { %v3271_v14 = vsel %vm2640_vm2, %v3259_v13, -inf  ;;  %v3274_v16 = vsel %vm2640_vm2, %v3260_v15, -inf }
 0x216   : > { %3272 = vmax.xlane.f32.xlu1 %v3271_v14 }
 0x21a   : > { %3275 = vmax.xlane.f32.xlu1 %v3274_v16 }
 0x223   : > { %v3017_v18 = vpop.f32.mrf.mxu0  ;;  %v3093_v19 = vpop.f32.mrf.mxu1 }
 0x224   : > { %v3253_v20 = vmul.f32 0.35355338, %v3017_v18  ;;  %v3254_v21 = vmul.f32 0.35355338, %v3093_v19 }
 0x225   : > { %v10397_v22 = vpop.f32.mrf.mxu0  ;;  %v10402_v23 = vpop.f32.mrf.mxu1 }
 0x226   : > { %v3262_v24 = vsel %vm12431_vm3, -1e+09, %v3254_v21  ;;  %v3261_v25 = vsel %vm12431_vm3, -1e+09, %v3253_v20 }
 0x227   : > { %v3280_v26 = vsel %vm2640_vm2, %v3262_v24, -inf  ;;  %v3277_v27 = vsel %vm2640_vm2, %v3261_v25, -inf }
 0x228   : > { %3281 = vmax.xlane.f32.xlu1 %v3280_v26  ;;  %3278 = vmax.xlane.f32.xlu0 %v3277_v27 }
 0x235   : > { %v3169_v28 = vpop.f32.mrf.mxu0  ;;  %v3245_v29 = vpop.f32.mrf.mxu1 }
 0x236   : > { %v3255_v30 = vmul.f32 0.35355338, %v3169_v28  ;;  %v3256_v31 = vmul.f32 0.35355338, %v3245_v29 }
 0x237   : > { %v10407_v32 = vpop.f32.mrf.mxu0  ;;  %v10412_v33 = vpop.f32.mrf.mxu1 }
 0x238   : > { %v3264_v34 = vsel %vm12431_vm3, -1e+09, %v3256_v31  ;;  %v3263_v35 = vsel %vm12431_vm3, -1e+09, %v3255_v30 }
 0x239   : > { %v3286_v36 = vsel %vm2640_vm2, %v3264_v34, -inf  ;;  %v3283_v37 = vsel %vm2640_vm2, %v3263_v35, -inf }
 0x23a   : > { %3287 = vmax.xlane.f32.xlu1 %v3286_v36  ;;  %3284 = vmax.xlane.f32.xlu0 %v3283_v37 }
 0x28d   : > { %v3267_v38 = vpop.xlane.xlu0 %3266 }
 0x28e   : > { %v3289_v39 = vsub.f32 %v3257_v3, %v3267_v38 }
 0x290   : > { %v3297_v40 = vmul.f32 1.442695, %v3289_v39 }
 0x291   : > { %v3270_v41 = vpop.xlane.xlu0 %3269 }
 0x292   : > { %11183 = vpow2.f32 %v3297_v40  ;;  %v3290_v42 = vsub.f32 %v3258_v5, %v3270_v41 }
 0x294   : > { %v3299_v17 = vmul.f32 1.442695, %v3290_v42  ;;  %v8989_v42 = vld [vmem:[%s13894_s0 + $0x50] sm:$0xff] }
 0x296   : > { %11185 = vpow2.f32 %v3299_v17 }
 0x29f   : > { %v11184_v45 = vpop.eup %11183  ;;  %v3273_v46 = vpop.xlane.xlu1 %3272 }
 0x2a0   : > { %v3291_v49 = vsub.f32 %v3259_v13, %v3273_v46  ;;  %v3313_v50 = vsel %vm2640_vm2, %v11184_v45, 0.0  ;;  %v8990_v46 = vld [vmem:[%s13894_s0 + $0x58] sm:$0xff] }
 0x2a1   : > { %3314 = vadd.xlane.f32.xlu0 %v3313_v50 }
 0x2a2   : > { %v3301_v53 = vmul.f32 1.442695, %v3291_v49 }
 0x2a3   : > { %v11186_v54 = vpop.eup %11185  ;;  %v3276_v56 = vpop.xlane.xlu1 %3275 }
 0x2a4   : > { %11187 = vpow2.f32 %v3301_v53  ;;  %v3292_v57 = vsub.f32 %v3260_v15, %v3276_v56  ;;  %v3316_v58 = vsel %vm2640_vm2, %v11186_v54, 0.0  ;;  %v8991_v53 = vld [vmem:[%s13894_s0 + $0x60] sm:$0xff] }
 0x2a5   : > { %3317 = vadd.xlane.f32.xlu1 %v3316_v58 }
 0x2a6   : > { %v3303_v59 = vmul.f32 1.442695, %v3292_v57  ;;  %v8992_v57 = vld [vmem:[%s13894_s0 + $0x68] sm:$0xff] }
 0x2a8   : > { %11189 = vpow2.f32 %v3303_v59 }
 0x2b1   : > { %v11188_v60 = vpop.eup %11187  ;;  %v3282_v61 = vpop.xlane.xlu1 %3281 }
 0x2b2   : > { %v3279_v62 = vpop.xlane.xlu0 %3278  ;;  %v3294_v63 = vsub.f32 %v3262_v24, %v3282_v61  ;;  %v3319_v1 = vsel %vm2640_vm2, %v11188_v60, 0.0 }
 0x2b3   : > { %v3293_v0 = vsub.f32 %v3261_v25, %v3279_v62  ;;  %3320 = vadd.xlane.f32.xlu0 %v3319_v1  ;;  %v8993_v62 = vld [vmem:[%s13894_s0 + $0x70] sm:$0xff] }
 0x2b4   : > { %v3307_v3 = vmul.f32 1.442695, %v3294_v63 }
 0x2b5   : > { %v3305_v4 = vmul.f32 1.442695, %v3293_v0  ;;  %v11190_v5 = vpop.eup %11189 }
 0x2b6   : > { %11191 = vpow2.f32 %v3307_v3  ;;  %v3322_v6 = vsel %vm2640_vm2, %v11190_v5, 0.0 }
 0x2b7   : > { %11193 = vpow2.f32 %v3305_v4  ;;  %3323 = vadd.xlane.f32.xlu1 %v3322_v6 }
 0x2c3   : > { %v11192_v7 = vpop.eup %11191  ;;  %v3288_v8 = vpop.xlane.xlu1 %3287 }
 0x2c4   : > { %v3285_v9 = vpop.xlane.xlu0 %3284  ;;  %v11194_v10 = vpop.eup %11193  ;;  %v3296_v11 = vsub.f32 %v3264_v34, %v3288_v8  ;;  %v3328_v13 = vsel %vm2640_vm2, %v11192_v7, 0.0 }
 0x2c5   : > { %v3295_v12 = vsub.f32 %v3263_v35, %v3285_v9  ;;  %3329 = vadd.xlane.f32.xlu1 %v3328_v13  ;;  %v3325_v14 = vsel %vm2640_vm2, %v11194_v10, 0.0 }
 0x2c6   : > { %v3311_v15 = vmul.f32 1.442695, %v3296_v11  ;;  %3326 = vadd.xlane.f32.xlu0 %v3325_v14 }
 0x2c7   : > { %v3309_v16 = vmul.f32 1.442695, %v3295_v12 }
 0x2c8   : > { %11195 = vpow2.f32 %v3311_v15 }
 0x2c9   : > { %11197 = vpow2.f32 %v3309_v16 }
 0x2d5   : > { %v11196_v18 = vpop.eup %11195 }
 0x2d6   : > { %v11198_v19 = vpop.eup %11197  ;;  %v3334_v20 = vsel %vm2640_vm2, %v11196_v18, 0.0 }
 0x2d7   : > { %3335 = vadd.xlane.f32.xlu1 %v3334_v20  ;;  %v3331_v21 = vsel %vm2640_vm2, %v11198_v19, 0.0 }
 0x2d8   : > { %3332 = vadd.xlane.f32.xlu0 %v3331_v21 }
 0x32a   : > { %v3315_v22 = vpop.xlane.xlu0 %3314 }
 0x32b   : > { %11199 = vrcp.f32 %v3315_v22 }
 0x32e   : > { %v3318_v23 = vpop.xlane.xlu1 %3317 }
 0x32f   : > { %11201 = vrcp.f32 %v3318_v23 }
 0x338   : > { %v11200_v24 = vpop.eup %11199 }
 0x339   : > { %v3338_v25 = vmul.f32 %v11200_v24, %v11184_v45 }
 0x33b   : > { %10416 = vmatmul.mubr.msk.f32.vlgmr.msra.gmra.mxu0 %vm2640_vm2, %v3338_v25 }
 0x33c   : > { %v11202_v26 = vpop.eup %11201  ;;  %v3321_v27 = vpop.xlane.xlu0 %3320  ;;  %10424 = vmatpush3.msra.mxu0 %v12419_v43  ;;  %10425 = vmatprep.mubr.msk.f32.mxu0 %vm11317_vm1, %v11316_v2 }
 0x33d   : > { %11203 = vrcp.f32 %v3321_v27  ;;  %v3340_v28 = vmul.f32 %v11202_v26, %v11186_v54  ;;  %10433 = vmatprep.subr.mxu0 %v11316_v2 }
 0x33f   : > { %10421 = vmatmul.mubr.msk.f32.vlgmr.msra.gmra.mxu1 %vm2640_vm2, %v3340_v28 }
 0x340   : > { %v3324_v29 = vpop.xlane.xlu1 %3323  ;;  %10429 = vmatpush3.msra.mxu1 %v12421_v44  ;;  %10430 = vmatprep.mubr.msk.f32.mxu1 %vm11317_vm1, %v11316_v2 }
 0x341   : > { %11205 = vrcp.f32 %v3324_v29  ;;  %10438 = vmatprep.subr.mxu1 %v11316_v2 }
 0x34a   : > { %v11204_v30 = vpop.eup %11203 }
 0x34b   : > { %v3342_v43 = vmul.f32 %v11204_v30, %v11188_v60  ;;  %v8994_v60 = vld [vmem:[%s13894_s0 + $0x78] sm:$0xff] }
 0x34d   : > { %10426 = vmatmul.mubr.msk.f32.vlgmr.msra.gmra.mxu0 %vm2640_vm2, %v3342_v43 }
 0x34e   : > { %v11206_v31 = vpop.eup %11205  ;;  %v3330_v32 = vpop.xlane.xlu1 %3329  ;;  %10434 = vmatpush3.msra.mxu0 %v12423_v47  ;;  %10435 = vmatprep.mubr.msk.f32.mxu0 %vm11317_vm1, %v11316_v2 }
 0x34f   : > { %11207 = vrcp.f32 %v3330_v32  ;;  %v3327_v33 = vpop.xlane.xlu0 %3326  ;;  %v3344_v44 = vmul.f32 %v11206_v31, %v11190_v5  ;;  %10443 = vmatprep.subr.mxu0 %v11316_v2 }
 0x350   : > { %11209 = vrcp.f32 %v3327_v33 }
 0x351   : > { %10431 = vmatmul.mubr.msk.f32.vlgmr.msra.gmra.mxu1 %vm2640_vm2, %v3344_v44 }
 0x352   : > { %10439 = vmatpush3.msra.mxu1 %v12425_v48  ;;  %10440 = vmatprep.mubr.msk.f32.mxu1 %vm11317_vm1, %v11316_v2 }
 0x353   : > { %10448 = vmatprep.subr.mxu1 %v11316_v2 }
 0x35c   : > { %v11208_v34 = vpop.eup %11207 }
 0x35d   : > { %v11210_v47 = vpop.eup %11209  ;;  %v3348_v35 = vmul.f32 %v11208_v34, %v11192_v7 }
 0x35e   : > { %v3346_v36 = vmul.f32 %v11210_v47, %v11194_v10 }
 0x35f   : > { %10441 = vmatmul.mubr.msk.f32.vlgmr.msra.gmra.mxu1 %vm2640_vm2, %v3348_v35 }
 0x360   : > { %v3336_v37 = vpop.xlane.xlu1 %3335  ;;  %10436 = vmatmul.mubr.msk.f32.vlgmr.msra.gmra.mxu0 %vm2640_vm2, %v3346_v36  ;;  %10449 = vmatpush3.msra.mxu1 %v12429_v52  ;;  %v8988_v52 = vld [vmem:[%s13894_s0 + $0x48] sm:$0xff]  ;;  %s8791_s0 = sshll.u32 %s723_s2, 3 }
 0x361   : > { %11211 = vrcp.f32 %v3336_v37  ;;  %v3333_v38 = vpop.xlane.xlu0 %3332  ;;  %10444 = vmatpush3.msra.mxu0 %v12427_v51  ;;  %10445 = vmatprep.mubr.msk.f32.mxu0 %vm11317_vm1, %v11316_v2  ;;  %v8987_v51 = vld [vmem:[%s13893_s24 + $0x40] sm:$0xff]  ;;  %s8694_s24 = scalar_lea.sflag [#allocation3], %s723_s2 }
 0x362   : > { %11213 = vrcp.f32 %v3333_v38  ;;  %10450 = vmatprep.mubr.msk.f32.mxu1 %vm11317_vm1, %v11316_v2  ;;  %10453 = vmatprep.subr.mxu0 %v11316_v2 }
 0x363   : > { %10458 = vmatprep.subr.mxu1 %v11316_v2 }
 0x36e   : > { %v11212_v48 = vpop.eup %11211 }
 0x36f   : > { %v11214_v39 = vpop.eup %11213  ;;  %v3352_v40 = vmul.f32 %v11212_v48, %v11196_v18 }
 0x370   : > { %v3350_v41 = vmul.f32 %v11214_v39, %v11198_v19 }
 0x371   : > { %10451 = vmatmul.mubr.msk.f32.vlgmr.msra.gmra.mxu1 %vm2640_vm2, %v3352_v40 }
 0x372   : > { %10446 = vmatmul.mubr.msk.f32.vlgmr.msra.gmra.mxu0 %vm2640_vm2, %v3350_v41  ;;  %10460 = vmatprep.mubr.msk.f32.mxu1 %vm11317_vm1, %v11316_v2 }
 0x373   : > { %10455 = vmatprep.mubr.msk.f32.mxu0 %vm11317_vm1, %v11316_v2  ;;  %10454 = vmatpush3.msra.mxu0 %v8987_v51  ;;  %v9062_v51 = vld [vmem:[%s13841_s9 + $0x238] sm:$0xff] }
 0x374   : > { %10463 = vmatprep.subr.mxu0 %v11316_v2  ;;  %10459 = vmatpush3.msra.mxu1 %v8988_v52  ;;  %v9070_v52 = vld [vmem:[%s13841_s9 + $0x278] sm:$0xff] }
 0x375   : > { %10468 = vmatprep.subr.mxu1 %v11316_v2 }
 0x3fb   : > { %v3422_v17 = vpop.f32.mrf.mxu0 }
 0x3fc   : > { %10456 = vmatmul.mubr.msk.f32.vlgmr.msra.gmra.mxu0 %vm2640_vm2, %v3422_v17  ;;  %v9060_v17 = vld [vmem:[%s13841_s9 + $0x228] sm:$0xff] }
 0x3fd   : > { %v10417_v45 = vpop.f32.mrf.mxu0  ;;  %10464 = vmatpush3.msra.mxu0 %v8989_v42  ;;  %10465 = vmatprep.mubr.msk.f32.mxu0 %vm11317_vm1, %v11316_v2  ;;  %v9069_v42 = vld [vmem:[%s13841_s9 + $0x270] sm:$0xff] }
 0x3fe   : > { %10473 = vmatprep.subr.mxu0 %v11316_v2  ;;  %v9068_v45 = vld [vmem:[%s13841_s9 + $0x268] sm:$0xff] }
 0x3ff   : > { %v3495_v49 = vpop.f32.mrf.mxu1 }
 0x400   : > { %10461 = vmatmul.mubr.msk.f32.vlgmr.msra.gmra.mxu1 %vm2640_vm2, %v3495_v49  ;;  %v9067_v49 = vld [vmem:[%s13841_s9 + $0x260] sm:$0xff] }
 0x401   : > { %v10422_v50 = vpop.f32.mrf.mxu1  ;;  %10469 = vmatpush3.msra.mxu1 %v8990_v46  ;;  %10470 = vmatprep.mubr.msk.f32.mxu1 %vm11317_vm1, %v11316_v2  ;;  %v9059_v46 = vld [vmem:[%s13841_s9 + $0x220] sm:$0xff] }
 0x402   : > { %10478 = vmatprep.subr.mxu1 %v11316_v2  ;;  %v9058_v50 = vld [vmem:[%s13841_s9 + $0x218] sm:$0xff] }
 0x40d   : > { %v3568_v54 = vpop.f32.mrf.mxu0 }
 0x40e   : > { %10466 = vmatmul.mubr.msk.f32.vlgmr.msra.gmra.mxu0 %vm2640_vm2, %v3568_v54  ;;  %v9057_v54 = vld [vmem:[%s13841_s9 + $0x210] sm:$0xff] }
 0x40f   : > { %v10427_v56 = vpop.f32.mrf.mxu0  ;;  %10474 = vmatpush3.msra.mxu0 %v8991_v53  ;;  %10475 = vmatprep.mubr.msk.f32.mxu0 %vm11317_vm1, %v11316_v2  ;;  %v9066_v53 = vld [vmem:[%s13841_s9 + $0x258] sm:$0xff] }
 0x410   : > { %10483 = vmatprep.subr.mxu0 %v11316_v2  ;;  %v9065_v56 = vld [vmem:[%s13841_s9 + $0x250] sm:$0xff] }
 0x411   : > { %v3641_v58 = vpop.f32.mrf.mxu1 }
 0x412   : > { %10471 = vmatmul.mubr.msk.f32.vlgmr.msra.gmra.mxu1 %vm2640_vm2, %v3641_v58  ;;  %v9064_v58 = vld [vmem:[%s13841_s9 + $0x248] sm:$0xff] }
 0x413   : > { %v10432_v59 = vpop.f32.mrf.mxu1  ;;  %10479 = vmatpush3.msra.mxu1 %v8992_v57  ;;  %10480 = vmatprep.mubr.msk.f32.mxu1 %vm11317_vm1, %v11316_v2  ;;  %v9056_v57 = vld [vmem:[%s13841_s9 + $0x208] sm:$0xff] }
 0x414   : > { %10488 = vmatprep.subr.mxu1 %v11316_v2  ;;  %v9055_v59 = vld [vmem:[%s13841_s9 + $0x200] sm:$0xff] }
 0x41f   : > { %v3787_v61 = vpop.f32.mrf.mxu1 }
 0x420   : > { %v3714_v63 = vpop.f32.mrf.mxu0  ;;  %10481 = vmatmul.mubr.msk.f32.vlgmr.msra.gmra.mxu1 %vm2640_vm2, %v3787_v61 }
 0x421   : > { %10476 = vmatmul.mubr.msk.f32.vlgmr.msra.gmra.mxu0 %vm2640_vm2, %v3714_v63  ;;  %v10442_v0 = vpop.f32.mrf.mxu1  ;;  %10489 = vmatpush3.msra.mxu1 %v8994_v60  ;;  %v9063_v60 = vld [vmem:[%s13841_s9 + $0x240] sm:$0xff] }
 0x422   : > { %v10437_v1 = vpop.f32.mrf.mxu0  ;;  %10484 = vmatpush3.msra.mxu0 %v8993_v62  ;;  %10485 = vmatprep.mubr.msk.f32.mxu0 %vm11317_vm1, %v11316_v2 }
 0x423   : > { %10490 = vmatprep.mubr.msk.f32.mxu1 %vm11317_vm1, %v11316_v2  ;;  %10493 = vmatprep.subr.mxu0 %v11316_v2  ;;  %v9053_v1 = vld [vmem:[%s13895_s4 + $0x1] ss:$0 sm:$0xff] }
 0x424   : > { %10512 = vmatprep.subr.mxu1 %v11316_v2 }
 0x431   : > { %v3933_v3 = vpop.f32.mrf.mxu1 }
 0x432   : > { %v3860_v4 = vpop.f32.mrf.mxu0  ;;  %10491 = vmatmul.mubr.msk.f32.vlgmr.msra.gmra.mxu1 %vm2640_vm2, %v3933_v3 }
 0x433   : > { %10486 = vmatmul.mubr.msk.f32.vlgmr.msra.gmra.mxu0 %vm2640_vm2, %v3860_v4  ;;  %v10452_v5 = vpop.f32.mrf.mxu1  ;;  %10528 = vmatprep.mubr.msk.f32.mxu1 %vm11317_vm1, %v11316_v2  ;;  %v9054_v4 = vld [vmem:[%s13896_s8 + $0x1] ss:$0 sm:$0xff] }
 0x434   : > { %v10447_v6 = vpop.f32.mrf.mxu0  ;;  %10509 = vmatprep.mubr.msk.f32.mxu0 %vm11317_vm1, %v11316_v2  ;;  %10494 = vmatpush3.msra.mxu0 %v9062_v51  ;;  %v9107_v51 = vld [vmem:[%s13841_s9 + $0x3a0] sm:$0xff] }
 0x435   : > { %10513 = vmatpush3.msra.mxu1 %v9070_v52  ;;  %10495 = vmatprep.subr.mxu0 %v11316_v2  ;;  %v9115_v52 = vld [vmem:[%s13841_s9 + $0x3e0] sm:$0xff] }
 0x436   : > { %10514 = vmatprep.subr.mxu1 %v11316_v2 }
 0x437   : > { %10515 = vmatpush3.msra.mxu1 %v9069_v42  ;;  %v9114_v42 = vld [vmem:[%s13841_s9 + $0x3d8] sm:$0xff] }
 0x438   : > { %10516 = vmatprep.subr.mxu1 %v11316_v2 }
 0x439   : > { %10517 = vmatpush3.msra.mxu1 %v9068_v45  ;;  %v9113_v45 = vld [vmem:[%s13841_s9 + $0x3d0] sm:$0xff] }
 0x43a   : > { %10518 = vmatprep.subr.mxu1 %v11316_v2 }
 0x43b   : > { %10519 = vmatpush3.msra.mxu1 %v9067_v49  ;;  %v9112_v49 = vld [vmem:[%s13841_s9 + $0x3c8] sm:$0xff] }
 0x43c   : > { %10520 = vmatprep.subr.mxu1 %v11316_v2 }
 0x43d   : > { %10521 = vmatpush3.msra.mxu1 %v9066_v53  ;;  %v9111_v53 = vld [vmem:[%s13841_s9 + $0x3c0] sm:$0xff] }
 0x43e   : > { %10522 = vmatprep.subr.mxu1 %v11316_v2 }
 0x43f   : > { %10523 = vmatpush3.msra.mxu1 %v9065_v56  ;;  %v9134_v56 = vld [vmem:[%s13842_s10 + $0x278] sm:$0xff] }
 0x440   : > { %10524 = vmatprep.subr.mxu1 %v11316_v2 }
 0x441   : > { %10525 = vmatpush3.msra.mxu1 %v9064_v58  ;;  %v9133_v58 = vld [vmem:[%s13842_s10 + $0x270] sm:$0xff] }
 0x442   : > { %10526 = vmatprep.subr.mxu1 %v11316_v2 }
 0x443   : > { %10527 = vmatpush3.msra.mxu1 %v9063_v60  ;;  %v9132_v60 = vld [vmem:[%s13842_s10 + $0x268] sm:$0xff] }
 0x444   : > { %10550 = vmatprep.subr.mxu1 %v11316_v2 }
 0x4bc   : > { %v4006_v7 = vpop.f32.mrf.mxu0 }
 0x4bd   : > { %v4521_v21 = vsel %vm956_vm0, %v4006_v7, 0.0  ;;  %v9078_v7 = vld [vmem:[%s13841_s9 + $0x2b8] sm:$0xff] }
 0x4be   : > { %v10457_v8 = vpop.f32.mrf.mxu0 }
 0x4bf   : > { %v9086_v8 = vld [vmem:[%s13841_s9 + $0x2f8] sm:$0xff] }
 0x4c0   : > { %v4079_v9 = vpop.f32.mrf.mxu1 }
 0x4c1   : > { %v4522_v20 = vsel %vm956_vm0, %v4079_v9, 0.0  ;;  %v9077_v9 = vld [vmem:[%s13841_s9 + $0x2b0] sm:$0xff] }
 0x4c2   : > { %v10462_v10 = vpop.f32.mrf.mxu1  ;;  %v4523_v23 = vadd.f32 %v4522_v20, %v4521_v21  ;;  %v9072_v20 = vld [vmem:[%s13841_s9 + $0x288] sm:$0xff] }
 0x4c3   : > { %v9085_v10 = vld [vmem:[%s13841_s9 + $0x2f0] sm:$0xff]  ;;  %v9080_v21 = vld [vmem:[%s13841_s9 + $0x2c8] sm:$0xff] }
 0x4ce   : > { %v4152_v11 = vpop.f32.mrf.mxu0 }
 0x4cf   : > { %v4524_v22 = vsel %vm956_vm0, %v4152_v11, 0.0  ;;  %v9076_v11 = vld [vmem:[%s13841_s9 + $0x2a8] sm:$0xff] }
 0x4d0   : > { %v10467_v12 = vpop.f32.mrf.mxu0  ;;  %v4525_v25 = vadd.f32 %v4524_v22, %v4523_v23  ;;  %v9071_v22 = vld [vmem:[%s13841_s9 + $0x280] sm:$0xff] }
 0x4d1   : > { %v9084_v12 = vld [vmem:[%s13841_s9 + $0x2e8] sm:$0xff]  ;;  %v9079_v23 = vld [vmem:[%s13841_s9 + $0x2c0] sm:$0xff] }
 0x4d2   : > { %v4225_v13 = vpop.f32.mrf.mxu1 }
 0x4d3   : > { %v4526_v24 = vsel %vm956_vm0, %v4225_v13, 0.0  ;;  %v9075_v13 = vld [vmem:[%s13841_s9 + $0x2a0] sm:$0xff] }
 0x4d4   : > { %v10472_v14 = vpop.f32.mrf.mxu1  ;;  %v4527_v27 = vadd.f32 %v4526_v24, %v4525_v25  ;;  %v9094_v24 = vld [vmem:[%s13841_s9 + $0x338] sm:$0xff] }
 0x4d5   : > { %v9083_v14 = vld [vmem:[%s13841_s9 + $0x2e0] sm:$0xff]  ;;  %v9102_v25 = vld [vmem:[%s13841_s9 + $0x378] sm:$0xff] }
 0x4e0   : > { %v4371_v15 = vpop.f32.mrf.mxu1 }
 0x4e1   : > { %v4298_v16 = vpop.f32.mrf.mxu0  ;;  %v4530_v29 = vsel %vm956_vm0, %v4371_v15, 0.0  ;;  %v9074_v15 = vld [vmem:[%s13841_s9 + $0x298] sm:$0xff] }
 0x4e2   : > { %v10482_v18 = vpop.f32.mrf.mxu1  ;;  %v4528_v26 = vsel %vm956_vm0, %v4298_v16, 0.0  ;;  %v9082_v16 = vld [vmem:[%s13841_s9 + $0x2d8] sm:$0xff] }
 0x4e3   : > { %v10477_v19 = vpop.f32.mrf.mxu0  ;;  %v4529_v28 = vadd.f32 %v4528_v26, %v4527_v27  ;;  %v9073_v18 = vld [vmem:[%s13841_s9 + $0x290] sm:$0xff] }
 0x4e4   : > { %v9081_v19 = vld [vmem:[%s13841_s9 + $0x2d0] sm:$0xff] }
 0x4e5   : > { %v4531_v43 = vadd.f32 %v4530_v29, %v4529_v28  ;;  %v9093_v26 = vld [vmem:[%s13841_s9 + $0x330] sm:$0xff]  ;;  %v9092_v28 = vld [vmem:[%s13841_s9 + $0x328] sm:$0xff] }
 0x4e6   : > { %v9101_v27 = vld [vmem:[%s13841_s9 + $0x370] sm:$0xff]  ;;  %v9100_v29 = vld [vmem:[%s13841_s9 + $0x368] sm:$0xff] }
 0x4f2   : > { %v4517_v30 = vpop.f32.mrf.mxu1 }
 0x4f3   : > { %v4444_v31 = vpop.f32.mrf.mxu0  ;;  %v4534_v47 = vsel %vm956_vm0, %v4517_v30, 0.0  ;;  %v9091_v30 = vld [vmem:[%s13841_s9 + $0x320] sm:$0xff] }
 0x4f4   : > { %v4532_v32 = vsel %vm956_vm0, %v4444_v31, 0.0  ;;  %v10492_v33 = vpop.f32.mrf.mxu1  ;;  %v9090_v31 = vld [vmem:[%s13841_s9 + $0x318] sm:$0xff] }
 0x4f5   : > { %v4533_v44 = vadd.f32 %v4532_v32, %v4531_v43  ;;  %v10487_v34 = vpop.f32.mrf.mxu0  ;;  %v9099_v43 = vld [vmem:[%s13841_s9 + $0x360] sm:$0xff]  ;;  %v9098_v32 = vld [vmem:[%s13841_s9 + $0x358] sm:$0xff]  ;;  %v9089_v33 = vld [vmem:[%s13841_s9 + $0x310] sm:$0xff] }
 0x4f6   : > { %v9088_v34 = vld [vmem:[%s13841_s9 + $0x308] sm:$0xff] }
 0x4f7   : > { %v4535_v35 = vadd.f32 %v4534_v47, %v4533_v44  ;;  %v9097_v44 = vld [vmem:[%s13841_s9 + $0x350] sm:$0xff]  ;;  %v9096_v47 = vld [vmem:[%s13841_s9 + $0x348] sm:$0xff] }
 0x4f9   : > { %v4540_v36 = vadd.f32 %v12301_v55, %v4535_v35  ;;  %v9061_v55 = vld [vmem:[%s13841_s9 + $0x230] sm:$0xff]  ;;  %v9087_v35 = vld [vmem:[%s13841_s9 + $0x300] sm:$0xff] }
 0x4fa   : > { %10496 = vmatpush3.msra.mxu0 %v9061_v55  ;;  %v9106_v55 = vld [vmem:[%s13841_s9 + $0x398] sm:$0xff] }
 0x4fb   : > { %v4541_v37 = vsel %vm956_vm0, %v4540_v36, 0.0  ;;  %10497 = vmatprep.subr.mxu0 %v11316_v2 }
 0x4fc   : > { %4542 = vadd.xlane.f32.xlu0 %v4541_v37  ;;  %10498 = vmatpush3.msra.mxu0 %v9060_v17  ;;  %v9110_v37 = vld [vmem:[%s13841_s9 + $0x3b8] sm:$0xff]  ;;  %v9105_v17 = vld [vmem:[%s13841_s9 + $0x390] sm:$0xff] }
 0x4fd   : > { %10499 = vmatprep.subr.mxu0 %v11316_v2 }
 0x4fe   : > { %10500 = vmatpush3.msra.mxu0 %v9059_v46  ;;  %v9104_v46 = vld [vmem:[%s13841_s9 + $0x388] sm:$0xff] }
 0x4ff   : > { %10501 = vmatprep.subr.mxu0 %v11316_v2 }
 0x500   : > { %10502 = vmatpush3.msra.mxu0 %v9058_v50  ;;  %v9103_v50 = vld [vmem:[%s13841_s9 + $0x380] sm:$0xff] }
 0x501   : > { %10503 = vmatprep.subr.mxu0 %v11316_v2 }
 0x502   : > { %10504 = vmatpush3.msra.mxu0 %v9057_v54  ;;  %v9126_v54 = vld [vmem:[%s13842_s10 + $0x238] sm:$0xff] }
 0x503   : > { %10505 = vmatprep.subr.mxu0 %v11316_v2 }
 0x504   : > { %10506 = vmatpush3.msra.mxu0 %v9056_v57  ;;  %v9125_v57 = vld [vmem:[%s13842_s10 + $0x230] sm:$0xff] }
 0x505   : > { %10507 = vmatprep.subr.mxu0 %v11316_v2 }
 0x506   : > { %10508 = vmatpush3.msra.mxu0 %v9055_v59  ;;  %v9124_v59 = vld [vmem:[%s13842_s10 + $0x228] sm:$0xff] }
 0x507   : > { %10531 = vmatprep.subr.mxu0 %v11316_v2 }
 0x585   : > { %v4543_v38 = vpop.xlane.xlu0 %4542 }
 0x586   : > { %v4545_v48 = vmul.f32 0.015625, %v4543_v38  ;;  %v9118_v38 = vld [vmem:[%s13841_s9 + $0x3f8] sm:$0xff] }
 0x588   : > { %v4546_v39 = vsub.f32 %v4540_v36, %v4545_v48  ;;  %v9095_v36 = vld [vmem:[%s13841_s9 + $0x340] sm:$0xff]  ;;  %v9109_v48 = vld [vmem:[%s13841_s9 + $0x3b0] sm:$0xff] }
 0x58a   : > { %v4547_v40 = vmul.f32 %v4546_v39, %v4546_v39 }
 0x58c   : > { %v4548_v41 = vsel %vm956_vm0, %v4547_v40, 0.0  ;;  %v9108_v40 = vld [vmem:[%s13841_s9 + $0x3a8] sm:$0xff] }
 0x58d   : > { %4549 = vadd.xlane.f32.xlu1 %v4548_v41  ;;  %v9116_v41 = vld [vmem:[%s13841_s9 + $0x3e8] sm:$0xff] }
 0x616   : > { %v4550_v61 = vpop.xlane.xlu1 %4549 }
 0x617   : > { %v4551_v62 = vmul.f32 0.015625, %v4550_v61  ;;  %v9123_v61 = vld [vmem:[%s13842_s10 + $0x220] sm:$0xff] }
 0x619   : > { %v4552_v63 = vadd.f32 1e-06, %v4551_v62  ;;  %v9131_v62 = vld [vmem:[%s13842_s10 + $0x260] sm:$0xff] }
 0x61b   : > { %11215 = vrsqrt.f32 %v4552_v63  ;;  %v9122_v63 = vld [vmem:[%s13842_s10 + $0x218] sm:$0xff] }
 0x628   : > { %v11216_v0 = vpop.eup %11215 }
 0x629   : > { %v4554_v3 = vmul.f32 %v11216_v0, %v4546_v39  ;;  %v9117_v39 = vld [vmem:[%s13841_s9 + $0x3f0] sm:$0xff]  ;;  %v9130_v0 = vld [vmem:[%s13842_s10 + $0x258] sm:$0xff] }
 0x62b   : > { %v4561_v5 = vmul.f32 %v9053_v1, %v4554_v3  ;;  %v9121_v1 = vld [vmem:[%s13842_s10 + $0x210] sm:$0xff] }
 0x62c   : > { %v9129_v3 = vld [vmem:[%s13842_s10 + $0x250] sm:$0xff] }
 0x62d   : > { %v12640_v6 = vadd.f32 %v9054_v4, %v4561_v5  ;;  %v9120_v4 = vld [vmem:[%s13842_s10 + $0x208] sm:$0xff] }
 0x62e   : > { %v9128_v5 = vld [vmem:[%s13842_s10 + $0x248] sm:$0xff] }
 0x62f   : > { %10510 = vmatmul.mubr.msk.f32.vlgmr.msra.gmra.mxu0 %vm956_vm0, %v12640_v6  ;;  %10529 = vmatmul.mubr.msk.f32.vlgmr.msra.gmra.mxu1 %vm956_vm0, %v12640_v6 }
 0x630   : > { %10532 = vmatpush3.msra.mxu0 %v9078_v7  ;;  %10551 = vmatpush3.msra.mxu1 %v9086_v8  ;;  %v9119_v7 = vld [vmem:[%s13842_s10 + $0x200] sm:$0xff] }
 0x631   : > { %10533 = vmatprep.subr.mxu0 %v11316_v2  ;;  %10552 = vmatprep.subr.mxu1 %v11316_v2  ;;  %v9127_v8 = vld [vmem:[%s13842_s10 + $0x240] sm:$0xff] }
 0x632   : > { %10534 = vmatpush3.msra.mxu0 %v9077_v9  ;;  %10553 = vmatpush3.msra.mxu1 %v9085_v10  ;;  %v12929_v9 = vld [vmem:[%s733_s26] sm:$0xff]  ;;  %v9142_v10 = vld [vmem:[%s13842_s10 + $0x2b8] sm:$0xff]  ;;  %s725_s26 = scalar_lea.vmem [#allocation2], %s8791_s0  ;;  %s11260_s0 = scalar_lea.vmem %s11259_s5, 256 }
 0x633   : > { %10535 = vmatprep.subr.mxu0 %v11316_v2  ;;  %10554 = vmatprep.subr.mxu1 %v11316_v2  ;;  %s8707_s1 = sshll.u32 %s725_s26, 4  ;;  %s8708_s1 = int_to_ptr.vmem [resolvable:$true] %s8707_s1 }
 0x634   : > { %10536 = vmatpush3.msra.mxu0 %v9076_v11  ;;  %10555 = vmatpush3.msra.mxu1 %v9084_v12  ;;  %v9150_v11 = vld [vmem:[%s13842_s10 + $0x2f8] sm:$0xff]  ;;  %v9141_v12 = vld [vmem:[%s13842_s10 + $0x2b0] sm:$0xff]  ;;  %s11254_s4 = scalar_lea.vmem %s8708_s1, 128  ;;  %p11261_p0 = scmp.lt.s32.totalorder %s8708_s1, %s11259_s5 }
 0x635   : > { %10537 = vmatprep.subr.mxu0 %v11316_v2  ;;  %10556 = vmatprep.subr.mxu1 %v11316_v2  ;;  %p11255_p11 = scmp.ne.s32.totalorder %s8708_s1, %s11254_s4  ;;  %p11262_p1 = scmp.lt.s32.totalorder %s11260_s0, %s11254_s4 }
 0x636   : > { %10538 = vmatpush3.msra.mxu0 %v9075_v13  ;;  %10557 = vmatpush3.msra.mxu1 %v9083_v14  ;;  %v9149_v13 = vld [vmem:[%s13842_s10 + $0x2f0] sm:$0xff]  ;;  %v9140_v14 = vld [vmem:[%s13842_s10 + $0x2a8] sm:$0xff] }
 0x637   : > { %10539 = vmatprep.subr.mxu0 %v11316_v2  ;;  %10558 = vmatprep.subr.mxu1 %v11316_v2  ;;  %p11256_p12 = pnand %p11255_p11, %p11477_p5  ;;  %p11263_p2 = por %p11262_p1, %p11261_p0 }
 0x638   : > { %10540 = vmatpush3.msra.mxu0 %v9074_v15  ;;  %10559 = vmatpush3.msra.mxu1 %v9082_v16  ;;  %v9148_v15 = vld [vmem:[%s13842_s10 + $0x2e8] sm:$0xff]  ;;  %v9139_v16 = vld [vmem:[%s13842_s10 + $0x2a0] sm:$0xff] }
 0x639   : > { %10541 = vmatprep.subr.mxu0 %v11316_v2  ;;  %10560 = vmatprep.subr.mxu1 %v11316_v2  ;;  %p11257_p13 = pneg %p11256_p12 }
 0x63a   : > { %10542 = vmatpush3.msra.mxu0 %v9073_v18  ;;  %10561 = vmatpush3.msra.mxu1 %v9081_v19  ;;  %v9147_v18 = vld [vmem:[%s13842_s10 + $0x2e0] sm:$0xff]  ;;  %v9138_v19 = vld [vmem:[%s13842_s10 + $0x298] sm:$0xff] }
 0x63b   : > { %10543 = vmatprep.subr.mxu0 %v11316_v2  ;;  %10562 = vmatprep.subr.mxu1 %v11316_v2  ;;  %p11264_p3 = pnand %p11263_p2, %p11257_p13 }
 0x63c   : > { %10544 = vmatpush3.msra.mxu0 %v9072_v20  ;;  %10563 = vmatpush3.msra.mxu1 %v9080_v21  ;;  %v9146_v20 = vld [vmem:[%s13842_s10 + $0x2d8] sm:$0xff]  ;;  %v9137_v21 = vld [vmem:[%s13842_s10 + $0x290] sm:$0xff] }
 0x63d   : > { %10545 = vmatprep.subr.mxu0 %v11316_v2  ;;  %10564 = vmatprep.subr.mxu1 %v11316_v2 }
 0x63e   : > { %10546 = vmatpush3.msra.mxu0 %v9071_v22  ;;  %10547 = vmatprep.mubr.msk.f32.mxu0 %vm11317_vm1, %v11316_v2  ;;  %v9145_v22 = vld [vmem:[%s13842_s10 + $0x2d0] sm:$0xff] }
 0x63f   : > { %10565 = vmatpush3.msra.mxu1 %v9079_v23  ;;  %10566 = vmatprep.mubr.msk.f32.mxu1 %vm11317_vm1, %v11316_v2  ;;  %v9136_v23 = vld [vmem:[%s13842_s10 + $0x288] sm:$0xff] }
 0x640   : > { %10548 = vmatmul.mubr.msk.f32.vlgmr.msra.gmra.mxu0 %vm956_vm0, %v12640_v6  ;;  %10567 = vmatmul.mubr.msk.f32.vlgmr.msra.gmra.mxu1 %vm956_vm0, %v12640_v6 }
 0x641   : > { %10569 = vmatprep.subr.mxu0 %v11316_v2  ;;  %10588 = vmatprep.subr.mxu1 %v11316_v2 }
 0x642   : > { %10570 = vmatpush3.msra.mxu0 %v9094_v24  ;;  %10589 = vmatpush3.msra.mxu1 %v9102_v25  ;;  %v9144_v24 = vld [vmem:[%s13842_s10 + $0x2c8] sm:$0xff]  ;;  %v9135_v25 = vld [vmem:[%s13842_s10 + $0x280] sm:$0xff] }
 0x643   : > { %10571 = vmatprep.subr.mxu0 %v11316_v2  ;;  %10590 = vmatprep.subr.mxu1 %v11316_v2 }
 0x644   : > { %10572 = vmatpush3.msra.mxu0 %v9093_v26  ;;  %10591 = vmatpush3.msra.mxu1 %v9101_v27  ;;  %v9143_v26 = vld [vmem:[%s13842_s10 + $0x2c0] sm:$0xff]  ;;  %v9158_v27 = vld [vmem:[%s13842_s10 + $0x338] sm:$0xff] }
 0x645   : > { %10573 = vmatprep.subr.mxu0 %v11316_v2  ;;  %10592 = vmatprep.subr.mxu1 %v11316_v2 }
 0x646   : > { %10574 = vmatpush3.msra.mxu0 %v9092_v28  ;;  %10593 = vmatpush3.msra.mxu1 %v9100_v29  ;;  %v9166_v28 = vld [vmem:[%s13842_s10 + $0x378] sm:$0xff]  ;;  %v9157_v29 = vld [vmem:[%s13842_s10 + $0x330] sm:$0xff] }
 0x647   : > { %10575 = vmatprep.subr.mxu0 %v11316_v2  ;;  %10594 = vmatprep.subr.mxu1 %v11316_v2 }
 0x648   : > { %10576 = vmatpush3.msra.mxu0 %v9091_v30  ;;  %10595 = vmatpush3.msra.mxu1 %v9099_v43  ;;  %v9165_v30 = vld [vmem:[%s13842_s10 + $0x370] sm:$0xff]  ;;  %v9156_v43 = vld [vmem:[%s13842_s10 + $0x328] sm:$0xff] }
 0x649   : > { %10577 = vmatprep.subr.mxu0 %v11316_v2  ;;  %10596 = vmatprep.subr.mxu1 %v11316_v2 }
 0x64a   : > { %10578 = vmatpush3.msra.mxu0 %v9090_v31  ;;  %10597 = vmatpush3.msra.mxu1 %v9098_v32  ;;  %v9164_v31 = vld [vmem:[%s13842_s10 + $0x368] sm:$0xff]  ;;  %v9155_v32 = vld [vmem:[%s13842_s10 + $0x320] sm:$0xff] }
 0x64b   : > { %10579 = vmatprep.subr.mxu0 %v11316_v2  ;;  %10598 = vmatprep.subr.mxu1 %v11316_v2 }
 0x64c   : > { %10580 = vmatpush3.msra.mxu0 %v9089_v33  ;;  %10599 = vmatpush3.msra.mxu1 %v9097_v44  ;;  %v9163_v33 = vld [vmem:[%s13842_s10 + $0x360] sm:$0xff]  ;;  %v9154_v44 = vld [vmem:[%s13842_s10 + $0x318] sm:$0xff] }
 0x64d   : > { %10581 = vmatprep.subr.mxu0 %v11316_v2  ;;  %10600 = vmatprep.subr.mxu1 %v11316_v2 }
 0x64e   : > { %10582 = vmatpush3.msra.mxu0 %v9088_v34  ;;  %10601 = vmatpush3.msra.mxu1 %v9096_v47  ;;  %v9162_v34 = vld [vmem:[%s13842_s10 + $0x358] sm:$0xff]  ;;  %v9153_v47 = vld [vmem:[%s13842_s10 + $0x310] sm:$0xff] }
 0x64f   : > { %10583 = vmatprep.subr.mxu0 %v11316_v2  ;;  %10602 = vmatprep.subr.mxu1 %v11316_v2 }
 0x650   : > { %10584 = vmatpush3.msra.mxu0 %v9087_v35  ;;  %10585 = vmatprep.mubr.msk.f32.mxu0 %vm11317_vm1, %v11316_v2  ;;  %v9161_v35 = vld [vmem:[%s13842_s10 + $0x350] sm:$0xff] }
 0x651   : > { %10603 = vmatpush3.msra.mxu1 %v9095_v36  ;;  %10604 = vmatprep.mubr.msk.f32.mxu1 %vm11317_vm1, %v11316_v2  ;;  %v9152_v36 = vld [vmem:[%s13842_s10 + $0x308] sm:$0xff] }
 0x652   : > { %10586 = vmatmul.mubr.msk.f32.vlgmr.msra.gmra.mxu0 %vm956_vm0, %v12640_v6  ;;  %10605 = vmatmul.mubr.msk.f32.vlgmr.msra.gmra.mxu1 %vm956_vm0, %v12640_v6 }
 0x653   : > { %10607 = vmatprep.subr.mxu0 %v11316_v2  ;;  %10626 = vmatprep.subr.mxu1 %v11316_v2 }
 0x654   : > { %10608 = vmatpush3.msra.mxu0 %v9110_v37  ;;  %10627 = vmatpush3.msra.mxu1 %v9118_v38  ;;  %v9160_v37 = vld [vmem:[%s13842_s10 + $0x348] sm:$0xff]  ;;  %v9151_v38 = vld [vmem:[%s13842_s10 + $0x300] sm:$0xff] }
 0x655   : > { %10609 = vmatprep.subr.mxu0 %v11316_v2  ;;  %10628 = vmatprep.subr.mxu1 %v11316_v2 }
 0x656   : > { %10610 = vmatpush3.msra.mxu0 %v9109_v48  ;;  %10629 = vmatpush3.msra.mxu1 %v9117_v39  ;;  %v9159_v48 = vld [vmem:[%s13842_s10 + $0x340] sm:$0xff]  ;;  %v9174_v39 = vld [vmem:[%s13842_s10 + $0x3b8] sm:$0xff] }
 0x657   : > { %10611 = vmatprep.subr.mxu0 %v11316_v2  ;;  %10630 = vmatprep.subr.mxu1 %v11316_v2 }
 0x658   : > { %10612 = vmatpush3.msra.mxu0 %v9108_v40  ;;  %10631 = vmatpush3.msra.mxu1 %v9116_v41  ;;  %v9182_v40 = vld [vmem:[%s13842_s10 + $0x3f8] sm:$0xff]  ;;  %v9173_v41 = vld [vmem:[%s13842_s10 + $0x3b0] sm:$0xff] }
 0x659   : > { %10613 = vmatprep.subr.mxu0 %v11316_v2  ;;  %10632 = vmatprep.subr.mxu1 %v11316_v2 }
 0x65a   : > { %10614 = vmatpush3.msra.mxu0 %v9107_v51  ;;  %10633 = vmatpush3.msra.mxu1 %v9115_v52  ;;  %v9181_v51 = vld [vmem:[%s13842_s10 + $0x3f0] sm:$0xff]  ;;  %v9172_v52 = vld [vmem:[%s13842_s10 + $0x3a8] sm:$0xff] }
 0x65b   : > { %10615 = vmatprep.subr.mxu0 %v11316_v2  ;;  %10634 = vmatprep.subr.mxu1 %v11316_v2 }
 0x65c   : > { %10616 = vmatpush3.msra.mxu0 %v9106_v55  ;;  %10635 = vmatpush3.msra.mxu1 %v9114_v42  ;;  %v9180_v55 = vld [vmem:[%s13842_s10 + $0x3e8] sm:$0xff]  ;;  %v9171_v42 = vld [vmem:[%s13842_s10 + $0x3a0] sm:$0xff] }
 0x65d   : > { %10617 = vmatprep.subr.mxu0 %v11316_v2  ;;  %10636 = vmatprep.subr.mxu1 %v11316_v2 }
 0x65e   : > { %10618 = vmatpush3.msra.mxu0 %v9105_v17  ;;  %10637 = vmatpush3.msra.mxu1 %v9113_v45  ;;  %v9179_v17 = vld [vmem:[%s13842_s10 + $0x3e0] sm:$0xff]  ;;  %v9170_v45 = vld [vmem:[%s13842_s10 + $0x398] sm:$0xff] }
 0x65f   : > { %10619 = vmatprep.subr.mxu0 %v11316_v2  ;;  %10638 = vmatprep.subr.mxu1 %v11316_v2 }
 0x660   : > { %10620 = vmatpush3.msra.mxu0 %v9104_v46  ;;  %10639 = vmatpush3.msra.mxu1 %v9112_v49  ;;  %v9178_v46 = vld [vmem:[%s13842_s10 + $0x3d8] sm:$0xff]  ;;  %v9169_v49 = vld [vmem:[%s13842_s10 + $0x390] sm:$0xff] }
 0x661   : > { %10621 = vmatprep.subr.mxu0 %v11316_v2  ;;  %10640 = vmatprep.subr.mxu1 %v11316_v2 }
 0x662   : > { %10622 = vmatpush3.msra.mxu0 %v9103_v50  ;;  %10623 = vmatprep.mubr.msk.f32.mxu0 %vm11317_vm1, %v11316_v2  ;;  %v9177_v50 = vld [vmem:[%s13842_s10 + $0x3d0] sm:$0xff] }
 0x663   : > { %10641 = vmatpush3.msra.mxu1 %v9111_v53  ;;  %10642 = vmatprep.mubr.msk.f32.mxu1 %vm11317_vm1, %v11316_v2  ;;  %v9168_v53 = vld [vmem:[%s13842_s10 + $0x388] sm:$0xff] }
 0x664   : > { %10624 = vmatmul.mubr.msk.f32.vlgmr.msra.gmra.mxu0 %vm956_vm0, %v12640_v6  ;;  %10643 = vmatmul.mubr.msk.f32.vlgmr.msra.gmra.mxu1 %vm956_vm0, %v12640_v6 }
 0x665   : > { %10645 = vmatprep.subr.mxu0 %v11316_v2  ;;  %10664 = vmatprep.subr.mxu1 %v11316_v2 }
 0x666   : > { %10646 = vmatpush3.msra.mxu0 %v9126_v54  ;;  %10665 = vmatpush3.msra.mxu1 %v9134_v56  ;;  %v9176_v54 = vld [vmem:[%s13842_s10 + $0x3c8] sm:$0xff]  ;;  %v9167_v56 = vld [vmem:[%s13842_s10 + $0x380] sm:$0xff] }
 0x667   : > { %10647 = vmatprep.subr.mxu0 %v11316_v2  ;;  %10666 = vmatprep.subr.mxu1 %v11316_v2 }
 0x668   : > { %10648 = vmatpush3.msra.mxu0 %v9125_v57  ;;  %10667 = vmatpush3.msra.mxu1 %v9133_v58  ;;  %v9175_v57 = vld [vmem:[%s13842_s10 + $0x3c0] sm:$0xff]  ;;  %v9190_v58 = vld [vmem:[%s13843_s11 + $0x238] sm:$0xff] }
 0x669   : > { %10649 = vmatprep.subr.mxu0 %v11316_v2  ;;  %10668 = vmatprep.subr.mxu1 %v11316_v2 }
 0x66a   : > { %10650 = vmatpush3.msra.mxu0 %v9124_v59  ;;  %10669 = vmatpush3.msra.mxu1 %v9132_v60  ;;  %v9198_v59 = vld [vmem:[%s13843_s11 + $0x278] sm:$0xff]  ;;  %v9189_v60 = vld [vmem:[%s13843_s11 + $0x230] sm:$0xff] }
 0x66b   : > { %10651 = vmatprep.subr.mxu0 %v11316_v2  ;;  %10670 = vmatprep.subr.mxu1 %v11316_v2 }
 0x66c   : > { %10652 = vmatpush3.msra.mxu0 %v9123_v61  ;;  %10671 = vmatpush3.msra.mxu1 %v9131_v62  ;;  %v9197_v61 = vld [vmem:[%s13843_s11 + $0x270] sm:$0xff]  ;;  %v9188_v62 = vld [vmem:[%s13843_s11 + $0x228] sm:$0xff] }
 0x66d   : > { %10653 = vmatprep.subr.mxu0 %v11316_v2  ;;  %10672 = vmatprep.subr.mxu1 %v11316_v2 }
 0x66e   : > { %10654 = vmatpush3.msra.mxu0 %v9122_v63  ;;  %10673 = vmatpush3.msra.mxu1 %v9130_v0  ;;  %v9196_v63 = vld [vmem:[%s13843_s11 + $0x268] sm:$0xff]  ;;  %v9187_v0 = vld [vmem:[%s13843_s11 + $0x220] sm:$0xff] }
 0x66f   : > { %10655 = vmatprep.subr.mxu0 %v11316_v2  ;;  %10674 = vmatprep.subr.mxu1 %v11316_v2 }
 0x670   : > { %10656 = vmatpush3.msra.mxu0 %v9121_v1  ;;  %10675 = vmatpush3.msra.mxu1 %v9129_v3  ;;  %v9195_v1 = vld [vmem:[%s13843_s11 + $0x260] sm:$0xff]  ;;  %v9186_v3 = vld [vmem:[%s13843_s11 + $0x218] sm:$0xff] }
 0x671   : > { %10657 = vmatprep.subr.mxu0 %v11316_v2  ;;  %10676 = vmatprep.subr.mxu1 %v11316_v2 }
 0x672   : > { %10658 = vmatpush3.msra.mxu0 %v9120_v4  ;;  %10677 = vmatpush3.msra.mxu1 %v9128_v5  ;;  %v9194_v4 = vld [vmem:[%s13843_s11 + $0x258] sm:$0xff]  ;;  %v9185_v5 = vld [vmem:[%s13843_s11 + $0x210] sm:$0xff] }
 0x673   : > { %10659 = vmatprep.subr.mxu0 %v11316_v2  ;;  %10678 = vmatprep.subr.mxu1 %v11316_v2 }
 0x674   : > { %10660 = vmatpush3.msra.mxu0 %v9119_v7  ;;  %10661 = vmatprep.mubr.msk.f32.mxu0 %vm11317_vm1, %v11316_v2  ;;  %v9193_v7 = vld [vmem:[%s13843_s11 + $0x250] sm:$0xff] }
 0x675   : > { %10679 = vmatpush3.msra.mxu1 %v9127_v8  ;;  %10680 = vmatprep.mubr.msk.f32.mxu1 %vm11317_vm1, %v11316_v2  ;;  %v9184_v8 = vld [vmem:[%s13843_s11 + $0x208] sm:$0xff] }
 0x676   : > { %10662 = vmatmul.mubr.msk.f32.vlgmr.msra.gmra.mxu0 %vm956_vm0, %v12929_v9  ;;  %10681 = vmatmul.mubr.msk.f32.vlgmr.msra.gmra.mxu1 %vm956_vm0, %v12929_v9 }
 0x677   : > { %10683 = vmatprep.subr.mxu0 %v11316_v2  ;;  %10702 = vmatprep.subr.mxu1 %v11316_v2 }
 0x678   : > { %10684 = vmatpush3.msra.mxu0 %v9142_v10  ;;  %10703 = vmatpush3.msra.mxu1 %v9150_v11  ;;  %v9192_v10 = vld [vmem:[%s13843_s11 + $0x248] sm:$0xff]  ;;  %v9183_v11 = vld [vmem:[%s13843_s11 + $0x200] sm:$0xff] }
 0x679   : > { %10685 = vmatprep.subr.mxu0 %v11316_v2  ;;  %10704 = vmatprep.subr.mxu1 %v11316_v2 }
 0x67a   : > { %10686 = vmatpush3.msra.mxu0 %v9141_v12  ;;  %10705 = vmatpush3.msra.mxu1 %v9149_v13  ;;  %v9191_v12 = vld [vmem:[%s13843_s11 + $0x240] sm:$0xff]  ;;  %v9206_v13 = vld [vmem:[%s13843_s11 + $0x2b8] sm:$0xff] }
 0x67b   : > { %10687 = vmatprep.subr.mxu0 %v11316_v2  ;;  %10706 = vmatprep.subr.mxu1 %v11316_v2 }
 0x67c   : > { %10688 = vmatpush3.msra.mxu0 %v9140_v14  ;;  %10707 = vmatpush3.msra.mxu1 %v9148_v15  ;;  %v9214_v14 = vld [vmem:[%s13843_s11 + $0x2f8] sm:$0xff]  ;;  %v9205_v15 = vld [vmem:[%s13843_s11 + $0x2b0] sm:$0xff] }
 0x67d   : > { %10689 = vmatprep.subr.mxu0 %v11316_v2  ;;  %10708 = vmatprep.subr.mxu1 %v11316_v2 }
 0x67e   : > { %10690 = vmatpush3.msra.mxu0 %v9139_v16  ;;  %10709 = vmatpush3.msra.mxu1 %v9147_v18  ;;  %v9213_v16 = vld [vmem:[%s13843_s11 + $0x2f0] sm:$0xff]  ;;  %v9204_v18 = vld [vmem:[%s13843_s11 + $0x2a8] sm:$0xff] }
 0x67f   : > { %10691 = vmatprep.subr.mxu0 %v11316_v2  ;;  %10710 = vmatprep.subr.mxu1 %v11316_v2 }
 0x680   : > { %10692 = vmatpush3.msra.mxu0 %v9138_v19  ;;  %10711 = vmatpush3.msra.mxu1 %v9146_v20  ;;  %v9212_v19 = vld [vmem:[%s13843_s11 + $0x2e8] sm:$0xff]  ;;  %v9203_v20 = vld [vmem:[%s13843_s11 + $0x2a0] sm:$0xff] }
 0x681   : > { %10693 = vmatprep.subr.mxu0 %v11316_v2  ;;  %10712 = vmatprep.subr.mxu1 %v11316_v2 }
 0x682   : > { %10694 = vmatpush3.msra.mxu0 %v9137_v21  ;;  %10713 = vmatpush3.msra.mxu1 %v9145_v22  ;;  %v9211_v21 = vld [vmem:[%s13843_s11 + $0x2e0] sm:$0xff]  ;;  %v9202_v22 = vld [vmem:[%s13843_s11 + $0x298] sm:$0xff] }
 0x683   : > { %10695 = vmatprep.subr.mxu0 %v11316_v2  ;;  %10714 = vmatprep.subr.mxu1 %v11316_v2 }
 0x684   : > { %10696 = vmatpush3.msra.mxu0 %v9136_v23  ;;  %10715 = vmatpush3.msra.mxu1 %v9144_v24  ;;  %v9210_v23 = vld [vmem:[%s13843_s11 + $0x2d8] sm:$0xff]  ;;  %v9201_v24 = vld [vmem:[%s13843_s11 + $0x290] sm:$0xff] }
 0x685   : > { %10697 = vmatprep.subr.mxu0 %v11316_v2  ;;  %10716 = vmatprep.subr.mxu1 %v11316_v2 }
 0x686   : > { %10698 = vmatpush3.msra.mxu0 %v9135_v25  ;;  %10699 = vmatprep.mubr.msk.f32.mxu0 %vm11317_vm1, %v11316_v2  ;;  %v9209_v25 = vld [vmem:[%s13843_s11 + $0x2d0] sm:$0xff] }
 0x687   : > { %10717 = vmatpush3.msra.mxu1 %v9143_v26  ;;  %10718 = vmatprep.mubr.msk.f32.mxu1 %vm11317_vm1, %v11316_v2  ;;  %v9200_v26 = vld [vmem:[%s13843_s11 + $0x288] sm:$0xff] }
 0x688   : > { %10700 = vmatmul.mubr.msk.f32.vlgmr.msra.gmra.mxu0 %vm956_vm0, %v12929_v9  ;;  %10719 = vmatmul.mubr.msk.f32.vlgmr.msra.gmra.mxu1 %vm956_vm0, %v12929_v9 }
 0x689   : > { %10721 = vmatprep.subr.mxu0 %v11316_v2  ;;  %10740 = vmatprep.subr.mxu1 %v11316_v2 }
 0x68a   : > { %10722 = vmatpush3.msra.mxu0 %v9158_v27  ;;  %10741 = vmatpush3.msra.mxu1 %v9166_v28  ;;  %v9208_v27 = vld [vmem:[%s13843_s11 + $0x2c8] sm:$0xff]  ;;  %v9199_v28 = vld [vmem:[%s13843_s11 + $0x280] sm:$0xff] }
 0x68b   : > { %10723 = vmatprep.subr.mxu0 %v11316_v2  ;;  %10742 = vmatprep.subr.mxu1 %v11316_v2 }
 0x68c   : > { %10724 = vmatpush3.msra.mxu0 %v9157_v29  ;;  %10743 = vmatpush3.msra.mxu1 %v9165_v30  ;;  %v9207_v29 = vld [vmem:[%s13843_s11 + $0x2c0] sm:$0xff]  ;;  %v9222_v30 = vld [vmem:[%s13843_s11 + $0x338] sm:$0xff] }
 0x68d   : > { %10725 = vmatprep.subr.mxu0 %v11316_v2  ;;  %10744 = vmatprep.subr.mxu1 %v11316_v2 }
 0x68e   : > { %10726 = vmatpush3.msra.mxu0 %v9156_v43  ;;  %10745 = vmatpush3.msra.mxu1 %v9164_v31  ;;  %v9230_v43 = vld [vmem:[%s13843_s11 + $0x378] sm:$0xff]  ;;  %v9221_v31 = vld [vmem:[%s13843_s11 + $0x330] sm:$0xff] }
 0x68f   : > { %10727 = vmatprep.subr.mxu0 %v11316_v2  ;;  %10746 = vmatprep.subr.mxu1 %v11316_v2 }
 0x690   : > { %10728 = vmatpush3.msra.mxu0 %v9155_v32  ;;  %10747 = vmatpush3.msra.mxu1 %v9163_v33  ;;  %v9229_v32 = vld [vmem:[%s13843_s11 + $0x370] sm:$0xff]  ;;  %v9220_v33 = vld [vmem:[%s13843_s11 + $0x328] sm:$0xff] }
 0x691   : > { %10729 = vmatprep.subr.mxu0 %v11316_v2  ;;  %10748 = vmatprep.subr.mxu1 %v11316_v2 }
 0x692   : > { %10730 = vmatpush3.msra.mxu0 %v9154_v44  ;;  %10749 = vmatpush3.msra.mxu1 %v9162_v34  ;;  %v9228_v44 = vld [vmem:[%s13843_s11 + $0x368] sm:$0xff]  ;;  %v9219_v34 = vld [vmem:[%s13843_s11 + $0x320] sm:$0xff] }
 0x693   : > { %10731 = vmatprep.subr.mxu0 %v11316_v2  ;;  %10750 = vmatprep.subr.mxu1 %v11316_v2 }
 0x694   : > { %10732 = vmatpush3.msra.mxu0 %v9153_v47  ;;  %10751 = vmatpush3.msra.mxu1 %v9161_v35  ;;  %v9227_v47 = vld [vmem:[%s13843_s11 + $0x360] sm:$0xff]  ;;  %v9218_v35 = vld [vmem:[%s13843_s11 + $0x318] sm:$0xff] }
 0x695   : > { %10733 = vmatprep.subr.mxu0 %v11316_v2  ;;  %10752 = vmatprep.subr.mxu1 %v11316_v2 }
 0x696   : > { %10734 = vmatpush3.msra.mxu0 %v9152_v36  ;;  %10753 = vmatpush3.msra.mxu1 %v9160_v37  ;;  %v9226_v36 = vld [vmem:[%s13843_s11 + $0x358] sm:$0xff]  ;;  %v9217_v37 = vld [vmem:[%s13843_s11 + $0x310] sm:$0xff] }
 0x697   : > { %10735 = vmatprep.subr.mxu0 %v11316_v2  ;;  %10754 = vmatprep.subr.mxu1 %v11316_v2 }
 0x698   : > { %10736 = vmatpush3.msra.mxu0 %v9151_v38  ;;  %10737 = vmatprep.mubr.msk.f32.mxu0 %vm11317_vm1, %v11316_v2  ;;  %v9225_v38 = vld [vmem:[%s13843_s11 + $0x350] sm:$0xff] }
 0x699   : > { %10755 = vmatpush3.msra.mxu1 %v9159_v48  ;;  %10756 = vmatprep.mubr.msk.f32.mxu1 %vm11317_vm1, %v11316_v2  ;;  %v9216_v48 = vld [vmem:[%s13843_s11 + $0x308] sm:$0xff] }
 0x69a   : > { %10738 = vmatmul.mubr.msk.f32.vlgmr.msra.gmra.mxu0 %vm956_vm0, %v12929_v9  ;;  %10757 = vmatmul.mubr.msk.f32.vlgmr.msra.gmra.mxu1 %vm956_vm0, %v12929_v9 }
 0x69b   : > { %10759 = vmatprep.subr.mxu0 %v11316_v2  ;;  %10778 = vmatprep.subr.mxu1 %v11316_v2 }
 0x69c   : > { %10760 = vmatpush3.msra.mxu0 %v9174_v39  ;;  %10779 = vmatpush3.msra.mxu1 %v9182_v40  ;;  %v9224_v39 = vld [vmem:[%s13843_s11 + $0x348] sm:$0xff]  ;;  %v9215_v40 = vld [vmem:[%s13843_s11 + $0x300] sm:$0xff] }
 0x69d   : > { %10761 = vmatprep.subr.mxu0 %v11316_v2  ;;  %10780 = vmatprep.subr.mxu1 %v11316_v2 }
 0x69e   : > { %10762 = vmatpush3.msra.mxu0 %v9173_v41  ;;  %10781 = vmatpush3.msra.mxu1 %v9181_v51  ;;  %v9223_v41 = vld [vmem:[%s13843_s11 + $0x340] sm:$0xff]  ;;  %v9238_v51 = vld [vmem:[%s13843_s11 + $0x3b8] sm:$0xff] }
 0x69f   : > { %10763 = vmatprep.subr.mxu0 %v11316_v2  ;;  %10782 = vmatprep.subr.mxu1 %v11316_v2 }
 0x6a0   : > { %10764 = vmatpush3.msra.mxu0 %v9172_v52  ;;  %10783 = vmatpush3.msra.mxu1 %v9180_v55  ;;  %v9246_v52 = vld [vmem:[%s13843_s11 + $0x3f8] sm:$0xff]  ;;  %v9237_v55 = vld [vmem:[%s13843_s11 + $0x3b0] sm:$0xff] }
 0x6a1   : > { %10765 = vmatprep.subr.mxu0 %v11316_v2  ;;  %10784 = vmatprep.subr.mxu1 %v11316_v2 }
 0x6a2   : > { %10766 = vmatpush3.msra.mxu0 %v9171_v42  ;;  %10785 = vmatpush3.msra.mxu1 %v9179_v17  ;;  %v9245_v42 = vld [vmem:[%s13843_s11 + $0x3f0] sm:$0xff]  ;;  %v9236_v17 = vld [vmem:[%s13843_s11 + $0x3a8] sm:$0xff] }
 0x6a3   : > { %10767 = vmatprep.subr.mxu0 %v11316_v2  ;;  %10786 = vmatprep.subr.mxu1 %v11316_v2 }
 0x6a4   : > { %10768 = vmatpush3.msra.mxu0 %v9170_v45  ;;  %10787 = vmatpush3.msra.mxu1 %v9178_v46  ;;  %v9244_v45 = vld [vmem:[%s13843_s11 + $0x3e8] sm:$0xff]  ;;  %v9235_v46 = vld [vmem:[%s13843_s11 + $0x3a0] sm:$0xff] }
 0x6a5   : > { %10769 = vmatprep.subr.mxu0 %v11316_v2  ;;  %10788 = vmatprep.subr.mxu1 %v11316_v2 }
 0x6a6   : > { %10770 = vmatpush3.msra.mxu0 %v9169_v49  ;;  %10789 = vmatpush3.msra.mxu1 %v9177_v50  ;;  %v9243_v49 = vld [vmem:[%s13843_s11 + $0x3e0] sm:$0xff]  ;;  %v9234_v50 = vld [vmem:[%s13843_s11 + $0x398] sm:$0xff] }
 0x6a7   : > { %10771 = vmatprep.subr.mxu0 %v11316_v2  ;;  %10790 = vmatprep.subr.mxu1 %v11316_v2 }
 0x6a8   : > { %10772 = vmatpush3.msra.mxu0 %v9168_v53  ;;  %10791 = vmatpush3.msra.mxu1 %v9176_v54  ;;  %v9242_v53 = vld [vmem:[%s13843_s11 + $0x3d8] sm:$0xff]  ;;  %v9233_v54 = vld [vmem:[%s13843_s11 + $0x390] sm:$0xff] }
 0x6a9   : > { %10773 = vmatprep.subr.mxu0 %v11316_v2  ;;  %10792 = vmatprep.subr.mxu1 %v11316_v2 }
 0x6aa   : > { %10774 = vmatpush3.msra.mxu0 %v9167_v56  ;;  %10775 = vmatprep.mubr.msk.f32.mxu0 %vm11317_vm1, %v11316_v2  ;;  %v9241_v56 = vld [vmem:[%s13843_s11 + $0x3d0] sm:$0xff] }
 0x6ab   : > { %10793 = vmatpush3.msra.mxu1 %v9175_v57  ;;  %10794 = vmatprep.mubr.msk.f32.mxu1 %vm11317_vm1, %v11316_v2  ;;  %v9232_v57 = vld [vmem:[%s13843_s11 + $0x388] sm:$0xff] }
 0x6ac   : > { %10776 = vmatmul.mubr.msk.f32.vlgmr.msra.gmra.mxu0 %vm956_vm0, %v12929_v9  ;;  %10795 = vmatmul.mubr.msk.f32.vlgmr.msra.gmra.mxu1 %vm956_vm0, %v12929_v9 }
 0x6ad   : > { %10797 = vmatprep.subr.mxu0 %v11316_v2  ;;  %10816 = vmatprep.subr.mxu1 %v11316_v2 }
 0x6ae   : > { %10798 = vmatpush3.msra.mxu0 %v9190_v58  ;;  %10817 = vmatpush3.msra.mxu1 %v9198_v59  ;;  %v9240_v58 = vld [vmem:[%s13843_s11 + $0x3c8] sm:$0xff] }
 0x6af   : > { %10799 = vmatprep.subr.mxu0 %v11316_v2  ;;  %10818 = vmatprep.subr.mxu1 %v11316_v2 }
 0x6b0   : > { %10800 = vmatpush3.msra.mxu0 %v9189_v60  ;;  %10819 = vmatpush3.msra.mxu1 %v9197_v61  ;;  %v9231_v61 = vld [vmem:[%s13843_s11 + $0x380] sm:$0xff] }
 0x6b1   : > { %10801 = vmatprep.subr.mxu0 %v11316_v2  ;;  %10820 = vmatprep.subr.mxu1 %v11316_v2 }
 0x6b2   : > { %10802 = vmatpush3.msra.mxu0 %v9188_v62  ;;  %10821 = vmatpush3.msra.mxu1 %v9196_v63  ;;  %v9239_v62 = vld [vmem:[%s13843_s11 + $0x3c0] sm:$0xff] }
 0x6b3   : > { %10803 = vmatprep.subr.mxu0 %v11316_v2  ;;  %10822 = vmatprep.subr.mxu1 %v11316_v2 }
 0x6b4   : > { %10804 = vmatpush3.msra.mxu0 %v9187_v0  ;;  %10823 = vmatpush3.msra.mxu1 %v9195_v1 }
 0x6b5   : > { %10805 = vmatprep.subr.mxu0 %v11316_v2  ;;  %10824 = vmatprep.subr.mxu1 %v11316_v2 }
 0x6b6   : > { %10806 = vmatpush3.msra.mxu0 %v9186_v3  ;;  %10825 = vmatpush3.msra.mxu1 %v9194_v4 }
 0x6b7   : > { %10807 = vmatprep.subr.mxu0 %v11316_v2  ;;  %10826 = vmatprep.subr.mxu1 %v11316_v2 }
 0x6b8   : > { %10808 = vmatpush3.msra.mxu0 %v9185_v5  ;;  %10827 = vmatpush3.msra.mxu1 %v9193_v7 }
 0x6b9   : > { %10809 = vmatprep.subr.mxu0 %v11316_v2  ;;  %10828 = vmatprep.subr.mxu1 %v11316_v2 }
 0x6ba   : > { %10810 = vmatpush3.msra.mxu0 %v9184_v8  ;;  %10829 = vmatpush3.msra.mxu1 %v9192_v10 }
 0x6bb   : > { %10811 = vmatprep.subr.mxu0 %v11316_v2  ;;  %10830 = vmatprep.subr.mxu1 %v11316_v2 }
 0x6bc   : > { %10812 = vmatpush3.msra.mxu0 %v9183_v11  ;;  %10831 = vmatpush3.msra.mxu1 %v9191_v12 }
 0x6bd   : > { %10813 = vmatprep.mubr.msk.f32.mxu0 %vm11317_vm1, %v11316_v2  ;;  %10832 = vmatprep.mubr.msk.f32.mxu1 %vm11317_vm1, %v11316_v2 }
 0x6be   : > { %10835 = vmatprep.subr.mxu0 %v11316_v2  ;;  %10854 = vmatprep.subr.mxu1 %v11316_v2 }
 0x6bf   : > { %10814 = vmatmul.mubr.msk.f32.vlgmr.msra.gmra.mxu0 %vm956_vm0, %v12929_v9  ;;  %10833 = vmatmul.mubr.msk.f32.vlgmr.msra.gmra.mxu1 %vm956_vm0, %v12929_v9 }
 0x6c0   : > { %10836 = vmatpush3.msra.mxu0 %v9206_v13  ;;  %10855 = vmatpush3.msra.mxu1 %v9214_v14 }
 0x6c1   : > { %10837 = vmatprep.subr.mxu0 %v11316_v2  ;;  %10856 = vmatprep.subr.mxu1 %v11316_v2 }
 0x6c2   : > { %10838 = vmatpush3.msra.mxu0 %v9205_v15  ;;  %10857 = vmatpush3.msra.mxu1 %v9213_v16 }
 0x6c3   : > { %10839 = vmatprep.subr.mxu0 %v11316_v2  ;;  %10858 = vmatprep.subr.mxu1 %v11316_v2 }
 0x6c4   : > { %10840 = vmatpush3.msra.mxu0 %v9204_v18  ;;  %10859 = vmatpush3.msra.mxu1 %v9212_v19 }
 0x6c5   : > { %10841 = vmatprep.subr.mxu0 %v11316_v2  ;;  %10860 = vmatprep.subr.mxu1 %v11316_v2 }
 0x6c6   : > { %10842 = vmatpush3.msra.mxu0 %v9203_v20  ;;  %10861 = vmatpush3.msra.mxu1 %v9211_v21 }
 0x6c7   : > { %10843 = vmatprep.subr.mxu0 %v11316_v2  ;;  %10862 = vmatprep.subr.mxu1 %v11316_v2 }
 0x6c8   : > { %10844 = vmatpush3.msra.mxu0 %v9202_v22  ;;  %10863 = vmatpush3.msra.mxu1 %v9210_v23 }
 0x6c9   : > { %10845 = vmatprep.subr.mxu0 %v11316_v2  ;;  %10864 = vmatprep.subr.mxu1 %v11316_v2 }
 0x6ca   : > { %10846 = vmatpush3.msra.mxu0 %v9201_v24  ;;  %10865 = vmatpush3.msra.mxu1 %v9209_v25 }
 0x6cb   : > { %10847 = vmatprep.subr.mxu0 %v11316_v2  ;;  %10866 = vmatprep.subr.mxu1 %v11316_v2 }
 0x6cc   : > { %10848 = vmatpush3.msra.mxu0 %v9200_v26  ;;  %10867 = vmatpush3.msra.mxu1 %v9208_v27 }
 0x6cd   : > { %10849 = vmatprep.subr.mxu0 %v11316_v2  ;;  %10868 = vmatprep.subr.mxu1 %v11316_v2 }
 0x6ce   : > { %10850 = vmatpush3.msra.mxu0 %v9199_v28  ;;  %10869 = vmatpush3.msra.mxu1 %v9207_v29 }
 0x6cf   : > { %10851 = vmatprep.mubr.msk.f32.mxu0 %vm11317_vm1, %v11316_v2  ;;  %10870 = vmatprep.mubr.msk.f32.mxu1 %vm11317_vm1, %v11316_v2 }
 0x6d0   : > { %10873 = vmatprep.subr.mxu0 %v11316_v2  ;;  %10892 = vmatprep.subr.mxu1 %v11316_v2 }
 0x6d1   : > { %10852 = vmatmul.mubr.msk.f32.vlgmr.msra.gmra.mxu0 %vm956_vm0, %v12929_v9  ;;  %10871 = vmatmul.mubr.msk.f32.vlgmr.msra.gmra.mxu1 %vm956_vm0, %v12929_v9 }
 0x6d2   : > { %10874 = vmatpush3.msra.mxu0 %v9222_v30  ;;  %10893 = vmatpush3.msra.mxu1 %v9230_v43 }
 0x6d3   : > { %10875 = vmatprep.subr.mxu0 %v11316_v2  ;;  %10894 = vmatprep.subr.mxu1 %v11316_v2 }
 0x6d4   : > { %10876 = vmatpush3.msra.mxu0 %v9221_v31  ;;  %10895 = vmatpush3.msra.mxu1 %v9229_v32 }
 0x6d5   : > { %10877 = vmatprep.subr.mxu0 %v11316_v2  ;;  %10896 = vmatprep.subr.mxu1 %v11316_v2 }
 0x6d6   : > { %10878 = vmatpush3.msra.mxu0 %v9220_v33  ;;  %10897 = vmatpush3.msra.mxu1 %v9228_v44 }
 0x6d7   : > { %10879 = vmatprep.subr.mxu0 %v11316_v2  ;;  %10898 = vmatprep.subr.mxu1 %v11316_v2 }
 0x6d8   : > { %10880 = vmatpush3.msra.mxu0 %v9219_v34  ;;  %10899 = vmatpush3.msra.mxu1 %v9227_v47 }
 0x6d9   : > { %10881 = vmatprep.subr.mxu0 %v11316_v2  ;;  %10900 = vmatprep.subr.mxu1 %v11316_v2 }
 0x6da   : > { %10882 = vmatpush3.msra.mxu0 %v9218_v35  ;;  %10901 = vmatpush3.msra.mxu1 %v9226_v36 }
 0x6db   : > { %10883 = vmatprep.subr.mxu0 %v11316_v2  ;;  %10902 = vmatprep.subr.mxu1 %v11316_v2 }
 0x6dc   : > { %10884 = vmatpush3.msra.mxu0 %v9217_v37  ;;  %10903 = vmatpush3.msra.mxu1 %v9225_v38 }
 0x6dd   : > { %10885 = vmatprep.subr.mxu0 %v11316_v2  ;;  %10904 = vmatprep.subr.mxu1 %v11316_v2 }
 0x6de   : > { %10886 = vmatpush3.msra.mxu0 %v9216_v48  ;;  %10905 = vmatpush3.msra.mxu1 %v9224_v39 }
 0x6df   : > { %10887 = vmatprep.subr.mxu0 %v11316_v2  ;;  %10906 = vmatprep.subr.mxu1 %v11316_v2 }
 0x6e0   : > { %10888 = vmatpush3.msra.mxu0 %v9215_v40  ;;  %10907 = vmatpush3.msra.mxu1 %v9223_v41 }
 0x6e1   : > { %10889 = vmatprep.mubr.msk.f32.mxu0 %vm11317_vm1, %v11316_v2  ;;  %10908 = vmatprep.mubr.msk.f32.mxu1 %vm11317_vm1, %v11316_v2 }
 0x6e2   : > { %10911 = vmatprep.subr.mxu0 %v11316_v2  ;;  %10930 = vmatprep.subr.mxu1 %v11316_v2 }
 0x6e3   : > { %10890 = vmatmul.mubr.msk.f32.vlgmr.msra.gmra.mxu0 %vm956_vm0, %v12929_v9  ;;  %10909 = vmatmul.mubr.msk.f32.vlgmr.msra.gmra.mxu1 %vm956_vm0, %v12929_v9 }
 0x6e4   : > { %10912 = vmatpush3.msra.mxu0 %v9238_v51  ;;  %10931 = vmatpush3.msra.mxu1 %v9246_v52 }
 0x6e5   : > { %10913 = vmatprep.subr.mxu0 %v11316_v2  ;;  %10932 = vmatprep.subr.mxu1 %v11316_v2 }
 0x6e6   : > { %10914 = vmatpush3.msra.mxu0 %v9237_v55  ;;  %10933 = vmatpush3.msra.mxu1 %v9245_v42  ;;  %v8794_v55 = vld [vmem:[%s736_s28] ss:$0 sm:$0xff] }
 0x6e7   : > { %10915 = vmatprep.subr.mxu0 %v11316_v2  ;;  %10934 = vmatprep.subr.mxu1 %v11316_v2  ;;  %vm751_vm4 = vcmp.gt.f32.partialorder %v8794_v55, 0.5 }
 0x6e8   : > { %10916 = vmatpush3.msra.mxu0 %v9236_v17  ;;  %10935 = vmatpush3.msra.mxu1 %v9244_v45 }
 0x6e9   : > { %10917 = vmatprep.subr.mxu0 %v11316_v2  ;;  %10936 = vmatprep.subr.mxu1 %v11316_v2 }
 0x6ea   : > { %10918 = vmatpush3.msra.mxu0 %v9235_v46  ;;  %10937 = vmatpush3.msra.mxu1 %v9243_v49 }
 0x6eb   : > { %10919 = vmatprep.subr.mxu0 %v11316_v2  ;;  %10938 = vmatprep.subr.mxu1 %v11316_v2 }
 0x6ec   : > { %10920 = vmatpush3.msra.mxu0 %v9234_v50  ;;  %10939 = vmatpush3.msra.mxu1 %v9242_v53 }
 0x6ed   : > { %10921 = vmatprep.subr.mxu0 %v11316_v2  ;;  %10940 = vmatprep.subr.mxu1 %v11316_v2 }
 0x6ee   : > { %10922 = vmatpush3.msra.mxu0 %v9233_v54  ;;  %10941 = vmatpush3.msra.mxu1 %v9241_v56 }
 0x6ef   : > { %v4842_v59 = vpop.f32.mrf.mxu0  ;;  %v4912_v60 = vpop.f32.mrf.mxu1  ;;  %10923 = vmatprep.subr.mxu0 %v11316_v2  ;;  %10942 = vmatprep.subr.mxu1 %v11316_v2 }
 0x6f0   : > { %10924 = vmatpush3.msra.mxu0 %v9232_v57  ;;  %10943 = vmatpush3.msra.mxu1 %v9240_v58 }
 0x6f1   : > { %v10511_v63 = vpop.f32.mrf.mxu0  ;;  %v10530_v0 = vpop.f32.mrf.mxu1  ;;  %10925 = vmatprep.subr.mxu0 %v11316_v2  ;;  %10944 = vmatprep.subr.mxu1 %v11316_v2 }
 0x6f2   : > { %10926 = vmatpush3.msra.mxu0 %v9231_v61  ;;  %10927 = vmatprep.mubr.msk.f32.mxu0 %vm11317_vm1, %v11316_v2 }
 0x6f3   : > { %10945 = vmatpush3.msra.mxu1 %v9239_v62  ;;  %10946 = vmatprep.mubr.msk.f32.mxu1 %vm11317_vm1, %v11316_v2 }
 0x6f4   : > { %10928 = vmatmul.mubr.msk.f32.vlgmr.msra.gmra.mxu0 %vm956_vm0, %v12929_v9  ;;  %10947 = vmatmul.mubr.msk.f32.vlgmr.msra.gmra.mxu1 %vm956_vm0, %v12929_v9 }
 0x6f5   : > { %10949 = vmatprep.subr.mxu0 %v11316_v2  ;;  %10954 = vmatprep.subr.mxu1 %v11316_v2 }
 0x6f6   : > { %10951 = vmatprep.mubr.msk.f32.mxu0 %vm11317_vm1, %v11316_v2  ;;  %10956 = vmatprep.mubr.msk.f32.mxu1 %vm11317_vm1, %v11316_v2 }
 0x700   : > { %v4982_v1 = vpop.f32.mrf.mxu0  ;;  %v5052_v3 = vpop.f32.mrf.mxu1 }
 0x702   : > { %v10549_v4 = vpop.f32.mrf.mxu0  ;;  %v10568_v5 = vpop.f32.mrf.mxu1 }
 0x712   : > { %v5122_v7 = vpop.f32.mrf.mxu0  ;;  %v5192_v8 = vpop.f32.mrf.mxu1 }
 0x714   : > { %v10587_v10 = vpop.f32.mrf.mxu0  ;;  %v10606_v11 = vpop.f32.mrf.mxu1 }
 0x724   : > { %v5262_v12 = vpop.f32.mrf.mxu0  ;;  %v5332_v9 = vpop.f32.mrf.mxu1 }
 0x726   : > { %v10625_v13 = vpop.f32.mrf.mxu0  ;;  %v10644_v14 = vpop.f32.mrf.mxu1 }
 0x736   : > { %v5405_v15 = vpop.f32.mrf.mxu0  ;;  %v5475_v16 = vpop.f32.mrf.mxu1 }
 0x737   : > { %10950 = vmatpush3.xpose.msk.msra.mxu0 %vm2640_vm2, %v5405_v15  ;;  %10955 = vmatpush3.xpose.msk.msra.mxu1 %vm2640_vm2, %v5475_v16 }
 0x738   : > { %v10663_v18 = vpop.f32.mrf.mxu0  ;;  %v10682_v19 = vpop.f32.mrf.mxu1  ;;  %10959 = vmatprep.subr.mxu0 %v11316_v2  ;;  %10964 = vmatprep.subr.mxu1 %v11316_v2 }
 0x73a   : > { %10952 = vmatmul.mubr.msk.f32.vlgmr.msra.gmra.mxu0 %vm2640_vm2, %v4842_v59  ;;  %10957 = vmatmul.mubr.msk.f32.vlgmr.msra.gmra.mxu1 %vm2640_vm2, %v4912_v60 }
 0x73b   : > { %10961 = vmatprep.mubr.msk.f32.mxu0 %vm11317_vm1, %v11316_v2  ;;  %10966 = vmatprep.mubr.msk.f32.mxu1 %vm11317_vm1, %v11316_v2 }
 0x748   : > { %v5545_v20 = vpop.f32.mrf.mxu0  ;;  %v5615_v21 = vpop.f32.mrf.mxu1 }
 0x749   : > { %10960 = vmatpush3.xpose.msk.msra.mxu0 %vm2640_vm2, %v5545_v20  ;;  %10965 = vmatpush3.xpose.msk.msra.mxu1 %vm2640_vm2, %v5615_v21 }
 0x74a   : > { %v10701_v22 = vpop.f32.mrf.mxu0  ;;  %v10720_v23 = vpop.f32.mrf.mxu1  ;;  %10969 = vmatprep.subr.mxu0 %v11316_v2  ;;  %10974 = vmatprep.subr.mxu1 %v11316_v2 }
 0x74c   : > { %10962 = vmatmul.mubr.msk.f32.vlgmr.msra.gmra.mxu0 %vm2640_vm2, %v4982_v1  ;;  %10967 = vmatmul.mubr.msk.f32.vlgmr.msra.gmra.mxu1 %vm2640_vm2, %v5052_v3 }
 0x74d   : > { %10971 = vmatprep.mubr.msk.f32.mxu0 %vm11317_vm1, %v11316_v2  ;;  %10976 = vmatprep.mubr.msk.f32.mxu1 %vm11317_vm1, %v11316_v2 }
 0x75a   : > { %v5685_v24 = vpop.f32.mrf.mxu0  ;;  %v5755_v25 = vpop.f32.mrf.mxu1 }
 0x75b   : > { %10970 = vmatpush3.xpose.msk.msra.mxu0 %vm2640_vm2, %v5685_v24  ;;  %10975 = vmatpush3.xpose.msk.msra.mxu1 %vm2640_vm2, %v5755_v25 }
 0x75c   : > { %v10739_v26 = vpop.f32.mrf.mxu0  ;;  %v10758_v27 = vpop.f32.mrf.mxu1  ;;  %10979 = vmatprep.subr.mxu0 %v11316_v2  ;;  %10984 = vmatprep.subr.mxu1 %v11316_v2 }
 0x75e   : > { %10972 = vmatmul.mubr.msk.f32.vlgmr.msra.gmra.mxu0 %vm2640_vm2, %v5122_v7  ;;  %10977 = vmatmul.mubr.msk.f32.vlgmr.msra.gmra.mxu1 %vm2640_vm2, %v5192_v8 }
 0x75f   : > { %10981 = vmatprep.mubr.msk.f32.mxu0 %vm11317_vm1, %v11316_v2  ;;  %10986 = vmatprep.mubr.msk.f32.mxu1 %vm11317_vm1, %v11316_v2 }
 0x76c   : > { %v5825_v28 = vpop.f32.mrf.mxu0  ;;  %v5895_v29 = vpop.f32.mrf.mxu1 }
 0x76d   : > { %10980 = vmatpush3.xpose.msk.msra.mxu0 %vm2640_vm2, %v5825_v28  ;;  %10985 = vmatpush3.xpose.msk.msra.mxu1 %vm2640_vm2, %v5895_v29 }
 0x76e   : > { %v10777_v30 = vpop.f32.mrf.mxu0  ;;  %v10796_v43 = vpop.f32.mrf.mxu1  ;;  %10989 = vmatprep.subr.mxu0 %v11316_v2  ;;  %10994 = vmatprep.subr.mxu1 %v11316_v2 }
 0x770   : > { %10982 = vmatmul.mubr.msk.f32.vlgmr.msra.gmra.mxu0 %vm2640_vm2, %v5262_v12  ;;  %10987 = vmatmul.mubr.msk.f32.vlgmr.msra.gmra.mxu1 %vm2640_vm2, %v5332_v9 }
 0x771   : > { %10996 = vmatprep.mubr.msk.f32.mxu1 %vm11317_vm1, %v11316_v2  ;;  %10991 = vmatprep.mubr.msk.f32.mxu0 %vm11317_vm1, %v11316_v2 }
 0x77f   : > { %v5965_v31 = vpop.f32.mrf.mxu0  ;;  %v6035_v32 = vpop.f32.mrf.mxu1 }
 0x780   : > { %10990 = vmatpush3.msra.mxu0 %v5965_v31  ;;  %10995 = vmatpush3.msra.mxu1 %v6035_v32 }
 0x781   : > { %v10815_v33 = vpop.f32.mrf.mxu0  ;;  %v10834_v44 = vpop.f32.mrf.mxu1  ;;  %11004 = vmatprep.subr.mxu1 %v11316_v2  ;;  %10999 = vmatprep.subr.mxu0 %v11316_v2 }
 0x791   : > { %v13491_v34 = vpop.f32.mrf.mxu0  ;;  %v13493_v47 = vpop.f32.mrf.mxu1 }
 0x793   : > { %v10853_v35 = vpop.f32.mrf.mxu0  ;;  %v10872_v36 = vpop.f32.mrf.mxu1 }
 0x7a3   : > { %v13495_v37 = vpop.f32.mrf.mxu0  ;;  %v13497_v38 = vpop.f32.mrf.mxu1 }
 0x7a5   : > { %v10891_v48 = vpop.f32.mrf.mxu0  ;;  %v10910_v39 = vpop.f32.mrf.mxu1 }
 0x7b4   : > { %v13499_v40 = vpop.f32.mrf.mxu0  ;;  %v13501_v41 = vpop.f32.mrf.mxu1 }
 0x7b6   : > { %v10929_v51 = vpop.f32.mrf.mxu0  ;;  %v10948_v52 = vpop.f32.mrf.mxu1 }
 0x7fa   : > { %v6531_v42 = vpop.f32.mrf.mxu0  ;;  %v6607_v17 = vpop.f32.mrf.mxu1 }
 0x7fb   : > { %v7067_v45 = vmul.f32 0.35355338, %v6531_v42  ;;  %v7068_v46 = vmul.f32 0.35355338, %v6607_v17 }
 0x7fc   : > { %v10953_v49 = vpop.f32.mrf.mxu0  ;;  %v10958_v50 = vpop.f32.mrf.mxu1 }
 0x7fd   : > { %v7076_v53 = vsel %vm751_vm4, -1e+09, %v7068_v46  ;;  %v7075_v54 = vsel %vm751_vm4, -1e+09, %v7067_v45 }
 0x7fe   : > { %v7086_v56 = vsel %vm2640_vm2, %v7076_v53, -inf  ;;  %v7083_v57 = vsel %vm2640_vm2, %v7075_v54, -inf }
 0x7ff   : > { %7087 = vmax.xlane.f32.xlu1 %v7086_v56  ;;  %7084 = vmax.xlane.f32.xlu0 %v7083_v57 }
 0x80c   : > { %v6683_v58 = vpop.f32.mrf.mxu0  ;;  %v6759_v59 = vpop.f32.mrf.mxu1 }
 0x80d   : > { %v7069_v60 = vmul.f32 0.35355338, %v6683_v58  ;;  %v7070_v61 = vmul.f32 0.35355338, %v6759_v59 }
 0x80e   : > { %v10963_v62 = vpop.f32.mrf.mxu0  ;;  %v10968_v63 = vpop.f32.mrf.mxu1 }
 0x80f   : > { %v7078_v0 = vsel %vm751_vm4, -1e+09, %v7070_v61  ;;  %v7077_v1 = vsel %vm751_vm4, -1e+09, %v7069_v60 }
 0x810   : > { %v7092_v3 = vsel %vm2640_vm2, %v7078_v0, -inf  ;;  %v7089_v4 = vsel %vm2640_vm2, %v7077_v1, -inf }
 0x811   : > { %7093 = vmax.xlane.f32.xlu1 %v7092_v3  ;;  %7090 = vmax.xlane.f32.xlu0 %v7089_v4 }
 0x81e   : > { %v6835_v5 = vpop.f32.mrf.mxu0  ;;  %v6911_v7 = vpop.f32.mrf.mxu1 }
 0x81f   : > { %v7071_v8 = vmul.f32 0.35355338, %v6835_v5  ;;  %v7072_v10 = vmul.f32 0.35355338, %v6911_v7 }
 0x820   : > { %v10973_v11 = vpop.f32.mrf.mxu0  ;;  %v10978_v12 = vpop.f32.mrf.mxu1 }
 0x821   : > { %v7080_v9 = vsel %vm751_vm4, -1e+09, %v7072_v10  ;;  %v7079_v13 = vsel %vm751_vm4, -1e+09, %v7071_v8 }
 0x822   : > { %v7098_v14 = vsel %vm2640_vm2, %v7080_v9, -inf  ;;  %v7095_v15 = vsel %vm2640_vm2, %v7079_v13, -inf }
 0x823   : > { %7099 = vmax.xlane.f32.xlu1 %v7098_v14  ;;  %7096 = vmax.xlane.f32.xlu0 %v7095_v15 }
 0x830   : > { %v6987_v16 = vpop.f32.mrf.mxu0  ;;  %v7063_v18 = vpop.f32.mrf.mxu1 }
 0x831   : > { %v7073_v19 = vmul.f32 0.35355338, %v6987_v16  ;;  %v7074_v20 = vmul.f32 0.35355338, %v7063_v18 }
 0x832   : > { %v10983_v21 = vpop.f32.mrf.mxu0  ;;  %v10988_v22 = vpop.f32.mrf.mxu1 }
 0x833   : > { %v7082_v23 = vsel %vm751_vm4, -1e+09, %v7074_v20  ;;  %v7081_v24 = vsel %vm751_vm4, -1e+09, %v7073_v19 }
 0x834   : > { %v7104_v25 = vsel %vm2640_vm2, %v7082_v23, -inf  ;;  %v7101_v26 = vsel %vm2640_vm2, %v7081_v24, -inf }
 0x835   : > { %7105 = vmax.xlane.f32.xlu1 %v7104_v25  ;;  %7102 = vmax.xlane.f32.xlu0 %v7101_v26 }
 0x888   : > { %v7088_v27 = vpop.xlane.xlu1 %7087  ;;  %v7085_v28 = vpop.xlane.xlu0 %7084 }
 0x889   : > { %v7108_v29 = vsub.f32 %v7076_v53, %v7088_v27  ;;  %v7107_v30 = vsub.f32 %v7075_v54, %v7085_v28 }
 0x88b   : > { %v7117_v43 = vmul.f32 1.442695, %v7108_v29  ;;  %v7115_v31 = vmul.f32 1.442695, %v7107_v30 }
 0x88d   : > { %11217 = vpow2.f32 %v7117_v43  ;;  %v9250_v43 = vld [vmem:[%s13844_s12 + $0x58] sm:$0xff] }
 0x88e   : > { %11219 = vpow2.f32 %v7115_v31 }
 0x89a   : > { %v11218_v32 = vpop.eup %11217  ;;  %v7094_v33 = vpop.xlane.xlu1 %7093 }
 0x89b   : > { %v7091_v44 = vpop.xlane.xlu0 %7090  ;;  %v11220_v35 = vpop.eup %11219  ;;  %v7110_v36 = vsub.f32 %v7078_v0, %v7094_v33  ;;  %v7134_v39 = vsel %vm2640_vm2, %v11218_v32, 0.0 }
 0x89c   : > { %v7109_v48 = vsub.f32 %v7077_v1, %v7091_v44  ;;  %7135 = vadd.xlane.f32.xlu1 %v7134_v39  ;;  %v7131_v51 = vsel %vm2640_vm2, %v11220_v35, 0.0  ;;  %v9251_v39 = vld [vmem:[%s13844_s12 + $0x60] sm:$0xff] }
 0x89d   : > { %v7121_v52 = vmul.f32 1.442695, %v7110_v36  ;;  %7132 = vadd.xlane.f32.xlu0 %v7131_v51  ;;  %v9252_v36 = vld [vmem:[%s13844_s12 + $0x68] sm:$0xff] }
 0x89e   : > { %v7119_v55 = vmul.f32 1.442695, %v7109_v48 }
 0x89f   : > { %11221 = vpow2.f32 %v7121_v52 }
 0x8a0   : > { %11223 = vpow2.f32 %v7119_v55 }
 0x8ac   : > { %v11222_v42 = vpop.eup %11221  ;;  %v7100_v17 = vpop.xlane.xlu1 %7099 }
 0x8ad   : > { %v7097_v45 = vpop.xlane.xlu0 %7096  ;;  %v11224_v46 = vpop.eup %11223  ;;  %v7112_v49 = vsub.f32 %v7080_v9, %v7100_v17  ;;  %v7140_v53 = vsel %vm2640_vm2, %v11222_v42, 0.0 }
 0x8ae   : > { %v7111_v50 = vsub.f32 %v7079_v13, %v7097_v45  ;;  %7141 = vadd.xlane.f32.xlu1 %v7140_v53  ;;  %v7137_v54 = vsel %vm2640_vm2, %v11224_v46, 0.0  ;;  %v9253_v45 = vld [vmem:[%s13844_s12 + $0x70] sm:$0xff] }
 0x8af   : > { %v7125_v56 = vmul.f32 1.442695, %v7112_v49  ;;  %7138 = vadd.xlane.f32.xlu0 %v7137_v54 }
 0x8b0   : > { %v7123_v57 = vmul.f32 1.442695, %v7111_v50 }
 0x8b1   : > { %11225 = vpow2.f32 %v7125_v56 }
 0x8b2   : > { %11227 = vpow2.f32 %v7123_v57 }
 0x8be   : > { %v11226_v58 = vpop.eup %11225  ;;  %v7106_v59 = vpop.xlane.xlu1 %7105 }
 0x8bf   : > { %v7103_v60 = vpop.xlane.xlu0 %7102  ;;  %v11228_v61 = vpop.eup %11227  ;;  %v7114_v62 = vsub.f32 %v7082_v23, %v7106_v59  ;;  %v7146_v0 = vsel %vm2640_vm2, %v11226_v58, 0.0 }
 0x8c0   : > { %v7113_v63 = vsub.f32 %v7081_v24, %v7103_v60  ;;  %7147 = vadd.xlane.f32.xlu1 %v7146_v0  ;;  %v7143_v1 = vsel %vm2640_vm2, %v11228_v61, 0.0 }
 0x8c1   : > { %v7129_v3 = vmul.f32 1.442695, %v7114_v62  ;;  %7144 = vadd.xlane.f32.xlu0 %v7143_v1 }
 0x8c2   : > { %v7127_v4 = vmul.f32 1.442695, %v7113_v63 }
 0x8c3   : > { %11229 = vpow2.f32 %v7129_v3 }
 0x8c4   : > { %11231 = vpow2.f32 %v7127_v4 }
 0x8d0   : > { %v11230_v5 = vpop.eup %11229 }
 0x8d1   : > { %v11232_v7 = vpop.eup %11231  ;;  %v7152_v8 = vsel %vm2640_vm2, %v11230_v5, 0.0 }
 0x8d2   : > { %7153 = vadd.xlane.f32.xlu1 %v7152_v8  ;;  %v7149_v10 = vsel %vm2640_vm2, %v11232_v7, 0.0 }
 0x8d3   : > { %7150 = vadd.xlane.f32.xlu0 %v7149_v10 }
 0x925   : > { %v7136_v11 = vpop.xlane.xlu1 %7135 }
 0x926   : > { %11233 = vrcp.f32 %v7136_v11  ;;  %v7133_v12 = vpop.xlane.xlu0 %7132 }
 0x927   : > { %11235 = vrcp.f32 %v7133_v12 }
 0x933   : > { %v11234_v9 = vpop.eup %11233 }
 0x934   : > { %v11236_v13 = vpop.eup %11235  ;;  %v7158_v14 = vmul.f32 %v11234_v9, %v11218_v32  ;;  %v9249_v32 = vld [vmem:[%s13844_s12 + $0x50] sm:$0xff] }
 0x935   : > { %v7156_v15 = vmul.f32 %v11236_v13, %v11220_v35 }
 0x936   : > { %10997 = vmatmul.mubr.msk.f32.vlgmr.msra.gmra.mxu1 %vm2640_vm2, %v7158_v14 }
 0x937   : > { %v7142_v16 = vpop.xlane.xlu1 %7141  ;;  %10992 = vmatmul.mubr.msk.f32.vlgmr.msra.gmra.mxu0 %vm2640_vm2, %v7156_v15  ;;  %11005 = vmatpush3.msra.mxu1 %v13493_v47 }
 0x938   : > { %11237 = vrcp.f32 %v7142_v16  ;;  %v7139_v18 = vpop.xlane.xlu0 %7138  ;;  %11000 = vmatpush3.msra.mxu0 %v13491_v34  ;;  %11006 = vmatprep.mubr.msk.f32.mxu1 %vm11317_vm1, %v11316_v2 }
 0x939   : > { %11239 = vrcp.f32 %v7139_v18  ;;  %11014 = vmatprep.subr.mxu1 %v11316_v2  ;;  %11001 = vmatprep.mubr.msk.f32.mxu0 %vm11317_vm1, %v11316_v2 }
 0x93a   : > { %11009 = vmatprep.subr.mxu0 %v11316_v2 }
 0x945   : > { %v11238_v19 = vpop.eup %11237 }
 0x946   : > { %v11240_v20 = vpop.eup %11239  ;;  %v7162_v21 = vmul.f32 %v11238_v19, %v11222_v42  ;;  %v9254_v42 = vld [vmem:[%s13844_s12 + $0x78] sm:$0xff] }
 0x947   : > { %v7160_v22 = vmul.f32 %v11240_v20, %v11224_v46 }
 0x948   : > { %11007 = vmatmul.mubr.msk.f32.vlgmr.msra.gmra.mxu1 %vm2640_vm2, %v7162_v21 }
 0x949   : > { %v7148_v47 = vpop.xlane.xlu1 %7147  ;;  %11002 = vmatmul.mubr.msk.f32.vlgmr.msra.gmra.mxu0 %vm2640_vm2, %v7160_v22  ;;  %11015 = vmatpush3.msra.mxu1 %v13497_v38 }
 0x94a   : > { %11241 = vrcp.f32 %v7148_v47  ;;  %v7145_v34 = vpop.xlane.xlu0 %7144  ;;  %11010 = vmatpush3.msra.mxu0 %v13495_v37  ;;  %11016 = vmatprep.mubr.msk.f32.mxu1 %vm11317_vm1, %v11316_v2 }
 0x94b   : > { %11243 = vrcp.f32 %v7145_v34  ;;  %11024 = vmatprep.subr.mxu1 %v11316_v2  ;;  %11011 = vmatprep.mubr.msk.f32.mxu0 %vm11317_vm1, %v11316_v2 }
 0x94c   : > { %11019 = vmatprep.subr.mxu0 %v11316_v2 }
 0x957   : > { %v11242_v23 = vpop.eup %11241 }
 0x958   : > { %v11244_v24 = vpop.eup %11243  ;;  %v7166_v25 = vmul.f32 %v11242_v23, %v11226_v58 }
 0x959   : > { %v7164_v26 = vmul.f32 %v11244_v24, %v11228_v61 }
 0x95a   : > { %11017 = vmatmul.mubr.msk.f32.vlgmr.msra.gmra.mxu1 %vm2640_vm2, %v7166_v25 }
 0x95b   : > { %v7154_v38 = vpop.xlane.xlu1 %7153  ;;  %11012 = vmatmul.mubr.msk.f32.vlgmr.msra.gmra.mxu0 %vm2640_vm2, %v7164_v26  ;;  %11025 = vmatpush3.msra.mxu1 %v13501_v41  ;;  %v9248_v41 = vld [vmem:[%s13844_s12 + $0x48] sm:$0xff] }
 0x95c   : > { %11245 = vrcp.f32 %v7154_v38  ;;  %v7151_v37 = vpop.xlane.xlu0 %7150  ;;  %11020 = vmatpush3.msra.mxu0 %v13499_v40  ;;  %11021 = vmatprep.mubr.msk.f32.mxu0 %vm11317_vm1, %v11316_v2  ;;  %v9247_v40 = vld [vmem:[%s13844_s12 + $0x40] sm:$0xff] }
 0x95d   : > { %11247 = vrcp.f32 %v7151_v37  ;;  %11026 = vmatprep.mubr.msk.f32.mxu1 %vm11317_vm1, %v11316_v2  ;;  %11029 = vmatprep.subr.mxu0 %v11316_v2 }
 0x95e   : > { %11034 = vmatprep.subr.mxu1 %v11316_v2 }
 0x969   : > { %v11246_v27 = vpop.eup %11245 }
 0x96a   : > { %v11248_v28 = vpop.eup %11247  ;;  %v7170_v29 = vmul.f32 %v11246_v27, %v11230_v5 }
 0x96b   : > { %v7168_v30 = vmul.f32 %v11248_v28, %v11232_v7 }
 0x96c   : > { %11027 = vmatmul.mubr.msk.f32.vlgmr.msra.gmra.mxu1 %vm2640_vm2, %v7170_v29 }
 0x96d   : > { %11022 = vmatmul.mubr.msk.f32.vlgmr.msra.gmra.mxu0 %vm2640_vm2, %v7168_v30  ;;  %11036 = vmatprep.mubr.msk.f32.mxu1 %vm11317_vm1, %v11316_v2 }
 0x96e   : > { %11031 = vmatprep.mubr.msk.f32.mxu0 %vm11317_vm1, %v11316_v2  ;;  %11030 = vmatpush3.msra.mxu0 %v9247_v40  ;;  %v9322_v40 = vld [vmem:[%s13847_s15 + $0x78] sm:$0xff] }
 0x96f   : > { %11035 = vmatpush3.msra.mxu1 %v9248_v41  ;;  %11039 = vmatprep.subr.mxu0 %v11316_v2  ;;  %v9320_v41 = vld [vmem:[%s13847_s15 + $0x68] sm:$0xff] }
 0x970   : > { %11044 = vmatprep.subr.mxu1 %v11316_v2 }
 0x9f6   : > { %v7313_v31 = vpop.f32.mrf.mxu1 }
 0x9f7   : > { %v7240_v33 = vpop.f32.mrf.mxu0  ;;  %11037 = vmatmul.mubr.msk.f32.vlgmr.msra.gmra.mxu1 %vm2640_vm2, %v7313_v31  ;;  %v9318_v31 = vld [vmem:[%s13847_s15 + $0x58] sm:$0xff] }
 0x9f8   : > { %11032 = vmatmul.mubr.msk.f32.vlgmr.msra.gmra.mxu0 %vm2640_vm2, %v7240_v33  ;;  %v10998_v44 = vpop.f32.mrf.mxu1  ;;  %11045 = vmatpush3.msra.mxu1 %v9250_v43  ;;  %v9319_v43 = vld [vmem:[%s13847_s15 + $0x60] sm:$0xff]  ;;  %v9316_v33 = vld [vmem:[%s13847_s15 + $0x48] sm:$0xff] }
 0x9f9   : > { %v10993_v35 = vpop.f32.mrf.mxu0  ;;  %11040 = vmatpush3.msra.mxu0 %v9249_v32  ;;  %11041 = vmatprep.mubr.msk.f32.mxu0 %vm11317_vm1, %v11316_v2  ;;  %v9317_v32 = vld [vmem:[%s13847_s15 + $0x50] sm:$0xff]  ;;  %v9315_v44 = vld [vmem:[%s13847_s15 + $0x40] sm:$0xff] }
 0x9fa   : > { %11046 = vmatprep.mubr.msk.f32.mxu1 %vm11317_vm1, %v11316_v2  ;;  %11049 = vmatprep.subr.mxu0 %v11316_v2  ;;  %v9339_v35 = vld [vmem:[%s13849_s17 + $0xf8] sm:$0xff] }
 0x9fb   : > { %11054 = vmatprep.subr.mxu1 %v11316_v2 }
 0xa08   : > { %v7459_v48 = vpop.f32.mrf.mxu1 }
 0xa09   : > { %v7386_v51 = vpop.f32.mrf.mxu0  ;;  %11047 = vmatmul.mubr.msk.f32.vlgmr.msra.gmra.mxu1 %vm2640_vm2, %v7459_v48  ;;  %v9337_v48 = vld [vmem:[%s13849_s17 + $0xe8] sm:$0xff] }
 0xa0a   : > { %11042 = vmatmul.mubr.msk.f32.vlgmr.msra.gmra.mxu0 %vm2640_vm2, %v7386_v51  ;;  %v11008_v52 = vpop.f32.mrf.mxu1  ;;  %11055 = vmatpush3.msra.mxu1 %v9252_v36  ;;  %v9338_v36 = vld [vmem:[%s13849_s17 + $0xf0] sm:$0xff]  ;;  %v9335_v51 = vld [vmem:[%s13849_s17 + $0xd8] sm:$0xff] }
 0xa0b   : > { %v11003_v55 = vpop.f32.mrf.mxu0  ;;  %11050 = vmatpush3.msra.mxu0 %v9251_v39  ;;  %11051 = vmatprep.mubr.msk.f32.mxu0 %vm11317_vm1, %v11316_v2  ;;  %v9336_v39 = vld [vmem:[%s13849_s17 + $0xe0] sm:$0xff]  ;;  %v9334_v52 = vld [vmem:[%s13849_s17 + $0xd0] sm:$0xff] }
 0xa0c   : > { %11056 = vmatprep.mubr.msk.f32.mxu1 %vm11317_vm1, %v11316_v2  ;;  %11059 = vmatprep.subr.mxu0 %v11316_v2  ;;  %v9333_v55 = vld [vmem:[%s13849_s17 + $0xc8] sm:$0xff] }
 0xa0d   : > { %11064 = vmatprep.subr.mxu1 %v11316_v2 }
 0xa1a   : > { %v7605_v17 = vpop.f32.mrf.mxu1 }
 0xa1b   : > { %v7532_v46 = vpop.f32.mrf.mxu0  ;;  %11057 = vmatmul.mubr.msk.f32.vlgmr.msra.gmra.mxu1 %vm2640_vm2, %v7605_v17  ;;  %v9331_v17 = vld [vmem:[%s13849_s17 + $0xb8] sm:$0xff] }
 0xa1c   : > { %11052 = vmatmul.mubr.msk.f32.vlgmr.msra.gmra.mxu0 %vm2640_vm2, %v7532_v46  ;;  %v11018_v49 = vpop.f32.mrf.mxu1  ;;  %11065 = vmatpush3.msra.mxu1 %v9254_v42  ;;  %v9332_v42 = vld [vmem:[%s13849_s17 + $0xc0] sm:$0xff]  ;;  %v9329_v46 = vld [vmem:[%s13849_s17 + $0xa8] sm:$0xff] }
 0xa1d   : > { %v11013_v50 = vpop.f32.mrf.mxu0  ;;  %11060 = vmatpush3.msra.mxu0 %v9253_v45  ;;  %11061 = vmatprep.mubr.msk.f32.mxu0 %vm11317_vm1, %v11316_v2  ;;  %v9330_v45 = vld [vmem:[%s13849_s17 + $0xb0] sm:$0xff]  ;;  %v9328_v49 = vld [vmem:[%s13849_s17 + $0xa0] sm:$0xff] }
 0xa1e   : > { %11066 = vmatprep.mubr.msk.f32.mxu1 %vm11317_vm1, %v11316_v2  ;;  %11069 = vmatprep.subr.mxu0 %v11316_v2  ;;  %v9327_v50 = vld [vmem:[%s13849_s17 + $0x98] sm:$0xff] }
 0xa1f   : > { %11088 = vmatprep.subr.mxu1 %v11316_v2 }
 0xa2c   : > { %v7751_v53 = vpop.f32.mrf.mxu1 }
 0xa2d   : > { %v7678_v54 = vpop.f32.mrf.mxu0  ;;  %11067 = vmatmul.mubr.msk.f32.vlgmr.msra.gmra.mxu1 %vm2640_vm2, %v7751_v53 }
 0xa2e   : > { %11062 = vmatmul.mubr.msk.f32.vlgmr.msra.gmra.mxu0 %vm2640_vm2, %v7678_v54  ;;  %v11028_v56 = vpop.f32.mrf.mxu1  ;;  %11120 = vmatprep.mubr.msk.f32.mxu1 %vm11317_vm1, %v11316_v2 }
 0xa2f   : > { %v11023_v57 = vpop.f32.mrf.mxu0  ;;  %11085 = vmatprep.mubr.msk.f32.mxu0 %vm11317_vm1, %v11316_v2  ;;  %11070 = vmatpush3.msra.mxu0 %v9322_v40  ;;  %v9347_v40 = vld [vmem:[%s13852_s20 + $0x1] ss:$0 sm:$0xff] }
 0xa30   : > { %11071 = vmatprep.subr.mxu0 %v11316_v2  ;;  %11089 = vmatpush3.msra.mxu1 %v9339_v35 }
 0xa31   : > { %11090 = vmatprep.subr.mxu1 %v11316_v2 }
 0xa32   : > { %11091 = vmatpush3.msra.mxu1 %v9338_v36 }
 0xa33   : > { %11092 = vmatprep.subr.mxu1 %v11316_v2 }
 0xa34   : > { %11093 = vmatpush3.msra.mxu1 %v9337_v48 }
 0xa35   : > { %11094 = vmatprep.subr.mxu1 %v11316_v2 }
 0xa36   : > { %11095 = vmatpush3.msra.mxu1 %v9336_v39 }
 0xa37   : > { %11096 = vmatprep.subr.mxu1 %v11316_v2 }
 0xa38   : > { %11097 = vmatpush3.msra.mxu1 %v9335_v51 }
 0xa39   : > { %11098 = vmatprep.subr.mxu1 %v11316_v2 }
 0xa3a   : > { %11099 = vmatpush3.msra.mxu1 %v9334_v52 }
 0xa3b   : > { %11100 = vmatprep.subr.mxu1 %v11316_v2 }
 0xa3c   : > { %11101 = vmatpush3.msra.mxu1 %v9333_v55 }
 0xa3d   : > { %11102 = vmatprep.subr.mxu1 %v11316_v2 }
 0xa3e   : > { %11103 = vmatpush3.msra.mxu1 %v9332_v42 }
 0xa3f   : > { %11104 = vmatprep.subr.mxu1 %v11316_v2 }
 0xa40   : > { %11105 = vmatpush3.msra.mxu1 %v9331_v17 }
 0xa41   : > { %11106 = vmatprep.subr.mxu1 %v11316_v2 }
 0xa42   : > { %11107 = vmatpush3.msra.mxu1 %v9330_v45 }
 0xa43   : > { %11108 = vmatprep.subr.mxu1 %v11316_v2 }
 0xa44   : > { %11109 = vmatpush3.msra.mxu1 %v9329_v46 }
 0xa45   : > { %11110 = vmatprep.subr.mxu1 %v11316_v2 }
 0xa46   : > { %11111 = vmatpush3.msra.mxu1 %v9328_v49 }
 0xa47   : > { %11112 = vmatprep.subr.mxu1 %v11316_v2 }
 0xa48   : > { %11113 = vmatpush3.msra.mxu1 %v9327_v50 }
 0xa49   : > { %11114 = vmatprep.subr.mxu1 %v11316_v2 }
 0xab7   : > { %v7897_v58 = vpop.f32.mrf.mxu1 }
 0xab8   : > { %v7824_v59 = vpop.f32.mrf.mxu0  ;;  %v8340_v10 = vsel %vm956_vm0, %v7897_v58, 0.0  ;;  %v9313_v58 = vld [vmem:[%s13845_s13 + $0x1] ss:$0 sm:$0xff] }
 0xab9   : > { %v11038_v60 = vpop.f32.mrf.mxu1  ;;  %v8339_v8 = vsel %vm956_vm0, %v7824_v59, 0.0 }
 0xaba   : > { %v11033_v61 = vpop.f32.mrf.mxu0  ;;  %v8341_v12 = vadd.f32 %v8340_v10, %v8339_v8  ;;  %v9314_v60 = vld [vmem:[%s13846_s14 + $0x1] ss:$0 sm:$0xff] }
 0xabb   : > { %v9343_v10 = vld [vmem:[%s13850_s18 + $0x1] ss:$0 sm:$0xff] }
 0xac9   : > { %v8043_v62 = vpop.f32.mrf.mxu1 }
 0xaca   : > { %v7970_v63 = vpop.f32.mrf.mxu0  ;;  %v8344_v13 = vsel %vm956_vm0, %v8043_v62, 0.0 }
 0xacb   : > { %v11048_v0 = vpop.f32.mrf.mxu1  ;;  %v8342_v11 = vsel %vm956_vm0, %v7970_v63, 0.0  ;;  %v9326_v63 = vld [vmem:[%s13849_s17 + $0x90] sm:$0xff] }
 0xacc   : > { %v11043_v1 = vpop.f32.mrf.mxu0  ;;  %v8343_v9 = vadd.f32 %v8342_v11, %v8341_v12  ;;  %11115 = vmatpush3.msra.mxu1 %v9326_v63  ;;  %v9325_v0 = vld [vmem:[%s13849_s17 + $0x88] sm:$0xff] }
 0xacd   : > { %11116 = vmatprep.subr.mxu1 %v11316_v2  ;;  %v9324_v1 = vld [vmem:[%s13849_s17 + $0x80] sm:$0xff] }
 0xace   : > { %v8345_v15 = vadd.f32 %v8344_v13, %v8343_v9  ;;  %11117 = vmatpush3.msra.mxu1 %v9325_v0 }
 0xacf   : > { %11118 = vmatprep.subr.mxu1 %v11316_v2 }
 0xad0   : > { %11119 = vmatpush3.msra.mxu1 %v9324_v1 }
 0xadb   : > { %v8189_v3 = vpop.f32.mrf.mxu1 }
 0xadc   : > { %v8116_v4 = vpop.f32.mrf.mxu0  ;;  %v8348_v18 = vsel %vm956_vm0, %v8189_v3, 0.0  ;;  %v9341_v3 = vld [vmem:[%s13848_s16 + $0x1] ss:$0 sm:$0xff] }
 0xadd   : > { %v11058_v5 = vpop.f32.mrf.mxu1  ;;  %v8346_v14 = vsel %vm956_vm0, %v8116_v4, 0.0 }
 0xade   : > { %v11053_v7 = vpop.f32.mrf.mxu0  ;;  %v8347_v16 = vadd.f32 %v8346_v14, %v8345_v15 }
 0xae0   : > { %v8349_v20 = vadd.f32 %v8348_v18, %v8347_v16 }
 0xaed   : > { %v8335_v19 = vpop.f32.mrf.mxu1 }
 0xaee   : > { %v8262_v21 = vpop.f32.mrf.mxu0  ;;  %v8352_v24 = vsel %vm956_vm0, %v8335_v19, 0.0 }
 0xaef   : > { %v8350_v22 = vsel %vm956_vm0, %v8262_v21, 0.0  ;;  %v11068_v47 = vpop.f32.mrf.mxu1  ;;  %v8611_v21 = vld [vmem:[%s13853_s21 + $0x38] sm:$0xff] }
 0xaf0   : > { %v8351_v34 = vadd.f32 %v8350_v22, %v8349_v20  ;;  %v11063_v23 = vpop.f32.mrf.mxu0  ;;  %v8610_v22 = vld [vmem:[%s13853_s21 + $0x30] sm:$0xff]  ;;  %v8609_v47 = vld [vmem:[%s13853_s21 + $0x28] sm:$0xff] }
 0xaf1   : > { %v8607_v23 = vld [vmem:[%s13853_s21 + $0x18] sm:$0xff] }
 0xaf2   : > { %v8353_v25 = vadd.f32 %v8352_v24, %v8351_v34  ;;  %v8608_v34 = vld [vmem:[%s13853_s21 + $0x20] sm:$0xff]  ;;  %v8606_v24 = vld [vmem:[%s13853_s21 + $0x10] sm:$0xff] }
 0xaf4   : > { %v8358_v26 = vadd.f32 %v8353_v25, %v12640_v6  ;;  %v9321_v6 = vld [vmem:[%s13847_s15 + $0x70] sm:$0xff]  ;;  %v8605_v25 = vld [vmem:[%s13853_s21 + $0x8] sm:$0xff] }
 0xaf5   : > { %11072 = vmatpush3.msra.mxu0 %v9321_v6 }
 0xaf6   : > { %v8359_v38 = vsel %vm956_vm0, %v8358_v26, 0.0  ;;  %11073 = vmatprep.subr.mxu0 %v11316_v2 }
 0xaf7   : > { %8360 = vadd.xlane.f32.xlu0 %v8359_v38  ;;  %11074 = vmatpush3.msra.mxu0 %v9320_v41 }
 0xaf8   : > { %11075 = vmatprep.subr.mxu0 %v11316_v2 }
 0xaf9   : > { %11076 = vmatpush3.msra.mxu0 %v9319_v43 }
 0xafa   : > { %11077 = vmatprep.subr.mxu0 %v11316_v2 }
 0xafb   : > { %11078 = vmatpush3.msra.mxu0 %v9318_v31 }
 0xafc   : > { %11079 = vmatprep.subr.mxu0 %v11316_v2 }
 0xafd   : > { %11080 = vmatpush3.msra.mxu0 %v9317_v32 }
 0xafe   : > { %11081 = vmatprep.subr.mxu0 %v11316_v2 }
 0xaff   : > { %11082 = vmatpush3.msra.mxu0 %v9316_v33 }
 0xb00   : > { %11083 = vmatprep.subr.mxu0 %v11316_v2 }
 0xb01   : > { %11084 = vmatpush3.msra.mxu0 %v9315_v44 }
 0xb02   : > { %11123 = vmatprep.subr.mxu0 %v11316_v2 }
 0xb80   : > { %v8361_v37 = vpop.xlane.xlu0 %8360 }
 0xb81   : > { %v8362_v27 = vmul.f32 0.015625, %v8361_v37 }
 0xb83   : > { %v13633_v28 = vsub.f32 %v8358_v26, %v8362_v27  ;;  %v8604_v26 = vld [vmem:[%s13853_s21] sm:$0xff] }
 0xb85   : > { %v8364_v29 = vmul.f32 %v13633_v28, %v13633_v28 }
 0xb87   : > { %v8365_v30 = vsel %vm956_vm0, %v8364_v29, 0.0  ;;  %v9346_v29 = vld [vmem:[%s13851_s19 + $0x1] ss:$0 sm:$0xff] }
 0xb88   : > { %8366 = vadd.xlane.f32.xlu1 %v8365_v30 }
 0xc11   : > { %v8367_v53 = vpop.xlane.xlu1 %8366 }
 0xc12   : > { %v8368_v54 = vmul.f32 0.015625, %v8367_v53 }
 0xc14   : > { %v8369_v56 = vadd.f32 1e-06, %v8368_v54 }
 0xc16   : > { %11249 = vrsqrt.f32 %v8369_v56 }
 0xc23   : > { %v11250_v57 = vpop.eup %11249 }
 0xc24   : > { %v8371_v59 = vmul.f32 %v11250_v57, %v13633_v28 }
 0xc26   : > { %v8378_v61 = vmul.f32 %v9313_v58, %v8371_v59 }
 0xc28   : > { %v8385_v62 = vadd.f32 %v9314_v60, %v8378_v61 }
 0xc2a   : > { %11086 = vmatmul.mubr.msk.f32.vlgmr.msra.gmra.mxu0 %vm956_vm0, %v8385_v62 }
 0xc2b   : > { %11139 = vmatprep.mubr.msk.f32.mxu0 %vm11317_vm1, %v11316_v2  ;;  %11124 = vmatpush3.msra.mxu0 %v8611_v21 }
 0xc2c   : > { %11125 = vmatprep.subr.mxu0 %v11316_v2 }
 0xc2d   : > { %11126 = vmatpush3.msra.mxu0 %v8610_v22 }
 0xc2e   : > { %11127 = vmatprep.subr.mxu0 %v11316_v2 }
 0xc2f   : > { %11128 = vmatpush3.msra.mxu0 %v8609_v47 }
 0xc30   : > { %11129 = vmatprep.subr.mxu0 %v11316_v2 }
 0xc31   : > { %11130 = vmatpush3.msra.mxu0 %v8608_v34 }
 0xc32   : > { %11131 = vmatprep.subr.mxu0 %v11316_v2 }
 0xc33   : > { %11132 = vmatpush3.msra.mxu0 %v8607_v23 }
 0xc34   : > { %11133 = vmatprep.subr.mxu0 %v11316_v2 }
 0xc35   : > { %11134 = vmatpush3.msra.mxu0 %v8606_v24 }
 0xc36   : > { %11135 = vmatprep.subr.mxu0 %v11316_v2 }
 0xc37   : > { %11136 = vmatpush3.msra.mxu0 %v8605_v25 }
 0xc38   : > { %11137 = vmatprep.subr.mxu0 %v11316_v2  ;;  %v9348_v2 = vld [vmem:[%s13854_s22] ss:$0 sm:$0xff] }
 0xc39   : > { %11138 = vmatpush3.msra.mxu0 %v8604_v26 }
 0xcea   : > { %v8491_v4 = vpop.f32.mrf.mxu0 }
 0xceb   : > { %v8492_v5 = vadd.f32 %v9341_v3, %v8491_v4 }
 0xcec   : > { %v11087_v7 = vpop.f32.mrf.mxu0 }
 0xced   : > { %v8495_v8 = vmax.f32 %v8492_v5, 0.0 }
 0xcef   : > { %11121 = vmatmul.mubr.f32.vlgmr.msra.gmra.mxu1 %v8495_v8 }
 0xdaf   : > { %v8568_v11 = vpop.f32.mrf.mxu1 }
 0xdb0   : > { %v8569_v12 = vadd.f32 %v9343_v10, %v8568_v11 }
 0xdb1   : > { %v11122_v9 = vpop.f32.mrf.mxu1 }
 0xdb2   : > { %v8576_v13 = vadd.f32 %v8569_v12, %v8385_v62 }
 0xdb4   : > { %v8577_v14 = vsel %vm956_vm0, %v8576_v13, 0.0 }
 0xdb5   : > { %8578 = vadd.xlane.f32.xlu0 %v8577_v14 }
 0xe3e   : > { %v8579_v15 = vpop.xlane.xlu0 %8578 }
 0xe3f   : > { %v8580_v16 = vmul.f32 0.015625, %v8579_v15 }
 0xe41   : > { %v8581_v18 = vsub.f32 %v8576_v13, %v8580_v16 }
 0xe43   : > { %v8582_v19 = vmul.f32 %v8581_v18, %v8581_v18 }
 0xe45   : > { %v8583_v20 = vsel %vm956_vm0, %v8582_v19, 0.0 }
 0xe46   : > { %8584 = vadd.xlane.f32.xlu1 %v8583_v20 }
 0xecf   : > { %v8585_v38 = vpop.xlane.xlu1 %8584 }
 0xed0   : > { %v8586_v37 = vmul.f32 0.015625, %v8585_v38 }
 0xed2   : > { %v8587_v27 = vadd.f32 1e-06, %v8586_v37 }
 0xed4   : > { %11251 = vrsqrt.f32 %v8587_v27 }
 0xee1   : > { %v11252_v28 = vpop.eup %11251 }
 0xee2   : > { %v8589_v30 = vmul.f32 %v11252_v28, %v8581_v18 }
 0xee4   : > { %v8596_v6 = vmul.f32 %v9346_v29, %v8589_v30 }
 0xee6   : > { %v8603_v41 = vadd.f32 %v9347_v40, %v8596_v6 }
 0xee8   : > { %11140 = vmatmul.mubr.msk.f32.vlgmr.msra.gmra.mxu0 %vm956_vm0, %v8603_v41 }
 0xfa8   : > { %v8688_v43 = vpop.f32.mrf.mxu0 }
 0xfa9   : > { %v8689_v31 = vadd.f32 %v9348_v2, %v8688_v43 }
 0xfaa   : > { %v11141_v32 = vpop.f32.mrf.mxu0 }
 0xfab   : > { %8692 = vst [vmem:[%s725_s26] sm:$0xff] %v8689_v31 }
 0xfac   : > { %11267 = shalt.err (!%p11264_p3)
}
 0xfad   : > { %s11268_s28 = scalar_lea.hbm %s13797_s6, 128  ;;  %s11272_s26 = scalar_lea.hbm %s13855_s23, 256 }
 0xfae   : > { %p11269_p4 = scmp.ne.s32.totalorder %s13797_s6, %s11268_s28  ;;  %p11273_p9 = scmp.lt.s32.totalorder %s13797_s6, %s13855_s23 }
 0xfaf   : > { %p11274_p10 = scmp.lt.s32.totalorder %s11272_s26, %s11268_s28 }
 0xfb0   : > { %p11270_p7 = pnand %p11269_p4, %p11477_p5 }
 0xfb1   : > { %p11275_p11 = por %p11274_p10, %p11273_p9 }
 0xfb2   : > { %p11271_p8 = pneg %p11270_p7 }
 0xfb4   : > { %p11276_p12 = pnand %p11275_p11, %p11271_p8 }
 0xfb6   : > { %11279 = shalt.err (!%p11276_p12)
}
 0xfb7   : > { %11142 = dma.vmem_to_hbm [thread:$0]  (%p11477_p5), %s8708_s1, 128, %s13797_s6, %s8694_s24  }
 0xfb8 PF: > { %s13900_s4 = sld [smem:[#allocation7_spill]] }
 0xfb9   : > { %s13901_s3 = sld [smem:[#allocation5_spill]] }
 0xfbe   : > { %p11148_p13 = scmp.ge.s32.totalorder %s13900_s4, 2 }
 0xfbf   : > { %s8719_s0 = sand.u32 1, %s13901_s3  }
 0xfc0   : > { %p11145_p0 = pnand %p11148_p13, %p11481_p6  ;;  %s8720_s2 = scalar_lea.sflag [#allocation3], %s8719_s0 }
 0xfc2   : > { %p11146_p1 = pneg %p11145_p0 }
 0xfc4   : > { %11297 = dma.done.wait (%p11146_p1), %s8720_s2, 128  }
 0xfc5   : > { %11299 = vsyncadd (%p11146_p1), %s8720_s2, 4294967168  ;;  %s13903_s25 = sld [smem:[#allocation8_spill]]  ;;  %s13906_s4 = smov %s11306_s30 }
 0xfc6   : > { %s13904_s28 = sld [smem:[#allocation6_spill]] }
 0xfc7   : > { %s13905_s24 = sld [smem:[#allocation9_spill]] }
 0xfcb   : > { %p33_p2 = scmp.ge.s32.totalorder %s13903_s25, 4  }
 0xfcc   : > { %s13907_s30 = smov %s13904_s28 }
 0xfcd   :  { %35 = sbr.rel (!%p33_p2) target bundleno = 13 (0xd), region = 171 }
 0xfd2   :  { %8725 = vsyncpa [#allocation3], 1 }
 0xfd3   :  { %8727 = vsyncpa [#allocation3 + $0x1], 1 }

</bundles_post_ra>
